<compile_context>
chip_gen: v7x
topology: tpu7x:2x2x1
jax: 0.10.0
libtpu: 0.0.40
codegen_flags: <defaults>
</compile_context>

<pallas_src>
import functools

import jax
import jax.numpy as jnp
from jax.experimental import pallas as pl
from jax.experimental.pallas import tpu as pltpu


# ----------------------------------------------------------------------------
# Small helpers
# ----------------------------------------------------------------------------
def _round_up(x, m):
    return ((x + m - 1) // m) * m


def _pick_tile(dim, cap, align):
    """Tile = min(cap, round_up(dim, align)); caller pads dim to a tile multiple."""
    return min(cap, _round_up(dim, align))


def _pad2d(x, rows, cols):
    r, c = x.shape
    if r == rows and c == cols:
        return x
    return jnp.pad(x, ((0, rows - r), (0, cols - c)))


# ----------------------------------------------------------------------------
# Pallas kernels
# ----------------------------------------------------------------------------
def _conv_bn_kernel(relu, add_residual, x_ref, w_ref, b_ref, *rest):
    """Tiled: acc += x@w over the K grid axis; epilogue bias [+res] [+ReLU] on last k."""
    if add_residual:
        r_ref, o_ref, acc_ref = rest
    else:
        o_ref, acc_ref = rest

    k = pl.program_id(2)

    @pl.when(k == 0)
    def _init():
        acc_ref[...] = jnp.zeros_like(acc_ref)

    acc_ref[...] += jnp.dot(x_ref[...], w_ref[...],
                            preferred_element_type=jnp.float32)

    @pl.when(k == pl.num_programs(2) - 1)
    def _finalize():
        acc = acc_ref[...] + b_ref[...]          # f32 epilogue (v5e has no bf16 VPU)
        if add_residual:
            acc = acc + r_ref[...]
        if relu:
            acc = jnp.maximum(acc, 0.0)
        o_ref[...] = acc.astype(o_ref.dtype)


def _maxpool_kernel(p_ref, o_ref):
    """p_ref: [9, TM, TW] window taps -> o_ref: [TM, TW] max over taps."""
    o_ref[...] = jnp.max(p_ref[...], axis=0)


# Cache one compiled pallas_call per distinct problem/tiling shape.
@functools.lru_cache(maxsize=None)
def _get_conv_call(M, K, N, TM, TK, TN, relu, add_residual):
    kernel = functools.partial(_conv_bn_kernel, relu, add_residual)
    gm, gn, gk = M // TM, N // TN, K // TK

    in_specs = [
        pl.BlockSpec((TM, TK), lambda i, j, k: (i, k)),   # im2col patches (bf16)
        pl.BlockSpec((TK, TN), lambda i, j, k: (k, j)),   # BN-folded weights (bf16)
        pl.BlockSpec((1, TN), lambda i, j, k: (0, j)),    # per-channel bias (f32)
    ]
    if add_residual:
        in_specs.append(pl.BlockSpec((TM, TN), lambda i, j, k: (i, j)))  # residual f32

    flops = 2 * M * K * N
    bytes_accessed = (M * K * 2 + K * N * 2
                      + M * N * 4 * (2 if add_residual else 1) + N * 4)

    return pl.pallas_call(
        kernel,
        out_shape=jax.ShapeDtypeStruct((M, N), jnp.float32),
        grid=(gm, gn, gk),
        in_specs=in_specs,
        out_specs=pl.BlockSpec((TM, TN), lambda i, j, k: (i, j)),
        scratch_shapes=[pltpu.VMEM((TM, TN), jnp.float32)],
        compiler_params=pltpu.CompilerParams(
            dimension_semantics=("parallel", "parallel", "arbitrary")),
        cost_estimate=pl.CostEstimate(flops=flops, transcendentals=0,
                                      bytes_accessed=bytes_accessed),
    )


@functools.lru_cache(maxsize=None)
def _get_maxpool_call(Mp, Wp, TM, TW):
    return pl.pallas_call(
        _maxpool_kernel,
        out_shape=jax.ShapeDtypeStruct((Mp, Wp), jnp.float32),
        grid=(Mp // TM, Wp // TW),
        in_specs=[pl.BlockSpec((9, TM, TW), lambda i, j: (0, i, j))],
        out_specs=pl.BlockSpec((TM, TW), lambda i, j: (i, j)),
        compiler_params=pltpu.CompilerParams(
            dimension_semantics=("parallel", "parallel")),
    )


# ----------------------------------------------------------------------------
# JAX glue: im2col, conv+bn wrapper, maxpool wrapper
# ----------------------------------------------------------------------------
def _im2col(x, kh, kw, stride, pad):
    """x: [N,H,W,C] NHWC -> ([N*Ho*Wo, kh*kw*C], N, Ho, Wo)."""
    n, h, w, c = x.shape
    xp = jnp.pad(x, ((0, 0), (pad, pad), (pad, pad), (0, 0)))
    ho = (h + 2 * pad - kh) // stride + 1
    wo = (w + 2 * pad - kw) // stride + 1
    cols = []
    for dy in range(kh):
        for dx in range(kw):
            cols.append(xp[:, dy:dy + stride * ho:stride,
                           dx:dx + stride * wo:stride, :])
    patches = jnp.stack(cols, axis=3)                 # [N,Ho,Wo,kh*kw,C]
    return patches.reshape(n * ho * wo, kh * kw * c), n, ho, wo


# Tile caps: fit comfortably in the 32 MiB scoped-VMEM default on every gen
# (v7x: 64 MiB physical, 2 TCs; v6e/v5e: 128 MiB).  Per-step footprint with
# (TM,TN,TK)=(256,256,512): bf16 x/w tiles 256 KB each, f32 out/res/acc 256 KB
# each, ~2.5 MB double-buffered total.
_TM_CAP, _TN_CAP, _TK_CAP = 256, 256, 512


def conv_bn(x, w, bias, *, stride=1, pad=0, relu=True, residual=None):
    """Conv2d(bias=False) + folded BatchNorm [+ residual] [+ ReLU] via tiled Pallas matmul.

    x: [N,H,W,Cin] NHWC (f32).  w: [kh,kw,Cin,Cout] (BN scale already folded in).
    Returns [N,Ho,Wo,Cout] f32.
    """
    kh, kw, cin, cout = w.shape
    # Cast activations to bf16 *before* im2col so the expanded patch tensor that XLA
    # materializes is half the HBM traffic; accumulation stays f32 in the kernel.
    patches, n, ho, wo = _im2col(x.astype(jnp.bfloat16), kh, kw, stride, pad)
    m, k = patches.shape

    tm = _pick_tile(m, _TM_CAP, 16)        # bf16 sublane pack
    tn = _pick_tile(cout, _TN_CAP, 128)    # lane-dense output (cout=64 -> pad to 128)
    tk = _pick_tile(k, _TK_CAP, 128)
    mp, kp, np_ = _round_up(m, tm), _round_up(k, tk), _round_up(cout, tn)

    patches_p = _pad2d(patches, mp, kp)
    w_p = _pad2d(w.reshape(kh * kw * cin, cout).astype(jnp.bfloat16), kp, np_)
    b_p = _pad2d(bias.reshape(1, cout).astype(jnp.float32), 1, np_)

    args = [patches_p, w_p, b_p]
    add_res = residual is not None
    if add_res:
        args.append(_pad2d(residual.reshape(m, cout).astype(jnp.float32), mp, np_))

    out = _get_conv_call(mp, kp, np_, tm, tk, tn, bool(relu), add_res)(*args)
    return out[:m, :cout].reshape(n, ho, wo, cout)


def maxpool_3x3_s2_p1(x):
    """PyTorch MaxPool2d(kernel_size=3, stride=2, padding=1) on NHWC, Pallas-tiled."""
    n, h, w, c = x.shape
    k, s, pad = 3, 2, 1
    xp = jnp.pad(x, ((0, 0), (pad, pad), (pad, pad), (0, 0)),
                 constant_values=-jnp.inf)
    ho = (h + 2 * pad - k) // s + 1
    wo = (w + 2 * pad - k) // s + 1
    cols = [xp[:, dy:dy + s * ho:s, dx:dx + s * wo:s, :]
            for dy in range(k) for dx in range(k)]
    # [9, N, Ho, Wo, C] -> [9, N*Ho, Wo*C]: keeps the last dim lane-dense (>=128).
    patches = jnp.stack(cols, axis=0).reshape(9, n * ho, wo * c)
    rows, width = n * ho, wo * c

    tm = _pick_tile(rows, 128, 8)
    tw = _pick_tile(width, 512, 128)
    rows_p, width_p = _round_up(rows, tm), _round_up(width, tw)
    patches = jnp.pad(patches, ((0, 0), (0, rows_p - rows), (0, width_p - width)))

    out = _get_maxpool_call(rows_p, width_p, tm, tw)(patches)
    return out[:rows, :width].reshape(n, ho, wo, c)


# ----------------------------------------------------------------------------
# Deterministic parameter construction (ResNet-50 shapes, BN folded into weights)
# ----------------------------------------------------------------------------
class _ParamGen:
    def __init__(self, key):
        self._key = key
        self._idx = 0

    def _next(self):
        kk = jax.random.fold_in(self._key, self._idx)
        self._idx += 1
        return kk

    def conv(self, kh, kw, cin, cout):
        fan_in = kh * kw * cin
        return jax.random.normal(self._next(), (kh, kw, cin, cout),
                                 jnp.float32) * (1.0 / jnp.sqrt(fan_in))

    def bn(self, c, eps=1e-5):
        gamma = 1.0 + 0.1 * jax.random.normal(self._next(), (c,), jnp.float32)
        beta = 0.1 * jax.random.normal(self._next(), (c,), jnp.float32)
        mean = 0.1 * jax.random.normal(self._next(), (c,), jnp.float32)
        var = jax.random.uniform(self._next(), (c,), jnp.float32, 0.5, 1.5)
        scale = gamma / jnp.sqrt(var + eps)      # fold running stats (eval mode)
        bias = beta - mean * scale
        return scale, bias

    def conv_bn(self, kh, kw, cin, cout):
        """Conv weight with BN scale folded in, plus the folded BN bias."""
        w = self.conv(kh, kw, cin, cout)
        scale, bias = self.bn(cout)
        return w * scale.reshape(1, 1, 1, cout), bias


def _make_bottleneck(pg, inplanes, planes, downsample):
    w1, b1 = pg.conv_bn(1, 1, inplanes, planes)
    w2, b2 = pg.conv_bn(3, 3, planes, planes)
    w3, b3 = pg.conv_bn(1, 1, planes, planes * 4)
    p = {"w1": w1, "b1": b1, "w2": w2, "b2": b2, "w3": w3, "b3": b3}
    if downsample:
        wd, bd = pg.conv_bn(1, 1, inplanes, planes * 4)
        p["wd"] = wd
        p["bd"] = bd
    return p


def make_resnet50_fpn_params(seed=0):
    pg = _ParamGen(jax.random.PRNGKey(seed))
    w1, b1 = pg.conv_bn(7, 7, 3, 64)
    params = {"conv1_w": w1, "conv1_b": b1}

    def layer(inplanes, planes, blocks):
        blks = [_make_bottleneck(pg, inplanes, planes, True)]
        for _ in range(blocks - 1):
            blks.append(_make_bottleneck(pg, planes * 4, planes, False))
        return blks

    params["layer1"] = layer(64, 64, 3)     # resnet.children()[4]  (stride 1)
    params["layer2"] = layer(256, 128, 4)   # children()[5]  -> map3 (stride 2)
    params["layer3"] = layer(512, 256, 6)   # children()[6]  -> map4 (stride 2)
    return params


# ----------------------------------------------------------------------------
# Forward pass (mirrors Resnet50FPN.forward)
# ----------------------------------------------------------------------------
def _bottleneck_forward(x, p, stride):
    if "wd" in p:
        identity = conv_bn(x, p["wd"], p["bd"], stride=stride, pad=0, relu=False)
    else:
        identity = x
    out = conv_bn(x, p["w1"], p["b1"], stride=1, pad=0, relu=True)
    out = conv_bn(out, p["w2"], p["b2"], stride=stride, pad=1, relu=True)
    # conv3 + bn3 + residual add + ReLU — fused in one tiled kernel call.
    out = conv_bn(out, p["w3"], p["b3"], stride=1, pad=0,
                  relu=True, residual=identity)
    return out


def _layer_forward(x, blocks, stride):
    for bi, p in enumerate(blocks):
        x = _bottleneck_forward(x, p, stride if bi == 0 else 1)
    return x


def resnet50_fpn_forward(params, im_data_nchw):
    """im_data_nchw: [N, 3, H, W] f32 -> {'map3': NCHW, 'map4': NCHW}."""
    x = jnp.transpose(im_data_nchw, (0, 2, 3, 1)).astype(jnp.float32)  # -> NHWC

    # conv1 = Conv7x7/s2 + (folded) BN + ReLU + MaxPool3x3/s2
    x = conv_bn(x, params["conv1_w"], params["conv1_b"], stride=2, pad=3, relu=True)
    x = maxpool_3x3_s2_p1(x)

    x = _layer_forward(x, params["layer1"], stride=1)      # conv2
    map3 = _layer_forward(x, params["layer2"], stride=2)   # conv3 -> map3
    map4 = _layer_forward(map3, params["layer3"], stride=2)  # conv4 -> map4

    return {
        "map3": jnp.transpose(map3, (0, 3, 1, 2)),   # back to NCHW
        "map4": jnp.transpose(map4, (0, 3, 1, 2)),
    }


# ----------------------------------------------------------------------------
if __name__ == "__main__":
    key = jax.random.PRNGKey(0)
    # Small image; spatial must survive /16 downsampling: 32 -> map3 4x4, map4 2x2.
    im_data = jax.random.normal(key, (2, 3, 32, 32), jnp.float32)

    params = make_resnet50_fpn_params(seed=0)
    fwd = jax.jit(resnet50_fpn_forward)          # one jit: glue fused around kernels
    feat = fwd(params, im_data)
    jax.block_until_ready(feat)

    assert feat["map3"].shape == (2, 512, 4, 4), feat["map3"].shape
    assert feat["map4"].shape == (2, 1024, 2, 2), feat["map4"].shape
    assert bool(jnp.all(jnp.isfinite(feat["map3"])))
    assert bool(jnp.all(jnp.isfinite(feat["map4"])))
    print("KERNEL_OK")
</pallas_src>

<mosaic_0001>
module attributes {stable_mosaic.version = 11 : i64} {
  func.func @_conv_bn_kernel(%arg0: i32, %arg1: i32, %arg2: i32, %arg3: memref<256x256xbf16, #tpu.memory_space<vmem>>, %arg4: memref<256x128xbf16, #tpu.memory_space<vmem>>, %arg5: memref<1x128xf32, #tpu.memory_space<vmem>>, %arg6: memref<256x128xf32, #tpu.memory_space<vmem>>, %arg7: memref<256x128xf32, #tpu.memory_space<vmem>>) attributes {dimension_semantics = [#tpu.dimension_semantics<parallel>, #tpu.dimension_semantics<parallel>, #tpu.dimension_semantics<arbitrary>], iteration_bounds = array<i64: 2, 1, 1>, scalar_prefetch = 0 : i64, scratch_operands = 1 : i64, tpu.core_type = #tpu.core_type<tc>, window_params = [{transform_indices = @transform_0, window_bounds = array<i64: 256, 256>}, {transform_indices = @transform_1, window_bounds = array<i64: 256, 128>}, {transform_indices = @transform_2, window_bounds = array<i64: 1, 128>}, {transform_indices = @transform_3, window_bounds = array<i64: 256, 128>}]} {
    %c0_i32 = arith.constant 0 : i32
    %0 = arith.cmpi eq, %arg2, %c0_i32 : i32
    %1 = arith.extui %0 : i1 to i32
    %c0_i32_0 = arith.constant 0 : i32
    %2 = arith.cmpi ne, %1, %c0_i32_0 : i32
    scf.if %2 {
      %cst_10 = arith.constant 0.000000e+00 : f32
      %12 = vector.broadcast %cst_10 : f32 to vector<256x128xf32>
      %c0_11 = arith.constant 0 : index
      %c0_12 = arith.constant 0 : index
      %13 = vector.load %arg7[%c0_11, %c0_12] : memref<256x128xf32, #tpu.memory_space<vmem>>, vector<256x128xf32>
      tpu.vector_store %arg7[%c0_11, %c0_12], %12 {strides = array<i32>} : memref<256x128xf32, #tpu.memory_space<vmem>>, vector<256x128xf32>,
    } else {
    }
    %c0 = arith.constant 0 : index
    %c0_1 = arith.constant 0 : index
    %3 = vector.load %arg7[%c0, %c0_1] : memref<256x128xf32, #tpu.memory_space<vmem>>, vector<256x128xf32>
    %c0_2 = arith.constant 0 : index
    %c0_3 = arith.constant 0 : index
    %4 = vector.load %arg3[%c0_2, %c0_3] : memref<256x256xbf16, #tpu.memory_space<vmem>>, vector<256x256xbf16>
    %c0_4 = arith.constant 0 : index
    %c0_5 = arith.constant 0 : index
    %5 = vector.load %arg4[%c0_4, %c0_5] : memref<256x128xbf16, #tpu.memory_space<vmem>>, vector<256x128xbf16>
    %cst = arith.constant dense<0.000000e+00> : vector<256x128xf32>
    %6 = tpu.matmul %4, %5, %cst {dimension_numbers = #tpu.dot_dimension_numbers<[1], [0], [0], [1], [0, 0, 1, 1], [], []>} : vector<256x256xbf16>, vector<256x128xbf16>, vector<256x128xf32> -> vector<256x128xf32>
    %7 = arith.addf %3, %6 : vector<256x128xf32>
    %c0_6 = arith.constant 0 : index
    %c0_7 = arith.constant 0 : index
    %8 = vector.load %arg7[%c0_6, %c0_7] : memref<256x128xf32, #tpu.memory_space<vmem>>, vector<256x128xf32>
    tpu.vector_store %arg7[%c0_6, %c0_7], %7 {strides = array<i32>} : memref<256x128xf32, #tpu.memory_space<vmem>>, vector<256x128xf32>,
    %c0_i32_8 = arith.constant 0 : i32
    %9 = arith.cmpi eq, %arg2, %c0_i32_8 : i32
    %10 = arith.extui %9 : i1 to i32
    %c0_i32_9 = arith.constant 0 : i32
    %11 = arith.cmpi ne, %10, %c0_i32_9 : i32
    scf.if %11 {
      %c0_10 = arith.constant 0 : index
      %c0_11 = arith.constant 0 : index
      %12 = vector.load %arg7[%c0_10, %c0_11] : memref<256x128xf32, #tpu.memory_space<vmem>>, vector<256x128xf32>
      %c0_12 = arith.constant 0 : index
      %c0_13 = arith.constant 0 : index
      %13 = vector.load %arg5[%c0_12, %c0_13] : memref<1x128xf32, #tpu.memory_space<vmem>>, vector<1x128xf32>
      %14 = vector.broadcast %13 : vector<1x128xf32> to vector<256x128xf32>
      %15 = arith.addf %12, %14 : vector<256x128xf32>
      %cst_14 = arith.constant 0.000000e+00 : f32
      %16 = vector.broadcast %cst_14 : f32 to vector<256x128xf32>
      %17 = arith.maximumf %15, %16 : vector<256x128xf32>
      %c0_15 = arith.constant 0 : index
      %c0_16 = arith.constant 0 : index
      %18 = vector.load %arg6[%c0_15, %c0_16] : memref<256x128xf32, #tpu.memory_space<vmem>>, vector<256x128xf32>
      tpu.vector_store %arg6[%c0_15, %c0_16], %17 {strides = array<i32>} : memref<256x128xf32, #tpu.memory_space<vmem>>, vector<256x128xf32>,
    } else {
    }
    return
  }
  func.func @transform_0(%arg0: i32, %arg1: i32, %arg2: i32) -> (i32, i32) {
    %c0_i32 = arith.constant 0 : i32
    return %arg0, %arg2 : i32, i32
  }
  func.func @transform_1(%arg0: i32, %arg1: i32, %arg2: i32) -> (i32, i32) {
    %c0_i32 = arith.constant 0 : i32
    return %arg2, %arg1 : i32, i32
  }
  func.func @transform_2(%arg0: i32, %arg1: i32, %arg2: i32) -> (i32, i32) {
    %c0_i32 = arith.constant 0 : i32
    %c0_i32_0 = arith.constant 0 : i32
    return %c0_i32, %arg1 : i32, i32
  }
  func.func @transform_3(%arg0: i32, %arg1: i32, %arg2: i32) -> (i32, i32) {
    %c0_i32 = arith.constant 0 : i32
    return %arg0, %arg1 : i32, i32
  }
}

module attributes {stable_mosaic.version = 11 : i64} {
  func.func @_maxpool_kernel(%arg0: i32, %arg1: i32, %arg2: memref<9x16x512xf32, #tpu.memory_space<vmem>>, %arg3: memref<16x512xf32, #tpu.memory_space<vmem>>) attributes {dimension_semantics = [#tpu.dimension_semantics<parallel>, #tpu.dimension_semantics<parallel>], iteration_bounds = array<i64: 1, 1>, scalar_prefetch = 0 : i64, scratch_operands = 0 : i64, tpu.core_type = #tpu.core_type<tc>, window_params = [{transform_indices = @transform_0, window_bounds = array<i64: 9, 16, 512>}, {transform_indices = @transform_1, window_bounds = array<i64: 16, 512>}]} {
    %c0 = arith.constant 0 : index
    %c0_0 = arith.constant 0 : index
    %c0_1 = arith.constant 0 : index
    %0 = vector.load %arg2[%c0, %c0_0, %c0_1] : memref<9x16x512xf32, #tpu.memory_space<vmem>>, vector<9x16x512xf32>
    %cst = arith.constant dense<0xFF800000> : vector<16x512xf32>
    %1 = vector.multi_reduction <maximumf>, %0, %cst [0] : vector<9x16x512xf32> to vector<16x512xf32>
    %c0_2 = arith.constant 0 : index
    %c0_3 = arith.constant 0 : index
    %2 = vector.load %arg3[%c0_2, %c0_3] : memref<16x512xf32, #tpu.memory_space<vmem>>, vector<16x512xf32>
    tpu.vector_store %arg3[%c0_2, %c0_3], %1 {strides = array<i32>} : memref<16x512xf32, #tpu.memory_space<vmem>>, vector<16x512xf32>,
    return
  }
  func.func @transform_0(%arg0: i32, %arg1: i32) -> (i32, i32, i32) {
    %c0_i32 = arith.constant 0 : i32
    %c0_i32_0 = arith.constant 0 : i32
    return %c0_i32, %arg0, %arg1 : i32, i32, i32
  }
  func.func @transform_1(%arg0: i32, %arg1: i32) -> (i32, i32) {
    %c0_i32 = arith.constant 0 : i32
    return %arg0, %arg1 : i32, i32
  }
}

module attributes {stable_mosaic.version = 11 : i64} {
  func.func @_conv_bn_kernel(%arg0: i32, %arg1: i32, %arg2: i32, %arg3: memref<128x128xbf16, #tpu.memory_space<vmem>>, %arg4: memref<128x128xbf16, #tpu.memory_space<vmem>>, %arg5: memref<1x128xf32, #tpu.memory_space<vmem>>, %arg6: memref<128x128xf32, #tpu.memory_space<vmem>>, %arg7: memref<128x128xf32, #tpu.memory_space<vmem>>) attributes {dimension_semantics = [#tpu.dimension_semantics<parallel>, #tpu.dimension_semantics<parallel>, #tpu.dimension_semantics<arbitrary>], iteration_bounds = array<i64: 1, 1, 1>, scalar_prefetch = 0 : i64, scratch_operands = 1 : i64, tpu.core_type = #tpu.core_type<tc>, window_params = [{transform_indices = @transform_0, window_bounds = array<i64: 128, 128>}, {transform_indices = @transform_1, window_bounds = array<i64: 128, 128>}, {transform_indices = @transform_2, window_bounds = array<i64: 1, 128>}, {transform_indices = @transform_3, window_bounds = array<i64: 128, 128>}]} {
    %c0_i32 = arith.constant 0 : i32
    %0 = arith.cmpi eq, %arg2, %c0_i32 : i32
    %1 = arith.extui %0 : i1 to i32
    %c0_i32_0 = arith.constant 0 : i32
    %2 = arith.cmpi ne, %1, %c0_i32_0 : i32
    scf.if %2 {
      %cst_10 = arith.constant 0.000000e+00 : f32
      %12 = vector.broadcast %cst_10 : f32 to vector<128x128xf32>
      %c0_11 = arith.constant 0 : index
      %c0_12 = arith.constant 0 : index
      %13 = vector.load %arg7[%c0_11, %c0_12] : memref<128x128xf32, #tpu.memory_space<vmem>>, vector<128x128xf32>
      tpu.vector_store %arg7[%c0_11, %c0_12], %12 {strides = array<i32>} : memref<128x128xf32, #tpu.memory_space<vmem>>, vector<128x128xf32>,
    } else {
    }
    %c0 = arith.constant 0 : index
    %c0_1 = arith.constant 0 : index
    %3 = vector.load %arg7[%c0, %c0_1] : memref<128x128xf32, #tpu.memory_space<vmem>>, vector<128x128xf32>
    %c0_2 = arith.constant 0 : index
    %c0_3 = arith.constant 0 : index
    %4 = vector.load %arg3[%c0_2, %c0_3] : memref<128x128xbf16, #tpu.memory_space<vmem>>, vector<128x128xbf16>
    %c0_4 = arith.constant 0 : index
    %c0_5 = arith.constant 0 : index
    %5 = vector.load %arg4[%c0_4, %c0_5] : memref<128x128xbf16, #tpu.memory_space<vmem>>, vector<128x128xbf16>
    %cst = arith.constant dense<0.000000e+00> : vector<128x128xf32>
    %6 = tpu.matmul %4, %5, %cst {dimension_numbers = #tpu.dot_dimension_numbers<[1], [0], [0], [1], [0, 0, 1, 1], [], []>} : vector<128x128xbf16>, vector<128x128xbf16>, vector<128x128xf32> -> vector<128x128xf32>
    %7 = arith.addf %3, %6 : vector<128x128xf32>
    %c0_6 = arith.constant 0 : index
    %c0_7 = arith.constant 0 : index
    %8 = vector.load %arg7[%c0_6, %c0_7] : memref<128x128xf32, #tpu.memory_space<vmem>>, vector<128x128xf32>
    tpu.vector_store %arg7[%c0_6, %c0_7], %7 {strides = array<i32>} : memref<128x128xf32, #tpu.memory_space<vmem>>, vector<128x128xf32>,
    %c0_i32_8 = arith.constant 0 : i32
    %9 = arith.cmpi eq, %arg2, %c0_i32_8 : i32
    %10 = arith.extui %9 : i1 to i32
    %c0_i32_9 = arith.constant 0 : i32
    %11 = arith.cmpi ne, %10, %c0_i32_9 : i32
    scf.if %11 {
      %c0_10 = arith.constant 0 : index
      %c0_11 = arith.constant 0 : index
      %12 = vector.load %arg7[%c0_10, %c0_11] : memref<128x128xf32, #tpu.memory_space<vmem>>, vector<128x128xf32>
      %c0_12 = arith.constant 0 : index
      %c0_13 = arith.constant 0 : index
      %13 = vector.load %arg5[%c0_12, %c0_13] : memref<1x128xf32, #tpu.memory_space<vmem>>, vector<1x128xf32>
      %14 = vector.broadcast %13 : vector<1x128xf32> to vector<128x128xf32>
      %15 = arith.addf %12, %14 : vector<128x128xf32>
      %cst_14 = arith.constant 0.000000e+00 : f32
      %16 = vector.broadcast %cst_14 : f32 to vector<128x128xf32>
      %17 = arith.maximumf %15, %16 : vector<128x128xf32>
      %c0_15 = arith.constant 0 : index
      %c0_16 = arith.constant 0 : index
      %18 = vector.load %arg6[%c0_15, %c0_16] : memref<128x128xf32, #tpu.memory_space<vmem>>, vector<128x128xf32>
      tpu.vector_store %arg6[%c0_15, %c0_16], %17 {strides = array<i32>} : memref<128x128xf32, #tpu.memory_space<vmem>>, vector<128x128xf32>,
    } else {
    }
    return
  }
  func.func @transform_0(%arg0: i32, %arg1: i32, %arg2: i32) -> (i32, i32) {
    %c0_i32 = arith.constant 0 : i32
    return %arg0, %arg2 : i32, i32
  }
  func.func @transform_1(%arg0: i32, %arg1: i32, %arg2: i32) -> (i32, i32) {
    %c0_i32 = arith.constant 0 : i32
    return %arg2, %arg1 : i32, i32
  }
  func.func @transform_2(%arg0: i32, %arg1: i32, %arg2: i32) -> (i32, i32) {
    %c0_i32 = arith.constant 0 : i32
    %c0_i32_0 = arith.constant 0 : i32
    return %c0_i32, %arg1 : i32, i32
  }
  func.func @transform_3(%arg0: i32, %arg1: i32, %arg2: i32) -> (i32, i32) {
    %c0_i32 = arith.constant 0 : i32
    return %arg0, %arg1 : i32, i32
  }
}

module attributes {stable_mosaic.version = 11 : i64} {
  func.func @_conv_bn_kernel(%arg0: i32, %arg1: i32, %arg2: i32, %arg3: memref<128x512xbf16, #tpu.memory_space<vmem>>, %arg4: memref<512x128xbf16, #tpu.memory_space<vmem>>, %arg5: memref<1x128xf32, #tpu.memory_space<vmem>>, %arg6: memref<128x128xf32, #tpu.memory_space<vmem>>, %arg7: memref<128x128xf32, #tpu.memory_space<vmem>>) attributes {dimension_semantics = [#tpu.dimension_semantics<parallel>, #tpu.dimension_semantics<parallel>, #tpu.dimension_semantics<arbitrary>], iteration_bounds = array<i64: 1, 1, 2>, scalar_prefetch = 0 : i64, scratch_operands = 1 : i64, tpu.core_type = #tpu.core_type<tc>, window_params = [{transform_indices = @transform_0, window_bounds = array<i64: 128, 512>}, {transform_indices = @transform_1, window_bounds = array<i64: 512, 128>}, {transform_indices = @transform_2, window_bounds = array<i64: 1, 128>}, {transform_indices = @transform_3, window_bounds = array<i64: 128, 128>}]} {
    %c0_i32 = arith.constant 0 : i32
    %0 = arith.cmpi eq, %arg2, %c0_i32 : i32
    %1 = arith.extui %0 : i1 to i32
    %c0_i32_0 = arith.constant 0 : i32
    %2 = arith.cmpi ne, %1, %c0_i32_0 : i32
    scf.if %2 {
      %cst_9 = arith.constant 0.000000e+00 : f32
      %12 = vector.broadcast %cst_9 : f32 to vector<128x128xf32>
      %c0_10 = arith.constant 0 : index
      %c0_11 = arith.constant 0 : index
      %13 = vector.load %arg7[%c0_10, %c0_11] : memref<128x128xf32, #tpu.memory_space<vmem>>, vector<128x128xf32>
      tpu.vector_store %arg7[%c0_10, %c0_11], %12 {strides = array<i32>} : memref<128x128xf32, #tpu.memory_space<vmem>>, vector<128x128xf32>,
    } else {
    }
    %c0 = arith.constant 0 : index
    %c0_1 = arith.constant 0 : index
    %3 = vector.load %arg7[%c0, %c0_1] : memref<128x128xf32, #tpu.memory_space<vmem>>, vector<128x128xf32>
    %c0_2 = arith.constant 0 : index
    %c0_3 = arith.constant 0 : index
    %4 = vector.load %arg3[%c0_2, %c0_3] : memref<128x512xbf16, #tpu.memory_space<vmem>>, vector<128x512xbf16>
    %c0_4 = arith.constant 0 : index
    %c0_5 = arith.constant 0 : index
    %5 = vector.load %arg4[%c0_4, %c0_5] : memref<512x128xbf16, #tpu.memory_space<vmem>>, vector<512x128xbf16>
    %cst = arith.constant dense<0.000000e+00> : vector<128x128xf32>
    %6 = tpu.matmul %4, %5, %cst {dimension_numbers = #tpu.dot_dimension_numbers<[1], [0], [0], [1], [0, 0, 1, 1], [], []>} : vector<128x512xbf16>, vector<512x128xbf16>, vector<128x128xf32> -> vector<128x128xf32>
    %7 = arith.addf %3, %6 : vector<128x128xf32>
    %c0_6 = arith.constant 0 : index
    %c0_7 = arith.constant 0 : index
    %8 = vector.load %arg7[%c0_6, %c0_7] : memref<128x128xf32, #tpu.memory_space<vmem>>, vector<128x128xf32>
    tpu.vector_store %arg7[%c0_6, %c0_7], %7 {strides = array<i32>} : memref<128x128xf32, #tpu.memory_space<vmem>>, vector<128x128xf32>,
    %c1_i32 = arith.constant 1 : i32
    %9 = arith.cmpi eq, %arg2, %c1_i32 : i32
    %10 = arith.extui %9 : i1 to i32
    %c0_i32_8 = arith.constant 0 : i32
    %11 = arith.cmpi ne, %10, %c0_i32_8 : i32
    scf.if %11 {
      %c0_9 = arith.constant 0 : index
      %c0_10 = arith.constant 0 : index
      %12 = vector.load %arg7[%c0_9, %c0_10] : memref<128x128xf32, #tpu.memory_space<vmem>>, vector<128x128xf32>
      %c0_11 = arith.constant 0 : index
      %c0_12 = arith.constant 0 : index
      %13 = vector.load %arg5[%c0_11, %c0_12] : memref<1x128xf32, #tpu.memory_space<vmem>>, vector<1x128xf32>
      %14 = vector.broadcast %13 : vector<1x128xf32> to vector<128x128xf32>
      %15 = arith.addf %12, %14 : vector<128x128xf32>
      %cst_13 = arith.constant 0.000000e+00 : f32
      %16 = vector.broadcast %cst_13 : f32 to vector<128x128xf32>
      %17 = arith.maximumf %15, %16 : vector<128x128xf32>
      %c0_14 = arith.constant 0 : index
      %c0_15 = arith.constant 0 : index
      %18 = vector.load %arg6[%c0_14, %c0_15] : memref<128x128xf32, #tpu.memory_space<vmem>>, vector<128x128xf32>
      tpu.vector_store %arg6[%c0_14, %c0_15], %17 {strides = array<i32>} : memref<128x128xf32, #tpu.memory_space<vmem>>, vector<128x128xf32>,
    } else {
    }
    return
  }
  func.func @transform_0(%arg0: i32, %arg1: i32, %arg2: i32) -> (i32, i32) {
    %c0_i32 = arith.constant 0 : i32
    return %arg0, %arg2 : i32, i32
  }
  func.func @transform_1(%arg0: i32, %arg1: i32, %arg2: i32) -> (i32, i32) {
    %c0_i32 = arith.constant 0 : i32
    return %arg2, %arg1 : i32, i32
  }
  func.func @transform_2(%arg0: i32, %arg1: i32, %arg2: i32) -> (i32, i32) {
    %c0_i32 = arith.constant 0 : i32
    %c0_i32_0 = arith.constant 0 : i32
    return %c0_i32, %arg1 : i32, i32
  }
  func.func @transform_3(%arg0: i32, %arg1: i32, %arg2: i32) -> (i32, i32) {
    %c0_i32 = arith.constant 0 : i32
    return %arg0, %arg1 : i32, i32
  }
}

module attributes {stable_mosaic.version = 11 : i64} {
  func.func @_conv_bn_kernel(%arg0: i32, %arg1: i32, %arg2: i32, %arg3: memref<128x128xbf16, #tpu.memory_space<vmem>>, %arg4: memref<128x256xbf16, #tpu.memory_space<vmem>>, %arg5: memref<1x256xf32, #tpu.memory_space<vmem>>, %arg6: memref<128x256xf32, #tpu.memory_space<vmem>>, %arg7: memref<128x256xf32, #tpu.memory_space<vmem>>) attributes {dimension_semantics = [#tpu.dimension_semantics<parallel>, #tpu.dimension_semantics<parallel>, #tpu.dimension_semantics<arbitrary>], iteration_bounds = array<i64: 1, 1, 1>, scalar_prefetch = 0 : i64, scratch_operands = 1 : i64, tpu.core_type = #tpu.core_type<tc>, window_params = [{transform_indices = @transform_0, window_bounds = array<i64: 128, 128>}, {transform_indices = @transform_1, window_bounds = array<i64: 128, 256>}, {transform_indices = @transform_2, window_bounds = array<i64: 1, 256>}, {transform_indices = @transform_3, window_bounds = array<i64: 128, 256>}]} {
    %c0_i32 = arith.constant 0 : i32
    %0 = arith.cmpi eq, %arg2, %c0_i32 : i32
    %1 = arith.extui %0 : i1 to i32
    %c0_i32_0 = arith.constant 0 : i32
    %2 = arith.cmpi ne, %1, %c0_i32_0 : i32
    scf.if %2 {
      %cst_10 = arith.constant 0.000000e+00 : f32
      %12 = vector.broadcast %cst_10 : f32 to vector<128x256xf32>
      %c0_11 = arith.constant 0 : index
      %c0_12 = arith.constant 0 : index
      %13 = vector.load %arg7[%c0_11, %c0_12] : memref<128x256xf32, #tpu.memory_space<vmem>>, vector<128x256xf32>
      tpu.vector_store %arg7[%c0_11, %c0_12], %12 {strides = array<i32>} : memref<128x256xf32, #tpu.memory_space<vmem>>, vector<128x256xf32>,
    } else {
    }
    %c0 = arith.constant 0 : index
    %c0_1 = arith.constant 0 : index
    %3 = vector.load %arg7[%c0, %c0_1] : memref<128x256xf32, #tpu.memory_space<vmem>>, vector<128x256xf32>
    %c0_2 = arith.constant 0 : index
    %c0_3 = arith.constant 0 : index
    %4 = vector.load %arg3[%c0_2, %c0_3] : memref<128x128xbf16, #tpu.memory_space<vmem>>, vector<128x128xbf16>
    %c0_4 = arith.constant 0 : index
    %c0_5 = arith.constant 0 : index
    %5 = vector.load %arg4[%c0_4, %c0_5] : memref<128x256xbf16, #tpu.memory_space<vmem>>, vector<128x256xbf16>
    %cst = arith.constant dense<0.000000e+00> : vector<128x256xf32>
    %6 = tpu.matmul %4, %5, %cst {dimension_numbers = #tpu.dot_dimension_numbers<[1], [0], [0], [1], [0, 0, 1, 1], [], []>} : vector<128x128xbf16>, vector<128x256xbf16>, vector<128x256xf32> -> vector<128x256xf32>
    %7 = arith.addf %3, %6 : vector<128x256xf32>
    %c0_6 = arith.constant 0 : index
    %c0_7 = arith.constant 0 : index
    %8 = vector.load %arg7[%c0_6, %c0_7] : memref<128x256xf32, #tpu.memory_space<vmem>>, vector<128x256xf32>
    tpu.vector_store %arg7[%c0_6, %c0_7], %7 {strides = array<i32>} : memref<128x256xf32, #tpu.memory_space<vmem>>, vector<128x256xf32>,
    %c0_i32_8 = arith.constant 0 : i32
    %9 = arith.cmpi eq, %arg2, %c0_i32_8 : i32
    %10 = arith.extui %9 : i1 to i32
    %c0_i32_9 = arith.constant 0 : i32
    %11 = arith.cmpi ne, %10, %c0_i32_9 : i32
    scf.if %11 {
      %c0_10 = arith.constant 0 : index
      %c0_11 = arith.constant 0 : index
      %12 = vector.load %arg7[%c0_10, %c0_11] : memref<128x256xf32, #tpu.memory_space<vmem>>, vector<128x256xf32>
      %c0_12 = arith.constant 0 : index
      %c0_13 = arith.constant 0 : index
      %13 = vector.load %arg5[%c0_12, %c0_13] : memref<1x256xf32, #tpu.memory_space<vmem>>, vector<1x256xf32>
      %14 = vector.broadcast %13 : vector<1x256xf32> to vector<128x256xf32>
      %15 = arith.addf %12, %14 : vector<128x256xf32>
      %c0_14 = arith.constant 0 : index
      %c0_15 = arith.constant 0 : index
      %16 = vector.load %arg6[%c0_14, %c0_15] : memref<128x256xf32, #tpu.memory_space<vmem>>, vector<128x256xf32>
      tpu.vector_store %arg6[%c0_14, %c0_15], %15 {strides = array<i32>} : memref<128x256xf32, #tpu.memory_space<vmem>>, vector<128x256xf32>,
    } else {
    }
    return
  }
  func.func @transform_0(%arg0: i32, %arg1: i32, %arg2: i32) -> (i32, i32) {
    %c0_i32 = arith.constant 0 : i32
    return %arg0, %arg2 : i32, i32
  }
  func.func @transform_1(%arg0: i32, %arg1: i32, %arg2: i32) -> (i32, i32) {
    %c0_i32 = arith.constant 0 : i32
    return %arg2, %arg1 : i32, i32
  }
  func.func @transform_2(%arg0: i32, %arg1: i32, %arg2: i32) -> (i32, i32) {
    %c0_i32 = arith.constant 0 : i32
    %c0_i32_0 = arith.constant 0 : i32
    return %c0_i32, %arg1 : i32, i32
  }
  func.func @transform_3(%arg0: i32, %arg1: i32, %arg2: i32) -> (i32, i32) {
    %c0_i32 = arith.constant 0 : i32
    return %arg0, %arg1 : i32, i32
  }
}

module attributes {stable_mosaic.version = 11 : i64} {
  func.func @_conv_bn_kernel(%arg0: i32, %arg1: i32, %arg2: i32, %arg3: memref<128x128xbf16, #tpu.memory_space<vmem>>, %arg4: memref<128x256xbf16, #tpu.memory_space<vmem>>, %arg5: memref<1x256xf32, #tpu.memory_space<vmem>>, %arg6: memref<128x256xf32, #tpu.memory_space<vmem>>, %arg7: memref<128x256xf32, #tpu.memory_space<vmem>>, %arg8: memref<128x256xf32, #tpu.memory_space<vmem>>) attributes {dimension_semantics = [#tpu.dimension_semantics<parallel>, #tpu.dimension_semantics<parallel>, #tpu.dimension_semantics<arbitrary>], iteration_bounds = array<i64: 1, 1, 1>, scalar_prefetch = 0 : i64, scratch_operands = 1 : i64, tpu.core_type = #tpu.core_type<tc>, window_params = [{transform_indices = @transform_0, window_bounds = array<i64: 128, 128>}, {transform_indices = @transform_1, window_bounds = array<i64: 128, 256>}, {transform_indices = @transform_2, window_bounds = array<i64: 1, 256>}, {transform_indices = @transform_3, window_bounds = array<i64: 128, 256>}, {transform_indices = @transform_4, window_bounds = array<i64: 128, 256>}]} {
    %c0_i32 = arith.constant 0 : i32
    %0 = arith.cmpi eq, %arg2, %c0_i32 : i32
    %1 = arith.extui %0 : i1 to i32
    %c0_i32_0 = arith.constant 0 : i32
    %2 = arith.cmpi ne, %1, %c0_i32_0 : i32
    scf.if %2 {
      %cst_10 = arith.constant 0.000000e+00 : f32
      %12 = vector.broadcast %cst_10 : f32 to vector<128x256xf32>
      %c0_11 = arith.constant 0 : index
      %c0_12 = arith.constant 0 : index
      %13 = vector.load %arg8[%c0_11, %c0_12] : memref<128x256xf32, #tpu.memory_space<vmem>>, vector<128x256xf32>
      tpu.vector_store %arg8[%c0_11, %c0_12], %12 {strides = array<i32>} : memref<128x256xf32, #tpu.memory_space<vmem>>, vector<128x256xf32>,
    } else {
    }
    %c0 = arith.constant 0 : index
    %c0_1 = arith.constant 0 : index
    %3 = vector.load %arg8[%c0, %c0_1] : memref<128x256xf32, #tpu.memory_space<vmem>>, vector<128x256xf32>
    %c0_2 = arith.constant 0 : index
    %c0_3 = arith.constant 0 : index
    %4 = vector.load %arg3[%c0_2, %c0_3] : memref<128x128xbf16, #tpu.memory_space<vmem>>, vector<128x128xbf16>
    %c0_4 = arith.constant 0 : index
    %c0_5 = arith.constant 0 : index
    %5 = vector.load %arg4[%c0_4, %c0_5] : memref<128x256xbf16, #tpu.memory_space<vmem>>, vector<128x256xbf16>
    %cst = arith.constant dense<0.000000e+00> : vector<128x256xf32>
    %6 = tpu.matmul %4, %5, %cst {dimension_numbers = #tpu.dot_dimension_numbers<[1], [0], [0], [1], [0, 0, 1, 1], [], []>} : vector<128x128xbf16>, vector<128x256xbf16>, vector<128x256xf32> -> vector<128x256xf32>
    %7 = arith.addf %3, %6 : vector<128x256xf32>
    %c0_6 = arith.constant 0 : index
    %c0_7 = arith.constant 0 : index
    %8 = vector.load %arg8[%c0_6, %c0_7] : memref<128x256xf32, #tpu.memory_space<vmem>>, vector<128x256xf32>
    tpu.vector_store %arg8[%c0_6, %c0_7], %7 {strides = array<i32>} : memref<128x256xf32, #tpu.memory_space<vmem>>, vector<128x256xf32>,
    %c0_i32_8 = arith.constant 0 : i32
    %9 = arith.cmpi eq, %arg2, %c0_i32_8 : i32
    %10 = arith.extui %9 : i1 to i32
    %c0_i32_9 = arith.constant 0 : i32
    %11 = arith.cmpi ne, %10, %c0_i32_9 : i32
    scf.if %11 {
      %c0_10 = arith.constant 0 : index
      %c0_11 = arith.constant 0 : index
      %12 = vector.load %arg8[%c0_10, %c0_11] : memref<128x256xf32, #tpu.memory_space<vmem>>, vector<128x256xf32>
      %c0_12 = arith.constant 0 : index
      %c0_13 = arith.constant 0 : index
      %13 = vector.load %arg5[%c0_12, %c0_13] : memref<1x256xf32, #tpu.memory_space<vmem>>, vector<1x256xf32>
      %14 = vector.broadcast %13 : vector<1x256xf32> to vector<128x256xf32>
      %15 = arith.addf %12, %14 : vector<128x256xf32>
      %c0_14 = arith.constant 0 : index
      %c0_15 = arith.constant 0 : index
      %16 = vector.load %arg6[%c0_14, %c0_15] : memref<128x256xf32, #tpu.memory_space<vmem>>, vector<128x256xf32>
      %17 = arith.addf %15, %16 : vector<128x256xf32>
      %cst_16 = arith.constant 0.000000e+00 : f32
      %18 = vector.broadcast %cst_16 : f32 to vector<128x256xf32>
      %19 = arith.maximumf %17, %18 : vector<128x256xf32>
      %c0_17 = arith.constant 0 : index
      %c0_18 = arith.constant 0 : index
      %20 = vector.load %arg7[%c0_17, %c0_18] : memref<128x256xf32, #tpu.memory_space<vmem>>, vector<128x256xf32>
      tpu.vector_store %arg7[%c0_17, %c0_18], %19 {strides = array<i32>} : memref<128x256xf32, #tpu.memory_space<vmem>>, vector<128x256xf32>,
    } else {
    }
    return
  }
  func.func @transform_0(%arg0: i32, %arg1: i32, %arg2: i32) -> (i32, i32) {
    %c0_i32 = arith.constant 0 : i32
    return %arg0, %arg2 : i32, i32
  }
  func.func @transform_1(%arg0: i32, %arg1: i32, %arg2: i32) -> (i32, i32) {
    %c0_i32 = arith.constant 0 : i32
    return %arg2, %arg1 : i32, i32
  }
  func.func @transform_2(%arg0: i32, %arg1: i32, %arg2: i32) -> (i32, i32) {
    %c0_i32 = arith.constant 0 : i32
    %c0_i32_0 = arith.constant 0 : i32
    return %c0_i32, %arg1 : i32, i32
  }
  func.func @transform_3(%arg0: i32, %arg1: i32, %arg2: i32) -> (i32, i32) {
    %c0_i32 = arith.constant 0 : i32
    return %arg0, %arg1 : i32, i32
  }
  func.func @transform_4(%arg0: i32, %arg1: i32, %arg2: i32) -> (i32, i32) {
    %c0_i32 = arith.constant 0 : i32
    return %arg0, %arg1 : i32, i32
  }
}

module attributes {stable_mosaic.version = 11 : i64} {
  func.func @_conv_bn_kernel(%arg0: i32, %arg1: i32, %arg2: i32, %arg3: memref<128x256xbf16, #tpu.memory_space<vmem>>, %arg4: memref<256x128xbf16, #tpu.memory_space<vmem>>, %arg5: memref<1x128xf32, #tpu.memory_space<vmem>>, %arg6: memref<128x128xf32, #tpu.memory_space<vmem>>, %arg7: memref<128x128xf32, #tpu.memory_space<vmem>>) attributes {dimension_semantics = [#tpu.dimension_semantics<parallel>, #tpu.dimension_semantics<parallel>, #tpu.dimension_semantics<arbitrary>], iteration_bounds = array<i64: 1, 1, 1>, scalar_prefetch = 0 : i64, scratch_operands = 1 : i64, tpu.core_type = #tpu.core_type<tc>, window_params = [{transform_indices = @transform_0, window_bounds = array<i64: 128, 256>}, {transform_indices = @transform_1, window_bounds = array<i64: 256, 128>}, {transform_indices = @transform_2, window_bounds = array<i64: 1, 128>}, {transform_indices = @transform_3, window_bounds = array<i64: 128, 128>}]} {
    %c0_i32 = arith.constant 0 : i32
    %0 = arith.cmpi eq, %arg2, %c0_i32 : i32
    %1 = arith.extui %0 : i1 to i32
    %c0_i32_0 = arith.constant 0 : i32
    %2 = arith.cmpi ne, %1, %c0_i32_0 : i32
    scf.if %2 {
      %cst_10 = arith.constant 0.000000e+00 : f32
      %12 = vector.broadcast %cst_10 : f32 to vector<128x128xf32>
      %c0_11 = arith.constant 0 : index
      %c0_12 = arith.constant 0 : index
      %13 = vector.load %arg7[%c0_11, %c0_12] : memref<128x128xf32, #tpu.memory_space<vmem>>, vector<128x128xf32>
      tpu.vector_store %arg7[%c0_11, %c0_12], %12 {strides = array<i32>} : memref<128x128xf32, #tpu.memory_space<vmem>>, vector<128x128xf32>,
    } else {
    }
    %c0 = arith.constant 0 : index
    %c0_1 = arith.constant 0 : index
    %3 = vector.load %arg7[%c0, %c0_1] : memref<128x128xf32, #tpu.memory_space<vmem>>, vector<128x128xf32>
    %c0_2 = arith.constant 0 : index
    %c0_3 = arith.constant 0 : index
    %4 = vector.load %arg3[%c0_2, %c0_3] : memref<128x256xbf16, #tpu.memory_space<vmem>>, vector<128x256xbf16>
    %c0_4 = arith.constant 0 : index
    %c0_5 = arith.constant 0 : index
    %5 = vector.load %arg4[%c0_4, %c0_5] : memref<256x128xbf16, #tpu.memory_space<vmem>>, vector<256x128xbf16>
    %cst = arith.constant dense<0.000000e+00> : vector<128x128xf32>
    %6 = tpu.matmul %4, %5, %cst {dimension_numbers = #tpu.dot_dimension_numbers<[1], [0], [0], [1], [0, 0, 1, 1], [], []>} : vector<128x256xbf16>, vector<256x128xbf16>, vector<128x128xf32> -> vector<128x128xf32>
    %7 = arith.addf %3, %6 : vector<128x128xf32>
    %c0_6 = arith.constant 0 : index
    %c0_7 = arith.constant 0 : index
    %8 = vector.load %arg7[%c0_6, %c0_7] : memref<128x128xf32, #tpu.memory_space<vmem>>, vector<128x128xf32>
    tpu.vector_store %arg7[%c0_6, %c0_7], %7 {strides = array<i32>} : memref<128x128xf32, #tpu.memory_space<vmem>>, vector<128x128xf32>,
    %c0_i32_8 = arith.constant 0 : i32
    %9 = arith.cmpi eq, %arg2, %c0_i32_8 : i32
    %10 = arith.extui %9 : i1 to i32
    %c0_i32_9 = arith.constant 0 : i32
    %11 = arith.cmpi ne, %10, %c0_i32_9 : i32
    scf.if %11 {
      %c0_10 = arith.constant 0 : index
      %c0_11 = arith.constant 0 : index
      %12 = vector.load %arg7[%c0_10, %c0_11] : memref<128x128xf32, #tpu.memory_space<vmem>>, vector<128x128xf32>
      %c0_12 = arith.constant 0 : index
      %c0_13 = arith.constant 0 : index
      %13 = vector.load %arg5[%c0_12, %c0_13] : memref<1x128xf32, #tpu.memory_space<vmem>>, vector<1x128xf32>
      %14 = vector.broadcast %13 : vector<1x128xf32> to vector<128x128xf32>
      %15 = arith.addf %12, %14 : vector<128x128xf32>
      %cst_14 = arith.constant 0.000000e+00 : f32
      %16 = vector.broadcast %cst_14 : f32 to vector<128x128xf32>
      %17 = arith.maximumf %15, %16 : vector<128x128xf32>
      %c0_15 = arith.constant 0 : index
      %c0_16 = arith.constant 0 : index
      %18 = vector.load %arg6[%c0_15, %c0_16] : memref<128x128xf32, #tpu.memory_space<vmem>>, vector<128x128xf32>
      tpu.vector_store %arg6[%c0_15, %c0_16], %17 {strides = array<i32>} : memref<128x128xf32, #tpu.memory_space<vmem>>, vector<128x128xf32>,
    } else {
    }
    return
  }
  func.func @transform_0(%arg0: i32, %arg1: i32, %arg2: i32) -> (i32, i32) {
    %c0_i32 = arith.constant 0 : i32
    return %arg0, %arg2 : i32, i32
  }
  func.func @transform_1(%arg0: i32, %arg1: i32, %arg2: i32) -> (i32, i32) {
    %c0_i32 = arith.constant 0 : i32
    return %arg2, %arg1 : i32, i32
  }
  func.func @transform_2(%arg0: i32, %arg1: i32, %arg2: i32) -> (i32, i32) {
    %c0_i32 = arith.constant 0 : i32
    %c0_i32_0 = arith.constant 0 : i32
    return %c0_i32, %arg1 : i32, i32
  }
  func.func @transform_3(%arg0: i32, %arg1: i32, %arg2: i32) -> (i32, i32) {
    %c0_i32 = arith.constant 0 : i32
    return %arg0, %arg1 : i32, i32
  }
}

module attributes {stable_mosaic.version = 11 : i64} {
  func.func @_conv_bn_kernel(%arg0: i32, %arg1: i32, %arg2: i32, %arg3: memref<32x512xbf16, #tpu.memory_space<vmem>>, %arg4: memref<512x128xbf16, #tpu.memory_space<vmem>>, %arg5: memref<1x128xf32, #tpu.memory_space<vmem>>, %arg6: memref<32x128xf32, #tpu.memory_space<vmem>>, %arg7: memref<32x128xf32, #tpu.memory_space<vmem>>) attributes {dimension_semantics = [#tpu.dimension_semantics<parallel>, #tpu.dimension_semantics<parallel>, #tpu.dimension_semantics<arbitrary>], iteration_bounds = array<i64: 1, 1, 3>, scalar_prefetch = 0 : i64, scratch_operands = 1 : i64, tpu.core_type = #tpu.core_type<tc>, window_params = [{transform_indices = @transform_0, window_bounds = array<i64: 32, 512>}, {transform_indices = @transform_1, window_bounds = array<i64: 512, 128>}, {transform_indices = @transform_2, window_bounds = array<i64: 1, 128>}, {transform_indices = @transform_3, window_bounds = array<i64: 32, 128>}]} {
    %c0_i32 = arith.constant 0 : i32
    %0 = arith.cmpi eq, %arg2, %c0_i32 : i32
    %1 = arith.extui %0 : i1 to i32
    %c0_i32_0 = arith.constant 0 : i32
    %2 = arith.cmpi ne, %1, %c0_i32_0 : i32
    scf.if %2 {
      %cst_9 = arith.constant 0.000000e+00 : f32
      %12 = vector.broadcast %cst_9 : f32 to vector<32x128xf32>
      %c0_10 = arith.constant 0 : index
      %c0_11 = arith.constant 0 : index
      %13 = vector.load %arg7[%c0_10, %c0_11] : memref<32x128xf32, #tpu.memory_space<vmem>>, vector<32x128xf32>
      tpu.vector_store %arg7[%c0_10, %c0_11], %12 {strides = array<i32>} : memref<32x128xf32, #tpu.memory_space<vmem>>, vector<32x128xf32>,
    } else {
    }
    %c0 = arith.constant 0 : index
    %c0_1 = arith.constant 0 : index
    %3 = vector.load %arg7[%c0, %c0_1] : memref<32x128xf32, #tpu.memory_space<vmem>>, vector<32x128xf32>
    %c0_2 = arith.constant 0 : index
    %c0_3 = arith.constant 0 : index
    %4 = vector.load %arg3[%c0_2, %c0_3] : memref<32x512xbf16, #tpu.memory_space<vmem>>, vector<32x512xbf16>
    %c0_4 = arith.constant 0 : index
    %c0_5 = arith.constant 0 : index
    %5 = vector.load %arg4[%c0_4, %c0_5] : memref<512x128xbf16, #tpu.memory_space<vmem>>, vector<512x128xbf16>
    %cst = arith.constant dense<0.000000e+00> : vector<32x128xf32>
    %6 = tpu.matmul %4, %5, %cst {dimension_numbers = #tpu.dot_dimension_numbers<[1], [0], [0], [1], [0, 0, 1, 1], [], []>} : vector<32x512xbf16>, vector<512x128xbf16>, vector<32x128xf32> -> vector<32x128xf32>
    %7 = arith.addf %3, %6 : vector<32x128xf32>
    %c0_6 = arith.constant 0 : index
    %c0_7 = arith.constant 0 : index
    %8 = vector.load %arg7[%c0_6, %c0_7] : memref<32x128xf32, #tpu.memory_space<vmem>>, vector<32x128xf32>
    tpu.vector_store %arg7[%c0_6, %c0_7], %7 {strides = array<i32>} : memref<32x128xf32, #tpu.memory_space<vmem>>, vector<32x128xf32>,
    %c2_i32 = arith.constant 2 : i32
    %9 = arith.cmpi eq, %arg2, %c2_i32 : i32
    %10 = arith.extui %9 : i1 to i32
    %c0_i32_8 = arith.constant 0 : i32
    %11 = arith.cmpi ne, %10, %c0_i32_8 : i32
    scf.if %11 {
      %c0_9 = arith.constant 0 : index
      %c0_10 = arith.constant 0 : index
      %12 = vector.load %arg7[%c0_9, %c0_10] : memref<32x128xf32, #tpu.memory_space<vmem>>, vector<32x128xf32>
      %c0_11 = arith.constant 0 : index
      %c0_12 = arith.constant 0 : index
      %13 = vector.load %arg5[%c0_11, %c0_12] : memref<1x128xf32, #tpu.memory_space<vmem>>, vector<1x128xf32>
      %14 = vector.broadcast %13 : vector<1x128xf32> to vector<32x128xf32>
      %15 = arith.addf %12, %14 : vector<32x128xf32>
      %cst_13 = arith.constant 0.000000e+00 : f32
      %16 = vector.broadcast %cst_13 : f32 to vector<32x128xf32>
      %17 = arith.maximumf %15, %16 : vector<32x128xf32>
      %c0_14 = arith.constant 0 : index
      %c0_15 = arith.constant 0 : index
      %18 = vector.load %arg6[%c0_14, %c0_15] : memref<32x128xf32, #tpu.memory_space<vmem>>, vector<32x128xf32>
      tpu.vector_store %arg6[%c0_14, %c0_15], %17 {strides = array<i32>} : memref<32x128xf32, #tpu.memory_space<vmem>>, vector<32x128xf32>,
    } else {
    }
    return
  }
  func.func @transform_0(%arg0: i32, %arg1: i32, %arg2: i32) -> (i32, i32) {
    %c0_i32 = arith.constant 0 : i32
    return %arg0, %arg2 : i32, i32
  }
  func.func @transform_1(%arg0: i32, %arg1: i32, %arg2: i32) -> (i32, i32) {
    %c0_i32 = arith.constant 0 : i32
    return %arg2, %arg1 : i32, i32
  }
  func.func @transform_2(%arg0: i32, %arg1: i32, %arg2: i32) -> (i32, i32) {
    %c0_i32 = arith.constant 0 : i32
    %c0_i32_0 = arith.constant 0 : i32
    return %c0_i32, %arg1 : i32, i32
  }
  func.func @transform_3(%arg0: i32, %arg1: i32, %arg2: i32) -> (i32, i32) {
    %c0_i32 = arith.constant 0 : i32
    return %arg0, %arg1 : i32, i32
  }
}

module attributes {stable_mosaic.version = 11 : i64} {
  func.func @_conv_bn_kernel(%arg0: i32, %arg1: i32, %arg2: i32, %arg3: memref<32x256xbf16, #tpu.memory_space<vmem>>, %arg4: memref<256x256xbf16, #tpu.memory_space<vmem>>, %arg5: memref<1x256xf32, #tpu.memory_space<vmem>>, %arg6: memref<32x256xf32, #tpu.memory_space<vmem>>, %arg7: memref<32x256xf32, #tpu.memory_space<vmem>>) attributes {dimension_semantics = [#tpu.dimension_semantics<parallel>, #tpu.dimension_semantics<parallel>, #tpu.dimension_semantics<arbitrary>], iteration_bounds = array<i64: 1, 2, 1>, scalar_prefetch = 0 : i64, scratch_operands = 1 : i64, tpu.core_type = #tpu.core_type<tc>, window_params = [{transform_indices = @transform_0, window_bounds = array<i64: 32, 256>}, {transform_indices = @transform_1, window_bounds = array<i64: 256, 256>}, {transform_indices = @transform_2, window_bounds = array<i64: 1, 256>}, {transform_indices = @transform_3, window_bounds = array<i64: 32, 256>}]} {
    %c0_i32 = arith.constant 0 : i32
    %0 = arith.cmpi eq, %arg2, %c0_i32 : i32
    %1 = arith.extui %0 : i1 to i32
    %c0_i32_0 = arith.constant 0 : i32
    %2 = arith.cmpi ne, %1, %c0_i32_0 : i32
    scf.if %2 {
      %cst_10 = arith.constant 0.000000e+00 : f32
      %12 = vector.broadcast %cst_10 : f32 to vector<32x256xf32>
      %c0_11 = arith.constant 0 : index
      %c0_12 = arith.constant 0 : index
      %13 = vector.load %arg7[%c0_11, %c0_12] : memref<32x256xf32, #tpu.memory_space<vmem>>, vector<32x256xf32>
      tpu.vector_store %arg7[%c0_11, %c0_12], %12 {strides = array<i32>} : memref<32x256xf32, #tpu.memory_space<vmem>>, vector<32x256xf32>,
    } else {
    }
    %c0 = arith.constant 0 : index
    %c0_1 = arith.constant 0 : index
    %3 = vector.load %arg7[%c0, %c0_1] : memref<32x256xf32, #tpu.memory_space<vmem>>, vector<32x256xf32>
    %c0_2 = arith.constant 0 : index
    %c0_3 = arith.constant 0 : index
    %4 = vector.load %arg3[%c0_2, %c0_3] : memref<32x256xbf16, #tpu.memory_space<vmem>>, vector<32x256xbf16>
    %c0_4 = arith.constant 0 : index
    %c0_5 = arith.constant 0 : index
    %5 = vector.load %arg4[%c0_4, %c0_5] : memref<256x256xbf16, #tpu.memory_space<vmem>>, vector<256x256xbf16>
    %cst = arith.constant dense<0.000000e+00> : vector<32x256xf32>
    %6 = tpu.matmul %4, %5, %cst {dimension_numbers = #tpu.dot_dimension_numbers<[1], [0], [0], [1], [0, 0, 1, 1], [], []>} : vector<32x256xbf16>, vector<256x256xbf16>, vector<32x256xf32> -> vector<32x256xf32>
    %7 = arith.addf %3, %6 : vector<32x256xf32>
    %c0_6 = arith.constant 0 : index
    %c0_7 = arith.constant 0 : index
    %8 = vector.load %arg7[%c0_6, %c0_7] : memref<32x256xf32, #tpu.memory_space<vmem>>, vector<32x256xf32>
    tpu.vector_store %arg7[%c0_6, %c0_7], %7 {strides = array<i32>} : memref<32x256xf32, #tpu.memory_space<vmem>>, vector<32x256xf32>,
    %c0_i32_8 = arith.constant 0 : i32
    %9 = arith.cmpi eq, %arg2, %c0_i32_8 : i32
    %10 = arith.extui %9 : i1 to i32
    %c0_i32_9 = arith.constant 0 : i32
    %11 = arith.cmpi ne, %10, %c0_i32_9 : i32
    scf.if %11 {
      %c0_10 = arith.constant 0 : index
      %c0_11 = arith.constant 0 : index
      %12 = vector.load %arg7[%c0_10, %c0_11] : memref<32x256xf32, #tpu.memory_space<vmem>>, vector<32x256xf32>
      %c0_12 = arith.constant 0 : index
      %c0_13 = arith.constant 0 : index
      %13 = vector.load %arg5[%c0_12, %c0_13] : memref<1x256xf32, #tpu.memory_space<vmem>>, vector<1x256xf32>
      %14 = vector.broadcast %13 : vector<1x256xf32> to vector<32x256xf32>
      %15 = arith.addf %12, %14 : vector<32x256xf32>
      %c0_14 = arith.constant 0 : index
      %c0_15 = arith.constant 0 : index
      %16 = vector.load %arg6[%c0_14, %c0_15] : memref<32x256xf32, #tpu.memory_space<vmem>>, vector<32x256xf32>
      tpu.vector_store %arg6[%c0_14, %c0_15], %15 {strides = array<i32>} : memref<32x256xf32, #tpu.memory_space<vmem>>, vector<32x256xf32>,
    } else {
    }
    return
  }
  func.func @transform_0(%arg0: i32, %arg1: i32, %arg2: i32) -> (i32, i32) {
    %c0_i32 = arith.constant 0 : i32
    return %arg0, %arg2 : i32, i32
  }
  func.func @transform_1(%arg0: i32, %arg1: i32, %arg2: i32) -> (i32, i32) {
    %c0_i32 = arith.constant 0 : i32
    return %arg2, %arg1 : i32, i32
  }
  func.func @transform_2(%arg0: i32, %arg1: i32, %arg2: i32) -> (i32, i32) {
    %c0_i32 = arith.constant 0 : i32
    %c0_i32_0 = arith.constant 0 : i32
    return %c0_i32, %arg1 : i32, i32
  }
  func.func @transform_3(%arg0: i32, %arg1: i32, %arg2: i32) -> (i32, i32) {
    %c0_i32 = arith.constant 0 : i32
    return %arg0, %arg1 : i32, i32
  }
}

module attributes {stable_mosaic.version = 11 : i64} {
  func.func @_conv_bn_kernel(%arg0: i32, %arg1: i32, %arg2: i32, %arg3: memref<32x128xbf16, #tpu.memory_space<vmem>>, %arg4: memref<128x256xbf16, #tpu.memory_space<vmem>>, %arg5: memref<1x256xf32, #tpu.memory_space<vmem>>, %arg6: memref<32x256xf32, #tpu.memory_space<vmem>>, %arg7: memref<32x256xf32, #tpu.memory_space<vmem>>, %arg8: memref<32x256xf32, #tpu.memory_space<vmem>>) attributes {dimension_semantics = [#tpu.dimension_semantics<parallel>, #tpu.dimension_semantics<parallel>, #tpu.dimension_semantics<arbitrary>], iteration_bounds = array<i64: 1, 2, 1>, scalar_prefetch = 0 : i64, scratch_operands = 1 : i64, tpu.core_type = #tpu.core_type<tc>, window_params = [{transform_indices = @transform_0, window_bounds = array<i64: 32, 128>}, {transform_indices = @transform_1, window_bounds = array<i64: 128, 256>}, {transform_indices = @transform_2, window_bounds = array<i64: 1, 256>}, {transform_indices = @transform_3, window_bounds = array<i64: 32, 256>}, {transform_indices = @transform_4, window_bounds = array<i64: 32, 256>}]} {
    %c0_i32 = arith.constant 0 : i32
    %0 = arith.cmpi eq, %arg2, %c0_i32 : i32
    %1 = arith.extui %0 : i1 to i32
    %c0_i32_0 = arith.constant 0 : i32
    %2 = arith.cmpi ne, %1, %c0_i32_0 : i32
    scf.if %2 {
      %cst_10 = arith.constant 0.000000e+00 : f32
      %12 = vector.broadcast %cst_10 : f32 to vector<32x256xf32>
      %c0_11 = arith.constant 0 : index
      %c0_12 = arith.constant 0 : index
      %13 = vector.load %arg8[%c0_11, %c0_12] : memref<32x256xf32, #tpu.memory_space<vmem>>, vector<32x256xf32>
      tpu.vector_store %arg8[%c0_11, %c0_12], %12 {strides = array<i32>} : memref<32x256xf32, #tpu.memory_space<vmem>>, vector<32x256xf32>,
    } else {
    }
    %c0 = arith.constant 0 : index
    %c0_1 = arith.constant 0 : index
    %3 = vector.load %arg8[%c0, %c0_1] : memref<32x256xf32, #tpu.memory_space<vmem>>, vector<32x256xf32>
    %c0_2 = arith.constant 0 : index
    %c0_3 = arith.constant 0 : index
    %4 = vector.load %arg3[%c0_2, %c0_3] : memref<32x128xbf16, #tpu.memory_space<vmem>>, vector<32x128xbf16>
    %c0_4 = arith.constant 0 : index
    %c0_5 = arith.constant 0 : index
    %5 = vector.load %arg4[%c0_4, %c0_5] : memref<128x256xbf16, #tpu.memory_space<vmem>>, vector<128x256xbf16>
    %cst = arith.constant dense<0.000000e+00> : vector<32x256xf32>
    %6 = tpu.matmul %4, %5, %cst {dimension_numbers = #tpu.dot_dimension_numbers<[1], [0], [0], [1], [0, 0, 1, 1], [], []>} : vector<32x128xbf16>, vector<128x256xbf16>, vector<32x256xf32> -> vector<32x256xf32>
    %7 = arith.addf %3, %6 : vector<32x256xf32>
    %c0_6 = arith.constant 0 : index
    %c0_7 = arith.constant 0 : index
    %8 = vector.load %arg8[%c0_6, %c0_7] : memref<32x256xf32, #tpu.memory_space<vmem>>, vector<32x256xf32>
    tpu.vector_store %arg8[%c0_6, %c0_7], %7 {strides = array<i32>} : memref<32x256xf32, #tpu.memory_space<vmem>>, vector<32x256xf32>,
    %c0_i32_8 = arith.constant 0 : i32
    %9 = arith.cmpi eq, %arg2, %c0_i32_8 : i32
    %10 = arith.extui %9 : i1 to i32
    %c0_i32_9 = arith.constant 0 : i32
    %11 = arith.cmpi ne, %10, %c0_i32_9 : i32
    scf.if %11 {
      %c0_10 = arith.constant 0 : index
      %c0_11 = arith.constant 0 : index
      %12 = vector.load %arg8[%c0_10, %c0_11] : memref<32x256xf32, #tpu.memory_space<vmem>>, vector<32x256xf32>
      %c0_12 = arith.constant 0 : index
      %c0_13 = arith.constant 0 : index
      %13 = vector.load %arg5[%c0_12, %c0_13] : memref<1x256xf32, #tpu.memory_space<vmem>>, vector<1x256xf32>
      %14 = vector.broadcast %13 : vector<1x256xf32> to vector<32x256xf32>
      %15 = arith.addf %12, %14 : vector<32x256xf32>
      %c0_14 = arith.constant 0 : index
      %c0_15 = arith.constant 0 : index
      %16 = vector.load %arg6[%c0_14, %c0_15] : memref<32x256xf32, #tpu.memory_space<vmem>>, vector<32x256xf32>
      %17 = arith.addf %15, %16 : vector<32x256xf32>
      %cst_16 = arith.constant 0.000000e+00 : f32
      %18 = vector.broadcast %cst_16 : f32 to vector<32x256xf32>
      %19 = arith.maximumf %17, %18 : vector<32x256xf32>
      %c0_17 = arith.constant 0 : index
      %c0_18 = arith.constant 0 : index
      %20 = vector.load %arg7[%c0_17, %c0_18] : memref<32x256xf32, #tpu.memory_space<vmem>>, vector<32x256xf32>
      tpu.vector_store %arg7[%c0_17, %c0_18], %19 {strides = array<i32>} : memref<32x256xf32, #tpu.memory_space<vmem>>, vector<32x256xf32>,
    } else {
    }
    return
  }
  func.func @transform_0(%arg0: i32, %arg1: i32, %arg2: i32) -> (i32, i32) {
    %c0_i32 = arith.constant 0 : i32
    return %arg0, %arg2 : i32, i32
  }
  func.func @transform_1(%arg0: i32, %arg1: i32, %arg2: i32) -> (i32, i32) {
    %c0_i32 = arith.constant 0 : i32
    return %arg2, %arg1 : i32, i32
  }
  func.func @transform_2(%arg0: i32, %arg1: i32, %arg2: i32) -> (i32, i32) {
    %c0_i32 = arith.constant 0 : i32
    %c0_i32_0 = arith.constant 0 : i32
    return %c0_i32, %arg1 : i32, i32
  }
  func.func @transform_3(%arg0: i32, %arg1: i32, %arg2: i32) -> (i32, i32) {
    %c0_i32 = arith.constant 0 : i32
    return %arg0, %arg1 : i32, i32
  }
  func.func @transform_4(%arg0: i32, %arg1: i32, %arg2: i32) -> (i32, i32) {
    %c0_i32 = arith.constant 0 : i32
    return %arg0, %arg1 : i32, i32
  }
}

module attributes {stable_mosaic.version = 11 : i64} {
  func.func @_conv_bn_kernel(%arg0: i32, %arg1: i32, %arg2: i32, %arg3: memref<32x512xbf16, #tpu.memory_space<vmem>>, %arg4: memref<512x128xbf16, #tpu.memory_space<vmem>>, %arg5: memref<1x128xf32, #tpu.memory_space<vmem>>, %arg6: memref<32x128xf32, #tpu.memory_space<vmem>>, %arg7: memref<32x128xf32, #tpu.memory_space<vmem>>) attributes {dimension_semantics = [#tpu.dimension_semantics<parallel>, #tpu.dimension_semantics<parallel>, #tpu.dimension_semantics<arbitrary>], iteration_bounds = array<i64: 1, 1, 1>, scalar_prefetch = 0 : i64, scratch_operands = 1 : i64, tpu.core_type = #tpu.core_type<tc>, window_params = [{transform_indices = @transform_0, window_bounds = array<i64: 32, 512>}, {transform_indices = @transform_1, window_bounds = array<i64: 512, 128>}, {transform_indices = @transform_2, window_bounds = array<i64: 1, 128>}, {transform_indices = @transform_3, window_bounds = array<i64: 32, 128>}]} {
    %c0_i32 = arith.constant 0 : i32
    %0 = arith.cmpi eq, %arg2, %c0_i32 : i32
    %1 = arith.extui %0 : i1 to i32
    %c0_i32_0 = arith.constant 0 : i32
    %2 = arith.cmpi ne, %1, %c0_i32_0 : i32
    scf.if %2 {
      %cst_10 = arith.constant 0.000000e+00 : f32
      %12 = vector.broadcast %cst_10 : f32 to vector<32x128xf32>
      %c0_11 = arith.constant 0 : index
      %c0_12 = arith.constant 0 : index
      %13 = vector.load %arg7[%c0_11, %c0_12] : memref<32x128xf32, #tpu.memory_space<vmem>>, vector<32x128xf32>
      tpu.vector_store %arg7[%c0_11, %c0_12], %12 {strides = array<i32>} : memref<32x128xf32, #tpu.memory_space<vmem>>, vector<32x128xf32>,
    } else {
    }
    %c0 = arith.constant 0 : index
    %c0_1 = arith.constant 0 : index
    %3 = vector.load %arg7[%c0, %c0_1] : memref<32x128xf32, #tpu.memory_space<vmem>>, vector<32x128xf32>
    %c0_2 = arith.constant 0 : index
    %c0_3 = arith.constant 0 : index
    %4 = vector.load %arg3[%c0_2, %c0_3] : memref<32x512xbf16, #tpu.memory_space<vmem>>, vector<32x512xbf16>
    %c0_4 = arith.constant 0 : index
    %c0_5 = arith.constant 0 : index
    %5 = vector.load %arg4[%c0_4, %c0_5] : memref<512x128xbf16, #tpu.memory_space<vmem>>, vector<512x128xbf16>
    %cst = arith.constant dense<0.000000e+00> : vector<32x128xf32>
    %6 = tpu.matmul %4, %5, %cst {dimension_numbers = #tpu.dot_dimension_numbers<[1], [0], [0], [1], [0, 0, 1, 1], [], []>} : vector<32x512xbf16>, vector<512x128xbf16>, vector<32x128xf32> -> vector<32x128xf32>
    %7 = arith.addf %3, %6 : vector<32x128xf32>
    %c0_6 = arith.constant 0 : index
    %c0_7 = arith.constant 0 : index
    %8 = vector.load %arg7[%c0_6, %c0_7] : memref<32x128xf32, #tpu.memory_space<vmem>>, vector<32x128xf32>
    tpu.vector_store %arg7[%c0_6, %c0_7], %7 {strides = array<i32>} : memref<32x128xf32, #tpu.memory_space<vmem>>, vector<32x128xf32>,
    %c0_i32_8 = arith.constant 0 : i32
    %9 = arith.cmpi eq, %arg2, %c0_i32_8 : i32
    %10 = arith.extui %9 : i1 to i32
    %c0_i32_9 = arith.constant 0 : i32
    %11 = arith.cmpi ne, %10, %c0_i32_9 : i32
    scf.if %11 {
      %c0_10 = arith.constant 0 : index
      %c0_11 = arith.constant 0 : index
      %12 = vector.load %arg7[%c0_10, %c0_11] : memref<32x128xf32, #tpu.memory_space<vmem>>, vector<32x128xf32>
      %c0_12 = arith.constant 0 : index
      %c0_13 = arith.constant 0 : index
      %13 = vector.load %arg5[%c0_12, %c0_13] : memref<1x128xf32, #tpu.memory_space<vmem>>, vector<1x128xf32>
      %14 = vector.broadcast %13 : vector<1x128xf32> to vector<32x128xf32>
      %15 = arith.addf %12, %14 : vector<32x128xf32>
      %cst_14 = arith.constant 0.000000e+00 : f32
      %16 = vector.broadcast %cst_14 : f32 to vector<32x128xf32>
      %17 = arith.maximumf %15, %16 : vector<32x128xf32>
      %c0_15 = arith.constant 0 : index
      %c0_16 = arith.constant 0 : index
      %18 = vector.load %arg6[%c0_15, %c0_16] : memref<32x128xf32, #tpu.memory_space<vmem>>, vector<32x128xf32>
      tpu.vector_store %arg6[%c0_15, %c0_16], %17 {strides = array<i32>} : memref<32x128xf32, #tpu.memory_space<vmem>>, vector<32x128xf32>,
    } else {
    }
    return
  }
  func.func @transform_0(%arg0: i32, %arg1: i32, %arg2: i32) -> (i32, i32) {
    %c0_i32 = arith.constant 0 : i32
    return %arg0, %arg2 : i32, i32
  }
  func.func @transform_1(%arg0: i32, %arg1: i32, %arg2: i32) -> (i32, i32) {
    %c0_i32 = arith.constant 0 : i32
    return %arg2, %arg1 : i32, i32
  }
  func.func @transform_2(%arg0: i32, %arg1: i32, %arg2: i32) -> (i32, i32) {
    %c0_i32 = arith.constant 0 : i32
    %c0_i32_0 = arith.constant 0 : i32
    return %c0_i32, %arg1 : i32, i32
  }
  func.func @transform_3(%arg0: i32, %arg1: i32, %arg2: i32) -> (i32, i32) {
    %c0_i32 = arith.constant 0 : i32
    return %arg0, %arg1 : i32, i32
  }
}

module attributes {stable_mosaic.version = 11 : i64} {
  func.func @_conv_bn_kernel(%arg0: i32, %arg1: i32, %arg2: i32, %arg3: memref<32x512xbf16, #tpu.memory_space<vmem>>, %arg4: memref<512x256xbf16, #tpu.memory_space<vmem>>, %arg5: memref<1x256xf32, #tpu.memory_space<vmem>>, %arg6: memref<32x256xf32, #tpu.memory_space<vmem>>, %arg7: memref<32x256xf32, #tpu.memory_space<vmem>>) attributes {dimension_semantics = [#tpu.dimension_semantics<parallel>, #tpu.dimension_semantics<parallel>, #tpu.dimension_semantics<arbitrary>], iteration_bounds = array<i64: 1, 1, 1>, scalar_prefetch = 0 : i64, scratch_operands = 1 : i64, tpu.core_type = #tpu.core_type<tc>, window_params = [{transform_indices = @transform_0, window_bounds = array<i64: 32, 512>}, {transform_indices = @transform_1, window_bounds = array<i64: 512, 256>}, {transform_indices = @transform_2, window_bounds = array<i64: 1, 256>}, {transform_indices = @transform_3, window_bounds = array<i64: 32, 256>}]} {
    %c0_i32 = arith.constant 0 : i32
    %0 = arith.cmpi eq, %arg2, %c0_i32 : i32
    %1 = arith.extui %0 : i1 to i32
    %c0_i32_0 = arith.constant 0 : i32
    %2 = arith.cmpi ne, %1, %c0_i32_0 : i32
    scf.if %2 {
      %cst_10 = arith.constant 0.000000e+00 : f32
      %12 = vector.broadcast %cst_10 : f32 to vector<32x256xf32>
      %c0_11 = arith.constant 0 : index
      %c0_12 = arith.constant 0 : index
      %13 = vector.load %arg7[%c0_11, %c0_12] : memref<32x256xf32, #tpu.memory_space<vmem>>, vector<32x256xf32>
      tpu.vector_store %arg7[%c0_11, %c0_12], %12 {strides = array<i32>} : memref<32x256xf32, #tpu.memory_space<vmem>>, vector<32x256xf32>,
    } else {
    }
    %c0 = arith.constant 0 : index
    %c0_1 = arith.constant 0 : index
    %3 = vector.load %arg7[%c0, %c0_1] : memref<32x256xf32, #tpu.memory_space<vmem>>, vector<32x256xf32>
    %c0_2 = arith.constant 0 : index
    %c0_3 = arith.constant 0 : index
    %4 = vector.load %arg3[%c0_2, %c0_3] : memref<32x512xbf16, #tpu.memory_space<vmem>>, vector<32x512xbf16>
    %c0_4 = arith.constant 0 : index
    %c0_5 = arith.constant 0 : index
    %5 = vector.load %arg4[%c0_4, %c0_5] : memref<512x256xbf16, #tpu.memory_space<vmem>>, vector<512x256xbf16>
    %cst = arith.constant dense<0.000000e+00> : vector<32x256xf32>
    %6 = tpu.matmul %4, %5, %cst {dimension_numbers = #tpu.dot_dimension_numbers<[1], [0], [0], [1], [0, 0, 1, 1], [], []>} : vector<32x512xbf16>, vector<512x256xbf16>, vector<32x256xf32> -> vector<32x256xf32>
    %7 = arith.addf %3, %6 : vector<32x256xf32>
    %c0_6 = arith.constant 0 : index
    %c0_7 = arith.constant 0 : index
    %8 = vector.load %arg7[%c0_6, %c0_7] : memref<32x256xf32, #tpu.memory_space<vmem>>, vector<32x256xf32>
    tpu.vector_store %arg7[%c0_6, %c0_7], %7 {strides = array<i32>} : memref<32x256xf32, #tpu.memory_space<vmem>>, vector<32x256xf32>,
    %c0_i32_8 = arith.constant 0 : i32
    %9 = arith.cmpi eq, %arg2, %c0_i32_8 : i32
    %10 = arith.extui %9 : i1 to i32
    %c0_i32_9 = arith.constant 0 : i32
    %11 = arith.cmpi ne, %10, %c0_i32_9 : i32
    scf.if %11 {
      %c0_10 = arith.constant 0 : index
      %c0_11 = arith.constant 0 : index
      %12 = vector.load %arg7[%c0_10, %c0_11] : memref<32x256xf32, #tpu.memory_space<vmem>>, vector<32x256xf32>
      %c0_12 = arith.constant 0 : index
      %c0_13 = arith.constant 0 : index
      %13 = vector.load %arg5[%c0_12, %c0_13] : memref<1x256xf32, #tpu.memory_space<vmem>>, vector<1x256xf32>
      %14 = vector.broadcast %13 : vector<1x256xf32> to vector<32x256xf32>
      %15 = arith.addf %12, %14 : vector<32x256xf32>
      %cst_14 = arith.constant 0.000000e+00 : f32
      %16 = vector.broadcast %cst_14 : f32 to vector<32x256xf32>
      %17 = arith.maximumf %15, %16 : vector<32x256xf32>
      %c0_15 = arith.constant 0 : index
      %c0_16 = arith.constant 0 : index
      %18 = vector.load %arg6[%c0_15, %c0_16] : memref<32x256xf32, #tpu.memory_space<vmem>>, vector<32x256xf32>
      tpu.vector_store %arg6[%c0_15, %c0_16], %17 {strides = array<i32>} : memref<32x256xf32, #tpu.memory_space<vmem>>, vector<32x256xf32>,
    } else {
    }
    return
  }
  func.func @transform_0(%arg0: i32, %arg1: i32, %arg2: i32) -> (i32, i32) {
    %c0_i32 = arith.constant 0 : i32
    return %arg0, %arg2 : i32, i32
  }
  func.func @transform_1(%arg0: i32, %arg1: i32, %arg2: i32) -> (i32, i32) {
    %c0_i32 = arith.constant 0 : i32
    return %arg2, %arg1 : i32, i32
  }
  func.func @transform_2(%arg0: i32, %arg1: i32, %arg2: i32) -> (i32, i32) {
    %c0_i32 = arith.constant 0 : i32
    %c0_i32_0 = arith.constant 0 : i32
    return %c0_i32, %arg1 : i32, i32
  }
  func.func @transform_3(%arg0: i32, %arg1: i32, %arg2: i32) -> (i32, i32) {
    %c0_i32 = arith.constant 0 : i32
    return %arg0, %arg1 : i32, i32
  }
}

module attributes {stable_mosaic.version = 11 : i64} {
  func.func @_conv_bn_kernel(%arg0: i32, %arg1: i32, %arg2: i32, %arg3: memref<16x512xbf16, #tpu.memory_space<vmem>>, %arg4: memref<512x256xbf16, #tpu.memory_space<vmem>>, %arg5: memref<1x256xf32, #tpu.memory_space<vmem>>, %arg6: memref<16x256xf32, #tpu.memory_space<vmem>>, %arg7: memref<16x256xf32, #tpu.memory_space<vmem>>) attributes {dimension_semantics = [#tpu.dimension_semantics<parallel>, #tpu.dimension_semantics<parallel>, #tpu.dimension_semantics<arbitrary>], iteration_bounds = array<i64: 1, 1, 5>, scalar_prefetch = 0 : i64, scratch_operands = 1 : i64, tpu.core_type = #tpu.core_type<tc>, window_params = [{transform_indices = @transform_0, window_bounds = array<i64: 16, 512>}, {transform_indices = @transform_1, window_bounds = array<i64: 512, 256>}, {transform_indices = @transform_2, window_bounds = array<i64: 1, 256>}, {transform_indices = @transform_3, window_bounds = array<i64: 16, 256>}]} {
    %c0_i32 = arith.constant 0 : i32
    %0 = arith.cmpi eq, %arg2, %c0_i32 : i32
    %1 = arith.extui %0 : i1 to i32
    %c0_i32_0 = arith.constant 0 : i32
    %2 = arith.cmpi ne, %1, %c0_i32_0 : i32
    scf.if %2 {
      %cst_9 = arith.constant 0.000000e+00 : f32
      %12 = vector.broadcast %cst_9 : f32 to vector<16x256xf32>
      %c0_10 = arith.constant 0 : index
      %c0_11 = arith.constant 0 : index
      %13 = vector.load %arg7[%c0_10, %c0_11] : memref<16x256xf32, #tpu.memory_space<vmem>>, vector<16x256xf32>
      tpu.vector_store %arg7[%c0_10, %c0_11], %12 {strides = array<i32>} : memref<16x256xf32, #tpu.memory_space<vmem>>, vector<16x256xf32>,
    } else {
    }
    %c0 = arith.constant 0 : index
    %c0_1 = arith.constant 0 : index
    %3 = vector.load %arg7[%c0, %c0_1] : memref<16x256xf32, #tpu.memory_space<vmem>>, vector<16x256xf32>
    %c0_2 = arith.constant 0 : index
    %c0_3 = arith.constant 0 : index
    %4 = vector.load %arg3[%c0_2, %c0_3] : memref<16x512xbf16, #tpu.memory_space<vmem>>, vector<16x512xbf16>
    %c0_4 = arith.constant 0 : index
    %c0_5 = arith.constant 0 : index
    %5 = vector.load %arg4[%c0_4, %c0_5] : memref<512x256xbf16, #tpu.memory_space<vmem>>, vector<512x256xbf16>
    %cst = arith.constant dense<0.000000e+00> : vector<16x256xf32>
    %6 = tpu.matmul %4, %5, %cst {dimension_numbers = #tpu.dot_dimension_numbers<[1], [0], [0], [1], [0, 0, 1, 1], [], []>} : vector<16x512xbf16>, vector<512x256xbf16>, vector<16x256xf32> -> vector<16x256xf32>
    %7 = arith.addf %3, %6 : vector<16x256xf32>
    %c0_6 = arith.constant 0 : index
    %c0_7 = arith.constant 0 : index
    %8 = vector.load %arg7[%c0_6, %c0_7] : memref<16x256xf32, #tpu.memory_space<vmem>>, vector<16x256xf32>
    tpu.vector_store %arg7[%c0_6, %c0_7], %7 {strides = array<i32>} : memref<16x256xf32, #tpu.memory_space<vmem>>, vector<16x256xf32>,
    %c4_i32 = arith.constant 4 : i32
    %9 = arith.cmpi eq, %arg2, %c4_i32 : i32
    %10 = arith.extui %9 : i1 to i32
    %c0_i32_8 = arith.constant 0 : i32
    %11 = arith.cmpi ne, %10, %c0_i32_8 : i32
    scf.if %11 {
      %c0_9 = arith.constant 0 : index
      %c0_10 = arith.constant 0 : index
      %12 = vector.load %arg7[%c0_9, %c0_10] : memref<16x256xf32, #tpu.memory_space<vmem>>, vector<16x256xf32>
      %c0_11 = arith.constant 0 : index
      %c0_12 = arith.constant 0 : index
      %13 = vector.load %arg5[%c0_11, %c0_12] : memref<1x256xf32, #tpu.memory_space<vmem>>, vector<1x256xf32>
      %14 = vector.broadcast %13 : vector<1x256xf32> to vector<16x256xf32>
      %15 = arith.addf %12, %14 : vector<16x256xf32>
      %cst_13 = arith.constant 0.000000e+00 : f32
      %16 = vector.broadcast %cst_13 : f32 to vector<16x256xf32>
      %17 = arith.maximumf %15, %16 : vector<16x256xf32>
      %c0_14 = arith.constant 0 : index
      %c0_15 = arith.constant 0 : index
      %18 = vector.load %arg6[%c0_14, %c0_15] : memref<16x256xf32, #tpu.memory_space<vmem>>, vector<16x256xf32>
      tpu.vector_store %arg6[%c0_14, %c0_15], %17 {strides = array<i32>} : memref<16x256xf32, #tpu.memory_space<vmem>>, vector<16x256xf32>,
    } else {
    }
    return
  }
  func.func @transform_0(%arg0: i32, %arg1: i32, %arg2: i32) -> (i32, i32) {
    %c0_i32 = arith.constant 0 : i32
    return %arg0, %arg2 : i32, i32
  }
  func.func @transform_1(%arg0: i32, %arg1: i32, %arg2: i32) -> (i32, i32) {
    %c0_i32 = arith.constant 0 : i32
    return %arg2, %arg1 : i32, i32
  }
  func.func @transform_2(%arg0: i32, %arg1: i32, %arg2: i32) -> (i32, i32) {
    %c0_i32 = arith.constant 0 : i32
    %c0_i32_0 = arith.constant 0 : i32
    return %c0_i32, %arg1 : i32, i32
  }
  func.func @transform_3(%arg0: i32, %arg1: i32, %arg2: i32) -> (i32, i32) {
    %c0_i32 = arith.constant 0 : i32
    return %arg0, %arg1 : i32, i32
  }
}

module attributes {stable_mosaic.version = 11 : i64} {
  func.func @_conv_bn_kernel(%arg0: i32, %arg1: i32, %arg2: i32, %arg3: memref<16x512xbf16, #tpu.memory_space<vmem>>, %arg4: memref<512x256xbf16, #tpu.memory_space<vmem>>, %arg5: memref<1x256xf32, #tpu.memory_space<vmem>>, %arg6: memref<16x256xf32, #tpu.memory_space<vmem>>, %arg7: memref<16x256xf32, #tpu.memory_space<vmem>>) attributes {dimension_semantics = [#tpu.dimension_semantics<parallel>, #tpu.dimension_semantics<parallel>, #tpu.dimension_semantics<arbitrary>], iteration_bounds = array<i64: 1, 4, 1>, scalar_prefetch = 0 : i64, scratch_operands = 1 : i64, tpu.core_type = #tpu.core_type<tc>, window_params = [{transform_indices = @transform_0, window_bounds = array<i64: 16, 512>}, {transform_indices = @transform_1, window_bounds = array<i64: 512, 256>}, {transform_indices = @transform_2, window_bounds = array<i64: 1, 256>}, {transform_indices = @transform_3, window_bounds = array<i64: 16, 256>}]} {
    %c0_i32 = arith.constant 0 : i32
    %0 = arith.cmpi eq, %arg2, %c0_i32 : i32
    %1 = arith.extui %0 : i1 to i32
    %c0_i32_0 = arith.constant 0 : i32
    %2 = arith.cmpi ne, %1, %c0_i32_0 : i32
    scf.if %2 {
      %cst_10 = arith.constant 0.000000e+00 : f32
      %12 = vector.broadcast %cst_10 : f32 to vector<16x256xf32>
      %c0_11 = arith.constant 0 : index
      %c0_12 = arith.constant 0 : index
      %13 = vector.load %arg7[%c0_11, %c0_12] : memref<16x256xf32, #tpu.memory_space<vmem>>, vector<16x256xf32>
      tpu.vector_store %arg7[%c0_11, %c0_12], %12 {strides = array<i32>} : memref<16x256xf32, #tpu.memory_space<vmem>>, vector<16x256xf32>,
    } else {
    }
    %c0 = arith.constant 0 : index
    %c0_1 = arith.constant 0 : index
    %3 = vector.load %arg7[%c0, %c0_1] : memref<16x256xf32, #tpu.memory_space<vmem>>, vector<16x256xf32>
    %c0_2 = arith.constant 0 : index
    %c0_3 = arith.constant 0 : index
    %4 = vector.load %arg3[%c0_2, %c0_3] : memref<16x512xbf16, #tpu.memory_space<vmem>>, vector<16x512xbf16>
    %c0_4 = arith.constant 0 : index
    %c0_5 = arith.constant 0 : index
    %5 = vector.load %arg4[%c0_4, %c0_5] : memref<512x256xbf16, #tpu.memory_space<vmem>>, vector<512x256xbf16>
    %cst = arith.constant dense<0.000000e+00> : vector<16x256xf32>
    %6 = tpu.matmul %4, %5, %cst {dimension_numbers = #tpu.dot_dimension_numbers<[1], [0], [0], [1], [0, 0, 1, 1], [], []>} : vector<16x512xbf16>, vector<512x256xbf16>, vector<16x256xf32> -> vector<16x256xf32>
    %7 = arith.addf %3, %6 : vector<16x256xf32>
    %c0_6 = arith.constant 0 : index
    %c0_7 = arith.constant 0 : index
    %8 = vector.load %arg7[%c0_6, %c0_7] : memref<16x256xf32, #tpu.memory_space<vmem>>, vector<16x256xf32>
    tpu.vector_store %arg7[%c0_6, %c0_7], %7 {strides = array<i32>} : memref<16x256xf32, #tpu.memory_space<vmem>>, vector<16x256xf32>,
    %c0_i32_8 = arith.constant 0 : i32
    %9 = arith.cmpi eq, %arg2, %c0_i32_8 : i32
    %10 = arith.extui %9 : i1 to i32
    %c0_i32_9 = arith.constant 0 : i32
    %11 = arith.cmpi ne, %10, %c0_i32_9 : i32
    scf.if %11 {
      %c0_10 = arith.constant 0 : index
      %c0_11 = arith.constant 0 : index
      %12 = vector.load %arg7[%c0_10, %c0_11] : memref<16x256xf32, #tpu.memory_space<vmem>>, vector<16x256xf32>
      %c0_12 = arith.constant 0 : index
      %c0_13 = arith.constant 0 : index
      %13 = vector.load %arg5[%c0_12, %c0_13] : memref<1x256xf32, #tpu.memory_space<vmem>>, vector<1x256xf32>
      %14 = vector.broadcast %13 : vector<1x256xf32> to vector<16x256xf32>
      %15 = arith.addf %12, %14 : vector<16x256xf32>
      %c0_14 = arith.constant 0 : index
      %c0_15 = arith.constant 0 : index
      %16 = vector.load %arg6[%c0_14, %c0_15] : memref<16x256xf32, #tpu.memory_space<vmem>>, vector<16x256xf32>
      tpu.vector_store %arg6[%c0_14, %c0_15], %15 {strides = array<i32>} : memref<16x256xf32, #tpu.memory_space<vmem>>, vector<16x256xf32>,
    } else {
    }
    return
  }
  func.func @transform_0(%arg0: i32, %arg1: i32, %arg2: i32) -> (i32, i32) {
    %c0_i32 = arith.constant 0 : i32
    return %arg0, %arg2 : i32, i32
  }
  func.func @transform_1(%arg0: i32, %arg1: i32, %arg2: i32) -> (i32, i32) {
    %c0_i32 = arith.constant 0 : i32
    return %arg2, %arg1 : i32, i32
  }
  func.func @transform_2(%arg0: i32, %arg1: i32, %arg2: i32) -> (i32, i32) {
    %c0_i32 = arith.constant 0 : i32
    %c0_i32_0 = arith.constant 0 : i32
    return %c0_i32, %arg1 : i32, i32
  }
  func.func @transform_3(%arg0: i32, %arg1: i32, %arg2: i32) -> (i32, i32) {
    %c0_i32 = arith.constant 0 : i32
    return %arg0, %arg1 : i32, i32
  }
}

module attributes {stable_mosaic.version = 11 : i64} {
  func.func @_conv_bn_kernel(%arg0: i32, %arg1: i32, %arg2: i32, %arg3: memref<16x256xbf16, #tpu.memory_space<vmem>>, %arg4: memref<256x256xbf16, #tpu.memory_space<vmem>>, %arg5: memref<1x256xf32, #tpu.memory_space<vmem>>, %arg6: memref<16x256xf32, #tpu.memory_space<vmem>>, %arg7: memref<16x256xf32, #tpu.memory_space<vmem>>, %arg8: memref<16x256xf32, #tpu.memory_space<vmem>>) attributes {dimension_semantics = [#tpu.dimension_semantics<parallel>, #tpu.dimension_semantics<parallel>, #tpu.dimension_semantics<arbitrary>], iteration_bounds = array<i64: 1, 4, 1>, scalar_prefetch = 0 : i64, scratch_operands = 1 : i64, tpu.core_type = #tpu.core_type<tc>, window_params = [{transform_indices = @transform_0, window_bounds = array<i64: 16, 256>}, {transform_indices = @transform_1, window_bounds = array<i64: 256, 256>}, {transform_indices = @transform_2, window_bounds = array<i64: 1, 256>}, {transform_indices = @transform_3, window_bounds = array<i64: 16, 256>}, {transform_indices = @transform_4, window_bounds = array<i64: 16, 256>}]} {
    %c0_i32 = arith.constant 0 : i32
    %0 = arith.cmpi eq, %arg2, %c0_i32 : i32
    %1 = arith.extui %0 : i1 to i32
    %c0_i32_0 = arith.constant 0 : i32
    %2 = arith.cmpi ne, %1, %c0_i32_0 : i32
    scf.if %2 {
      %cst_10 = arith.constant 0.000000e+00 : f32
      %12 = vector.broadcast %cst_10 : f32 to vector<16x256xf32>
      %c0_11 = arith.constant 0 : index
      %c0_12 = arith.constant 0 : index
      %13 = vector.load %arg8[%c0_11, %c0_12] : memref<16x256xf32, #tpu.memory_space<vmem>>, vector<16x256xf32>
      tpu.vector_store %arg8[%c0_11, %c0_12], %12 {strides = array<i32>} : memref<16x256xf32, #tpu.memory_space<vmem>>, vector<16x256xf32>,
    } else {
    }
    %c0 = arith.constant 0 : index
    %c0_1 = arith.constant 0 : index
    %3 = vector.load %arg8[%c0, %c0_1] : memref<16x256xf32, #tpu.memory_space<vmem>>, vector<16x256xf32>
    %c0_2 = arith.constant 0 : index
    %c0_3 = arith.constant 0 : index
    %4 = vector.load %arg3[%c0_2, %c0_3] : memref<16x256xbf16, #tpu.memory_space<vmem>>, vector<16x256xbf16>
    %c0_4 = arith.constant 0 : index
    %c0_5 = arith.constant 0 : index
    %5 = vector.load %arg4[%c0_4, %c0_5] : memref<256x256xbf16, #tpu.memory_space<vmem>>, vector<256x256xbf16>
    %cst = arith.constant dense<0.000000e+00> : vector<16x256xf32>
    %6 = tpu.matmul %4, %5, %cst {dimension_numbers = #tpu.dot_dimension_numbers<[1], [0], [0], [1], [0, 0, 1, 1], [], []>} : vector<16x256xbf16>, vector<256x256xbf16>, vector<16x256xf32> -> vector<16x256xf32>
    %7 = arith.addf %3, %6 : vector<16x256xf32>
    %c0_6 = arith.constant 0 : index
    %c0_7 = arith.constant 0 : index
    %8 = vector.load %arg8[%c0_6, %c0_7] : memref<16x256xf32, #tpu.memory_space<vmem>>, vector<16x256xf32>
    tpu.vector_store %arg8[%c0_6, %c0_7], %7 {strides = array<i32>} : memref<16x256xf32, #tpu.memory_space<vmem>>, vector<16x256xf32>,
    %c0_i32_8 = arith.constant 0 : i32
    %9 = arith.cmpi eq, %arg2, %c0_i32_8 : i32
    %10 = arith.extui %9 : i1 to i32
    %c0_i32_9 = arith.constant 0 : i32
    %11 = arith.cmpi ne, %10, %c0_i32_9 : i32
    scf.if %11 {
      %c0_10 = arith.constant 0 : index
      %c0_11 = arith.constant 0 : index
      %12 = vector.load %arg8[%c0_10, %c0_11] : memref<16x256xf32, #tpu.memory_space<vmem>>, vector<16x256xf32>
      %c0_12 = arith.constant 0 : index
      %c0_13 = arith.constant 0 : index
      %13 = vector.load %arg5[%c0_12, %c0_13] : memref<1x256xf32, #tpu.memory_space<vmem>>, vector<1x256xf32>
      %14 = vector.broadcast %13 : vector<1x256xf32> to vector<16x256xf32>
      %15 = arith.addf %12, %14 : vector<16x256xf32>
      %c0_14 = arith.constant 0 : index
      %c0_15 = arith.constant 0 : index
      %16 = vector.load %arg6[%c0_14, %c0_15] : memref<16x256xf32, #tpu.memory_space<vmem>>, vector<16x256xf32>
      %17 = arith.addf %15, %16 : vector<16x256xf32>
      %cst_16 = arith.constant 0.000000e+00 : f32
      %18 = vector.broadcast %cst_16 : f32 to vector<16x256xf32>
      %19 = arith.maximumf %17, %18 : vector<16x256xf32>
      %c0_17 = arith.constant 0 : index
      %c0_18 = arith.constant 0 : index
      %20 = vector.load %arg7[%c0_17, %c0_18] : memref<16x256xf32, #tpu.memory_space<vmem>>, vector<16x256xf32>
      tpu.vector_store %arg7[%c0_17, %c0_18], %19 {strides = array<i32>} : memref<16x256xf32, #tpu.memory_space<vmem>>, vector<16x256xf32>,
    } else {
    }
    return
  }
  func.func @transform_0(%arg0: i32, %arg1: i32, %arg2: i32) -> (i32, i32) {
    %c0_i32 = arith.constant 0 : i32
    return %arg0, %arg2 : i32, i32
  }
  func.func @transform_1(%arg0: i32, %arg1: i32, %arg2: i32) -> (i32, i32) {
    %c0_i32 = arith.constant 0 : i32
    return %arg2, %arg1 : i32, i32
  }
  func.func @transform_2(%arg0: i32, %arg1: i32, %arg2: i32) -> (i32, i32) {
    %c0_i32 = arith.constant 0 : i32
    %c0_i32_0 = arith.constant 0 : i32
    return %c0_i32, %arg1 : i32, i32
  }
  func.func @transform_3(%arg0: i32, %arg1: i32, %arg2: i32) -> (i32, i32) {
    %c0_i32 = arith.constant 0 : i32
    return %arg0, %arg1 : i32, i32
  }
  func.func @transform_4(%arg0: i32, %arg1: i32, %arg2: i32) -> (i32, i32) {
    %c0_i32 = arith.constant 0 : i32
    return %arg0, %arg1 : i32, i32
  }
}

module attributes {stable_mosaic.version = 11 : i64} {
  func.func @_conv_bn_kernel(%arg0: i32, %arg1: i32, %arg2: i32, %arg3: memref<16x512xbf16, #tpu.memory_space<vmem>>, %arg4: memref<512x256xbf16, #tpu.memory_space<vmem>>, %arg5: memref<1x256xf32, #tpu.memory_space<vmem>>, %arg6: memref<16x256xf32, #tpu.memory_space<vmem>>, %arg7: memref<16x256xf32, #tpu.memory_space<vmem>>) attributes {dimension_semantics = [#tpu.dimension_semantics<parallel>, #tpu.dimension_semantics<parallel>, #tpu.dimension_semantics<arbitrary>], iteration_bounds = array<i64: 1, 1, 2>, scalar_prefetch = 0 : i64, scratch_operands = 1 : i64, tpu.core_type = #tpu.core_type<tc>, window_params = [{transform_indices = @transform_0, window_bounds = array<i64: 16, 512>}, {transform_indices = @transform_1, window_bounds = array<i64: 512, 256>}, {transform_indices = @transform_2, window_bounds = array<i64: 1, 256>}, {transform_indices = @transform_3, window_bounds = array<i64: 16, 256>}]} {
    %c0_i32 = arith.constant 0 : i32
    %0 = arith.cmpi eq, %arg2, %c0_i32 : i32
    %1 = arith.extui %0 : i1 to i32
    %c0_i32_0 = arith.constant 0 : i32
    %2 = arith.cmpi ne, %1, %c0_i32_0 : i32
    scf.if %2 {
      %cst_9 = arith.constant 0.000000e+00 : f32
      %12 = vector.broadcast %cst_9 : f32 to vector<16x256xf32>
      %c0_10 = arith.constant 0 : index
      %c0_11 = arith.constant 0 : index
      %13 = vector.load %arg7[%c0_10, %c0_11] : memref<16x256xf32, #tpu.memory_space<vmem>>, vector<16x256xf32>
      tpu.vector_store %arg7[%c0_10, %c0_11], %12 {strides = array<i32>} : memref<16x256xf32, #tpu.memory_space<vmem>>, vector<16x256xf32>,
    } else {
    }
    %c0 = arith.constant 0 : index
    %c0_1 = arith.constant 0 : index
    %3 = vector.load %arg7[%c0, %c0_1] : memref<16x256xf32, #tpu.memory_space<vmem>>, vector<16x256xf32>
    %c0_2 = arith.constant 0 : index
    %c0_3 = arith.constant 0 : index
    %4 = vector.load %arg3[%c0_2, %c0_3] : memref<16x512xbf16, #tpu.memory_space<vmem>>, vector<16x512xbf16>
    %c0_4 = arith.constant 0 : index
    %c0_5 = arith.constant 0 : index
    %5 = vector.load %arg4[%c0_4, %c0_5] : memref<512x256xbf16, #tpu.memory_space<vmem>>, vector<512x256xbf16>
    %cst = arith.constant dense<0.000000e+00> : vector<16x256xf32>
    %6 = tpu.matmul %4, %5, %cst {dimension_numbers = #tpu.dot_dimension_numbers<[1], [0], [0], [1], [0, 0, 1, 1], [], []>} : vector<16x512xbf16>, vector<512x256xbf16>, vector<16x256xf32> -> vector<16x256xf32>
    %7 = arith.addf %3, %6 : vector<16x256xf32>
    %c0_6 = arith.constant 0 : index
    %c0_7 = arith.constant 0 : index
    %8 = vector.load %arg7[%c0_6, %c0_7] : memref<16x256xf32, #tpu.memory_space<vmem>>, vector<16x256xf32>
    tpu.vector_store %arg7[%c0_6, %c0_7], %7 {strides = array<i32>} : memref<16x256xf32, #tpu.memory_space<vmem>>, vector<16x256xf32>,
    %c1_i32 = arith.constant 1 : i32
    %9 = arith.cmpi eq, %arg2, %c1_i32 : i32
    %10 = arith.extui %9 : i1 to i32
    %c0_i32_8 = arith.constant 0 : i32
    %11 = arith.cmpi ne, %10, %c0_i32_8 : i32
    scf.if %11 {
      %c0_9 = arith.constant 0 : index
      %c0_10 = arith.constant 0 : index
      %12 = vector.load %arg7[%c0_9, %c0_10] : memref<16x256xf32, #tpu.memory_space<vmem>>, vector<16x256xf32>
      %c0_11 = arith.constant 0 : index
      %c0_12 = arith.constant 0 : index
      %13 = vector.load %arg5[%c0_11, %c0_12] : memref<1x256xf32, #tpu.memory_space<vmem>>, vector<1x256xf32>
      %14 = vector.broadcast %13 : vector<1x256xf32> to vector<16x256xf32>
      %15 = arith.addf %12, %14 : vector<16x256xf32>
      %cst_13 = arith.constant 0.000000e+00 : f32
      %16 = vector.broadcast %cst_13 : f32 to vector<16x256xf32>
      %17 = arith.maximumf %15, %16 : vector<16x256xf32>
      %c0_14 = arith.constant 0 : index
      %c0_15 = arith.constant 0 : index
      %18 = vector.load %arg6[%c0_14, %c0_15] : memref<16x256xf32, #tpu.memory_space<vmem>>, vector<16x256xf32>
      tpu.vector_store %arg6[%c0_14, %c0_15], %17 {strides = array<i32>} : memref<16x256xf32, #tpu.memory_space<vmem>>, vector<16x256xf32>,
    } else {
    }
    return
  }
  func.func @transform_0(%arg0: i32, %arg1: i32, %arg2: i32) -> (i32, i32) {
    %c0_i32 = arith.constant 0 : i32
    return %arg0, %arg2 : i32, i32
  }
  func.func @transform_1(%arg0: i32, %arg1: i32, %arg2: i32) -> (i32, i32) {
    %c0_i32 = arith.constant 0 : i32
    return %arg2, %arg1 : i32, i32
  }
  func.func @transform_2(%arg0: i32, %arg1: i32, %arg2: i32) -> (i32, i32) {
    %c0_i32 = arith.constant 0 : i32
    %c0_i32_0 = arith.constant 0 : i32
    return %c0_i32, %arg1 : i32, i32
  }
  func.func @transform_3(%arg0: i32, %arg1: i32, %arg2: i32) -> (i32, i32) {
    %c0_i32 = arith.constant 0 : i32
    return %arg0, %arg1 : i32, i32
  }
}

</mosaic_0001>

<bundles_post_ra>
// kernel: resnet50_fpn_forward.44
= control target key start
LH: loop header
LB: loop body
LE: loop exit
PB: predicated region body
PF: predicated region fallthrough
CT: control target
= control target key end

     0   :  { %s1457_s12 = smov 0   ;;  %s1459_s13 = smov 0   ;;  %s1650_s0 = inlined_call_operand.vmem [shape: bf16[512,256], index: 0, kind: input, shape index: {}]   ;;  %s1651_s1 = inlined_call_operand.vmem [shape: bf16[256,128], index: 1, kind: input, shape index: {}]   ;;  %s1652_s2 = inlined_call_operand.vmem [shape: f32[1,128], index: 2, kind: input, shape index: {}]   ;;  %s1653_s3 = inlined_call_operand.vmem [shape: f32[512,128], index: 3, kind: output, shape index: {}]  }
   0x1   :  { %s1461_s14 = smov 0  }
   0x2 LB: > { %s32_s15 = sadd.s32 1, %s1431_s13  ;;  %p1139_p0 = scmp.ge.s32.totalorder %s1435_s14, 1  ;;  %s1435_s14 = sphi %s1461_s14, %s13_s14   ;;  %s1431_s13 = sphi %s1459_s13, %s1655_s13   ;;  %s1427_s12 = sphi %s1457_s12, %s1654_s12  }
   0x3   : > { %p34_p1 = scmp.ge.s32.totalorder %s32_s15, 2  ;;  %p191_p2 = scmp.lt.s32.totalorder %s1435_s14, 3 }
   0x5   : > { %s1657_s15 = smov (%p34_p1, %s32_s15), 0  ;;  %p192_p3 = pnand %p1139_p0, %p191_p2 }
   0x6   : > { %v1349_v0 = vld [vmem:[%s1651_s1 + $0x40] sm:$0xff] (!%p192_p3)   ;;  %s1140_s18 = sshll.u32 (!%p192_p3), %s1427_s12, 5  ;;  %v1351_v2 = vld [vmem:[%s1651_s1 + $0x48] sm:$0xff] (!%p192_p3)   ;;  %v1353_v4 = vld [vmem:[%s1651_s1 + $0x50] sm:$0xff] (!%p192_p3)  }
   0x7   : > { %195 = sbr.rel (%p192_p3) target bundleno = 317 (0x13d), region = 32  ;;  %v1350_v1 = vld [vmem:[%s1651_s1] sm:$0xff] (!%p192_p3)   ;;  %1197 = vmatprep.subr.bf16.mxu0 (!%p192_p3), %v1349_v0  ;;  %1309 = vmatprep.subr.bf16.mxu1 (!%p192_p3), %v1349_v0  ;;  %v1352_v3 = vld [vmem:[%s1651_s1 + $0x8] sm:$0xff] (!%p192_p3)   ;;  %p236_p4 = scmp.lt.s32.totalorder (!%p192_p3), %s1140_s18, 63  ;;  %v1354_v5 = vld [vmem:[%s1651_s1 + $0x10] sm:$0xff] (!%p192_p3)  }
   0x8   : > { %1198 = vmatpush3.bf16.msra.mxu0 (!%p192_p3), %v1350_v1  ;;  %1317 = vmatpush3.bf16.msra.mxu1 (!%p192_p3), %v1350_v1  ;;  %v1355_v6 = vld [vmem:[%s1651_s1 + $0x58] sm:$0xff] (!%p192_p3)   ;;  %v1357_v8 = vld [vmem:[%s1651_s1 + $0x60] sm:$0xff] (!%p192_p3)   ;;  %v1359_v10 = vld [vmem:[%s1651_s1 + $0x68] sm:$0xff] (!%p192_p3)  }
   0x9   : > { %1199 = vmatprep.subr.bf16.mxu0 (!%p192_p3), %v1351_v2  ;;  %1310 = vmatprep.subr.bf16.mxu1 (!%p192_p3), %v1351_v2  ;;  %v1356_v7 = vld [vmem:[%s1651_s1 + $0x18] sm:$0xff] (!%p192_p3)   ;;  %v1358_v9 = vld [vmem:[%s1651_s1 + $0x20] sm:$0xff] (!%p192_p3)   ;;  %v1360_v13 = vld [vmem:[%s1651_s1 + $0x28] sm:$0xff] (!%p192_p3)  }
   0xa   : > { %v1361_v14 = vld [vmem:[%s1651_s1 + $0x70] sm:$0xff] (!%p192_p3)   ;;  %v1363_v16 = vld [vmem:[%s1651_s1 + $0x78] sm:$0xff] (!%p192_p3)   ;;  %v1568_v51 = vld [vmem:[%s1652_s2] ss:$0 sm:$0xff] (!%p192_p3) }
   0xb   : > { %v1362_v15 = vld [vmem:[%s1651_s1 + $0x30] sm:$0xff] (!%p192_p3)   ;;  %v1364_v17 = vld [vmem:[%s1651_s1 + $0x38] sm:$0xff] (!%p192_p3)  }
   0xc   : > { %1200 = vmatpush3.bf16.msra.mxu0 (!%p192_p3), %v1352_v3  ;;  %1318 = vmatpush3.bf16.msra.mxu1 (!%p192_p3), %v1352_v3 }
   0xd   : > { %1201 = vmatprep.subr.bf16.mxu0 (!%p192_p3), %v1353_v4  ;;  %1311 = vmatprep.subr.bf16.mxu1 (!%p192_p3), %v1353_v4 }
   0xe   : > { %s1659_s18 = smov (!%p236_p4, %s1140_s18), 63 }
   0xf   : > { %s1196_s6 = sshll.u32 %s1659_s18, 3 }
  0x10   : > { %1202 = vmatpush3.bf16.msra.mxu0 %v1354_v5  ;;  %1319 = vmatpush3.bf16.msra.mxu1 %v1354_v5  ;;  %s1510_s11 = scalar_lea.vmem %s1650_s0, %s1196_s6  ;;  %s1577_s8 = scalar_lea.vmem %s1653_s3, %s1196_s6 }
  0x11   : > { %1203 = vmatprep.subr.bf16.mxu0 %v1355_v6  ;;  %1312 = vmatprep.subr.bf16.mxu1 %v1355_v6  ;;  %v1367_v11 = vld [vmem:[%s1510_s11 + $0x4] ss:$8 sps:$4 sm:$0xff]   ;;  %v1365_v18 = vld [vmem:[%s1510_s11] ss:$8 sps:$4 sm:$0xff]   ;;  %v1371_v20 = vld [vmem:[%s1510_s11 + $0x14] ss:$8 sps:$4 sm:$0xff]  }
  0x12   : > { %v1370_v12 = vld [vmem:[%s1510_s11 + $0x84] ss:$8 sps:$4 sm:$0xff]   ;;  %688 = vmatprep.mubr.bf16.mxu0 %v1367_v11  ;;  %v1368_v19 = vld [vmem:[%s1510_s11 + $0x80] ss:$8 sps:$4 sm:$0xff]   ;;  %v1373_v21 = vld [vmem:[%s1510_s11 + $0x94] ss:$8 sps:$4 sm:$0xff]  }
  0x13   : > { %752 = vmatprep.mubr.bf16.mxu1 %v1370_v12  ;;  %v1375_v22 = vld [vmem:[%s1510_s11 + $0x10] ss:$8 sps:$4 sm:$0xff]   ;;  %v1377_v24 = vld [vmem:[%s1510_s11 + $0x24] ss:$8 sps:$4 sm:$0xff]   ;;  %v1381_v26 = vld [vmem:[%s1510_s11 + $0x20] ss:$8 sps:$4 sm:$0xff]  }
  0x14   : > { %1204 = vmatpush3.bf16.msra.mxu0 %v1356_v7  ;;  %1320 = vmatpush3.bf16.msra.mxu1 %v1356_v7  ;;  %v1376_v23 = vld [vmem:[%s1510_s11 + $0x90] ss:$8 sps:$4 sm:$0xff]   ;;  %v1379_v25 = vld [vmem:[%s1510_s11 + $0xa4] ss:$8 sps:$4 sm:$0xff]   ;;  %v1382_v27 = vld [vmem:[%s1510_s11 + $0xa0] ss:$8 sps:$4 sm:$0xff]  }
  0x15   : > { %1205 = vmatprep.subr.bf16.mxu0 %v1357_v8  ;;  %1313 = vmatprep.subr.bf16.mxu1 %v1357_v8  ;;  %v1383_v28 = vld [vmem:[%s1510_s11 + $0x34] ss:$8 sps:$4 sm:$0xff]   ;;  %v1387_v30 = vld [vmem:[%s1510_s11 + $0x30] ss:$8 sps:$4 sm:$0xff]   ;;  %v1389_v32 = vld [vmem:[%s1510_s11 + $0x44] ss:$8 sps:$4 sm:$0xff]  }
  0x16   : > { %v1385_v29 = vld [vmem:[%s1510_s11 + $0xb4] ss:$8 sps:$4 sm:$0xff]   ;;  %v1388_v31 = vld [vmem:[%s1510_s11 + $0xb0] ss:$8 sps:$4 sm:$0xff]   ;;  %v1391_v33 = vld [vmem:[%s1510_s11 + $0xc4] ss:$8 sps:$4 sm:$0xff]  }
  0x17   : > { %v1393_v34 = vld [vmem:[%s1510_s11 + $0x40] ss:$8 sps:$4 sm:$0xff]   ;;  %v1395_v36 = vld [vmem:[%s1510_s11 + $0x54] ss:$8 sps:$4 sm:$0xff]   ;;  %v1399_v38 = vld [vmem:[%s1510_s11 + $0x50] ss:$8 sps:$4 sm:$0xff]  }
  0x18   : > { %1206 = vmatpush3.bf16.msra.mxu0 %v1358_v9  ;;  %1321 = vmatpush3.bf16.msra.mxu1 %v1358_v9  ;;  %v1394_v35 = vld [vmem:[%s1510_s11 + $0xc0] ss:$8 sps:$4 sm:$0xff]   ;;  %v1397_v37 = vld [vmem:[%s1510_s11 + $0xd4] ss:$8 sps:$4 sm:$0xff]   ;;  %v1400_v39 = vld [vmem:[%s1510_s11 + $0xd0] ss:$8 sps:$4 sm:$0xff]  }
  0x19   : > { %1207 = vmatprep.subr.bf16.mxu0 %v1359_v10  ;;  %1314 = vmatprep.subr.bf16.mxu1 %v1359_v10  ;;  %v1401_v40 = vld [vmem:[%s1510_s11 + $0x64] ss:$8 sps:$4 sm:$0xff]   ;;  %v1405_v42 = vld [vmem:[%s1510_s11 + $0x60] ss:$8 sps:$4 sm:$0xff]   ;;  %v1407_v44 = vld [vmem:[%s1510_s11 + $0x74] ss:$8 sps:$4 sm:$0xff]  }
  0x1a   : > { %v1403_v41 = vld [vmem:[%s1510_s11 + $0xe4] ss:$8 sps:$4 sm:$0xff]   ;;  %v1406_v43 = vld [vmem:[%s1510_s11 + $0xe0] ss:$8 sps:$4 sm:$0xff]   ;;  %v1409_v45 = vld [vmem:[%s1510_s11 + $0xf4] ss:$8 sps:$4 sm:$0xff]  }
  0x1b   : > { %v1411_v46 = vld [vmem:[%s1510_s11 + $0x70] ss:$8 sps:$4 sm:$0xff]  }
  0x1c   : > { %1208 = vmatpush3.bf16.msra.mxu0 %v1360_v13  ;;  %1322 = vmatpush3.bf16.msra.mxu1 %v1360_v13  ;;  %v1412_v47 = vld [vmem:[%s1510_s11 + $0xf0] ss:$8 sps:$4 sm:$0xff]  }
  0x1d   : > { %1209 = vmatprep.subr.bf16.mxu0 %v1361_v14  ;;  %1315 = vmatprep.subr.bf16.mxu1 %v1361_v14 }
  0x20   : > { %1210 = vmatpush3.bf16.msra.mxu0 %v1362_v15  ;;  %1323 = vmatpush3.bf16.msra.mxu1 %v1362_v15 }
  0x21   : > { %1211 = vmatprep.subr.bf16.mxu0 %v1363_v16  ;;  %1316 = vmatprep.subr.bf16.mxu1 %v1363_v16 }
  0x24   : > { %1212 = vmatpush3.bf16.msra.mxu0 %v1364_v17  ;;  %1324 = vmatpush3.bf16.msra.mxu1 %v1364_v17 }
  0x27   : > { %689 = vmatmul.mubr.bf16.vlgmr.msra.gmra.mrb[0].mxu0 %v1365_v18  ;;  %753 = vmatmul.mubr.bf16.vlgmr.msra.gmra.mrb[0].mxu1 %v1368_v19 }
  0x28   : > { %696 = vmatprep.mubr.bf16.mxu0 %v1371_v20  ;;  %760 = vmatprep.mubr.bf16.mxu1 %v1373_v21 }
  0x2f   : > { %697 = vmatmul.mubr.bf16.gmra.mrb[4].mxu0 %v1375_v22  ;;  %761 = vmatmul.mubr.bf16.gmra.mrb[4].mxu1 %v1376_v23 }
  0x30   : > { %704 = vmatprep.mubr.bf16.mxu0 %v1377_v24  ;;  %768 = vmatprep.mubr.bf16.mxu1 %v1379_v25 }
  0x37   : > { %705 = vmatmul.mubr.bf16.gmra.mrb[8].mxu0 %v1381_v26  ;;  %769 = vmatmul.mubr.bf16.gmra.mrb[8].mxu1 %v1382_v27 }
  0x38   : > { %712 = vmatprep.mubr.bf16.mxu0 %v1383_v28  ;;  %776 = vmatprep.mubr.bf16.mxu1 %v1385_v29 }
  0x3f   : > { %713 = vmatmul.mubr.bf16.gmra.mrb[12].mxu0 %v1387_v30  ;;  %777 = vmatmul.mubr.bf16.gmra.mrb[12].mxu1 %v1388_v31 }
  0x40   : > { %720 = vmatprep.mubr.bf16.mxu0 %v1389_v32  ;;  %784 = vmatprep.mubr.bf16.mxu1 %v1391_v33 }
  0x47   : > { %721 = vmatmul.mubr.bf16.gmra.mrb[16].mxu0 %v1393_v34  ;;  %785 = vmatmul.mubr.bf16.gmra.mrb[16].mxu1 %v1394_v35 }
  0x48   : > { %728 = vmatprep.mubr.bf16.mxu0 %v1395_v36  ;;  %792 = vmatprep.mubr.bf16.mxu1 %v1397_v37 }
  0x4f   : > { %729 = vmatmul.mubr.bf16.gmra.mrb[20].mxu0 %v1399_v38  ;;  %793 = vmatmul.mubr.bf16.gmra.mrb[20].mxu1 %v1400_v39 }
  0x50   : > { %736 = vmatprep.mubr.bf16.mxu0 %v1401_v40  ;;  %800 = vmatprep.mubr.bf16.mxu1 %v1403_v41 }
  0x57   : > { %737 = vmatmul.mubr.bf16.gmra.mrb[24].mxu0 %v1405_v42  ;;  %801 = vmatmul.mubr.bf16.gmra.mrb[24].mxu1 %v1406_v43 }
  0x58   : > { %744 = vmatprep.mubr.bf16.mxu0 %v1407_v44  ;;  %808 = vmatprep.mubr.bf16.mxu1 %v1409_v45 }
  0x5f   : > { %745 = vmatmul.mubr.bf16.gmra.mrb[28].mxu0 %v1411_v46  ;;  %809 = vmatmul.mubr.bf16.gmra.mrb[28].mxu1 %v1412_v47 }
  0xfa   : > { %v1213_v48 = vpop.f32.mrb[0].mxu0  ;;  %v1261_v49 = vpop.f32.mrb[0].mxu1 }
  0xfb   : > { %v1214_v50 = vpop.f32.mrb[1].mxu0  ;;  %v1262_v52 = vpop.f32.mrb[1].mxu1 }
  0xfc   : > { %v1215_v53 = vadd.f32 %v1214_v50, %v1213_v48  ;;  %v1263_v54 = vadd.f32 %v1262_v52, %v1261_v49  ;;  %v1216_v55 = vpop.f32.mrb[2].mxu0  ;;  %v1264_v56 = vpop.f32.mrb[2].mxu1 }
  0xfd   : > { %v1217_v57 = vpop.f32.mrb[3].mxu0  ;;  %v1265_v58 = vpop.f32.mrb[3].mxu1 }
  0xfe   : > { %v923_v59 = vadd.f32 %v1215_v53, %v1568_v51  ;;  %v939_v60 = vadd.f32 %v1263_v54, %v1568_v51  ;;  %v1218_v61 = vadd.f32 %v1217_v57, %v1216_v55  ;;  %v1266_v62 = vadd.f32 %v1265_v58, %v1264_v56 }
 0x100   : > { %v955_v63 = vmax.f32 %v923_v59, 0.0  ;;  %v971_v0 = vmax.f32 %v939_v60, 0.0  ;;  %v924_v1 = vadd.f32 %v1218_v61, %v1568_v51  ;;  %v940_v2 = vadd.f32 %v1266_v62, %v1568_v51 }
 0x102   : > { %987 = vst [vmem:[%s1577_s8] sm:$0xff] %v955_v63  ;;  %1003 = vst [vmem:[%s1577_s8 + $0x80] sm:$0xff] %v971_v0  ;;  %v956_v3 = vmax.f32 %v924_v1, 0.0  ;;  %v972_v4 = vmax.f32 %v940_v2, 0.0  ;;  %v1219_v5 = vpop.f32.mrb[4].mxu0  ;;  %v1267_v6 = vpop.f32.mrb[4].mxu1 }
 0x103   : > { %v1220_v7 = vpop.f32.mrb[5].mxu0  ;;  %v1268_v8 = vpop.f32.mrb[5].mxu1 }
 0x104   : > { %988 = vst [vmem:[%s1577_s8 + $0x8] sm:$0xff] %v956_v3  ;;  %1004 = vst [vmem:[%s1577_s8 + $0x88] sm:$0xff] %v972_v4  ;;  %v1221_v9 = vadd.f32 %v1220_v7, %v1219_v5  ;;  %v1269_v10 = vadd.f32 %v1268_v8, %v1267_v6  ;;  %v1222_v11 = vpop.f32.mrb[6].mxu0  ;;  %v1270_v12 = vpop.f32.mrb[6].mxu1 }
 0x105   : > { %v1223_v13 = vpop.f32.mrb[7].mxu0  ;;  %v1271_v14 = vpop.f32.mrb[7].mxu1 }
 0x106   : > { %v925_v15 = vadd.f32 %v1221_v9, %v1568_v51  ;;  %v941_v16 = vadd.f32 %v1269_v10, %v1568_v51  ;;  %v1224_v17 = vadd.f32 %v1223_v13, %v1222_v11  ;;  %v1272_v18 = vadd.f32 %v1271_v14, %v1270_v12 }
 0x108   : > { %v957_v19 = vmax.f32 %v925_v15, 0.0  ;;  %v973_v20 = vmax.f32 %v941_v16, 0.0  ;;  %v926_v21 = vadd.f32 %v1224_v17, %v1568_v51  ;;  %v942_v22 = vadd.f32 %v1272_v18, %v1568_v51 }
 0x10a   : > { %989 = vst [vmem:[%s1577_s8 + $0x10] sm:$0xff] %v957_v19  ;;  %1005 = vst [vmem:[%s1577_s8 + $0x90] sm:$0xff] %v973_v20  ;;  %v958_v23 = vmax.f32 %v926_v21, 0.0  ;;  %v974_v24 = vmax.f32 %v942_v22, 0.0  ;;  %v1225_v25 = vpop.f32.mrb[8].mxu0  ;;  %v1273_v26 = vpop.f32.mrb[8].mxu1 }
 0x10b   : > { %v1226_v27 = vpop.f32.mrb[9].mxu0  ;;  %v1274_v28 = vpop.f32.mrb[9].mxu1 }
 0x10c   : > { %990 = vst [vmem:[%s1577_s8 + $0x18] sm:$0xff] %v958_v23  ;;  %1006 = vst [vmem:[%s1577_s8 + $0x98] sm:$0xff] %v974_v24  ;;  %v1227_v29 = vadd.f32 %v1226_v27, %v1225_v25  ;;  %v1275_v30 = vadd.f32 %v1274_v28, %v1273_v26  ;;  %v1228_v31 = vpop.f32.mrb[10].mxu0  ;;  %v1276_v32 = vpop.f32.mrb[10].mxu1 }
 0x10d   : > { %v1229_v33 = vpop.f32.mrb[11].mxu0  ;;  %v1277_v34 = vpop.f32.mrb[11].mxu1 }
 0x10e   : > { %v927_v35 = vadd.f32 %v1227_v29, %v1568_v51  ;;  %v943_v36 = vadd.f32 %v1275_v30, %v1568_v51  ;;  %v1230_v37 = vadd.f32 %v1229_v33, %v1228_v31  ;;  %v1278_v38 = vadd.f32 %v1277_v34, %v1276_v32 }
 0x110   : > { %v959_v39 = vmax.f32 %v927_v35, 0.0  ;;  %v975_v40 = vmax.f32 %v943_v36, 0.0  ;;  %v928_v41 = vadd.f32 %v1230_v37, %v1568_v51  ;;  %v944_v42 = vadd.f32 %v1278_v38, %v1568_v51 }
 0x112   : > { %991 = vst [vmem:[%s1577_s8 + $0x20] sm:$0xff] %v959_v39  ;;  %1007 = vst [vmem:[%s1577_s8 + $0xa0] sm:$0xff] %v975_v40  ;;  %v960_v43 = vmax.f32 %v928_v41, 0.0  ;;  %v976_v44 = vmax.f32 %v944_v42, 0.0  ;;  %v1231_v45 = vpop.f32.mrb[12].mxu0  ;;  %v1279_v46 = vpop.f32.mrb[12].mxu1 }
 0x113   : > { %v1232_v47 = vpop.f32.mrb[13].mxu0  ;;  %v1280_v48 = vpop.f32.mrb[13].mxu1 }
 0x114   : > { %992 = vst [vmem:[%s1577_s8 + $0x28] sm:$0xff] %v960_v43  ;;  %1008 = vst [vmem:[%s1577_s8 + $0xa8] sm:$0xff] %v976_v44  ;;  %v1233_v49 = vadd.f32 %v1232_v47, %v1231_v45  ;;  %v1281_v50 = vadd.f32 %v1280_v48, %v1279_v46  ;;  %v1234_v52 = vpop.f32.mrb[14].mxu0  ;;  %v1282_v53 = vpop.f32.mrb[14].mxu1 }
 0x115   : > { %v1235_v54 = vpop.f32.mrb[15].mxu0  ;;  %v1283_v55 = vpop.f32.mrb[15].mxu1 }
 0x116   : > { %v929_v56 = vadd.f32 %v1233_v49, %v1568_v51  ;;  %v945_v57 = vadd.f32 %v1281_v50, %v1568_v51  ;;  %v1236_v58 = vadd.f32 %v1235_v54, %v1234_v52  ;;  %v1284_v59 = vadd.f32 %v1283_v55, %v1282_v53 }
 0x118   : > { %v961_v60 = vmax.f32 %v929_v56, 0.0  ;;  %v977_v61 = vmax.f32 %v945_v57, 0.0  ;;  %v930_v62 = vadd.f32 %v1236_v58, %v1568_v51  ;;  %v946_v63 = vadd.f32 %v1284_v59, %v1568_v51 }
 0x11a   : > { %993 = vst [vmem:[%s1577_s8 + $0x30] sm:$0xff] %v961_v60  ;;  %1009 = vst [vmem:[%s1577_s8 + $0xb0] sm:$0xff] %v977_v61  ;;  %v962_v0 = vmax.f32 %v930_v62, 0.0  ;;  %v978_v1 = vmax.f32 %v946_v63, 0.0  ;;  %v1237_v2 = vpop.f32.mrb[16].mxu0  ;;  %v1285_v3 = vpop.f32.mrb[16].mxu1 }
 0x11b   : > { %v1238_v4 = vpop.f32.mrb[17].mxu0  ;;  %v1286_v5 = vpop.f32.mrb[17].mxu1 }
 0x11c   : > { %994 = vst [vmem:[%s1577_s8 + $0x38] sm:$0xff] %v962_v0  ;;  %1010 = vst [vmem:[%s1577_s8 + $0xb8] sm:$0xff] %v978_v1  ;;  %v1239_v6 = vadd.f32 %v1238_v4, %v1237_v2  ;;  %v1287_v7 = vadd.f32 %v1286_v5, %v1285_v3  ;;  %v1240_v8 = vpop.f32.mrb[18].mxu0  ;;  %v1288_v9 = vpop.f32.mrb[18].mxu1 }
 0x11d   : > { %v1241_v10 = vpop.f32.mrb[19].mxu0  ;;  %v1289_v11 = vpop.f32.mrb[19].mxu1 }
 0x11e   : > { %v931_v12 = vadd.f32 %v1239_v6, %v1568_v51  ;;  %v947_v13 = vadd.f32 %v1287_v7, %v1568_v51  ;;  %v1242_v14 = vadd.f32 %v1241_v10, %v1240_v8  ;;  %v1290_v15 = vadd.f32 %v1289_v11, %v1288_v9 }
 0x120   : > { %v963_v16 = vmax.f32 %v931_v12, 0.0  ;;  %v979_v17 = vmax.f32 %v947_v13, 0.0  ;;  %v932_v18 = vadd.f32 %v1242_v14, %v1568_v51  ;;  %v948_v19 = vadd.f32 %v1290_v15, %v1568_v51 }
 0x122   : > { %995 = vst [vmem:[%s1577_s8 + $0x40] sm:$0xff] %v963_v16  ;;  %1011 = vst [vmem:[%s1577_s8 + $0xc0] sm:$0xff] %v979_v17  ;;  %v964_v20 = vmax.f32 %v932_v18, 0.0  ;;  %v980_v21 = vmax.f32 %v948_v19, 0.0  ;;  %v1243_v22 = vpop.f32.mrb[20].mxu0  ;;  %v1291_v23 = vpop.f32.mrb[20].mxu1 }
 0x123   : > { %v1244_v24 = vpop.f32.mrb[21].mxu0  ;;  %v1292_v25 = vpop.f32.mrb[21].mxu1 }
 0x124   : > { %996 = vst [vmem:[%s1577_s8 + $0x48] sm:$0xff] %v964_v20  ;;  %1012 = vst [vmem:[%s1577_s8 + $0xc8] sm:$0xff] %v980_v21  ;;  %v1245_v26 = vadd.f32 %v1244_v24, %v1243_v22  ;;  %v1293_v27 = vadd.f32 %v1292_v25, %v1291_v23  ;;  %v1246_v28 = vpop.f32.mrb[22].mxu0  ;;  %v1294_v29 = vpop.f32.mrb[22].mxu1 }
 0x125   : > { %v1247_v30 = vpop.f32.mrb[23].mxu0  ;;  %v1295_v31 = vpop.f32.mrb[23].mxu1 }
 0x126   : > { %v933_v32 = vadd.f32 %v1245_v26, %v1568_v51  ;;  %v949_v33 = vadd.f32 %v1293_v27, %v1568_v51  ;;  %v1248_v34 = vadd.f32 %v1247_v30, %v1246_v28  ;;  %v1296_v35 = vadd.f32 %v1295_v31, %v1294_v29 }
 0x128   : > { %v965_v36 = vmax.f32 %v933_v32, 0.0  ;;  %v981_v37 = vmax.f32 %v949_v33, 0.0  ;;  %v934_v38 = vadd.f32 %v1248_v34, %v1568_v51  ;;  %v950_v39 = vadd.f32 %v1296_v35, %v1568_v51 }
 0x12a   : > { %997 = vst [vmem:[%s1577_s8 + $0x50] sm:$0xff] %v965_v36  ;;  %1013 = vst [vmem:[%s1577_s8 + $0xd0] sm:$0xff] %v981_v37  ;;  %v966_v40 = vmax.f32 %v934_v38, 0.0  ;;  %v982_v41 = vmax.f32 %v950_v39, 0.0  ;;  %v1249_v42 = vpop.f32.mrb[24].mxu0  ;;  %v1297_v43 = vpop.f32.mrb[24].mxu1 }
 0x12b   : > { %v1250_v44 = vpop.f32.mrb[25].mxu0  ;;  %v1298_v45 = vpop.f32.mrb[25].mxu1 }
 0x12c   : > { %998 = vst [vmem:[%s1577_s8 + $0x58] sm:$0xff] %v966_v40  ;;  %1014 = vst [vmem:[%s1577_s8 + $0xd8] sm:$0xff] %v982_v41  ;;  %v1251_v46 = vadd.f32 %v1250_v44, %v1249_v42  ;;  %v1299_v47 = vadd.f32 %v1298_v45, %v1297_v43  ;;  %v1252_v48 = vpop.f32.mrb[26].mxu0  ;;  %v1300_v49 = vpop.f32.mrb[26].mxu1 }
 0x12d   : > { %v1253_v50 = vpop.f32.mrb[27].mxu0  ;;  %v1301_v52 = vpop.f32.mrb[27].mxu1 }
 0x12e   : > { %v935_v53 = vadd.f32 %v1251_v46, %v1568_v51  ;;  %v951_v54 = vadd.f32 %v1299_v47, %v1568_v51  ;;  %v1254_v55 = vadd.f32 %v1253_v50, %v1252_v48  ;;  %v1302_v56 = vadd.f32 %v1301_v52, %v1300_v49 }
 0x130   : > { %v967_v57 = vmax.f32 %v935_v53, 0.0  ;;  %v983_v58 = vmax.f32 %v951_v54, 0.0  ;;  %v936_v59 = vadd.f32 %v1254_v55, %v1568_v51  ;;  %v952_v60 = vadd.f32 %v1302_v56, %v1568_v51 }
 0x132   : > { %999 = vst [vmem:[%s1577_s8 + $0x60] sm:$0xff] %v967_v57  ;;  %1015 = vst [vmem:[%s1577_s8 + $0xe0] sm:$0xff] %v983_v58  ;;  %v968_v61 = vmax.f32 %v936_v59, 0.0  ;;  %v984_v62 = vmax.f32 %v952_v60, 0.0  ;;  %v1255_v63 = vpop.f32.mrb[28].mxu0  ;;  %v1303_v0 = vpop.f32.mrb[28].mxu1 }
 0x133   : > { %v1256_v1 = vpop.f32.mrb[29].mxu0  ;;  %v1304_v2 = vpop.f32.mrb[29].mxu1 }
 0x134   : > { %1000 = vst [vmem:[%s1577_s8 + $0x68] sm:$0xff] %v968_v61  ;;  %1016 = vst [vmem:[%s1577_s8 + $0xe8] sm:$0xff] %v984_v62  ;;  %v1257_v3 = vadd.f32 %v1256_v1, %v1255_v63  ;;  %v1305_v4 = vadd.f32 %v1304_v2, %v1303_v0  ;;  %v1258_v5 = vpop.f32.mrb[30].mxu0  ;;  %v1306_v6 = vpop.f32.mrb[30].mxu1 }
 0x135   : > { %v1259_v7 = vpop.f32.mrb[31].mxu0  ;;  %v1307_v8 = vpop.f32.mrb[31].mxu1 }
 0x136   : > { %v937_v9 = vadd.f32 %v1257_v3, %v1568_v51  ;;  %v953_v10 = vadd.f32 %v1305_v4, %v1568_v51  ;;  %v1260_v11 = vadd.f32 %v1259_v7, %v1258_v5  ;;  %v1308_v12 = vadd.f32 %v1307_v8, %v1306_v6 }
 0x138   : > { %v969_v13 = vmax.f32 %v937_v9, 0.0  ;;  %v985_v14 = vmax.f32 %v953_v10, 0.0  ;;  %v938_v15 = vadd.f32 %v1260_v11, %v1568_v51  ;;  %v954_v16 = vadd.f32 %v1308_v12, %v1568_v51 }
 0x13a   : > { %1001 = vst [vmem:[%s1577_s8 + $0x70] sm:$0xff] %v969_v13  ;;  %1017 = vst [vmem:[%s1577_s8 + $0xf0] sm:$0xff] %v985_v14  ;;  %v970_v17 = vmax.f32 %v938_v15, 0.0  ;;  %v986_v18 = vmax.f32 %v954_v16, 0.0 }
 0x13c   : > { %1002 = vst [vmem:[%s1577_s8 + $0x78] sm:$0xff] %v970_v17  ;;  %1018 = vst [vmem:[%s1577_s8 + $0xf8] sm:$0xff] %v986_v18 }
 0x13d PF: > { %s13_s14 = sadd.s32 1, %s1435_s14   ;;  %s1654_s12 = smov %s1431_s13 }
 0x13e   : > { %p10_p5 = scmp.ge.s32.totalorder %s13_s14, 4   ;;  %s1655_s13 = smov %s1657_s15 }
 0x140   :  { %12 = sbr.rel (!%p10_p5) target bundleno = 2 (0x2), region = 76 }

// kernel: resnet50_fpn_forward.45
= control target key start
LH: loop header
LB: loop body
LE: loop exit
PB: predicated region body
PF: predicated region fallthrough
CT: control target
= control target key end

     0   :  { %s406_s0 = inlined_call_operand.vmem [shape: f32[9,16,512], index: 0, kind: input, shape index: {}]   ;;  %s407_s1 = inlined_call_operand.vmem [shape: f32[16,512], index: 1, kind: output, shape index: {}]  }
   0x1   :  { %v8_v0 = vld [vmem:[%s406_s0] sm:$0xff]  ;;  %v9_v6 = vld [vmem:[%s406_s0 + $0x8] sm:$0xff]  ;;  %v10_v15 = vld [vmem:[%s406_s0 + $0x10] sm:$0xff] }
   0x2   :  { %v16_v1 = vld [vmem:[%s406_s0 + $0x40] sm:$0xff]  ;;  %v17_v7 = vld [vmem:[%s406_s0 + $0x48] sm:$0xff]  ;;  %v18_v16 = vld [vmem:[%s406_s0 + $0x50] sm:$0xff] }
   0x3   :  { %v24_v2 = vld [vmem:[%s406_s0 + $0x80] sm:$0xff]  ;;  %v80_v3 = vmax.f32 %v8_v0, %v16_v1  ;;  %v25_v8 = vld [vmem:[%s406_s0 + $0x88] sm:$0xff]  ;;  %v88_v10 = vmax.f32 %v9_v6, %v17_v7  ;;  %v26_v17 = vld [vmem:[%s406_s0 + $0x90] sm:$0xff]  ;;  %v96_v20 = vmax.f32 %v10_v15, %v18_v16 }
   0x4   :  { %v32_v4 = vld [vmem:[%s406_s0 + $0xc0] sm:$0xff]  ;;  %v33_v13 = vld [vmem:[%s406_s0 + $0xc8] sm:$0xff]  ;;  %v34_v24 = vld [vmem:[%s406_s0 + $0xd0] sm:$0xff] }
   0x5   :  { %v81_v5 = vmax.f32 %v80_v3, %v24_v2  ;;  %v40_v9 = vld [vmem:[%s406_s0 + $0x100] sm:$0xff]  ;;  %v89_v14 = vmax.f32 %v88_v10, %v25_v8  ;;  %v41_v19 = vld [vmem:[%s406_s0 + $0x108] sm:$0xff]  ;;  %v97_v26 = vmax.f32 %v96_v20, %v26_v17  ;;  %v11_v27 = vld [vmem:[%s406_s0 + $0x18] sm:$0xff] }
   0x6   :  { %v48_v11 = vld [vmem:[%s406_s0 + $0x140] sm:$0xff]  ;;  %v49_v22 = vld [vmem:[%s406_s0 + $0x148] sm:$0xff]  ;;  %v19_v28 = vld [vmem:[%s406_s0 + $0x58] sm:$0xff] }
   0x7   :  { %v82_v12 = vmax.f32 %v81_v5, %v32_v4  ;;  %v56_v21 = vld [vmem:[%s406_s0 + $0x180] sm:$0xff]  ;;  %v90_v23 = vmax.f32 %v89_v14, %v33_v13  ;;  %v27_v29 = vld [vmem:[%s406_s0 + $0x98] sm:$0xff]  ;;  %v42_v33 = vld [vmem:[%s406_s0 + $0x110] sm:$0xff]  ;;  %v104_v34 = vmax.f32 %v11_v27, %v19_v28  ;;  %v98_v38 = vmax.f32 %v97_v26, %v34_v24 }
   0x8   :  { %v64_v30 = vld [vmem:[%s406_s0 + $0x1c0] sm:$0xff]  ;;  %v57_v36 = vld [vmem:[%s406_s0 + $0x188] sm:$0xff]  ;;  %v50_v37 = vld [vmem:[%s406_s0 + $0x150] sm:$0xff] }
   0x9   :  { %v83_v18 = vmax.f32 %v82_v12, %v40_v9  ;;  %v72_v31 = vld [vmem:[%s406_s0 + $0x200] sm:$0xff]  ;;  %v91_v32 = vmax.f32 %v90_v23, %v41_v19  ;;  %v35_v39 = vld [vmem:[%s406_s0 + $0xd8] sm:$0xff]  ;;  %v105_v41 = vmax.f32 %v104_v34, %v27_v29  ;;  %v65_v46 = vld [vmem:[%s406_s0 + $0x1c8] sm:$0xff]  ;;  %v99_v48 = vmax.f32 %v98_v38, %v42_v33 }
   0xa   :  { %v12_v42 = vld [vmem:[%s406_s0 + $0x20] sm:$0xff]  ;;  %v73_v47 = vld [vmem:[%s406_s0 + $0x208] sm:$0xff]  ;;  %v43_v49 = vld [vmem:[%s406_s0 + $0x118] sm:$0xff] }
   0xb   :  { %v84_v25 = vmax.f32 %v83_v18, %v48_v11  ;;  %v92_v40 = vmax.f32 %v91_v32, %v49_v22  ;;  %v20_v43 = vld [vmem:[%s406_s0 + $0x60] sm:$0xff]  ;;  %v58_v52 = vld [vmem:[%s406_s0 + $0x190] sm:$0xff]  ;;  %v51_v53 = vld [vmem:[%s406_s0 + $0x158] sm:$0xff]  ;;  %v106_v54 = vmax.f32 %v105_v41, %v35_v39  ;;  %v100_v57 = vmax.f32 %v99_v48, %v50_v37 }
   0xc   :  { %v28_v44 = vld [vmem:[%s406_s0 + $0xa0] sm:$0xff]  ;;  %v112_v50 = vmax.f32 %v12_v42, %v20_v43  ;;  %v13_v59 = vld [vmem:[%s406_s0 + $0x28] sm:$0xff]  ;;  %v66_v63 = vld [vmem:[%s406_s0 + $0x1d0] sm:$0xff] }
   0xd   :  { %v85_v35 = vmax.f32 %v84_v25, %v56_v21  ;;  %v93_v51 = vmax.f32 %v92_v40, %v57_v36  ;;  %v36_v55 = vld [vmem:[%s406_s0 + $0xe0] sm:$0xff]  ;;  %v21_v60 = vld [vmem:[%s406_s0 + $0x68] sm:$0xff]  ;;  %v74_v0 = vld [vmem:[%s406_s0 + $0x210] sm:$0xff]  ;;  %v107_v1 = vmax.f32 %v106_v54, %v43_v49  ;;  %v101_v4 = vmax.f32 %v100_v57, %v58_v52 }
   0xe   :  { %v113_v58 = vmax.f32 %v112_v50, %v28_v44  ;;  %v29_v61 = vld [vmem:[%s406_s0 + $0xa8] sm:$0xff]  ;;  %v44_v2 = vld [vmem:[%s406_s0 + $0x120] sm:$0xff]  ;;  %v120_v3 = vmax.f32 %v13_v59, %v21_v60  ;;  %v59_v5 = vld [vmem:[%s406_s0 + $0x198] sm:$0xff] }
   0xf   :  { %v86_v45 = vmax.f32 %v85_v35, %v64_v30  ;;  %v94_v62 = vmax.f32 %v93_v51, %v65_v46  ;;  %v52_v6 = vld [vmem:[%s406_s0 + $0x160] sm:$0xff]  ;;  %v37_v8 = vld [vmem:[%s406_s0 + $0xe8] sm:$0xff]  ;;  %v108_v10 = vmax.f32 %v107_v1, %v51_v53  ;;  %v14_v12 = vld [vmem:[%s406_s0 + $0x30] sm:$0xff]  ;;  %v102_v15 = vmax.f32 %v101_v4, %v66_v63 }
  0x10   :  { %v114_v7 = vmax.f32 %v113_v58, %v36_v55  ;;  %v121_v11 = vmax.f32 %v120_v3, %v29_v61  ;;  %v22_v13 = vld [vmem:[%s406_s0 + $0x70] sm:$0xff]  ;;  %v67_v16 = vld [vmem:[%s406_s0 + $0x1d8] sm:$0xff]  ;;  %v45_v19 = vld [vmem:[%s406_s0 + $0x128] sm:$0xff] }
  0x11   :  { %v87_v56 = vmax.f32 %v86_v45, %v72_v31  ;;  %v95_v9 = vmax.f32 %v94_v62, %v73_v47  ;;  %v30_v14 = vld [vmem:[%s406_s0 + $0xb0] sm:$0xff]  ;;  %v75_v17 = vld [vmem:[%s406_s0 + $0x218] sm:$0xff]  ;;  %v128_v20 = vmax.f32 %v14_v12, %v22_v13  ;;  %v109_v21 = vmax.f32 %v108_v10, %v59_v5  ;;  %v60_v22 = vld [vmem:[%s406_s0 + $0x1a0] sm:$0xff] }
  0x12   :  { %v115_v18 = vmax.f32 %v114_v7, %v44_v2  ;;  %v53_v23 = vld [vmem:[%s406_s0 + $0x168] sm:$0xff]  ;;  %v122_v24 = vmax.f32 %v121_v11, %v37_v8  ;;  %v38_v25 = vld [vmem:[%s406_s0 + $0xf0] sm:$0xff]  ;;  %v103_v26 = vmax.f32 %v102_v15, %v74_v0  ;;  %v15_v29 = vld [vmem:[%s406_s0 + $0x38] sm:$0xff] }
  0x13   :  { %144 = vst [vmem:[%s407_s1] sm:$0xff] %v87_v56  ;;  %145 = vst [vmem:[%s407_s1 + $0x8] sm:$0xff] %v95_v9  ;;  %v129_v28 = vmax.f32 %v128_v20, %v30_v14  ;;  %v23_v30 = vld [vmem:[%s406_s0 + $0x78] sm:$0xff]  ;;  %v110_v32 = vmax.f32 %v109_v21, %v67_v16  ;;  %v68_v33 = vld [vmem:[%s406_s0 + $0x1e0] sm:$0xff] }
  0x14   :  { %v116_v27 = vmax.f32 %v115_v18, %v52_v6  ;;  %v31_v31 = vld [vmem:[%s406_s0 + $0xb8] sm:$0xff]  ;;  %v123_v34 = vmax.f32 %v122_v24, %v45_v19  ;;  %v46_v35 = vld [vmem:[%s406_s0 + $0x130] sm:$0xff]  ;;  %v136_v36 = vmax.f32 %v15_v29, %v23_v30  ;;  %146 = vst [vmem:[%s407_s1 + $0x10] sm:$0xff] %v103_v26  ;;  %v61_v38 = vld [vmem:[%s406_s0 + $0x1a8] sm:$0xff] }
  0x15   :  { %v130_v39 = vmax.f32 %v129_v28, %v38_v25  ;;  %v39_v40 = vld [vmem:[%s406_s0 + $0xf8] sm:$0xff]  ;;  %v111_v41 = vmax.f32 %v110_v32, %v75_v17  ;;  %v76_v42 = vld [vmem:[%s406_s0 + $0x220] sm:$0xff]  ;;  %v54_v44 = vld [vmem:[%s406_s0 + $0x170] sm:$0xff] }
  0x16   :  { %v117_v37 = vmax.f32 %v116_v27, %v60_v22  ;;  %v124_v43 = vmax.f32 %v123_v34, %v53_v23  ;;  %v137_v45 = vmax.f32 %v136_v36, %v31_v31  ;;  %v69_v47 = vld [vmem:[%s406_s0 + $0x1e8] sm:$0xff]  ;;  %v47_v49 = vld [vmem:[%s406_s0 + $0x138] sm:$0xff]  ;;  %v62_v51 = vld [vmem:[%s406_s0 + $0x1b0] sm:$0xff] }
  0x17   :  { %v131_v48 = vmax.f32 %v130_v39, %v46_v35  ;;  %147 = vst [vmem:[%s407_s1 + $0x18] sm:$0xff] %v111_v41  ;;  %v77_v54 = vld [vmem:[%s406_s0 + $0x228] sm:$0xff]  ;;  %v55_v56 = vld [vmem:[%s406_s0 + $0x178] sm:$0xff]  ;;  %v70_v58 = vld [vmem:[%s406_s0 + $0x1f0] sm:$0xff] }
  0x18   :  { %v118_v46 = vmax.f32 %v117_v37, %v68_v33  ;;  %v125_v50 = vmax.f32 %v124_v43, %v61_v38  ;;  %v138_v52 = vmax.f32 %v137_v45, %v39_v40  ;;  %v63_v61 = vld [vmem:[%s406_s0 + $0x1b8] sm:$0xff]  ;;  %v78_v63 = vld [vmem:[%s406_s0 + $0x230] sm:$0xff] }
  0x19   :  { %v132_v55 = vmax.f32 %v131_v48, %v54_v44  ;;  %v71_v2 = vld [vmem:[%s406_s0 + $0x1f8] sm:$0xff] }
  0x1a   :  { %v119_v53 = vmax.f32 %v118_v46, %v76_v42  ;;  %v126_v57 = vmax.f32 %v125_v50, %v69_v47  ;;  %v139_v59 = vmax.f32 %v138_v52, %v47_v49  ;;  %v79_v5 = vld [vmem:[%s406_s0 + $0x238] sm:$0xff] }
  0x1b   :  { %v133_v60 = vmax.f32 %v132_v55, %v62_v51 }
  0x1c   :  { %148 = vst [vmem:[%s407_s1 + $0x20] sm:$0xff] %v119_v53  ;;  %v127_v62 = vmax.f32 %v126_v57, %v77_v54  ;;  %v140_v0 = vmax.f32 %v139_v59, %v55_v56 }
  0x1d   :  { %v134_v1 = vmax.f32 %v133_v60, %v70_v58 }
  0x1e   :  { %149 = vst [vmem:[%s407_s1 + $0x28] sm:$0xff] %v127_v62  ;;  %v141_v3 = vmax.f32 %v140_v0, %v63_v61 }
  0x1f   :  { %v135_v4 = vmax.f32 %v134_v1, %v78_v63 }
  0x20   :  { %v142_v6 = vmax.f32 %v141_v3, %v71_v2 }
  0x21   :  { %150 = vst [vmem:[%s407_s1 + $0x30] sm:$0xff] %v135_v4 }
  0x22   :  { %v143_v7 = vmax.f32 %v142_v6, %v79_v5 }
  0x24   :  { %151 = vst [vmem:[%s407_s1 + $0x38] sm:$0xff] %v143_v7 }

// kernel: resnet50_fpn_forward.47
= control target key start
LH: loop header
LB: loop body
LE: loop exit
PB: predicated region body
PF: predicated region fallthrough
CT: control target
= control target key end

     0   :  { %s602_s1 = inlined_call_operand.vmem [shape: bf16[128,128], index: 1, kind: input, shape index: {}]   ;;  %s603_s0 = inlined_call_operand.vmem [shape: bf16[128,128], index: 0, kind: input, shape index: {}]   ;;  %s604_s2 = inlined_call_operand.vmem [shape: f32[1,128], index: 2, kind: input, shape index: {}]   ;;  %s605_s3 = inlined_call_operand.vmem [shape: f32[128,128], index: 3, kind: output, shape index: {}]  }
   0x1   :  { %v467_v0 = vld [vmem:[%s602_s1] sm:$0xff]   ;;  %v468_v1 = vld [vmem:[%s602_s1 + $0x8] sm:$0xff]   ;;  %v469_v2 = vld [vmem:[%s602_s1 + $0x10] sm:$0xff]  }
   0x2   :  { %419 = vmatprep.subr.bf16.mxu0 %v467_v0  ;;  %451 = vmatprep.subr.bf16.mxu1 %v467_v0  ;;  %v470_v3 = vld [vmem:[%s602_s1 + $0x18] sm:$0xff]   ;;  %v475_v4 = vld [vmem:[%s603_s0] sm:$0xff]   ;;  %v472_v7 = vld [vmem:[%s602_s1 + $0x28] sm:$0xff]  }
   0x3   :  { %420 = vmatpush3.bf16.msra.mxu0 %v467_v0  ;;  %459 = vmatpush3.bf16.msra.mxu1 %v467_v0  ;;  %v476_v5 = vld [vmem:[%s603_s0 + $0x20] sm:$0xff]   ;;  %v473_v8 = vld [vmem:[%s602_s1 + $0x30] sm:$0xff]   ;;  %v474_v9 = vld [vmem:[%s602_s1 + $0x38] sm:$0xff]  }
   0x4   :  { %421 = vmatprep.subr.bf16.mxu0 %v468_v1  ;;  %452 = vmatprep.subr.bf16.mxu1 %v468_v1  ;;  %v471_v6 = vld [vmem:[%s602_s1 + $0x20] sm:$0xff]   ;;  %v477_v10 = vld [vmem:[%s603_s0 + $0x8] sm:$0xff]   ;;  %v479_v12 = vld [vmem:[%s603_s0 + $0x10] sm:$0xff]  }
   0x5   :  { %435 = vmatprep.mubr.bf16.mxu0 %v475_v4  ;;  %443 = vmatprep.mubr.bf16.mxu1 %v476_v5  ;;  %v478_v11 = vld [vmem:[%s603_s0 + $0x28] sm:$0xff]   ;;  %v480_v13 = vld [vmem:[%s603_s0 + $0x30] sm:$0xff]   ;;  %v481_v14 = vld [vmem:[%s603_s0 + $0x18] sm:$0xff]  }
   0x6   :  { %v482_v15 = vld [vmem:[%s603_s0 + $0x38] sm:$0xff]   ;;  %v402_v16 = vld [vmem:[%s604_s2] ss:$0 sm:$0xff] }
   0x7   :  { %422 = vmatpush3.bf16.msra.mxu0 %v468_v1  ;;  %460 = vmatpush3.bf16.msra.mxu1 %v468_v1 }
   0x8   :  { %423 = vmatprep.subr.bf16.mxu0 %v469_v2  ;;  %453 = vmatprep.subr.bf16.mxu1 %v469_v2 }
   0xb   :  { %424 = vmatpush3.bf16.msra.mxu0 %v469_v2  ;;  %461 = vmatpush3.bf16.msra.mxu1 %v469_v2 }
   0xc   :  { %425 = vmatprep.subr.bf16.mxu0 %v470_v3  ;;  %454 = vmatprep.subr.bf16.mxu1 %v470_v3 }
   0xf   :  { %426 = vmatpush3.bf16.msra.mxu0 %v470_v3  ;;  %462 = vmatpush3.bf16.msra.mxu1 %v470_v3 }
  0x10   :  { %427 = vmatprep.subr.bf16.mxu0 %v471_v6  ;;  %455 = vmatprep.subr.bf16.mxu1 %v471_v6 }
  0x13   :  { %428 = vmatpush3.bf16.msra.mxu0 %v471_v6  ;;  %463 = vmatpush3.bf16.msra.mxu1 %v471_v6 }
  0x14   :  { %429 = vmatprep.subr.bf16.mxu0 %v472_v7  ;;  %456 = vmatprep.subr.bf16.mxu1 %v472_v7 }
  0x17   :  { %430 = vmatpush3.bf16.msra.mxu0 %v472_v7  ;;  %464 = vmatpush3.bf16.msra.mxu1 %v472_v7 }
  0x18   :  { %431 = vmatprep.subr.bf16.mxu0 %v473_v8  ;;  %457 = vmatprep.subr.bf16.mxu1 %v473_v8 }
  0x1b   :  { %432 = vmatpush3.bf16.msra.mxu0 %v473_v8  ;;  %465 = vmatpush3.bf16.msra.mxu1 %v473_v8 }
  0x1c   :  { %433 = vmatprep.subr.bf16.mxu0 %v474_v9  ;;  %458 = vmatprep.subr.bf16.mxu1 %v474_v9 }
  0x1f   :  { %434 = vmatpush3.bf16.msra.mxu0 %v474_v9  ;;  %466 = vmatpush3.bf16.msra.mxu1 %v474_v9 }
  0x22   :  { %436 = vmatmul.mubr.bf16.vlgmr.msra.gmra.mrb[0].mxu0 %v477_v10  ;;  %444 = vmatmul.mubr.bf16.vlgmr.msra.gmra.mrb[0].mxu1 %v478_v11 }
  0x23   :  { %439 = vmatprep.mubr.bf16.mxu0 %v479_v12  ;;  %447 = vmatprep.mubr.bf16.mxu1 %v480_v13 }
  0x2a   :  { %440 = vmatmul.mubr.bf16.gmra.mrb[4].mxu0 %v481_v14  ;;  %448 = vmatmul.mubr.bf16.gmra.mrb[4].mxu1 %v482_v15 }
  0xf5   :  { %v437_v17 = vpop.f32.mrb[0].mxu0  ;;  %v445_v18 = vpop.f32.mrb[0].mxu1 }
  0xf6   :  { %v336_v19 = vadd.f32 %v437_v17, %v402_v16  ;;  %v344_v20 = vadd.f32 %v445_v18, %v402_v16  ;;  %v213_v21 = vpop.f32.mrb[1].mxu0  ;;  %v245_v22 = vpop.f32.mrb[1].mxu1 }
  0xf7   :  { %v334_v23 = vadd.f32 %v402_v16, %v213_v21  ;;  %v342_v24 = vadd.f32 %v402_v16, %v245_v22  ;;  %v438_v25 = vpop.f32.mrb[2].mxu0  ;;  %v446_v26 = vpop.f32.mrb[2].mxu1 }
  0xf8   :  { %v352_v27 = vmax.f32 %v336_v19, 0.0  ;;  %v360_v28 = vmax.f32 %v344_v20, 0.0  ;;  %v337_v29 = vadd.f32 %v438_v25, %v402_v16  ;;  %v345_v30 = vadd.f32 %v446_v26, %v402_v16  ;;  %v216_v31 = vpop.f32.mrb[3].mxu0  ;;  %v248_v32 = vpop.f32.mrb[3].mxu1 }
  0xf9   :  { %v350_v33 = vmax.f32 %v334_v23, 0.0  ;;  %v358_v34 = vmax.f32 %v342_v24, 0.0  ;;  %v335_v35 = vadd.f32 %v402_v16, %v216_v31  ;;  %v343_v36 = vadd.f32 %v402_v16, %v248_v32 }
  0xfa   :  { %368 = vst [vmem:[%s605_s3 + $0x10] sm:$0xff] %v352_v27  ;;  %376 = vst [vmem:[%s605_s3 + $0x50] sm:$0xff] %v360_v28  ;;  %v353_v37 = vmax.f32 %v337_v29, 0.0  ;;  %v361_v38 = vmax.f32 %v345_v30, 0.0 }
  0xfb   :  { %366 = vst [vmem:[%s605_s3] sm:$0xff] %v350_v33  ;;  %374 = vst [vmem:[%s605_s3 + $0x40] sm:$0xff] %v358_v34  ;;  %v351_v39 = vmax.f32 %v335_v35, 0.0  ;;  %v359_v40 = vmax.f32 %v343_v36, 0.0 }
  0xfc   :  { %369 = vst [vmem:[%s605_s3 + $0x18] sm:$0xff] %v353_v37  ;;  %377 = vst [vmem:[%s605_s3 + $0x58] sm:$0xff] %v361_v38 }
  0xfd   :  { %367 = vst [vmem:[%s605_s3 + $0x8] sm:$0xff] %v351_v39  ;;  %375 = vst [vmem:[%s605_s3 + $0x48] sm:$0xff] %v359_v40  ;;  %v441_v41 = vpop.f32.mrb[4].mxu0  ;;  %v449_v42 = vpop.f32.mrb[4].mxu1 }
  0xfe   :  { %v340_v43 = vadd.f32 %v441_v41, %v402_v16  ;;  %v348_v44 = vadd.f32 %v449_v42, %v402_v16  ;;  %v229_v45 = vpop.f32.mrb[5].mxu0  ;;  %v261_v46 = vpop.f32.mrb[5].mxu1 }
  0xff   :  { %v338_v47 = vadd.f32 %v402_v16, %v229_v45  ;;  %v346_v48 = vadd.f32 %v402_v16, %v261_v46  ;;  %v442_v49 = vpop.f32.mrb[6].mxu0  ;;  %v450_v50 = vpop.f32.mrb[6].mxu1 }
 0x100   :  { %v356_v51 = vmax.f32 %v340_v43, 0.0  ;;  %v364_v52 = vmax.f32 %v348_v44, 0.0  ;;  %v341_v53 = vadd.f32 %v442_v49, %v402_v16  ;;  %v349_v54 = vadd.f32 %v450_v50, %v402_v16  ;;  %v232_v55 = vpop.f32.mrb[7].mxu0  ;;  %v264_v56 = vpop.f32.mrb[7].mxu1 }
 0x101   :  { %v354_v57 = vmax.f32 %v338_v47, 0.0  ;;  %v362_v58 = vmax.f32 %v346_v48, 0.0  ;;  %v339_v59 = vadd.f32 %v402_v16, %v232_v55  ;;  %v347_v60 = vadd.f32 %v402_v16, %v264_v56 }
 0x102   :  { %372 = vst [vmem:[%s605_s3 + $0x30] sm:$0xff] %v356_v51  ;;  %380 = vst [vmem:[%s605_s3 + $0x70] sm:$0xff] %v364_v52  ;;  %v357_v61 = vmax.f32 %v341_v53, 0.0  ;;  %v365_v62 = vmax.f32 %v349_v54, 0.0 }
 0x103   :  { %370 = vst [vmem:[%s605_s3 + $0x20] sm:$0xff] %v354_v57  ;;  %378 = vst [vmem:[%s605_s3 + $0x60] sm:$0xff] %v362_v58  ;;  %v355_v63 = vmax.f32 %v339_v59, 0.0  ;;  %v363_v0 = vmax.f32 %v347_v60, 0.0 }
 0x104   :  { %373 = vst [vmem:[%s605_s3 + $0x38] sm:$0xff] %v357_v61  ;;  %381 = vst [vmem:[%s605_s3 + $0x78] sm:$0xff] %v365_v62 }
 0x105   :  { %371 = vst [vmem:[%s605_s3 + $0x28] sm:$0xff] %v355_v63  ;;  %379 = vst [vmem:[%s605_s3 + $0x68] sm:$0xff] %v363_v0 }

// kernel: resnet50_fpn_forward.48
= control target key start
LH: loop header
LB: loop body
LE: loop exit
PB: predicated region body
PF: predicated region fallthrough
CT: control target
= control target key end

     0   :  { %s1625_s12 = smov 0   ;;  %s1627_s13 = smov 0   ;;  %s1879_s0 = inlined_call_operand.vmem [shape: bf16[128,1024], index: 0, kind: input, shape index: {}]   ;;  %s1880_s1 = inlined_call_operand.vmem [shape: bf16[1024,128], index: 1, kind: input, shape index: {}]   ;;  %s1881_s2 = inlined_call_operand.vmem [shape: f32[1,128], index: 2, kind: input, shape index: {}]   ;;  %s1882_s3 = inlined_call_operand.vmem [shape: f32[128,128], index: 3, kind: output, shape index: {}]  }
   0x1   :  { %s1629_s14 = smov 0   ;;  %s1631_s15 = smov 0  }
   0x2   :  { %s1633_s16 = smov 0  }
   0x3 LB: > { %s25_s17 = sadd.s32 1, %s1598_s15  ;;  %p48_p1 = scmp.ne.s32.totalorder %s1590_s13, %s1586_s12  ;;  %s1602_s16 = sphi %s1633_s16, %s13_s16   ;;  %s1598_s15 = sphi %s1631_s15, %s1886_s15   ;;  %s1594_s14 = sphi %s1629_s14, %s1885_s14   ;;  %s1590_s13 = sphi %s1627_s13, %s1884_s13   ;;  %s1586_s12 = sphi %s1625_s12, %s1883_s12  }
   0x4   : > { %p26_p0 = scmp.ge.s32.totalorder %s25_s17, 2  ;;  %p49_p2 = scmp.eq.s32.totalorder %s1602_s16, 0 }
   0x5   : > { %s41_s19 = sadd.s32 1, %s1590_s13  ;;  %p1235_p5 = scmp.ge.s32.totalorder %s1602_s16, 2 }
   0x6   : > { %s1888_s17 = smov (%p26_p0, %s25_s17), 0  ;;  %p50_p3 = por %p49_p2, %p48_p1 }
   0x7   : > { %s37_s18 = ssub.s32 %s1598_s15, %s1888_s17  ;;  %162 = sbr.rel (%p1235_p5) target bundleno = 34 (0x22), region = 20 }
   0x8   : > { %p39_p4 = scmp.eq.s32.totalorder %s37_s18, 0 }
   0xa   : > { %s1660_s20 = scalar_select %p39_p4, %s1590_s13, %s41_s19  }
   0xe   : > { %165 = sbr.rel (!%p50_p3) target bundleno = 34 (0x22), region = 24  ;;  %s167_s21 = sand.u32 (%p50_p3), 1, %s1590_s13  }
   0xf   : > { %s1314_s22 = sshll.u32 (%p50_p3), %s1598_s15, 4  ;;  %s1236_s23 = sshll.u32 (%p50_p3), %s167_s21, 8 }
  0x10   : > { %s1668_s26 = scalar_lea.vmem (%p50_p3), %s1879_s0, %s1314_s22  ;;  %s1673_s27 = scalar_lea.vmem (%p50_p3), [#allocation3], %s1236_s23 }
  0x11   : > { %v188_v0 = vld [vmem:[%s1668_s26] sm:$0xff] (%p50_p3)  ;;  %v190_v1 = vld [vmem:[%s1668_s26 + $0x8] sm:$0xff] (%p50_p3) }
  0x12   : > { %v192_v2 = vld [vmem:[%s1668_s26 + $0x20] sm:$0xff] (%p50_p3)  ;;  %189 = vst [vmem:[%s1673_s27] sm:$0xff] (%p50_p3), %v188_v0  ;;  %191 = vst [vmem:[%s1673_s27 + $0x8] sm:$0xff] (%p50_p3), %v190_v1  ;;  %v194_v3 = vld [vmem:[%s1668_s26 + $0x28] sm:$0xff] (%p50_p3) }
  0x13   : > { %193 = vst [vmem:[%s1673_s27 + $0x10] sm:$0xff] (%p50_p3), %v192_v2  ;;  %v196_v4 = vld [vmem:[%s1668_s26 + $0x40] sm:$0xff] (%p50_p3)  ;;  %v198_v5 = vld [vmem:[%s1668_s26 + $0x48] sm:$0xff] (%p50_p3)  ;;  %195 = vst [vmem:[%s1673_s27 + $0x18] sm:$0xff] (%p50_p3), %v194_v3 }
  0x14   : > { %197 = vst [vmem:[%s1673_s27 + $0x20] sm:$0xff] (%p50_p3), %v196_v4  ;;  %199 = vst [vmem:[%s1673_s27 + $0x28] sm:$0xff] (%p50_p3), %v198_v5  ;;  %v200_v6 = vld [vmem:[%s1668_s26 + $0x60] sm:$0xff] (%p50_p3)  ;;  %v202_v7 = vld [vmem:[%s1668_s26 + $0x68] sm:$0xff] (%p50_p3) }
  0x15   : > { %v204_v8 = vld [vmem:[%s1668_s26 + $0x80] sm:$0xff]  ;;  %201 = vst [vmem:[%s1673_s27 + $0x30] sm:$0xff] %v200_v6  ;;  %203 = vst [vmem:[%s1673_s27 + $0x38] sm:$0xff] %v202_v7  ;;  %v206_v9 = vld [vmem:[%s1668_s26 + $0x88] sm:$0xff] }
  0x16   : > { %205 = vst [vmem:[%s1673_s27 + $0x40] sm:$0xff] %v204_v8  ;;  %v208_v10 = vld [vmem:[%s1668_s26 + $0xa0] sm:$0xff]  ;;  %v210_v11 = vld [vmem:[%s1668_s26 + $0xa8] sm:$0xff]  ;;  %207 = vst [vmem:[%s1673_s27 + $0x48] sm:$0xff] %v206_v9 }
  0x17   : > { %209 = vst [vmem:[%s1673_s27 + $0x50] sm:$0xff] %v208_v10  ;;  %211 = vst [vmem:[%s1673_s27 + $0x58] sm:$0xff] %v210_v11  ;;  %v212_v12 = vld [vmem:[%s1668_s26 + $0xc0] sm:$0xff]  ;;  %v214_v13 = vld [vmem:[%s1668_s26 + $0xc8] sm:$0xff] }
  0x18   : > { %v216_v14 = vld [vmem:[%s1668_s26 + $0xe0] sm:$0xff]  ;;  %213 = vst [vmem:[%s1673_s27 + $0x60] sm:$0xff] %v212_v12  ;;  %215 = vst [vmem:[%s1673_s27 + $0x68] sm:$0xff] %v214_v13  ;;  %v218_v15 = vld [vmem:[%s1668_s26 + $0xe8] sm:$0xff] }
  0x19   : > { %217 = vst [vmem:[%s1673_s27 + $0x70] sm:$0xff] %v216_v14  ;;  %v220_v16 = vld [vmem:[%s1668_s26 + $0x100] sm:$0xff]  ;;  %v222_v17 = vld [vmem:[%s1668_s26 + $0x108] sm:$0xff]  ;;  %219 = vst [vmem:[%s1673_s27 + $0x78] sm:$0xff] %v218_v15 }
  0x1a   : > { %221 = vst [vmem:[%s1673_s27 + $0x80] sm:$0xff] %v220_v16  ;;  %223 = vst [vmem:[%s1673_s27 + $0x88] sm:$0xff] %v222_v17  ;;  %v224_v18 = vld [vmem:[%s1668_s26 + $0x120] sm:$0xff]  ;;  %v226_v19 = vld [vmem:[%s1668_s26 + $0x128] sm:$0xff] }
  0x1b   : > { %v228_v20 = vld [vmem:[%s1668_s26 + $0x140] sm:$0xff]  ;;  %225 = vst [vmem:[%s1673_s27 + $0x90] sm:$0xff] %v224_v18  ;;  %227 = vst [vmem:[%s1673_s27 + $0x98] sm:$0xff] %v226_v19  ;;  %v230_v21 = vld [vmem:[%s1668_s26 + $0x148] sm:$0xff] }
  0x1c   : > { %229 = vst [vmem:[%s1673_s27 + $0xa0] sm:$0xff] %v228_v20  ;;  %v232_v22 = vld [vmem:[%s1668_s26 + $0x160] sm:$0xff]  ;;  %v234_v23 = vld [vmem:[%s1668_s26 + $0x168] sm:$0xff]  ;;  %231 = vst [vmem:[%s1673_s27 + $0xa8] sm:$0xff] %v230_v21 }
  0x1d   : > { %233 = vst [vmem:[%s1673_s27 + $0xb0] sm:$0xff] %v232_v22  ;;  %235 = vst [vmem:[%s1673_s27 + $0xb8] sm:$0xff] %v234_v23  ;;  %v236_v24 = vld [vmem:[%s1668_s26 + $0x180] sm:$0xff]  ;;  %v238_v25 = vld [vmem:[%s1668_s26 + $0x188] sm:$0xff] }
  0x1e   : > { %v240_v26 = vld [vmem:[%s1668_s26 + $0x1a0] sm:$0xff]  ;;  %237 = vst [vmem:[%s1673_s27 + $0xc0] sm:$0xff] %v236_v24  ;;  %239 = vst [vmem:[%s1673_s27 + $0xc8] sm:$0xff] %v238_v25  ;;  %v242_v27 = vld [vmem:[%s1668_s26 + $0x1a8] sm:$0xff] }
  0x1f   : > { %241 = vst [vmem:[%s1673_s27 + $0xd0] sm:$0xff] %v240_v26  ;;  %v244_v28 = vld [vmem:[%s1668_s26 + $0x1c0] sm:$0xff]  ;;  %v246_v29 = vld [vmem:[%s1668_s26 + $0x1c8] sm:$0xff]  ;;  %243 = vst [vmem:[%s1673_s27 + $0xd8] sm:$0xff] %v242_v27 }
  0x20   : > { %245 = vst [vmem:[%s1673_s27 + $0xe0] sm:$0xff] %v244_v28  ;;  %247 = vst [vmem:[%s1673_s27 + $0xe8] sm:$0xff] %v246_v29  ;;  %v248_v30 = vld [vmem:[%s1668_s26 + $0x1e0] sm:$0xff]  ;;  %v250_v31 = vld [vmem:[%s1668_s26 + $0x1e8] sm:$0xff] }
  0x21   : > { %249 = vst [vmem:[%s1673_s27 + $0xf0] sm:$0xff] %v248_v30  ;;  %251 = vst [vmem:[%s1673_s27 + $0xf8] sm:$0xff] %v250_v31 }
  0x22 PF: > { %p1239_p6 = scmp.ge.s32.totalorder %s1602_s16, 1  ;;  %p268_p7 = scmp.lt.s32.totalorder %s1602_s16, 3 }
  0x24   : > { %p269_p8 = pnand %p1239_p6, %p268_p7 }
  0x25   : > { %s275_s28 = sand.u32 (!%p269_p8), 1, %s1586_s12   ;;  %s1241_s29 = sshll.u32 (!%p269_p8), %s1594_s14, 6 }
  0x26   : > { %272 = sbr.rel (%p269_p8) target bundleno = 380 (0x17c), region = 51  ;;  %s1240_s30 = sshll.u32 (!%p269_p8), %s275_s28, 8 }
  0x27   : > { %p315_p9 = scmp.lt.s32.totalorder (!%p269_p8), %s1241_s29, 127  ;;  %s1745_s8 = scalar_lea.vmem (!%p269_p8), [#allocation3], %s1240_s30 }
  0x28   : > { %p1243_p10 = scmp.ne.s32.totalorder (!%p269_p8), %s1594_s14, 0 }
  0x2d   : > { %s1890_s29 = smov (!%p315_p9, %s1241_s29), 127  ;;  %339 = sbr.rel (%p1243_p10) target bundleno = 55 (0x37), region = 59 }
  0x2e   : > { %s1242_s4 = sshll.u32 %s1890_s29, 2  ;;  %v1604_v32 = vmov (!%p1243_p10), 0.0  }
  0x2f   : > { %s1743_s7 = scalar_lea.vmem %s1880_s1, %s1242_s4  ;;  %340 = vst [vmem:[#allocation2] sm:$0xff] (!%p1243_p10), %v1604_v32  ;;  %341 = vst [vmem:[#allocation2 + $0x8] sm:$0xff] (!%p1243_p10), %v1604_v32 }
  0x30   : > { %342 = vst [vmem:[#allocation2 + $0x10] sm:$0xff] (!%p1243_p10), %v1604_v32  ;;  %343 = vst [vmem:[#allocation2 + $0x18] sm:$0xff] (!%p1243_p10), %v1604_v32 }
  0x31   : > { %344 = vst [vmem:[#allocation2 + $0x20] sm:$0xff] (!%p1243_p10), %v1604_v32  ;;  %345 = vst [vmem:[#allocation2 + $0x28] sm:$0xff] (!%p1243_p10), %v1604_v32 }
  0x32   : > { %346 = vst [vmem:[#allocation2 + $0x30] sm:$0xff] (!%p1243_p10), %v1604_v32  ;;  %347 = vst [vmem:[#allocation2 + $0x38] sm:$0xff] (!%p1243_p10), %v1604_v32 }
  0x33   : > { %348 = vst [vmem:[#allocation2 + $0x40] sm:$0xff] (!%p1243_p10), %v1604_v32  ;;  %349 = vst [vmem:[#allocation2 + $0x48] sm:$0xff] (!%p1243_p10), %v1604_v32 }
  0x34   : > { %350 = vst [vmem:[#allocation2 + $0x50] sm:$0xff] %v1604_v32  ;;  %351 = vst [vmem:[#allocation2 + $0x58] sm:$0xff] %v1604_v32 }
  0x35   : > { %352 = vst [vmem:[#allocation2 + $0x60] sm:$0xff] %v1604_v32  ;;  %353 = vst [vmem:[#allocation2 + $0x68] sm:$0xff] %v1604_v32 }
  0x36   : > { %354 = vst [vmem:[#allocation2 + $0x70] sm:$0xff] %v1604_v32  ;;  %355 = vst [vmem:[#allocation2 + $0x78] sm:$0xff] %v1604_v32 }
  0x37 PF: > { %v1484_v33 = vld [vmem:[%s1743_s7 + $0x40] sm:$0xff]   ;;  %v1488_v37 = vld [vmem:[%s1743_s7 + $0x48] sm:$0xff]   ;;  %v1492_v41 = vld [vmem:[%s1743_s7 + $0x50] sm:$0xff]   ;;  %p1308_p11 = scmp.ne.s32.totalorder %s1594_s14, 1 }
  0x38   : > { %v1485_v34 = vld [vmem:[%s1743_s7 + $0xc0] sm:$0xff]   ;;  %1315 = vmatprep.subr.bf16.mxu0 %v1484_v33  ;;  %v1489_v38 = vld [vmem:[%s1743_s7 + $0xc8] sm:$0xff]   ;;  %v1493_v42 = vld [vmem:[%s1743_s7 + $0xd0] sm:$0xff]  }
  0x39   : > { %v1486_v35 = vld [vmem:[%s1743_s7] sm:$0xff]   ;;  %1379 = vmatprep.subr.bf16.mxu1 %v1485_v34  ;;  %v1490_v39 = vld [vmem:[%s1743_s7 + $0x8] sm:$0xff]   ;;  %v1494_v43 = vld [vmem:[%s1743_s7 + $0x10] sm:$0xff]  }
  0x3a   : > { %v1487_v36 = vld [vmem:[%s1743_s7 + $0x80] sm:$0xff]   ;;  %1316 = vmatpush3.bf16.msra.mxu0 %v1486_v35  ;;  %v1491_v40 = vld [vmem:[%s1743_s7 + $0x88] sm:$0xff]   ;;  %v1495_v44 = vld [vmem:[%s1743_s7 + $0x90] sm:$0xff]  }
  0x3b   : > { %1380 = vmatpush3.bf16.msra.mxu1 %v1487_v36  ;;  %1317 = vmatprep.subr.bf16.mxu0 %v1488_v37  ;;  %v1496_v45 = vld [vmem:[%s1743_s7 + $0x58] sm:$0xff]   ;;  %v1500_v49 = vld [vmem:[%s1743_s7 + $0x60] sm:$0xff]   ;;  %v1504_v53 = vld [vmem:[%s1743_s7 + $0x68] sm:$0xff]  }
  0x3c   : > { %1381 = vmatprep.subr.bf16.mxu1 %v1489_v38  ;;  %v1497_v46 = vld [vmem:[%s1743_s7 + $0xd8] sm:$0xff]   ;;  %v1501_v50 = vld [vmem:[%s1743_s7 + $0xe0] sm:$0xff]   ;;  %v1505_v54 = vld [vmem:[%s1743_s7 + $0xe8] sm:$0xff]  }
  0x3d   : > { %v1498_v47 = vld [vmem:[%s1743_s7 + $0x18] sm:$0xff]   ;;  %v1502_v51 = vld [vmem:[%s1743_s7 + $0x20] sm:$0xff]   ;;  %v1506_v55 = vld [vmem:[%s1743_s7 + $0x28] sm:$0xff]  }
  0x3e   : > { %1318 = vmatpush3.bf16.msra.mxu0 %v1490_v39  ;;  %v1499_v48 = vld [vmem:[%s1743_s7 + $0x98] sm:$0xff]   ;;  %v1503_v52 = vld [vmem:[%s1743_s7 + $0xa0] sm:$0xff]   ;;  %v1507_v56 = vld [vmem:[%s1743_s7 + $0xa8] sm:$0xff]  }
  0x3f   : > { %1382 = vmatpush3.bf16.msra.mxu1 %v1491_v40  ;;  %1319 = vmatprep.subr.bf16.mxu0 %v1492_v41  ;;  %v1508_v57 = vld [vmem:[%s1743_s7 + $0x70] sm:$0xff]   ;;  %v1512_v61 = vld [vmem:[%s1743_s7 + $0x78] sm:$0xff]  }
  0x40   : > { %1383 = vmatprep.subr.bf16.mxu1 %v1493_v42  ;;  %v1509_v58 = vld [vmem:[%s1743_s7 + $0xf0] sm:$0xff]   ;;  %v1513_v62 = vld [vmem:[%s1743_s7 + $0xf8] sm:$0xff]   ;;  %v356_v42 = vld [vmem:[#allocation2] sm:$0xff] }
  0x41   : > { %v1510_v59 = vld [vmem:[%s1743_s7 + $0x30] sm:$0xff]   ;;  %v1514_v63 = vld [vmem:[%s1743_s7 + $0x38] sm:$0xff]  }
  0x42   : > { %1320 = vmatpush3.bf16.msra.mxu0 %v1494_v43  ;;  %v1511_v60 = vld [vmem:[%s1743_s7 + $0xb0] sm:$0xff]   ;;  %v1515_v0 = vld [vmem:[%s1743_s7 + $0xb8] sm:$0xff]  }
  0x43   : > { %1384 = vmatpush3.bf16.msra.mxu1 %v1495_v44  ;;  %1321 = vmatprep.subr.bf16.mxu0 %v1496_v45  ;;  %v1516_v1 = vld [vmem:[%s1745_s8] ss:$16 sps:$4 sm:$0xff]   ;;  %v1518_v2 = vld [vmem:[%s1745_s8 + $0x4] ss:$16 sps:$4 sm:$0xff]   ;;  %v1519_v3 = vld [vmem:[%s1745_s8 + $0x8] ss:$16 sps:$4 sm:$0xff]  }
  0x44   : > { %1385 = vmatprep.subr.bf16.mxu1 %v1497_v46  ;;  %v1521_v4 = vld [vmem:[%s1745_s8 + $0xc] ss:$16 sps:$4 sm:$0xff]   ;;  %852 = vmatprep.mubr.bf16.mxu0 %v1518_v2  ;;  %v1522_v5 = vld [vmem:[%s1745_s8 + $0x24] ss:$16 sps:$4 sm:$0xff]   ;;  %v1526_v7 = vld [vmem:[%s1745_s8 + $0x20] ss:$16 sps:$4 sm:$0xff]  }
  0x45   : > { %949 = vmatprep.mubr.bf16.mxu1 %v1521_v4  ;;  %v1524_v6 = vld [vmem:[%s1745_s8 + $0x2c] ss:$16 sps:$4 sm:$0xff]   ;;  %v1527_v8 = vld [vmem:[%s1745_s8 + $0x28] ss:$16 sps:$4 sm:$0xff]   ;;  %v1528_v9 = vld [vmem:[%s1745_s8 + $0x44] ss:$16 sps:$4 sm:$0xff]  }
  0x46   : > { %1322 = vmatpush3.bf16.msra.mxu0 %v1498_v47  ;;  %v1530_v10 = vld [vmem:[%s1745_s8 + $0x4c] ss:$16 sps:$4 sm:$0xff]   ;;  %v1532_v11 = vld [vmem:[%s1745_s8 + $0x40] ss:$16 sps:$4 sm:$0xff]   ;;  %v1533_v12 = vld [vmem:[%s1745_s8 + $0x48] ss:$16 sps:$4 sm:$0xff]  }
  0x47   : > { %1386 = vmatpush3.bf16.msra.mxu1 %v1499_v48  ;;  %1323 = vmatprep.subr.bf16.mxu0 %v1500_v49  ;;  %v1534_v13 = vld [vmem:[%s1745_s8 + $0x64] ss:$16 sps:$4 sm:$0xff]   ;;  %v1536_v14 = vld [vmem:[%s1745_s8 + $0x6c] ss:$16 sps:$4 sm:$0xff]   ;;  %v1538_v15 = vld [vmem:[%s1745_s8 + $0x60] ss:$16 sps:$4 sm:$0xff]  }
  0x48   : > { %1387 = vmatprep.subr.bf16.mxu1 %v1501_v50  ;;  %v1539_v16 = vld [vmem:[%s1745_s8 + $0x68] ss:$16 sps:$4 sm:$0xff]   ;;  %v1540_v17 = vld [vmem:[%s1745_s8 + $0x84] ss:$16 sps:$4 sm:$0xff]   ;;  %v1542_v18 = vld [vmem:[%s1745_s8 + $0x8c] ss:$16 sps:$4 sm:$0xff]  }
  0x49   : > { %v1544_v19 = vld [vmem:[%s1745_s8 + $0x80] ss:$16 sps:$4 sm:$0xff]   ;;  %v1545_v20 = vld [vmem:[%s1745_s8 + $0x88] ss:$16 sps:$4 sm:$0xff]   ;;  %v1546_v21 = vld [vmem:[%s1745_s8 + $0xa4] ss:$16 sps:$4 sm:$0xff]  }
  0x4a   : > { %1324 = vmatpush3.bf16.msra.mxu0 %v1502_v51  ;;  %v1548_v22 = vld [vmem:[%s1745_s8 + $0xac] ss:$16 sps:$4 sm:$0xff]   ;;  %v1550_v23 = vld [vmem:[%s1745_s8 + $0xa0] ss:$16 sps:$4 sm:$0xff]   ;;  %v1551_v24 = vld [vmem:[%s1745_s8 + $0xa8] ss:$16 sps:$4 sm:$0xff]  }
  0x4b   : > { %1388 = vmatpush3.bf16.msra.mxu1 %v1503_v52  ;;  %1325 = vmatprep.subr.bf16.mxu0 %v1504_v53  ;;  %v1552_v25 = vld [vmem:[%s1745_s8 + $0xc4] ss:$16 sps:$4 sm:$0xff]   ;;  %v1554_v26 = vld [vmem:[%s1745_s8 + $0xcc] ss:$16 sps:$4 sm:$0xff]   ;;  %v1556_v27 = vld [vmem:[%s1745_s8 + $0xc0] ss:$16 sps:$4 sm:$0xff]  }
  0x4c   : > { %1389 = vmatprep.subr.bf16.mxu1 %v1505_v54  ;;  %v1557_v28 = vld [vmem:[%s1745_s8 + $0xc8] ss:$16 sps:$4 sm:$0xff]   ;;  %v1558_v29 = vld [vmem:[%s1745_s8 + $0xe4] ss:$16 sps:$4 sm:$0xff]   ;;  %v1560_v30 = vld [vmem:[%s1745_s8 + $0xec] ss:$16 sps:$4 sm:$0xff]  }
  0x4d   : > { %v1562_v31 = vld [vmem:[%s1745_s8 + $0xe0] ss:$16 sps:$4 sm:$0xff]   ;;  %v1563_v32 = vld [vmem:[%s1745_s8 + $0xe8] ss:$16 sps:$4 sm:$0xff]  }
  0x4e   : > { %1326 = vmatpush3.bf16.msra.mxu0 %v1506_v55  ;;  %v357_v47 = vld [vmem:[#allocation2 + $0x8] sm:$0xff] }
  0x4f   : > { %1390 = vmatpush3.bf16.msra.mxu1 %v1507_v56  ;;  %1327 = vmatprep.subr.bf16.mxu0 %v1508_v57 }
  0x50   : > { %1391 = vmatprep.subr.bf16.mxu1 %v1509_v58 }
  0x52   : > { %1328 = vmatpush3.bf16.msra.mxu0 %v1510_v59 }
  0x53   : > { %1392 = vmatpush3.bf16.msra.mxu1 %v1511_v60  ;;  %1329 = vmatprep.subr.bf16.mxu0 %v1512_v61  ;;  %v358_v60 = vld [vmem:[#allocation2 + $0x10] sm:$0xff] }
  0x54   : > { %1393 = vmatprep.subr.bf16.mxu1 %v1513_v62 }
  0x56   : > { %1330 = vmatpush3.bf16.msra.mxu0 %v1514_v63 }
  0x57   : > { %1394 = vmatpush3.bf16.msra.mxu1 %v1515_v0 }
  0x59   : > { %853 = vmatmul.mubr.bf16.vlgmr.msra.gmra.mrb[0].mxu0 %v1516_v1  ;;  %v359_v1 = vld [vmem:[#allocation2 + $0x18] sm:$0xff] }
  0x5a   : > { %950 = vmatmul.mubr.bf16.vlgmr.msra.gmra.mrb[0].mxu1 %v1519_v3  ;;  %860 = vmatprep.mubr.bf16.mxu0 %v1522_v5 }
  0x5b   : > { %957 = vmatprep.mubr.bf16.mxu1 %v1524_v6 }
  0x61   : > { %861 = vmatmul.mubr.bf16.gmra.mrb[4].mxu0 %v1526_v7 }
  0x62   : > { %958 = vmatmul.mubr.bf16.gmra.mrb[4].mxu1 %v1527_v8  ;;  %868 = vmatprep.mubr.bf16.mxu0 %v1528_v9 }
  0x63   : > { %965 = vmatprep.mubr.bf16.mxu1 %v1530_v10 }
  0x69   : > { %869 = vmatmul.mubr.bf16.gmra.mrb[8].mxu0 %v1532_v11 }
  0x6a   : > { %966 = vmatmul.mubr.bf16.gmra.mrb[8].mxu1 %v1533_v12  ;;  %876 = vmatprep.mubr.bf16.mxu0 %v1534_v13 }
  0x6b   : > { %973 = vmatprep.mubr.bf16.mxu1 %v1536_v14  ;;  %v360_v14 = vld [vmem:[#allocation2 + $0x20] sm:$0xff] }
  0x71   : > { %877 = vmatmul.mubr.bf16.gmra.mrb[12].mxu0 %v1538_v15 }
  0x72   : > { %974 = vmatmul.mubr.bf16.gmra.mrb[12].mxu1 %v1539_v16  ;;  %884 = vmatprep.mubr.bf16.mxu0 %v1540_v17 }
  0x73   : > { %981 = vmatprep.mubr.bf16.mxu1 %v1542_v18 }
  0x79   : > { %885 = vmatmul.mubr.bf16.gmra.mrb[16].mxu0 %v1544_v19  ;;  %v361_v19 = vld [vmem:[#allocation2 + $0x28] sm:$0xff] }
  0x7a   : > { %982 = vmatmul.mubr.bf16.gmra.mrb[16].mxu1 %v1545_v20  ;;  %892 = vmatprep.mubr.bf16.mxu0 %v1546_v21 }
  0x7b   : > { %989 = vmatprep.mubr.bf16.mxu1 %v1548_v22 }
  0x81   : > { %893 = vmatmul.mubr.bf16.gmra.mrb[20].mxu0 %v1550_v23 }
  0x82   : > { %990 = vmatmul.mubr.bf16.gmra.mrb[20].mxu1 %v1551_v24  ;;  %900 = vmatprep.mubr.bf16.mxu0 %v1552_v25 }
  0x83   : > { %997 = vmatprep.mubr.bf16.mxu1 %v1554_v26 }
  0x89   : > { %901 = vmatmul.mubr.bf16.gmra.mrb[24].mxu0 %v1556_v27 }
  0x8a   : > { %998 = vmatmul.mubr.bf16.gmra.mrb[24].mxu1 %v1557_v28  ;;  %908 = vmatprep.mubr.bf16.mxu0 %v1558_v29 }
  0x8b   : > { %1005 = vmatprep.mubr.bf16.mxu1 %v1560_v30 }
  0x91   : > { %909 = vmatmul.mubr.bf16.gmra.mrb[28].mxu0 %v1562_v31 }
  0x92   : > { %1006 = vmatmul.mubr.bf16.gmra.mrb[28].mxu1 %v1563_v32  ;;  %v362_v32 = vld [vmem:[#allocation2 + $0x30] sm:$0xff] }
 0x12c   : > { %v1331_v33 = vpop.f32.mrb[0].mxu0 }
 0x12d   : > { %v1395_v34 = vpop.f32.mrb[0].mxu1  ;;  %v1332_v35 = vpop.f32.mrb[1].mxu0 }
 0x12e   : > { %v1333_v36 = vadd.f32 %v1332_v35, %v1331_v33  ;;  %v1396_v37 = vpop.f32.mrb[1].mxu1  ;;  %v1334_v38 = vpop.f32.mrb[2].mxu0 }
 0x12f   : > { %v1397_v39 = vadd.f32 %v1396_v37, %v1395_v34  ;;  %v1398_v40 = vpop.f32.mrb[2].mxu1  ;;  %v1335_v41 = vpop.f32.mrb[3].mxu0  ;;  %v363_v37 = vld [vmem:[#allocation2 + $0x38] sm:$0xff] }
 0x130   : > { %v1336_v43 = vadd.f32 %v1335_v41, %v1334_v38  ;;  %v1399_v44 = vpop.f32.mrb[3].mxu1 }
 0x131   : > { %v952_v45 = vadd.f32 %v1397_v39, %v1333_v36  ;;  %v1400_v46 = vadd.f32 %v1399_v44, %v1398_v40 }
 0x133   : > { %v1014_v48 = vadd.f32 %v952_v45, %v356_v42  ;;  %v955_v49 = vadd.f32 %v1400_v46, %v1336_v43 }
 0x134   : > { %v1337_v50 = vpop.f32.mrb[4].mxu0 }
 0x135   : > { %1030 = vst [vmem:[#allocation2] sm:$0xff] %v1014_v48  ;;  %v1015_v51 = vadd.f32 %v955_v49, %v357_v47  ;;  %v1401_v52 = vpop.f32.mrb[4].mxu1  ;;  %v1338_v53 = vpop.f32.mrb[5].mxu0 }
 0x136   : > { %v1339_v54 = vadd.f32 %v1338_v53, %v1337_v50  ;;  %v1402_v55 = vpop.f32.mrb[5].mxu1  ;;  %v1340_v56 = vpop.f32.mrb[6].mxu0  ;;  %v364_v50 = vld [vmem:[#allocation2 + $0x40] sm:$0xff] }
 0x137   : > { %1031 = vst [vmem:[#allocation2 + $0x8] sm:$0xff] %v1015_v51  ;;  %v1403_v57 = vadd.f32 %v1402_v55, %v1401_v52  ;;  %v1404_v58 = vpop.f32.mrb[6].mxu1  ;;  %v1341_v59 = vpop.f32.mrb[7].mxu0  ;;  %v365_v55 = vld [vmem:[#allocation2 + $0x48] sm:$0xff] }
 0x138   : > { %v1342_v61 = vadd.f32 %v1341_v59, %v1340_v56  ;;  %v1405_v62 = vpop.f32.mrb[7].mxu1 }
 0x139   : > { %v960_v63 = vadd.f32 %v1403_v57, %v1339_v54  ;;  %v1406_v0 = vadd.f32 %v1405_v62, %v1404_v58 }
 0x13b   : > { %v1016_v2 = vadd.f32 %v960_v63, %v358_v60  ;;  %v963_v3 = vadd.f32 %v1406_v0, %v1342_v61 }
 0x13c   : > { %v1343_v4 = vpop.f32.mrb[8].mxu0 }
 0x13d   : > { %1032 = vst [vmem:[#allocation2 + $0x10] sm:$0xff] %v1016_v2  ;;  %v1017_v5 = vadd.f32 %v963_v3, %v359_v1  ;;  %v1407_v6 = vpop.f32.mrb[8].mxu1  ;;  %v1344_v7 = vpop.f32.mrb[9].mxu0 }
 0x13e   : > { %v1345_v8 = vadd.f32 %v1344_v7, %v1343_v4  ;;  %v1408_v9 = vpop.f32.mrb[9].mxu1  ;;  %v1346_v10 = vpop.f32.mrb[10].mxu0  ;;  %v366_v4 = vld [vmem:[#allocation2 + $0x50] sm:$0xff] }
 0x13f   : > { %1033 = vst [vmem:[#allocation2 + $0x18] sm:$0xff] %v1017_v5  ;;  %v1409_v11 = vadd.f32 %v1408_v9, %v1407_v6  ;;  %v1410_v12 = vpop.f32.mrb[10].mxu1  ;;  %v1347_v13 = vpop.f32.mrb[11].mxu0  ;;  %v367_v9 = vld [vmem:[#allocation2 + $0x58] sm:$0xff] }
 0x140   : > { %v1348_v15 = vadd.f32 %v1347_v13, %v1346_v10  ;;  %v1411_v16 = vpop.f32.mrb[11].mxu1 }
 0x141   : > { %v968_v17 = vadd.f32 %v1409_v11, %v1345_v8  ;;  %v1412_v18 = vadd.f32 %v1411_v16, %v1410_v12 }
 0x143   : > { %v1018_v20 = vadd.f32 %v968_v17, %v360_v14  ;;  %v971_v21 = vadd.f32 %v1412_v18, %v1348_v15 }
 0x144   : > { %v1349_v22 = vpop.f32.mrb[12].mxu0 }
 0x145   : > { %1034 = vst [vmem:[#allocation2 + $0x20] sm:$0xff] %v1018_v20  ;;  %v1019_v23 = vadd.f32 %v971_v21, %v361_v19  ;;  %v1413_v24 = vpop.f32.mrb[12].mxu1  ;;  %v1350_v25 = vpop.f32.mrb[13].mxu0 }
 0x146   : > { %v1351_v26 = vadd.f32 %v1350_v25, %v1349_v22  ;;  %v1414_v27 = vpop.f32.mrb[13].mxu1  ;;  %v1352_v28 = vpop.f32.mrb[14].mxu0  ;;  %v368_v22 = vld [vmem:[#allocation2 + $0x60] sm:$0xff] }
 0x147   : > { %1035 = vst [vmem:[#allocation2 + $0x28] sm:$0xff] %v1019_v23  ;;  %v1415_v29 = vadd.f32 %v1414_v27, %v1413_v24  ;;  %v1416_v30 = vpop.f32.mrb[14].mxu1  ;;  %v1353_v31 = vpop.f32.mrb[15].mxu0  ;;  %v369_v27 = vld [vmem:[#allocation2 + $0x68] sm:$0xff] }
 0x148   : > { %v1354_v33 = vadd.f32 %v1353_v31, %v1352_v28  ;;  %v1417_v34 = vpop.f32.mrb[15].mxu1 }
 0x149   : > { %v976_v35 = vadd.f32 %v1415_v29, %v1351_v26  ;;  %v1418_v36 = vadd.f32 %v1417_v34, %v1416_v30 }
 0x14b   : > { %v1020_v38 = vadd.f32 %v976_v35, %v362_v32  ;;  %v979_v39 = vadd.f32 %v1418_v36, %v1354_v33 }
 0x14c   : > { %v1355_v40 = vpop.f32.mrb[16].mxu0 }
 0x14d   : > { %1036 = vst [vmem:[#allocation2 + $0x30] sm:$0xff] %v1020_v38  ;;  %v1021_v41 = vadd.f32 %v979_v39, %v363_v37  ;;  %v1419_v42 = vpop.f32.mrb[16].mxu1  ;;  %v1356_v43 = vpop.f32.mrb[17].mxu0 }
 0x14e   : > { %v1357_v44 = vadd.f32 %v1356_v43, %v1355_v40  ;;  %v1420_v45 = vpop.f32.mrb[17].mxu1  ;;  %v1358_v46 = vpop.f32.mrb[18].mxu0  ;;  %v370_v40 = vld [vmem:[#allocation2 + $0x70] sm:$0xff] }
 0x14f   : > { %1037 = vst [vmem:[#allocation2 + $0x38] sm:$0xff] %v1021_v41  ;;  %v1421_v47 = vadd.f32 %v1420_v45, %v1419_v42  ;;  %v1422_v48 = vpop.f32.mrb[18].mxu1  ;;  %v1359_v49 = vpop.f32.mrb[19].mxu0  ;;  %v371_v45 = vld [vmem:[#allocation2 + $0x78] sm:$0xff] }
 0x150   : > { %v1360_v51 = vadd.f32 %v1359_v49, %v1358_v46  ;;  %v1423_v52 = vpop.f32.mrb[19].mxu1  ;;  %v1050_v49 = vld [vmem:[#allocation2] sm:$0xff] (!%p1308_p11) }
 0x151   : > { %v984_v53 = vadd.f32 %v1421_v47, %v1357_v44  ;;  %v1424_v54 = vadd.f32 %v1423_v52, %v1422_v48 }
 0x153   : > { %v1022_v56 = vadd.f32 %v984_v53, %v364_v50  ;;  %v987_v57 = vadd.f32 %v1424_v54, %v1360_v51  ;;  %v1309_v50 = vld [vmem:[%s1881_s2] ss:$0 sm:$0xff] (!%p1308_p11)  ;;  %v1051_v51 = vld [vmem:[#allocation2 + $0x8] sm:$0xff] (!%p1308_p11)  ;;  %v1052_v54 = vld [vmem:[#allocation2 + $0x10] sm:$0xff] (!%p1308_p11) }
 0x154   : > { %v1361_v58 = vpop.f32.mrb[20].mxu0  ;;  %v1073_v52 = vadd.f32 (!%p1308_p11), %v1309_v50, %v1050_v49  ;;  %v1074_v53 = vadd.f32 (!%p1308_p11), %v1309_v50, %v1051_v51 }
 0x155   : > { %1038 = vst [vmem:[#allocation2 + $0x40] sm:$0xff] %v1022_v56  ;;  %v1023_v59 = vadd.f32 %v987_v57, %v365_v55  ;;  %v1425_v60 = vpop.f32.mrb[20].mxu1  ;;  %v1362_v61 = vpop.f32.mrb[21].mxu0  ;;  %v1053_v55 = vld [vmem:[#allocation2 + $0x18] sm:$0xff] (!%p1308_p11)  ;;  %v1054_v56 = vld [vmem:[#allocation2 + $0x20] sm:$0xff] (!%p1308_p11)  ;;  %v1075_v57 = vadd.f32 (!%p1308_p11), %v1309_v50, %v1052_v54 }
 0x156   : > { %v1363_v62 = vadd.f32 %v1362_v61, %v1361_v58  ;;  %v1426_v63 = vpop.f32.mrb[21].mxu1  ;;  %v1364_v0 = vpop.f32.mrb[22].mxu0  ;;  %v1076_v58 = vadd.f32 (!%p1308_p11), %v1309_v50, %v1053_v55  ;;  %v1056_v61 = vld [vmem:[#allocation2 + $0x30] sm:$0xff] (!%p1308_p11) }
 0x157   : > { %1039 = vst [vmem:[#allocation2 + $0x48] sm:$0xff] %v1023_v59  ;;  %v1427_v1 = vadd.f32 %v1426_v63, %v1425_v60  ;;  %v1428_v2 = vpop.f32.mrb[22].mxu1  ;;  %v1365_v3 = vpop.f32.mrb[23].mxu0  ;;  %v1077_v59 = vadd.f32 (!%p1308_p11), %v1309_v50, %v1054_v56  ;;  %v1055_v60 = vld [vmem:[#allocation2 + $0x28] sm:$0xff] (!%p1308_p11)  ;;  %v1089_v63 = vmax.f32 (!%p1308_p11), %v1073_v52, 0.0 }
 0x158   : > { %v1366_v5 = vadd.f32 %v1365_v3, %v1364_v0  ;;  %v1429_v6 = vpop.f32.mrb[23].mxu1  ;;  %v1090_v0 = vmax.f32 (!%p1308_p11), %v1074_v53, 0.0 }
 0x159   : > { %v992_v7 = vadd.f32 %v1427_v1, %v1363_v62  ;;  %v1430_v8 = vadd.f32 %v1429_v6, %v1428_v2  ;;  %v1057_v62 = vld [vmem:[#allocation2 + $0x38] sm:$0xff] (!%p1308_p11)  ;;  %v1078_v1 = vadd.f32 (!%p1308_p11), %v1309_v50, %v1055_v60  ;;  %v1079_v2 = vadd.f32 (!%p1308_p11), %v1309_v50, %v1056_v61  ;;  %1105 = vst [vmem:[%s1882_s3] sm:$0xff] (!%p1308_p11), %v1089_v63 }
 0x15a   : > { %v1091_v6 = vmax.f32 (!%p1308_p11), %v1075_v57, 0.0  ;;  %1106 = vst [vmem:[%s1882_s3 + $0x8] sm:$0xff] (!%p1308_p11), %v1090_v0 }
 0x15b   : > { %v1024_v10 = vadd.f32 %v992_v7, %v366_v4  ;;  %v995_v11 = vadd.f32 %v1430_v8, %v1366_v5  ;;  %v1092_v7 = vmax.f32 (!%p1308_p11), %v1076_v58, 0.0  ;;  %v1093_v8 = vmax.f32 (!%p1308_p11), %v1077_v59, 0.0 }
 0x15c   : > { %v1367_v12 = vpop.f32.mrb[24].mxu0  ;;  %v1058_v3 = vld [vmem:[#allocation2 + $0x40] sm:$0xff] (!%p1308_p11)  ;;  %1107 = vst [vmem:[%s1882_s3 + $0x10] sm:$0xff] (!%p1308_p11), %v1091_v6 }
 0x15d   : > { %1040 = vst [vmem:[#allocation2 + $0x50] sm:$0xff] %v1024_v10  ;;  %v1025_v13 = vadd.f32 %v995_v11, %v367_v9  ;;  %v1431_v14 = vpop.f32.mrb[24].mxu1  ;;  %v1368_v15 = vpop.f32.mrb[25].mxu0  ;;  %v1080_v9 = vadd.f32 (!%p1308_p11), %v1309_v50, %v1057_v62  ;;  %1108 = vst [vmem:[%s1882_s3 + $0x18] sm:$0xff] (!%p1308_p11), %v1092_v7 }
 0x15e   : > { %v1369_v16 = vadd.f32 %v1368_v15, %v1367_v12  ;;  %v1432_v17 = vpop.f32.mrb[25].mxu1  ;;  %v1370_v18 = vpop.f32.mrb[26].mxu0  ;;  %v1059_v4 = vld [vmem:[#allocation2 + $0x48] sm:$0xff] (!%p1308_p11)  ;;  %v1081_v15 = vadd.f32 (!%p1308_p11), %v1309_v50, %v1058_v3  ;;  %1109 = vst [vmem:[%s1882_s3 + $0x20] sm:$0xff] (!%p1308_p11), %v1093_v8 }
 0x15f   : > { %1041 = vst [vmem:[#allocation2 + $0x58] sm:$0xff] %v1025_v13  ;;  %v1433_v19 = vadd.f32 %v1432_v17, %v1431_v14  ;;  %v1434_v20 = vpop.f32.mrb[26].mxu1  ;;  %v1371_v21 = vpop.f32.mrb[27].mxu0  ;;  %v1094_v13 = vmax.f32 (!%p1308_p11), %v1078_v1, 0.0  ;;  %v1095_v14 = vmax.f32 (!%p1308_p11), %v1079_v2, 0.0 }
 0x160   : > { %v1372_v23 = vadd.f32 %v1371_v21, %v1370_v18  ;;  %v1435_v24 = vpop.f32.mrb[27].mxu1 }
 0x161   : > { %v1000_v25 = vadd.f32 %v1433_v19, %v1369_v16  ;;  %v1436_v26 = vadd.f32 %v1435_v24, %v1434_v20  ;;  %v1082_v16 = vadd.f32 (!%p1308_p11), %v1309_v50, %v1059_v4  ;;  %v1096_v19 = vmax.f32 (!%p1308_p11), %v1080_v9, 0.0  ;;  %1110 = vst [vmem:[%s1882_s3 + $0x28] sm:$0xff] (!%p1308_p11), %v1094_v13  ;;  %1111 = vst [vmem:[%s1882_s3 + $0x30] sm:$0xff] (!%p1308_p11), %v1095_v14 }
 0x163   : > { %v1026_v28 = vadd.f32 %v1000_v25, %v368_v22  ;;  %v1003_v29 = vadd.f32 %v1436_v26, %v1372_v23  ;;  %v1097_v23 = vmax.f32 (!%p1308_p11), %v1081_v15, 0.0  ;;  %v1098_v24 = vmax.f32 (!%p1308_p11), %v1082_v16, 0.0  ;;  %1112 = vst [vmem:[%s1882_s3 + $0x38] sm:$0xff] (!%p1308_p11), %v1096_v19 }
 0x164   : > { %v1373_v30 = vpop.f32.mrb[28].mxu0  ;;  %v1060_v5 = vld [vmem:[#allocation2 + $0x50] sm:$0xff] (!%p1308_p11) }
 0x165   : > { %1042 = vst [vmem:[#allocation2 + $0x60] sm:$0xff] %v1026_v28  ;;  %v1027_v31 = vadd.f32 %v1003_v29, %v369_v27  ;;  %v1437_v32 = vpop.f32.mrb[28].mxu1  ;;  %v1374_v33 = vpop.f32.mrb[29].mxu0  ;;  %v1083_v20 = vadd.f32 (!%p1308_p11), %v1309_v50, %v1060_v5  ;;  %1113 = vst [vmem:[%s1882_s3 + $0x40] sm:$0xff] (!%p1308_p11), %v1097_v23 }
 0x166   : > { %v1375_v34 = vadd.f32 %v1374_v33, %v1373_v30  ;;  %v1438_v35 = vpop.f32.mrb[29].mxu1  ;;  %v1376_v36 = vpop.f32.mrb[30].mxu0  ;;  %v1061_v10 = vld [vmem:[#allocation2 + $0x58] sm:$0xff] (!%p1308_p11)  ;;  %1114 = vst [vmem:[%s1882_s3 + $0x48] sm:$0xff] (!%p1308_p11), %v1098_v24 }
 0x167   : > { %1043 = vst [vmem:[#allocation2 + $0x68] sm:$0xff] %v1027_v31  ;;  %v1439_v37 = vadd.f32 %v1438_v35, %v1437_v32  ;;  %v1440_v38 = vpop.f32.mrb[30].mxu1  ;;  %v1377_v39 = vpop.f32.mrb[31].mxu0  ;;  %v1084_v21 = vadd.f32 (!%p1308_p11), %v1309_v50, %v1061_v10  ;;  %v1099_v27 = vmax.f32 (!%p1308_p11), %v1083_v20, 0.0 }
 0x168   : > { %v1378_v41 = vadd.f32 %v1377_v39, %v1376_v36  ;;  %v1441_v42 = vpop.f32.mrb[31].mxu1 }
 0x169   : > { %v1008_v43 = vadd.f32 %v1439_v37, %v1375_v34  ;;  %v1442_v44 = vadd.f32 %v1441_v42, %v1440_v38  ;;  %1049 = sbr.rel (%p1308_p11) target bundleno = 380 (0x17c), region = 63  ;;  %v1100_v28 = vmax.f32 (!%p1308_p11), %v1084_v21, 0.0  ;;  %1115 = vst [vmem:[%s1882_s3 + $0x50] sm:$0xff] (!%p1308_p11), %v1099_v27 }
 0x16b   : > { %v1028_v46 = vadd.f32 %v1008_v43, %v370_v40  ;;  %v1011_v47 = vadd.f32 %v1442_v44, %v1378_v41  ;;  %1116 = vst [vmem:[%s1882_s3 + $0x58] sm:$0xff] (!%p1308_p11), %v1100_v28 }
 0x16c   : > { %v1062_v11 = vld [vmem:[#allocation2 + $0x60] sm:$0xff] (!%p1308_p11) }
 0x16d   : > { %1044 = vst [vmem:[#allocation2 + $0x70] sm:$0xff] %v1028_v46  ;;  %v1029_v48 = vadd.f32 %v1011_v47, %v371_v45  ;;  %v1085_v22 = vadd.f32 (!%p1308_p11), %v1309_v50, %v1062_v11 }
 0x16e   : > { %v1063_v12 = vld [vmem:[#allocation2 + $0x68] sm:$0xff] (!%p1308_p11) }
 0x16f   : > { %1045 = vst [vmem:[#allocation2 + $0x78] sm:$0xff] %v1029_v48  ;;  %v1086_v25 = vadd.f32 (!%p1308_p11), %v1309_v50, %v1063_v12  ;;  %v1101_v29 = vmax.f32 (!%p1308_p11), %v1085_v22, 0.0 }
 0x171   : > { %v1102_v31 = vmax.f32 %v1086_v25, 0.0  ;;  %1117 = vst [vmem:[%s1882_s3 + $0x60] sm:$0xff] %v1101_v29 }
 0x173   : > { %1118 = vst [vmem:[%s1882_s3 + $0x68] sm:$0xff] %v1102_v31 }
 0x174   : > { %v1064_v17 = vld [vmem:[#allocation2 + $0x70] sm:$0xff] }
 0x175   : > { %v1087_v26 = vadd.f32 %v1309_v50, %v1064_v17 }
 0x176   : > { %v1065_v18 = vld [vmem:[#allocation2 + $0x78] sm:$0xff] }
 0x177   : > { %v1088_v30 = vadd.f32 %v1309_v50, %v1065_v18  ;;  %v1103_v32 = vmax.f32 %v1087_v26, 0.0 }
 0x179   : > { %v1104_v33 = vmax.f32 %v1088_v30, 0.0  ;;  %1119 = vst [vmem:[%s1882_s3 + $0x70] sm:$0xff] %v1103_v32 }
 0x17b   : > { %1120 = vst [vmem:[%s1882_s3 + $0x78] sm:$0xff] %v1104_v33 }
 0x17c PF: > { %s13_s16 = sadd.s32 1, %s1602_s16   ;;  %s1883_s12 = smov %s1590_s13 }
 0x17d   : > { %p10_p12 = scmp.ge.s32.totalorder %s13_s16, 4   ;;  %s1884_s13 = smov %s1660_s20 }
 0x17e   : > { %s1885_s14 = smov %s1598_s15  ;;  %s1886_s15 = smov %s1888_s17 }
 0x17f   :  { %12 = sbr.rel (!%p10_p12) target bundleno = 3 (0x3), region = 104 }

// kernel: resnet50_fpn_forward.46
= control target key start
LH: loop header
LB: loop body
LE: loop exit
PB: predicated region body
PF: predicated region fallthrough
CT: control target
= control target key end

     0   :  { %v608_v1 = vmov 0   ;;  %v457_v25 = vlaneseq  ;;  %s844_s1 = inlined_call_operand.vmem [shape: bf16[128,256], index: 1, kind: input, shape index: {}]   ;;  %s845_s0 = inlined_call_operand.vmem [shape: bf16[128,128], index: 0, kind: input, shape index: {}]   ;;  %s846_s2 = inlined_call_operand.vmem [shape: f32[1,256], index: 2, kind: input, shape index: {}]   ;;  %s847_s3 = inlined_call_operand.vmem [shape: f32[128,256], index: 3, kind: output, shape index: {}]  }
   0x1   :  { %v576_v0 = vld [vmem:[%s844_s1 + $0x4] ss:$8 sps:$4 sm:$0xff]   ;;  %275 = vmatprep.mubr.bf16.mxu0 %v608_v1  ;;  %315 = vmatprep.mubr.bf16.mxu1 %v608_v1  ;;  %v578_v2 = vld [vmem:[%s844_s1] ss:$8 sps:$4 sm:$0xff]   ;;  %v579_v3 = vld [vmem:[%s844_s1 + $0x14] ss:$8 sps:$4 sm:$0xff]  }
   0x2   :  { %243 = vmatprep.subr.bf16.mxu0 %v576_v0  ;;  %559 = vmatprep.subr.bf16.mxu1 %v576_v0  ;;  %v581_v4 = vld [vmem:[%s844_s1 + $0x10] ss:$8 sps:$4 sm:$0xff]   ;;  %v582_v5 = vld [vmem:[%s844_s1 + $0x24] ss:$8 sps:$4 sm:$0xff]   ;;  %v584_v6 = vld [vmem:[%s844_s1 + $0x20] ss:$8 sps:$4 sm:$0xff]  }
   0x3   :  { %244 = vmatpush1.bf16.msra.mxu0 %v578_v2  ;;  %567 = vmatpush1.bf16.msra.mxu1 %v578_v2  ;;  %v585_v7 = vld [vmem:[%s844_s1 + $0x34] ss:$8 sps:$4 sm:$0xff]   ;;  %v587_v8 = vld [vmem:[%s844_s1 + $0x30] ss:$8 sps:$4 sm:$0xff]   ;;  %v588_v9 = vld [vmem:[%s844_s1 + $0x44] ss:$8 sps:$4 sm:$0xff]  }
   0x4   :  { %245 = vmatprep.subr.bf16.mxu0 %v579_v3  ;;  %560 = vmatprep.subr.bf16.mxu1 %v579_v3  ;;  %v590_v10 = vld [vmem:[%s844_s1 + $0x40] ss:$8 sps:$4 sm:$0xff]   ;;  %v591_v11 = vld [vmem:[%s844_s1 + $0x54] ss:$8 sps:$4 sm:$0xff]   ;;  %v593_v12 = vld [vmem:[%s844_s1 + $0x50] ss:$8 sps:$4 sm:$0xff]  }
   0x5   :  { %v594_v13 = vld [vmem:[%s844_s1 + $0x64] ss:$8 sps:$4 sm:$0xff]   ;;  %v596_v14 = vld [vmem:[%s844_s1 + $0x60] ss:$8 sps:$4 sm:$0xff]   ;;  %v597_v15 = vld [vmem:[%s844_s1 + $0x74] ss:$8 sps:$4 sm:$0xff]  }
   0x6   :  { %v599_v16 = vld [vmem:[%s844_s1 + $0x70] ss:$8 sps:$4 sm:$0xff]   ;;  %v600_v17 = vld [vmem:[%s845_s0] sm:$0xff]   ;;  %v602_v19 = vld [vmem:[%s845_s0 + $0x8] sm:$0xff]   ;;  %v458_v26 = vshrl.u32 %v457_v25, 7 }
   0x7   :  { %246 = vmatpush1.bf16.msra.mxu0 %v581_v4  ;;  %568 = vmatpush1.bf16.msra.mxu1 %v581_v4  ;;  %v601_v18 = vld [vmem:[%s845_s0 + $0x20] sm:$0xff]   ;;  %v603_v20 = vld [vmem:[%s845_s0 + $0x28] sm:$0xff]   ;;  %v604_v21 = vld [vmem:[%s845_s0 + $0x10] sm:$0xff]  }
   0x8   :  { %247 = vmatprep.subr.bf16.mxu0 %v582_v5  ;;  %561 = vmatprep.subr.bf16.mxu1 %v582_v5  ;;  %v605_v22 = vld [vmem:[%s845_s0 + $0x30] sm:$0xff]   ;;  %v606_v23 = vld [vmem:[%s845_s0 + $0x18] sm:$0xff]   ;;  %v459_v27 = vsub.s32 0, %v458_v26  ;;  %v455_v28 = vld [vmem:[%s846_s2] sm:$0x3]  ;;  %v463_v29 = vsub.s32 1, %v458_v26 }
   0x9   :  { %v607_v24 = vld [vmem:[%s845_s0 + $0x38] sm:$0xff]  }
   0xa   :  { %v712_v30 = vrot.slane %v455_v28, %v459_v27  ;;  %v714_v31 = vrot.slane %v455_v28, %v463_v29 }
   0xb   :  { %248 = vmatpush1.bf16.msra.mxu0 %v584_v6  ;;  %569 = vmatpush1.bf16.msra.mxu1 %v584_v6 }
   0xc   :  { %249 = vmatprep.subr.bf16.mxu0 %v585_v7  ;;  %562 = vmatprep.subr.bf16.mxu1 %v585_v7 }
   0xf   :  { %250 = vmatpush1.bf16.msra.mxu0 %v587_v8  ;;  %570 = vmatpush1.bf16.msra.mxu1 %v587_v8 }
  0x10   :  { %251 = vmatprep.subr.bf16.mxu0 %v588_v9  ;;  %563 = vmatprep.subr.bf16.mxu1 %v588_v9 }
  0x13   :  { %252 = vmatpush1.bf16.msra.mxu0 %v590_v10  ;;  %571 = vmatpush1.bf16.msra.mxu1 %v590_v10 }
  0x14   :  { %253 = vmatprep.subr.bf16.mxu0 %v591_v11  ;;  %564 = vmatprep.subr.bf16.mxu1 %v591_v11 }
  0x17   :  { %254 = vmatpush1.bf16.msra.mxu0 %v593_v12  ;;  %572 = vmatpush1.bf16.msra.mxu1 %v593_v12 }
  0x18   :  { %255 = vmatprep.subr.bf16.mxu0 %v594_v13  ;;  %565 = vmatprep.subr.bf16.mxu1 %v594_v13 }
  0x1b   :  { %256 = vmatpush1.bf16.msra.mxu0 %v596_v14  ;;  %573 = vmatpush1.bf16.msra.mxu1 %v596_v14 }
  0x1c   :  { %257 = vmatprep.subr.bf16.mxu0 %v597_v15  ;;  %566 = vmatprep.subr.bf16.mxu1 %v597_v15 }
  0x1f   :  { %258 = vmatpush1.bf16.msra.mxu0 %v599_v16  ;;  %574 = vmatpush1.bf16.msra.mxu1 %v599_v16 }
  0x22   :  { %276 = vmatmul.mubr.bf16.vlgmr.msra.gmra.mrb[0].mxu0 %v600_v17  ;;  %316 = vmatmul.mubr.bf16.vlgmr.msra.gmra.mrb[0].mxu1 %v601_v18 }
  0x23   :  { %285 = vmatprep.mubr.bf16.mxu0 %v608_v1  ;;  %325 = vmatprep.mubr.bf16.mxu1 %v608_v1 }
  0x2a   :  { %286 = vmatmul.mubr.bf16.gmra.mrb[4].mxu0 %v602_v19  ;;  %326 = vmatmul.mubr.bf16.gmra.mrb[4].mxu1 %v603_v20 }
  0x2b   :  { %295 = vmatprep.mubr.bf16.mxu0 %v608_v1  ;;  %335 = vmatprep.mubr.bf16.mxu1 %v608_v1 }
  0x32   :  { %296 = vmatmul.mubr.bf16.gmra.mrb[8].mxu0 %v604_v21  ;;  %336 = vmatmul.mubr.bf16.gmra.mrb[8].mxu1 %v605_v22 }
  0x33   :  { %305 = vmatprep.mubr.bf16.mxu0 %v608_v1  ;;  %345 = vmatprep.mubr.bf16.mxu1 %v608_v1 }
  0x3a   :  { %306 = vmatmul.mubr.bf16.gmra.mrb[12].mxu0 %v606_v23  ;;  %346 = vmatmul.mubr.bf16.gmra.mrb[12].mxu1 %v607_v24 }
  0xf5   :  { %v277_v32 = vpop.f32.mrb[0].mxu0  ;;  %v317_v33 = vpop.f32.mrb[0].mxu1 }
  0xf6   :  { %v467_v34 = vadd.f32 %v712_v30, %v277_v32  ;;  %v483_v35 = vadd.f32 %v712_v30, %v317_v33  ;;  %v279_v36 = vpop.f32.mrb[1].mxu0  ;;  %v319_v37 = vpop.f32.mrb[1].mxu1 }
  0xf7   :  { %v468_v38 = vadd.f32 %v714_v31, %v279_v36  ;;  %v484_v39 = vadd.f32 %v714_v31, %v319_v37  ;;  %v281_v40 = vpop.f32.mrb[2].mxu0  ;;  %v321_v41 = vpop.f32.mrb[2].mxu1 }
  0xf8   :  { %499 = vst [vmem:[%s847_s3] sm:$0xff] %v467_v34  ;;  %515 = vst [vmem:[%s847_s3 + $0x80] sm:$0xff] %v483_v35  ;;  %v469_v42 = vadd.f32 %v712_v30, %v281_v40  ;;  %v485_v43 = vadd.f32 %v712_v30, %v321_v41  ;;  %v283_v44 = vpop.f32.mrb[3].mxu0  ;;  %v323_v45 = vpop.f32.mrb[3].mxu1 }
  0xf9   :  { %500 = vst [vmem:[%s847_s3 + $0x8] sm:$0xff] %v468_v38  ;;  %516 = vst [vmem:[%s847_s3 + $0x88] sm:$0xff] %v484_v39  ;;  %v470_v46 = vadd.f32 %v714_v31, %v283_v44  ;;  %v486_v47 = vadd.f32 %v714_v31, %v323_v45 }
  0xfa   :  { %501 = vst [vmem:[%s847_s3 + $0x10] sm:$0xff] %v469_v42  ;;  %517 = vst [vmem:[%s847_s3 + $0x90] sm:$0xff] %v485_v43 }
  0xfb   :  { %502 = vst [vmem:[%s847_s3 + $0x18] sm:$0xff] %v470_v46  ;;  %518 = vst [vmem:[%s847_s3 + $0x98] sm:$0xff] %v486_v47 }
  0xfd   :  { %v287_v48 = vpop.f32.mrb[4].mxu0  ;;  %v327_v49 = vpop.f32.mrb[4].mxu1 }
  0xfe   :  { %v471_v50 = vadd.f32 %v712_v30, %v287_v48  ;;  %v487_v51 = vadd.f32 %v712_v30, %v327_v49  ;;  %v289_v52 = vpop.f32.mrb[5].mxu0  ;;  %v329_v53 = vpop.f32.mrb[5].mxu1 }
  0xff   :  { %v472_v54 = vadd.f32 %v714_v31, %v289_v52  ;;  %v488_v55 = vadd.f32 %v714_v31, %v329_v53  ;;  %v291_v56 = vpop.f32.mrb[6].mxu0  ;;  %v331_v57 = vpop.f32.mrb[6].mxu1 }
 0x100   :  { %503 = vst [vmem:[%s847_s3 + $0x20] sm:$0xff] %v471_v50  ;;  %519 = vst [vmem:[%s847_s3 + $0xa0] sm:$0xff] %v487_v51  ;;  %v473_v58 = vadd.f32 %v712_v30, %v291_v56  ;;  %v489_v59 = vadd.f32 %v712_v30, %v331_v57  ;;  %v293_v60 = vpop.f32.mrb[7].mxu0  ;;  %v333_v61 = vpop.f32.mrb[7].mxu1 }
 0x101   :  { %504 = vst [vmem:[%s847_s3 + $0x28] sm:$0xff] %v472_v54  ;;  %520 = vst [vmem:[%s847_s3 + $0xa8] sm:$0xff] %v488_v55  ;;  %v474_v62 = vadd.f32 %v714_v31, %v293_v60  ;;  %v490_v63 = vadd.f32 %v714_v31, %v333_v61 }
 0x102   :  { %505 = vst [vmem:[%s847_s3 + $0x30] sm:$0xff] %v473_v58  ;;  %521 = vst [vmem:[%s847_s3 + $0xb0] sm:$0xff] %v489_v59 }
 0x103   :  { %506 = vst [vmem:[%s847_s3 + $0x38] sm:$0xff] %v474_v62  ;;  %522 = vst [vmem:[%s847_s3 + $0xb8] sm:$0xff] %v490_v63 }
 0x105   :  { %v297_v0 = vpop.f32.mrb[8].mxu0  ;;  %v337_v1 = vpop.f32.mrb[8].mxu1 }
 0x106   :  { %v475_v2 = vadd.f32 %v712_v30, %v297_v0  ;;  %v491_v3 = vadd.f32 %v712_v30, %v337_v1  ;;  %v299_v4 = vpop.f32.mrb[9].mxu0  ;;  %v339_v5 = vpop.f32.mrb[9].mxu1 }
 0x107   :  { %v476_v6 = vadd.f32 %v714_v31, %v299_v4  ;;  %v492_v7 = vadd.f32 %v714_v31, %v339_v5  ;;  %v301_v8 = vpop.f32.mrb[10].mxu0  ;;  %v341_v9 = vpop.f32.mrb[10].mxu1 }
 0x108   :  { %507 = vst [vmem:[%s847_s3 + $0x40] sm:$0xff] %v475_v2  ;;  %523 = vst [vmem:[%s847_s3 + $0xc0] sm:$0xff] %v491_v3  ;;  %v477_v10 = vadd.f32 %v712_v30, %v301_v8  ;;  %v493_v11 = vadd.f32 %v712_v30, %v341_v9  ;;  %v303_v12 = vpop.f32.mrb[11].mxu0  ;;  %v343_v13 = vpop.f32.mrb[11].mxu1 }
 0x109   :  { %508 = vst [vmem:[%s847_s3 + $0x48] sm:$0xff] %v476_v6  ;;  %524 = vst [vmem:[%s847_s3 + $0xc8] sm:$0xff] %v492_v7  ;;  %v478_v14 = vadd.f32 %v714_v31, %v303_v12  ;;  %v494_v15 = vadd.f32 %v714_v31, %v343_v13 }
 0x10a   :  { %509 = vst [vmem:[%s847_s3 + $0x50] sm:$0xff] %v477_v10  ;;  %525 = vst [vmem:[%s847_s3 + $0xd0] sm:$0xff] %v493_v11 }
 0x10b   :  { %510 = vst [vmem:[%s847_s3 + $0x58] sm:$0xff] %v478_v14  ;;  %526 = vst [vmem:[%s847_s3 + $0xd8] sm:$0xff] %v494_v15 }
 0x10d   :  { %v307_v16 = vpop.f32.mrb[12].mxu0  ;;  %v347_v17 = vpop.f32.mrb[12].mxu1 }
 0x10e   :  { %v479_v18 = vadd.f32 %v712_v30, %v307_v16  ;;  %v495_v19 = vadd.f32 %v712_v30, %v347_v17  ;;  %v309_v20 = vpop.f32.mrb[13].mxu0  ;;  %v349_v21 = vpop.f32.mrb[13].mxu1 }
 0x10f   :  { %v480_v22 = vadd.f32 %v714_v31, %v309_v20  ;;  %v496_v23 = vadd.f32 %v714_v31, %v349_v21  ;;  %v311_v24 = vpop.f32.mrb[14].mxu0  ;;  %v351_v25 = vpop.f32.mrb[14].mxu1 }
 0x110   :  { %511 = vst [vmem:[%s847_s3 + $0x60] sm:$0xff] %v479_v18  ;;  %527 = vst [vmem:[%s847_s3 + $0xe0] sm:$0xff] %v495_v19  ;;  %v481_v26 = vadd.f32 %v712_v30, %v311_v24  ;;  %v497_v27 = vadd.f32 %v712_v30, %v351_v25  ;;  %v313_v28 = vpop.f32.mrb[15].mxu0  ;;  %v353_v29 = vpop.f32.mrb[15].mxu1 }
 0x111   :  { %512 = vst [vmem:[%s847_s3 + $0x68] sm:$0xff] %v480_v22  ;;  %528 = vst [vmem:[%s847_s3 + $0xe8] sm:$0xff] %v496_v23  ;;  %v482_v32 = vadd.f32 %v714_v31, %v313_v28  ;;  %v498_v33 = vadd.f32 %v714_v31, %v353_v29 }
 0x112   :  { %513 = vst [vmem:[%s847_s3 + $0x70] sm:$0xff] %v481_v26  ;;  %529 = vst [vmem:[%s847_s3 + $0xf0] sm:$0xff] %v497_v27 }
 0x113   :  { %514 = vst [vmem:[%s847_s3 + $0x78] sm:$0xff] %v482_v32  ;;  %530 = vst [vmem:[%s847_s3 + $0xf8] sm:$0xff] %v498_v33 }

// kernel: resnet50_fpn_forward.49
= control target key start
LH: loop header
LB: loop body
LE: loop exit
PB: predicated region body
PF: predicated region fallthrough
CT: control target
= control target key end

     0   :  { %v707_v1 = vmov 0   ;;  %v460_v25 = vlaneseq  ;;  %s1044_s1 = inlined_call_operand.vmem [shape: bf16[128,256], index: 1, kind: input, shape index: {}]   ;;  %s1045_s0 = inlined_call_operand.vmem [shape: bf16[128,128], index: 0, kind: input, shape index: {}]   ;;  %s1046_s2 = inlined_call_operand.vmem [shape: f32[1,256], index: 2, kind: input, shape index: {}]   ;;  %s1047_s3 = inlined_call_operand.vmem [shape: f32[128,256], index: 3, kind: input, shape index: {}]   ;;  %s1048_s4 = inlined_call_operand.vmem [shape: f32[128,256], index: 4, kind: output, shape index: {}]  }
   0x1   :  { %v675_v0 = vld [vmem:[%s1044_s1 + $0x4] ss:$8 sps:$4 sm:$0xff]   ;;  %278 = vmatprep.mubr.bf16.mxu0 %v707_v1  ;;  %318 = vmatprep.mubr.bf16.mxu1 %v707_v1  ;;  %v677_v2 = vld [vmem:[%s1044_s1] ss:$8 sps:$4 sm:$0xff]   ;;  %v678_v3 = vld [vmem:[%s1044_s1 + $0x14] ss:$8 sps:$4 sm:$0xff]  }
   0x2   :  { %246 = vmatprep.subr.bf16.mxu0 %v675_v0  ;;  %658 = vmatprep.subr.bf16.mxu1 %v675_v0  ;;  %v680_v4 = vld [vmem:[%s1044_s1 + $0x10] ss:$8 sps:$4 sm:$0xff]   ;;  %v681_v5 = vld [vmem:[%s1044_s1 + $0x24] ss:$8 sps:$4 sm:$0xff]   ;;  %v683_v6 = vld [vmem:[%s1044_s1 + $0x20] ss:$8 sps:$4 sm:$0xff]  }
   0x3   :  { %247 = vmatpush1.bf16.msra.mxu0 %v677_v2  ;;  %666 = vmatpush1.bf16.msra.mxu1 %v677_v2  ;;  %v684_v7 = vld [vmem:[%s1044_s1 + $0x34] ss:$8 sps:$4 sm:$0xff]   ;;  %v686_v8 = vld [vmem:[%s1044_s1 + $0x30] ss:$8 sps:$4 sm:$0xff]   ;;  %v687_v9 = vld [vmem:[%s1044_s1 + $0x44] ss:$8 sps:$4 sm:$0xff]  }
   0x4   :  { %248 = vmatprep.subr.bf16.mxu0 %v678_v3  ;;  %659 = vmatprep.subr.bf16.mxu1 %v678_v3  ;;  %v689_v10 = vld [vmem:[%s1044_s1 + $0x40] ss:$8 sps:$4 sm:$0xff]   ;;  %v690_v11 = vld [vmem:[%s1044_s1 + $0x54] ss:$8 sps:$4 sm:$0xff]   ;;  %v692_v12 = vld [vmem:[%s1044_s1 + $0x50] ss:$8 sps:$4 sm:$0xff]  }
   0x5   :  { %v693_v13 = vld [vmem:[%s1044_s1 + $0x64] ss:$8 sps:$4 sm:$0xff]   ;;  %v695_v14 = vld [vmem:[%s1044_s1 + $0x60] ss:$8 sps:$4 sm:$0xff]   ;;  %v696_v15 = vld [vmem:[%s1044_s1 + $0x74] ss:$8 sps:$4 sm:$0xff]  }
   0x6   :  { %v698_v16 = vld [vmem:[%s1044_s1 + $0x70] ss:$8 sps:$4 sm:$0xff]   ;;  %v699_v17 = vld [vmem:[%s1045_s0] sm:$0xff]   ;;  %v701_v19 = vld [vmem:[%s1045_s0 + $0x8] sm:$0xff]   ;;  %v461_v26 = vshrl.u32 %v460_v25, 7 }
   0x7   :  { %249 = vmatpush1.bf16.msra.mxu0 %v680_v4  ;;  %667 = vmatpush1.bf16.msra.mxu1 %v680_v4  ;;  %v700_v18 = vld [vmem:[%s1045_s0 + $0x20] sm:$0xff]   ;;  %v702_v20 = vld [vmem:[%s1045_s0 + $0x28] sm:$0xff]   ;;  %v703_v21 = vld [vmem:[%s1045_s0 + $0x10] sm:$0xff]  }
   0x8   :  { %250 = vmatprep.subr.bf16.mxu0 %v681_v5  ;;  %660 = vmatprep.subr.bf16.mxu1 %v681_v5  ;;  %v704_v22 = vld [vmem:[%s1045_s0 + $0x30] sm:$0xff]   ;;  %v705_v23 = vld [vmem:[%s1045_s0 + $0x18] sm:$0xff]   ;;  %v462_v27 = vsub.s32 0, %v461_v26  ;;  %v458_v28 = vld [vmem:[%s1046_s2] sm:$0x3]  ;;  %v466_v29 = vsub.s32 1, %v461_v26 }
   0x9   :  { %v706_v24 = vld [vmem:[%s1045_s0 + $0x38] sm:$0xff]   ;;  %v502_v33 = vld [vmem:[%s1047_s3] sm:$0xff]  ;;  %v503_v39 = vld [vmem:[%s1047_s3 + $0x8] sm:$0xff] }
   0xa   :  { %v816_v30 = vrot.slane %v458_v28, %v462_v27  ;;  %v818_v31 = vrot.slane %v458_v28, %v466_v29  ;;  %v518_v35 = vld [vmem:[%s1047_s3 + $0x80] sm:$0xff]  ;;  %v519_v41 = vld [vmem:[%s1047_s3 + $0x88] sm:$0xff]  ;;  %v504_v45 = vld [vmem:[%s1047_s3 + $0x10] sm:$0xff] }
   0xb   :  { %251 = vmatpush1.bf16.msra.mxu0 %v683_v6  ;;  %668 = vmatpush1.bf16.msra.mxu1 %v683_v6  ;;  %v520_v47 = vld [vmem:[%s1047_s3 + $0x90] sm:$0xff]  ;;  %v505_v53 = vld [vmem:[%s1047_s3 + $0x18] sm:$0xff] }
   0xc   :  { %252 = vmatprep.subr.bf16.mxu0 %v684_v7  ;;  %661 = vmatprep.subr.bf16.mxu1 %v684_v7  ;;  %v521_v55 = vld [vmem:[%s1047_s3 + $0x98] sm:$0xff] }
   0xd   :  { %v509_v29 = vld [vmem:[%s1047_s3 + $0x38] sm:$0xff] }
   0xf   :  { %253 = vmatpush1.bf16.msra.mxu0 %v686_v8  ;;  %669 = vmatpush1.bf16.msra.mxu1 %v686_v8 }
  0x10   :  { %254 = vmatprep.subr.bf16.mxu0 %v687_v9  ;;  %662 = vmatprep.subr.bf16.mxu1 %v687_v9  ;;  %v506_v9 = vld [vmem:[%s1047_s3 + $0x20] sm:$0xff] }
  0x13   :  { %255 = vmatpush1.bf16.msra.mxu0 %v689_v10  ;;  %670 = vmatpush1.bf16.msra.mxu1 %v689_v10 }
  0x14   :  { %256 = vmatprep.subr.bf16.mxu0 %v690_v11  ;;  %663 = vmatprep.subr.bf16.mxu1 %v690_v11  ;;  %v522_v11 = vld [vmem:[%s1047_s3 + $0xa0] sm:$0xff] }
  0x17   :  { %257 = vmatpush1.bf16.msra.mxu0 %v692_v12  ;;  %671 = vmatpush1.bf16.msra.mxu1 %v692_v12 }
  0x18   :  { %258 = vmatprep.subr.bf16.mxu0 %v693_v13  ;;  %664 = vmatprep.subr.bf16.mxu1 %v693_v13 }
  0x1b   :  { %259 = vmatpush1.bf16.msra.mxu0 %v695_v14  ;;  %672 = vmatpush1.bf16.msra.mxu1 %v695_v14 }
  0x1c   :  { %260 = vmatprep.subr.bf16.mxu0 %v696_v15  ;;  %665 = vmatprep.subr.bf16.mxu1 %v696_v15  ;;  %v507_v15 = vld [vmem:[%s1047_s3 + $0x28] sm:$0xff] }
  0x1f   :  { %261 = vmatpush1.bf16.msra.mxu0 %v698_v16  ;;  %673 = vmatpush1.bf16.msra.mxu1 %v698_v16 }
  0x22   :  { %279 = vmatmul.mubr.bf16.vlgmr.msra.gmra.mrb[0].mxu0 %v699_v17  ;;  %319 = vmatmul.mubr.bf16.vlgmr.msra.gmra.mrb[0].mxu1 %v700_v18  ;;  %v523_v17 = vld [vmem:[%s1047_s3 + $0xa8] sm:$0xff] }
  0x23   :  { %288 = vmatprep.mubr.bf16.mxu0 %v707_v1  ;;  %328 = vmatprep.mubr.bf16.mxu1 %v707_v1 }
  0x2a   :  { %289 = vmatmul.mubr.bf16.gmra.mrb[4].mxu0 %v701_v19  ;;  %329 = vmatmul.mubr.bf16.gmra.mrb[4].mxu1 %v702_v20 }
  0x2b   :  { %298 = vmatprep.mubr.bf16.mxu0 %v707_v1  ;;  %338 = vmatprep.mubr.bf16.mxu1 %v707_v1 }
  0x32   :  { %299 = vmatmul.mubr.bf16.gmra.mrb[8].mxu0 %v703_v21  ;;  %339 = vmatmul.mubr.bf16.gmra.mrb[8].mxu1 %v704_v22  ;;  %v508_v21 = vld [vmem:[%s1047_s3 + $0x30] sm:$0xff] }
  0x33   :  { %308 = vmatprep.mubr.bf16.mxu0 %v707_v1  ;;  %348 = vmatprep.mubr.bf16.mxu1 %v707_v1 }
  0x3a   :  { %309 = vmatmul.mubr.bf16.gmra.mrb[12].mxu0 %v705_v23  ;;  %349 = vmatmul.mubr.bf16.gmra.mrb[12].mxu1 %v706_v24  ;;  %v524_v23 = vld [vmem:[%s1047_s3 + $0xb0] sm:$0xff] }
  0xf5   :  { %v280_v32 = vpop.f32.mrb[0].mxu0  ;;  %v320_v34 = vpop.f32.mrb[0].mxu1 }
  0xf6   :  { %v470_v36 = vadd.f32 %v816_v30, %v280_v32  ;;  %v486_v37 = vadd.f32 %v816_v30, %v320_v34  ;;  %v282_v38 = vpop.f32.mrb[1].mxu0  ;;  %v322_v40 = vpop.f32.mrb[1].mxu1 }
  0xf7   :  { %v471_v42 = vadd.f32 %v818_v31, %v282_v38  ;;  %v487_v43 = vadd.f32 %v818_v31, %v322_v40  ;;  %v284_v44 = vpop.f32.mrb[2].mxu0  ;;  %v324_v46 = vpop.f32.mrb[2].mxu1 }
  0xf8   :  { %v534_v48 = vadd.f32 %v502_v33, %v470_v36  ;;  %v550_v49 = vadd.f32 %v518_v35, %v486_v37  ;;  %v472_v50 = vadd.f32 %v816_v30, %v284_v44  ;;  %v488_v51 = vadd.f32 %v816_v30, %v324_v46  ;;  %v286_v52 = vpop.f32.mrb[3].mxu0  ;;  %v326_v54 = vpop.f32.mrb[3].mxu1  ;;  %v525_v33 = vld [vmem:[%s1047_s3 + $0xb8] sm:$0xff] }
  0xf9   :  { %v535_v56 = vadd.f32 %v503_v39, %v471_v42  ;;  %v551_v57 = vadd.f32 %v519_v41, %v487_v43  ;;  %v473_v58 = vadd.f32 %v818_v31, %v286_v52  ;;  %v489_v59 = vadd.f32 %v818_v31, %v326_v54 }
  0xfa   :  { %v566_v60 = vmax.f32 %v534_v48, 0.0  ;;  %v582_v61 = vmax.f32 %v550_v49, 0.0  ;;  %v536_v62 = vadd.f32 %v504_v45, %v472_v50  ;;  %v552_v63 = vadd.f32 %v520_v47, %v488_v51  ;;  %v510_v51 = vld [vmem:[%s1047_s3 + $0x40] sm:$0xff] }
  0xfb   :  { %v567_v0 = vmax.f32 %v535_v56, 0.0  ;;  %v583_v1 = vmax.f32 %v551_v57, 0.0  ;;  %v537_v2 = vadd.f32 %v505_v53, %v473_v58  ;;  %v553_v3 = vadd.f32 %v521_v55, %v489_v59  ;;  %v526_v53 = vld [vmem:[%s1047_s3 + $0xc0] sm:$0xff]  ;;  %v511_v57 = vld [vmem:[%s1047_s3 + $0x48] sm:$0xff] }
  0xfc   :  { %598 = vst [vmem:[%s1048_s4] sm:$0xff] %v566_v60  ;;  %614 = vst [vmem:[%s1048_s4 + $0x80] sm:$0xff] %v582_v61  ;;  %v568_v4 = vmax.f32 %v536_v62, 0.0  ;;  %v584_v5 = vmax.f32 %v552_v63, 0.0  ;;  %v527_v59 = vld [vmem:[%s1047_s3 + $0xc8] sm:$0xff]  ;;  %v512_v63 = vld [vmem:[%s1047_s3 + $0x50] sm:$0xff] }
  0xfd   :  { %599 = vst [vmem:[%s1048_s4 + $0x8] sm:$0xff] %v567_v0  ;;  %615 = vst [vmem:[%s1048_s4 + $0x88] sm:$0xff] %v583_v1  ;;  %v569_v6 = vmax.f32 %v537_v2, 0.0  ;;  %v585_v7 = vmax.f32 %v553_v3, 0.0  ;;  %v290_v8 = vpop.f32.mrb[4].mxu0  ;;  %v330_v10 = vpop.f32.mrb[4].mxu1 }
  0xfe   :  { %600 = vst [vmem:[%s1048_s4 + $0x10] sm:$0xff] %v568_v4  ;;  %616 = vst [vmem:[%s1048_s4 + $0x90] sm:$0xff] %v584_v5  ;;  %v474_v12 = vadd.f32 %v816_v30, %v290_v8  ;;  %v490_v13 = vadd.f32 %v816_v30, %v330_v10  ;;  %v292_v14 = vpop.f32.mrb[5].mxu0  ;;  %v332_v16 = vpop.f32.mrb[5].mxu1  ;;  %v528_v1 = vld [vmem:[%s1047_s3 + $0xd0] sm:$0xff] }
  0xff   :  { %601 = vst [vmem:[%s1048_s4 + $0x18] sm:$0xff] %v569_v6  ;;  %617 = vst [vmem:[%s1048_s4 + $0x98] sm:$0xff] %v585_v7  ;;  %v475_v18 = vadd.f32 %v818_v31, %v292_v14  ;;  %v491_v19 = vadd.f32 %v818_v31, %v332_v16  ;;  %v294_v20 = vpop.f32.mrb[6].mxu0  ;;  %v334_v22 = vpop.f32.mrb[6].mxu1  ;;  %v513_v7 = vld [vmem:[%s1047_s3 + $0x58] sm:$0xff] }
 0x100   :  { %v538_v24 = vadd.f32 %v506_v9, %v474_v12  ;;  %v554_v25 = vadd.f32 %v522_v11, %v490_v13  ;;  %v476_v26 = vadd.f32 %v816_v30, %v294_v20  ;;  %v492_v27 = vadd.f32 %v816_v30, %v334_v22  ;;  %v296_v28 = vpop.f32.mrb[7].mxu0  ;;  %v336_v32 = vpop.f32.mrb[7].mxu1  ;;  %v529_v9 = vld [vmem:[%s1047_s3 + $0xd8] sm:$0xff] }
 0x101   :  { %v539_v34 = vadd.f32 %v507_v15, %v475_v18  ;;  %v555_v35 = vadd.f32 %v523_v17, %v491_v19  ;;  %v477_v36 = vadd.f32 %v818_v31, %v296_v28  ;;  %v493_v37 = vadd.f32 %v818_v31, %v336_v32 }
 0x102   :  { %v570_v38 = vmax.f32 %v538_v24, 0.0  ;;  %v586_v39 = vmax.f32 %v554_v25, 0.0  ;;  %v540_v40 = vadd.f32 %v508_v21, %v476_v26  ;;  %v556_v41 = vadd.f32 %v524_v23, %v492_v27  ;;  %v514_v27 = vld [vmem:[%s1047_s3 + $0x60] sm:$0xff] }
 0x103   :  { %v571_v42 = vmax.f32 %v539_v34, 0.0  ;;  %v587_v43 = vmax.f32 %v555_v35, 0.0  ;;  %v541_v44 = vadd.f32 %v509_v29, %v477_v36  ;;  %v557_v45 = vadd.f32 %v525_v33, %v493_v37  ;;  %v530_v29 = vld [vmem:[%s1047_s3 + $0xe0] sm:$0xff]  ;;  %v515_v35 = vld [vmem:[%s1047_s3 + $0x68] sm:$0xff] }
 0x104   :  { %602 = vst [vmem:[%s1048_s4 + $0x20] sm:$0xff] %v570_v38  ;;  %618 = vst [vmem:[%s1048_s4 + $0xa0] sm:$0xff] %v586_v39  ;;  %v572_v46 = vmax.f32 %v540_v40, 0.0  ;;  %v588_v47 = vmax.f32 %v556_v41, 0.0  ;;  %v531_v37 = vld [vmem:[%s1047_s3 + $0xe8] sm:$0xff]  ;;  %v516_v41 = vld [vmem:[%s1047_s3 + $0x70] sm:$0xff] }
 0x105   :  { %603 = vst [vmem:[%s1048_s4 + $0x28] sm:$0xff] %v571_v42  ;;  %619 = vst [vmem:[%s1048_s4 + $0xa8] sm:$0xff] %v587_v43  ;;  %v573_v48 = vmax.f32 %v541_v44, 0.0  ;;  %v589_v49 = vmax.f32 %v557_v45, 0.0  ;;  %v300_v50 = vpop.f32.mrb[8].mxu0  ;;  %v340_v52 = vpop.f32.mrb[8].mxu1 }
 0x106   :  { %604 = vst [vmem:[%s1048_s4 + $0x30] sm:$0xff] %v572_v46  ;;  %620 = vst [vmem:[%s1048_s4 + $0xb0] sm:$0xff] %v588_v47  ;;  %v478_v54 = vadd.f32 %v816_v30, %v300_v50  ;;  %v494_v55 = vadd.f32 %v816_v30, %v340_v52  ;;  %v302_v56 = vpop.f32.mrb[9].mxu0  ;;  %v342_v58 = vpop.f32.mrb[9].mxu1  ;;  %v532_v43 = vld [vmem:[%s1047_s3 + $0xf0] sm:$0xff] }
 0x107   :  { %605 = vst [vmem:[%s1048_s4 + $0x38] sm:$0xff] %v573_v48  ;;  %621 = vst [vmem:[%s1048_s4 + $0xb8] sm:$0xff] %v589_v49  ;;  %v479_v60 = vadd.f32 %v818_v31, %v302_v56  ;;  %v495_v61 = vadd.f32 %v818_v31, %v342_v58  ;;  %v304_v62 = vpop.f32.mrb[10].mxu0  ;;  %v344_v0 = vpop.f32.mrb[10].mxu1  ;;  %v517_v49 = vld [vmem:[%s1047_s3 + $0x78] sm:$0xff] }
 0x108   :  { %v542_v2 = vadd.f32 %v510_v51, %v478_v54  ;;  %v558_v3 = vadd.f32 %v526_v53, %v494_v55  ;;  %v480_v4 = vadd.f32 %v816_v30, %v304_v62  ;;  %v496_v5 = vadd.f32 %v816_v30, %v344_v0  ;;  %v306_v6 = vpop.f32.mrb[11].mxu0  ;;  %v346_v8 = vpop.f32.mrb[11].mxu1  ;;  %v533_v51 = vld [vmem:[%s1047_s3 + $0xf8] sm:$0xff] }
 0x109   :  { %v543_v10 = vadd.f32 %v511_v57, %v479_v60  ;;  %v559_v11 = vadd.f32 %v527_v59, %v495_v61  ;;  %v481_v12 = vadd.f32 %v818_v31, %v306_v6  ;;  %v497_v13 = vadd.f32 %v818_v31, %v346_v8 }
 0x10a   :  { %v574_v14 = vmax.f32 %v542_v2, 0.0  ;;  %v590_v15 = vmax.f32 %v558_v3, 0.0  ;;  %v544_v16 = vadd.f32 %v512_v63, %v480_v4  ;;  %v560_v17 = vadd.f32 %v528_v1, %v496_v5 }
 0x10b   :  { %v575_v18 = vmax.f32 %v543_v10, 0.0  ;;  %v591_v19 = vmax.f32 %v559_v11, 0.0  ;;  %v545_v20 = vadd.f32 %v513_v7, %v481_v12  ;;  %v561_v21 = vadd.f32 %v529_v9, %v497_v13 }
 0x10c   :  { %606 = vst [vmem:[%s1048_s4 + $0x40] sm:$0xff] %v574_v14  ;;  %622 = vst [vmem:[%s1048_s4 + $0xc0] sm:$0xff] %v590_v15  ;;  %v576_v22 = vmax.f32 %v544_v16, 0.0  ;;  %v592_v23 = vmax.f32 %v560_v17, 0.0 }
 0x10d   :  { %607 = vst [vmem:[%s1048_s4 + $0x48] sm:$0xff] %v575_v18  ;;  %623 = vst [vmem:[%s1048_s4 + $0xc8] sm:$0xff] %v591_v19  ;;  %v577_v24 = vmax.f32 %v545_v20, 0.0  ;;  %v593_v25 = vmax.f32 %v561_v21, 0.0  ;;  %v310_v26 = vpop.f32.mrb[12].mxu0  ;;  %v350_v28 = vpop.f32.mrb[12].mxu1 }
 0x10e   :  { %608 = vst [vmem:[%s1048_s4 + $0x50] sm:$0xff] %v576_v22  ;;  %624 = vst [vmem:[%s1048_s4 + $0xd0] sm:$0xff] %v592_v23  ;;  %v482_v32 = vadd.f32 %v816_v30, %v310_v26  ;;  %v498_v33 = vadd.f32 %v816_v30, %v350_v28  ;;  %v312_v34 = vpop.f32.mrb[13].mxu0  ;;  %v352_v36 = vpop.f32.mrb[13].mxu1 }
 0x10f   :  { %609 = vst [vmem:[%s1048_s4 + $0x58] sm:$0xff] %v577_v24  ;;  %625 = vst [vmem:[%s1048_s4 + $0xd8] sm:$0xff] %v593_v25  ;;  %v483_v38 = vadd.f32 %v818_v31, %v312_v34  ;;  %v499_v39 = vadd.f32 %v818_v31, %v352_v36  ;;  %v314_v40 = vpop.f32.mrb[14].mxu0  ;;  %v354_v42 = vpop.f32.mrb[14].mxu1 }
 0x110   :  { %v546_v44 = vadd.f32 %v514_v27, %v482_v32  ;;  %v562_v45 = vadd.f32 %v530_v29, %v498_v33  ;;  %v484_v46 = vadd.f32 %v816_v30, %v314_v40  ;;  %v500_v47 = vadd.f32 %v816_v30, %v354_v42  ;;  %v316_v48 = vpop.f32.mrb[15].mxu0  ;;  %v356_v50 = vpop.f32.mrb[15].mxu1 }
 0x111   :  { %v547_v52 = vadd.f32 %v515_v35, %v483_v38  ;;  %v563_v53 = vadd.f32 %v531_v37, %v499_v39  ;;  %v485_v54 = vadd.f32 %v818_v31, %v316_v48  ;;  %v501_v55 = vadd.f32 %v818_v31, %v356_v50 }
 0x112   :  { %v578_v56 = vmax.f32 %v546_v44, 0.0  ;;  %v594_v57 = vmax.f32 %v562_v45, 0.0  ;;  %v548_v58 = vadd.f32 %v516_v41, %v484_v46  ;;  %v564_v30 = vadd.f32 %v532_v43, %v500_v47 }
 0x113   :  { %v579_v59 = vmax.f32 %v547_v52, 0.0  ;;  %v595_v60 = vmax.f32 %v563_v53, 0.0  ;;  %v549_v61 = vadd.f32 %v517_v49, %v485_v54  ;;  %v565_v62 = vadd.f32 %v533_v51, %v501_v55 }
 0x114   :  { %610 = vst [vmem:[%s1048_s4 + $0x60] sm:$0xff] %v578_v56  ;;  %626 = vst [vmem:[%s1048_s4 + $0xe0] sm:$0xff] %v594_v57  ;;  %v580_v63 = vmax.f32 %v548_v58, 0.0  ;;  %v596_v0 = vmax.f32 %v564_v30, 0.0 }
 0x115   :  { %611 = vst [vmem:[%s1048_s4 + $0x68] sm:$0xff] %v579_v59  ;;  %627 = vst [vmem:[%s1048_s4 + $0xe8] sm:$0xff] %v595_v60  ;;  %v581_v31 = vmax.f32 %v549_v61, 0.0  ;;  %v597_v1 = vmax.f32 %v565_v62, 0.0 }
 0x116   :  { %612 = vst [vmem:[%s1048_s4 + $0x70] sm:$0xff] %v580_v63  ;;  %628 = vst [vmem:[%s1048_s4 + $0xf0] sm:$0xff] %v596_v0 }
 0x117   :  { %613 = vst [vmem:[%s1048_s4 + $0x78] sm:$0xff] %v581_v31  ;;  %629 = vst [vmem:[%s1048_s4 + $0xf8] sm:$0xff] %v597_v1 }

// kernel: resnet50_fpn_forward.50
= control target key start
LH: loop header
LB: loop body
LE: loop exit
PB: predicated region body
PF: predicated region fallthrough
CT: control target
= control target key end

     0   :  { %s820_s1 = inlined_call_operand.vmem [shape: bf16[256,128], index: 1, kind: input, shape index: {}]   ;;  %s821_s0 = inlined_call_operand.vmem [shape: bf16[128,256], index: 0, kind: input, shape index: {}]   ;;  %s822_s2 = inlined_call_operand.vmem [shape: f32[1,128], index: 2, kind: input, shape index: {}]   ;;  %s823_s3 = inlined_call_operand.vmem [shape: f32[128,128], index: 3, kind: output, shape index: {}]  }
   0x1   :  { %v595_v0 = vld [vmem:[%s820_s1 + $0x40] sm:$0xff]   ;;  %v597_v2 = vld [vmem:[%s820_s1 + $0x48] sm:$0xff]   ;;  %v599_v4 = vld [vmem:[%s820_s1 + $0x50] sm:$0xff]  }
   0x2   :  { %v596_v1 = vld [vmem:[%s820_s1] sm:$0xff]   ;;  %515 = vmatprep.subr.bf16.mxu0 %v595_v0  ;;  %579 = vmatprep.subr.bf16.mxu1 %v595_v0  ;;  %v598_v3 = vld [vmem:[%s820_s1 + $0x8] sm:$0xff]   ;;  %v600_v5 = vld [vmem:[%s820_s1 + $0x10] sm:$0xff]  }
   0x3   :  { %516 = vmatpush3.bf16.msra.mxu0 %v596_v1  ;;  %587 = vmatpush3.bf16.msra.mxu1 %v596_v1  ;;  %v601_v6 = vld [vmem:[%s820_s1 + $0x58] sm:$0xff]   ;;  %v603_v8 = vld [vmem:[%s820_s1 + $0x60] sm:$0xff]   ;;  %v605_v10 = vld [vmem:[%s820_s1 + $0x68] sm:$0xff]  }
   0x4   :  { %517 = vmatprep.subr.bf16.mxu0 %v597_v2  ;;  %580 = vmatprep.subr.bf16.mxu1 %v597_v2  ;;  %v602_v7 = vld [vmem:[%s820_s1 + $0x18] sm:$0xff]   ;;  %v604_v9 = vld [vmem:[%s820_s1 + $0x20] sm:$0xff]   ;;  %v606_v13 = vld [vmem:[%s820_s1 + $0x28] sm:$0xff]  }
   0x5   :  { %v613_v11 = vld [vmem:[%s821_s0 + $0x4] ss:$8 sps:$4 sm:$0xff]   ;;  %v607_v14 = vld [vmem:[%s820_s1 + $0x70] sm:$0xff]   ;;  %v609_v16 = vld [vmem:[%s820_s1 + $0x78] sm:$0xff]  }
   0x6   :  { %v616_v12 = vld [vmem:[%s821_s0 + $0x44] ss:$8 sps:$4 sm:$0xff]   ;;  %307 = vmatprep.mubr.bf16.mxu0 %v613_v11  ;;  %v608_v15 = vld [vmem:[%s820_s1 + $0x30] sm:$0xff]   ;;  %v610_v17 = vld [vmem:[%s820_s1 + $0x38] sm:$0xff]  }
   0x7   :  { %518 = vmatpush3.bf16.msra.mxu0 %v598_v3  ;;  %588 = vmatpush3.bf16.msra.mxu1 %v598_v3  ;;  %v611_v18 = vld [vmem:[%s821_s0] ss:$8 sps:$4 sm:$0xff]   ;;  %v617_v20 = vld [vmem:[%s821_s0 + $0x14] ss:$8 sps:$4 sm:$0xff]   ;;  %v621_v22 = vld [vmem:[%s821_s0 + $0x10] ss:$8 sps:$4 sm:$0xff]  }
   0x8   :  { %519 = vmatprep.subr.bf16.mxu0 %v599_v4  ;;  %581 = vmatprep.subr.bf16.mxu1 %v599_v4  ;;  %v614_v19 = vld [vmem:[%s821_s0 + $0x40] ss:$8 sps:$4 sm:$0xff]   ;;  %v619_v21 = vld [vmem:[%s821_s0 + $0x54] ss:$8 sps:$4 sm:$0xff]   ;;  %v622_v23 = vld [vmem:[%s821_s0 + $0x50] ss:$8 sps:$4 sm:$0xff]  }
   0x9   :  { %339 = vmatprep.mubr.bf16.mxu1 %v616_v12  ;;  %v623_v24 = vld [vmem:[%s821_s0 + $0x24] ss:$8 sps:$4 sm:$0xff]   ;;  %v627_v26 = vld [vmem:[%s821_s0 + $0x20] ss:$8 sps:$4 sm:$0xff]   ;;  %v629_v28 = vld [vmem:[%s821_s0 + $0x34] ss:$8 sps:$4 sm:$0xff]  }
   0xa   :  { %v625_v25 = vld [vmem:[%s821_s0 + $0x64] ss:$8 sps:$4 sm:$0xff]   ;;  %v628_v27 = vld [vmem:[%s821_s0 + $0x60] ss:$8 sps:$4 sm:$0xff]   ;;  %v631_v29 = vld [vmem:[%s821_s0 + $0x74] ss:$8 sps:$4 sm:$0xff]  }
   0xb   :  { %520 = vmatpush3.bf16.msra.mxu0 %v600_v5  ;;  %589 = vmatpush3.bf16.msra.mxu1 %v600_v5  ;;  %v633_v30 = vld [vmem:[%s821_s0 + $0x30] ss:$8 sps:$4 sm:$0xff]   ;;  %v754_v35 = vld [vmem:[%s822_s2] ss:$0 sm:$0xff] }
   0xc   :  { %521 = vmatprep.subr.bf16.mxu0 %v601_v6  ;;  %582 = vmatprep.subr.bf16.mxu1 %v601_v6  ;;  %v634_v31 = vld [vmem:[%s821_s0 + $0x70] ss:$8 sps:$4 sm:$0xff]  }
   0xf   :  { %522 = vmatpush3.bf16.msra.mxu0 %v602_v7  ;;  %590 = vmatpush3.bf16.msra.mxu1 %v602_v7 }
  0x10   :  { %523 = vmatprep.subr.bf16.mxu0 %v603_v8  ;;  %583 = vmatprep.subr.bf16.mxu1 %v603_v8 }
  0x13   :  { %524 = vmatpush3.bf16.msra.mxu0 %v604_v9  ;;  %591 = vmatpush3.bf16.msra.mxu1 %v604_v9 }
  0x14   :  { %525 = vmatprep.subr.bf16.mxu0 %v605_v10  ;;  %584 = vmatprep.subr.bf16.mxu1 %v605_v10 }
  0x17   :  { %526 = vmatpush3.bf16.msra.mxu0 %v606_v13  ;;  %592 = vmatpush3.bf16.msra.mxu1 %v606_v13 }
  0x18   :  { %527 = vmatprep.subr.bf16.mxu0 %v607_v14  ;;  %585 = vmatprep.subr.bf16.mxu1 %v607_v14 }
  0x1b   :  { %528 = vmatpush3.bf16.msra.mxu0 %v608_v15  ;;  %593 = vmatpush3.bf16.msra.mxu1 %v608_v15 }
  0x1c   :  { %529 = vmatprep.subr.bf16.mxu0 %v609_v16  ;;  %586 = vmatprep.subr.bf16.mxu1 %v609_v16 }
  0x1f   :  { %530 = vmatpush3.bf16.msra.mxu0 %v610_v17  ;;  %594 = vmatpush3.bf16.msra.mxu1 %v610_v17 }
  0x22   :  { %308 = vmatmul.mubr.bf16.vlgmr.msra.gmra.mrb[0].mxu0 %v611_v18  ;;  %340 = vmatmul.mubr.bf16.vlgmr.msra.gmra.mrb[0].mxu1 %v614_v19 }
  0x23   :  { %315 = vmatprep.mubr.bf16.mxu0 %v617_v20  ;;  %347 = vmatprep.mubr.bf16.mxu1 %v619_v21 }
  0x2a   :  { %316 = vmatmul.mubr.bf16.gmra.mrb[4].mxu0 %v621_v22  ;;  %348 = vmatmul.mubr.bf16.gmra.mrb[4].mxu1 %v622_v23 }
  0x2b   :  { %323 = vmatprep.mubr.bf16.mxu0 %v623_v24  ;;  %355 = vmatprep.mubr.bf16.mxu1 %v625_v25 }
  0x32   :  { %324 = vmatmul.mubr.bf16.gmra.mrb[8].mxu0 %v627_v26  ;;  %356 = vmatmul.mubr.bf16.gmra.mrb[8].mxu1 %v628_v27 }
  0x33   :  { %331 = vmatprep.mubr.bf16.mxu0 %v629_v28  ;;  %363 = vmatprep.mubr.bf16.mxu1 %v631_v29 }
  0x3a   :  { %332 = vmatmul.mubr.bf16.gmra.mrb[12].mxu0 %v633_v30  ;;  %364 = vmatmul.mubr.bf16.gmra.mrb[12].mxu1 %v634_v31 }
  0xf5   :  { %v531_v32 = vpop.f32.mrb[0].mxu0  ;;  %v555_v33 = vpop.f32.mrb[0].mxu1 }
  0xf6   :  { %v532_v34 = vpop.f32.mrb[1].mxu0  ;;  %v556_v36 = vpop.f32.mrb[1].mxu1 }
  0xf7   :  { %v533_v37 = vadd.f32 %v532_v34, %v531_v32  ;;  %v557_v38 = vadd.f32 %v556_v36, %v555_v33  ;;  %v534_v39 = vpop.f32.mrb[2].mxu0  ;;  %v558_v40 = vpop.f32.mrb[2].mxu1 }
  0xf8   :  { %v535_v41 = vpop.f32.mrb[3].mxu0  ;;  %v559_v42 = vpop.f32.mrb[3].mxu1 }
  0xf9   :  { %v430_v43 = vadd.f32 %v533_v37, %v754_v35  ;;  %v438_v44 = vadd.f32 %v557_v38, %v754_v35  ;;  %v536_v45 = vadd.f32 %v535_v41, %v534_v39  ;;  %v560_v46 = vadd.f32 %v559_v42, %v558_v40 }
  0xfb   :  { %v446_v47 = vmax.f32 %v430_v43, 0.0  ;;  %v454_v48 = vmax.f32 %v438_v44, 0.0  ;;  %v431_v49 = vadd.f32 %v536_v45, %v754_v35  ;;  %v439_v50 = vadd.f32 %v560_v46, %v754_v35 }
  0xfd   :  { %462 = vst [vmem:[%s823_s3] sm:$0xff] %v446_v47  ;;  %470 = vst [vmem:[%s823_s3 + $0x40] sm:$0xff] %v454_v48  ;;  %v447_v51 = vmax.f32 %v431_v49, 0.0  ;;  %v455_v52 = vmax.f32 %v439_v50, 0.0  ;;  %v537_v53 = vpop.f32.mrb[4].mxu0  ;;  %v561_v54 = vpop.f32.mrb[4].mxu1 }
  0xfe   :  { %v538_v55 = vpop.f32.mrb[5].mxu0  ;;  %v562_v56 = vpop.f32.mrb[5].mxu1 }
  0xff   :  { %463 = vst [vmem:[%s823_s3 + $0x8] sm:$0xff] %v447_v51  ;;  %471 = vst [vmem:[%s823_s3 + $0x48] sm:$0xff] %v455_v52  ;;  %v539_v57 = vadd.f32 %v538_v55, %v537_v53  ;;  %v563_v58 = vadd.f32 %v562_v56, %v561_v54  ;;  %v540_v59 = vpop.f32.mrb[6].mxu0  ;;  %v564_v60 = vpop.f32.mrb[6].mxu1 }
 0x100   :  { %v541_v61 = vpop.f32.mrb[7].mxu0  ;;  %v565_v62 = vpop.f32.mrb[7].mxu1 }
 0x101   :  { %v432_v63 = vadd.f32 %v539_v57, %v754_v35  ;;  %v440_v0 = vadd.f32 %v563_v58, %v754_v35  ;;  %v542_v1 = vadd.f32 %v541_v61, %v540_v59  ;;  %v566_v2 = vadd.f32 %v565_v62, %v564_v60 }
 0x103   :  { %v448_v3 = vmax.f32 %v432_v63, 0.0  ;;  %v456_v4 = vmax.f32 %v440_v0, 0.0  ;;  %v433_v5 = vadd.f32 %v542_v1, %v754_v35  ;;  %v441_v6 = vadd.f32 %v566_v2, %v754_v35 }
 0x105   :  { %464 = vst [vmem:[%s823_s3 + $0x10] sm:$0xff] %v448_v3  ;;  %472 = vst [vmem:[%s823_s3 + $0x50] sm:$0xff] %v456_v4  ;;  %v449_v7 = vmax.f32 %v433_v5, 0.0  ;;  %v457_v8 = vmax.f32 %v441_v6, 0.0  ;;  %v543_v9 = vpop.f32.mrb[8].mxu0  ;;  %v567_v10 = vpop.f32.mrb[8].mxu1 }
 0x106   :  { %v544_v11 = vpop.f32.mrb[9].mxu0  ;;  %v568_v12 = vpop.f32.mrb[9].mxu1 }
 0x107   :  { %465 = vst [vmem:[%s823_s3 + $0x18] sm:$0xff] %v449_v7  ;;  %473 = vst [vmem:[%s823_s3 + $0x58] sm:$0xff] %v457_v8  ;;  %v545_v13 = vadd.f32 %v544_v11, %v543_v9  ;;  %v569_v14 = vadd.f32 %v568_v12, %v567_v10  ;;  %v546_v15 = vpop.f32.mrb[10].mxu0  ;;  %v570_v16 = vpop.f32.mrb[10].mxu1 }
 0x108   :  { %v547_v17 = vpop.f32.mrb[11].mxu0  ;;  %v571_v18 = vpop.f32.mrb[11].mxu1 }
 0x109   :  { %v434_v19 = vadd.f32 %v545_v13, %v754_v35  ;;  %v442_v20 = vadd.f32 %v569_v14, %v754_v35  ;;  %v548_v21 = vadd.f32 %v547_v17, %v546_v15  ;;  %v572_v22 = vadd.f32 %v571_v18, %v570_v16 }
 0x10b   :  { %v450_v23 = vmax.f32 %v434_v19, 0.0  ;;  %v458_v24 = vmax.f32 %v442_v20, 0.0  ;;  %v435_v25 = vadd.f32 %v548_v21, %v754_v35  ;;  %v443_v26 = vadd.f32 %v572_v22, %v754_v35 }
 0x10d   :  { %466 = vst [vmem:[%s823_s3 + $0x20] sm:$0xff] %v450_v23  ;;  %474 = vst [vmem:[%s823_s3 + $0x60] sm:$0xff] %v458_v24  ;;  %v451_v27 = vmax.f32 %v435_v25, 0.0  ;;  %v459_v28 = vmax.f32 %v443_v26, 0.0  ;;  %v549_v29 = vpop.f32.mrb[12].mxu0  ;;  %v573_v30 = vpop.f32.mrb[12].mxu1 }
 0x10e   :  { %v550_v31 = vpop.f32.mrb[13].mxu0  ;;  %v574_v32 = vpop.f32.mrb[13].mxu1 }
 0x10f   :  { %467 = vst [vmem:[%s823_s3 + $0x28] sm:$0xff] %v451_v27  ;;  %475 = vst [vmem:[%s823_s3 + $0x68] sm:$0xff] %v459_v28  ;;  %v551_v33 = vadd.f32 %v550_v31, %v549_v29  ;;  %v575_v34 = vadd.f32 %v574_v32, %v573_v30  ;;  %v552_v36 = vpop.f32.mrb[14].mxu0  ;;  %v576_v37 = vpop.f32.mrb[14].mxu1 }
 0x110   :  { %v553_v38 = vpop.f32.mrb[15].mxu0  ;;  %v577_v39 = vpop.f32.mrb[15].mxu1 }
 0x111   :  { %v436_v40 = vadd.f32 %v551_v33, %v754_v35  ;;  %v444_v41 = vadd.f32 %v575_v34, %v754_v35  ;;  %v554_v42 = vadd.f32 %v553_v38, %v552_v36  ;;  %v578_v43 = vadd.f32 %v577_v39, %v576_v37 }
 0x113   :  { %v452_v44 = vmax.f32 %v436_v40, 0.0  ;;  %v460_v45 = vmax.f32 %v444_v41, 0.0  ;;  %v437_v46 = vadd.f32 %v554_v42, %v754_v35  ;;  %v445_v47 = vadd.f32 %v578_v43, %v754_v35 }
 0x115   :  { %468 = vst [vmem:[%s823_s3 + $0x30] sm:$0xff] %v452_v44  ;;  %476 = vst [vmem:[%s823_s3 + $0x70] sm:$0xff] %v460_v45  ;;  %v453_v48 = vmax.f32 %v437_v46, 0.0  ;;  %v461_v49 = vmax.f32 %v445_v47, 0.0 }
 0x117   :  { %469 = vst [vmem:[%s823_s3 + $0x38] sm:$0xff] %v453_v48  ;;  %477 = vst [vmem:[%s823_s3 + $0x78] sm:$0xff] %v461_v49 }

// kernel: resnet50_fpn_forward.58
= control target key start
LH: loop header
LB: loop body
LE: loop exit
PB: predicated region body
PF: predicated region fallthrough
CT: control target
= control target key end

     0   :  { %s1109_s12 = smov 0   ;;  %s1111_s13 = smov 0   ;;  %s1235_s0 = inlined_call_operand.vmem [shape: bf16[32,1536], index: 0, kind: input, shape index: {}]   ;;  %s1236_s1 = inlined_call_operand.vmem [shape: bf16[1536,128], index: 1, kind: input, shape index: {}]   ;;  %s1237_s2 = inlined_call_operand.vmem [shape: f32[1,128], index: 2, kind: input, shape index: {}]   ;;  %s1238_s3 = inlined_call_operand.vmem [shape: f32[32,128], index: 3, kind: output, shape index: {}]  }
   0x1   :  { %s1113_s14 = smov 0   ;;  %s1115_s15 = smov 0  }
   0x2   :  { %s1117_s16 = smov 0  }
   0x3 LB: > { %s25_s17 = sadd.s32 1, %s1082_s15  ;;  %p48_p1 = scmp.ne.s32.totalorder %s1074_s13, %s1070_s12  ;;  %s1086_s16 = sphi %s1117_s16, %s13_s16   ;;  %s1082_s15 = sphi %s1115_s15, %s1242_s15   ;;  %s1078_s14 = sphi %s1113_s14, %s1241_s14   ;;  %s1074_s13 = sphi %s1111_s13, %s1240_s13   ;;  %s1070_s12 = sphi %s1109_s12, %s1239_s12  }
   0x4   : > { %p26_p0 = scmp.ge.s32.totalorder %s25_s17, 3  ;;  %p49_p2 = scmp.eq.s32.totalorder %s1086_s16, 0 }
   0x5   : > { %s41_s19 = sadd.s32 1, %s1074_s13  ;;  %p851_p5 = scmp.ge.s32.totalorder %s1086_s16, 3 }
   0x6   : > { %s1244_s17 = smov (%p26_p0, %s25_s17), 0  ;;  %p50_p3 = por %p49_p2, %p48_p1 }
   0x7   : > { %s37_s18 = ssub.s32 %s1082_s15, %s1244_s17  ;;  %162 = sbr.rel (%p851_p5) target bundleno = 22 (0x16), region = 20 }
   0x8   : > { %p39_p4 = scmp.eq.s32.totalorder %s37_s18, 0 }
   0xa   : > { %s1144_s20 = scalar_select %p39_p4, %s1074_s13, %s41_s19  }
   0xe   : > { %165 = sbr.rel (!%p50_p3) target bundleno = 22 (0x16), region = 24  ;;  %s167_s21 = sand.u32 (%p50_p3), 1, %s1074_s13  }
   0xf   : > { %s906_s22 = sshll.u32 (%p50_p3), %s1082_s15, 4  ;;  %s852_s23 = sshll.u32 (%p50_p3), %s167_s21, 6 }
  0x10   : > { %s175_s26 = scalar_lea.vmem (%p50_p3), %s1235_s0, %s906_s22  ;;  %s169_s27 = scalar_lea.vmem (%p50_p3), [#allocation3], %s852_s23 }
  0x11   : > { %v188_v0 = vld [vmem:[%s175_s26] sm:$0xff] (%p50_p3)  ;;  %v190_v1 = vld [vmem:[%s175_s26 + $0x8] sm:$0xff] (%p50_p3)  ;;  %v192_v2 = vld [vmem:[%s175_s26 + $0x30] sm:$0xff] (%p50_p3) }
  0x12   : > { %189 = vst [vmem:[%s169_s27] sm:$0xff] (%p50_p3), %v188_v0  ;;  %191 = vst [vmem:[%s169_s27 + $0x8] sm:$0xff] (%p50_p3), %v190_v1  ;;  %v194_v3 = vld [vmem:[%s175_s26 + $0x38] sm:$0xff] (%p50_p3)  ;;  %v196_v4 = vld [vmem:[%s175_s26 + $0x60] sm:$0xff] (%p50_p3) }
  0x13   : > { %193 = vst [vmem:[%s169_s27 + $0x10] sm:$0xff] (%p50_p3), %v192_v2  ;;  %v198_v5 = vld [vmem:[%s175_s26 + $0x68] sm:$0xff] (%p50_p3)  ;;  %195 = vst [vmem:[%s169_s27 + $0x18] sm:$0xff] (%p50_p3), %v194_v3  ;;  %v200_v6 = vld [vmem:[%s175_s26 + $0x90] sm:$0xff] (%p50_p3) }
  0x14   : > { %197 = vst [vmem:[%s169_s27 + $0x20] sm:$0xff] (%p50_p3), %v196_v4  ;;  %199 = vst [vmem:[%s169_s27 + $0x28] sm:$0xff] (%p50_p3), %v198_v5  ;;  %v202_v7 = vld [vmem:[%s175_s26 + $0x98] sm:$0xff] (%p50_p3) }
  0x15   : > { %201 = vst [vmem:[%s169_s27 + $0x30] sm:$0xff] %v200_v6  ;;  %203 = vst [vmem:[%s169_s27 + $0x38] sm:$0xff] %v202_v7 }
  0x16 PF: > { %p855_p6 = scmp.ge.s32.totalorder %s1086_s16, 1  ;;  %p220_p7 = scmp.lt.s32.totalorder %s1086_s16, 4 }
  0x18   : > { %p221_p8 = pnand %p855_p6, %p220_p7 }
  0x19   : > { %s227_s28 = sand.u32 (!%p221_p8), 1, %s1070_s12   ;;  %s857_s29 = sshll.u32 (!%p221_p8), %s1078_s14, 6 }
  0x1a   : > { %224 = sbr.rel (%p221_p8) target bundleno = 317 (0x13d), region = 51  ;;  %s856_s30 = sshll.u32 (!%p221_p8), %s227_s28, 6 }
  0x1b   : > { %p267_p9 = scmp.lt.s32.totalorder (!%p221_p8), %s857_s29, 191  ;;  %s1161_s8 = scalar_lea.vmem (!%p221_p8), [#allocation3], %s856_s30 }
  0x1c   : > { %p859_p10 = scmp.ne.s32.totalorder (!%p221_p8), %s1078_s14, 0 }
  0x21   : > { %s1246_s29 = smov (!%p267_p9, %s857_s29), 191  ;;  %291 = sbr.rel (%p859_p10) target bundleno = 40 (0x28), region = 59 }
  0x22   : > { %s858_s4 = sshll.u32 %s1246_s29, 2  ;;  %v1088_v8 = vmov (!%p859_p10), 0.0  }
  0x23   : > { %s1159_s7 = scalar_lea.vmem %s1236_s1, %s858_s4  ;;  %292 = vst [vmem:[#allocation2] sm:$0xff] (!%p859_p10), %v1088_v8  ;;  %293 = vst [vmem:[#allocation2 + $0x8] sm:$0xff] (!%p859_p10), %v1088_v8 }
  0x24   : > { %294 = vst [vmem:[#allocation2 + $0x10] sm:$0xff] (!%p859_p10), %v1088_v8  ;;  %295 = vst [vmem:[#allocation2 + $0x18] sm:$0xff] (!%p859_p10), %v1088_v8 }
  0x28 PF: > { %v1004_v9 = vld [vmem:[%s1159_s7 + $0x40] sm:$0xff]   ;;  %v1008_v13 = vld [vmem:[%s1159_s7 + $0x48] sm:$0xff]   ;;  %v1012_v17 = vld [vmem:[%s1159_s7 + $0x50] sm:$0xff]   ;;  %p900_p11 = scmp.ne.s32.totalorder %s1078_s14, 2 }
  0x29   : > { %v1005_v10 = vld [vmem:[%s1159_s7 + $0xc0] sm:$0xff]   ;;  %907 = vmatprep.subr.bf16.mxu0 %v1004_v9  ;;  %v1009_v14 = vld [vmem:[%s1159_s7 + $0xc8] sm:$0xff]   ;;  %v1013_v18 = vld [vmem:[%s1159_s7 + $0xd0] sm:$0xff]  }
  0x2a   : > { %v1006_v11 = vld [vmem:[%s1159_s7] sm:$0xff]   ;;  %935 = vmatprep.subr.bf16.mxu1 %v1005_v10  ;;  %v1010_v15 = vld [vmem:[%s1159_s7 + $0x8] sm:$0xff]   ;;  %v1014_v19 = vld [vmem:[%s1159_s7 + $0x10] sm:$0xff]  }
  0x2b   : > { %v1007_v12 = vld [vmem:[%s1159_s7 + $0x80] sm:$0xff]   ;;  %908 = vmatpush3.bf16.msra.mxu0 %v1006_v11  ;;  %v1011_v16 = vld [vmem:[%s1159_s7 + $0x88] sm:$0xff]   ;;  %v1015_v20 = vld [vmem:[%s1159_s7 + $0x90] sm:$0xff]  }
  0x2c   : > { %936 = vmatpush3.bf16.msra.mxu1 %v1007_v12  ;;  %909 = vmatprep.subr.bf16.mxu0 %v1008_v13  ;;  %v1016_v21 = vld [vmem:[%s1159_s7 + $0x58] sm:$0xff]   ;;  %v1020_v25 = vld [vmem:[%s1159_s7 + $0x60] sm:$0xff]   ;;  %v1024_v29 = vld [vmem:[%s1159_s7 + $0x68] sm:$0xff]  }
  0x2d   : > { %937 = vmatprep.subr.bf16.mxu1 %v1009_v14  ;;  %v1017_v22 = vld [vmem:[%s1159_s7 + $0xd8] sm:$0xff]   ;;  %v1021_v26 = vld [vmem:[%s1159_s7 + $0xe0] sm:$0xff]   ;;  %v1025_v30 = vld [vmem:[%s1159_s7 + $0xe8] sm:$0xff]  }
  0x2e   : > { %v1018_v23 = vld [vmem:[%s1159_s7 + $0x18] sm:$0xff]   ;;  %v1022_v27 = vld [vmem:[%s1159_s7 + $0x20] sm:$0xff]   ;;  %v1026_v31 = vld [vmem:[%s1159_s7 + $0x28] sm:$0xff]  }
  0x2f   : > { %910 = vmatpush3.bf16.msra.mxu0 %v1010_v15  ;;  %v1019_v24 = vld [vmem:[%s1159_s7 + $0x98] sm:$0xff]   ;;  %v1023_v28 = vld [vmem:[%s1159_s7 + $0xa0] sm:$0xff]   ;;  %v1027_v32 = vld [vmem:[%s1159_s7 + $0xa8] sm:$0xff]  }
  0x30   : > { %938 = vmatpush3.bf16.msra.mxu1 %v1011_v16  ;;  %911 = vmatprep.subr.bf16.mxu0 %v1012_v17  ;;  %v1028_v33 = vld [vmem:[%s1159_s7 + $0x70] sm:$0xff]   ;;  %v1032_v37 = vld [vmem:[%s1159_s7 + $0x78] sm:$0xff]   ;;  %v296_v58 = vld [vmem:[#allocation2] sm:$0xff] }
  0x31   : > { %939 = vmatprep.subr.bf16.mxu1 %v1013_v18  ;;  %v1029_v34 = vld [vmem:[%s1159_s7 + $0xf0] sm:$0xff]   ;;  %v1033_v38 = vld [vmem:[%s1159_s7 + $0xf8] sm:$0xff]   ;;  %v297_v63 = vld [vmem:[#allocation2 + $0x8] sm:$0xff] }
  0x32   : > { %v1030_v35 = vld [vmem:[%s1159_s7 + $0x30] sm:$0xff]   ;;  %v1034_v39 = vld [vmem:[%s1159_s7 + $0x38] sm:$0xff]  }
  0x33   : > { %912 = vmatpush3.bf16.msra.mxu0 %v1014_v19  ;;  %v1031_v36 = vld [vmem:[%s1159_s7 + $0xb0] sm:$0xff]   ;;  %v1035_v40 = vld [vmem:[%s1159_s7 + $0xb8] sm:$0xff]  }
  0x34   : > { %940 = vmatpush3.bf16.msra.mxu1 %v1015_v20  ;;  %913 = vmatprep.subr.bf16.mxu0 %v1016_v21  ;;  %v1036_v41 = vld [vmem:[%s1161_s8] ss:$16 sps:$4 sm:$0xff]   ;;  %v1038_v42 = vld [vmem:[%s1161_s8 + $0x4] ss:$16 sps:$4 sm:$0xff]   ;;  %v1039_v43 = vld [vmem:[%s1161_s8 + $0x8] ss:$16 sps:$4 sm:$0xff]  }
  0x35   : > { %941 = vmatprep.subr.bf16.mxu1 %v1017_v22  ;;  %v1041_v44 = vld [vmem:[%s1161_s8 + $0xc] ss:$16 sps:$4 sm:$0xff]   ;;  %636 = vmatprep.mubr.bf16.mxu0 %v1038_v42  ;;  %v1042_v45 = vld [vmem:[%s1161_s8 + $0x24] ss:$16 sps:$4 sm:$0xff]   ;;  %v1046_v47 = vld [vmem:[%s1161_s8 + $0x20] ss:$16 sps:$4 sm:$0xff]  }
  0x36   : > { %685 = vmatprep.mubr.bf16.mxu1 %v1041_v44  ;;  %v1044_v46 = vld [vmem:[%s1161_s8 + $0x2c] ss:$16 sps:$4 sm:$0xff]   ;;  %v1047_v48 = vld [vmem:[%s1161_s8 + $0x28] ss:$16 sps:$4 sm:$0xff]   ;;  %v298_v12 = vld [vmem:[#allocation2 + $0x10] sm:$0xff] }
  0x37   : > { %914 = vmatpush3.bf16.msra.mxu0 %v1018_v23  ;;  %v299_v17 = vld [vmem:[#allocation2 + $0x18] sm:$0xff]  ;;  %v901_v22 = vld [vmem:[%s1237_s2] ss:$0 sm:$0xff] (!%p900_p11) }
  0x38   : > { %942 = vmatpush3.bf16.msra.mxu1 %v1019_v24  ;;  %915 = vmatprep.subr.bf16.mxu0 %v1020_v25 }
  0x39   : > { %943 = vmatprep.subr.bf16.mxu1 %v1021_v26 }
  0x3b   : > { %916 = vmatpush3.bf16.msra.mxu0 %v1022_v27 }
  0x3c   : > { %944 = vmatpush3.bf16.msra.mxu1 %v1023_v28  ;;  %917 = vmatprep.subr.bf16.mxu0 %v1024_v29 }
  0x3d   : > { %945 = vmatprep.subr.bf16.mxu1 %v1025_v30 }
  0x3f   : > { %918 = vmatpush3.bf16.msra.mxu0 %v1026_v31 }
  0x40   : > { %946 = vmatpush3.bf16.msra.mxu1 %v1027_v32  ;;  %919 = vmatprep.subr.bf16.mxu0 %v1028_v33 }
  0x41   : > { %947 = vmatprep.subr.bf16.mxu1 %v1029_v34 }
  0x43   : > { %920 = vmatpush3.bf16.msra.mxu0 %v1030_v35 }
  0x44   : > { %948 = vmatpush3.bf16.msra.mxu1 %v1031_v36  ;;  %921 = vmatprep.subr.bf16.mxu0 %v1032_v37 }
  0x45   : > { %949 = vmatprep.subr.bf16.mxu1 %v1033_v38 }
  0x47   : > { %922 = vmatpush3.bf16.msra.mxu0 %v1034_v39 }
  0x48   : > { %950 = vmatpush3.bf16.msra.mxu1 %v1035_v40 }
  0x4a   : > { %637 = vmatmul.mubr.bf16.vlgmr.msra.gmra.mrb[0].mxu0 %v1036_v41 }
  0x4b   : > { %686 = vmatmul.mubr.bf16.vlgmr.msra.gmra.mrb[0].mxu1 %v1039_v43  ;;  %644 = vmatprep.mubr.bf16.mxu0 %v1042_v45 }
  0x4c   : > { %693 = vmatprep.mubr.bf16.mxu1 %v1044_v46 }
  0x52   : > { %645 = vmatmul.mubr.bf16.gmra.mrb[4].mxu0 %v1046_v47 }
  0x53   : > { %694 = vmatmul.mubr.bf16.gmra.mrb[4].mxu1 %v1047_v48 }
 0x11d   : > { %v923_v49 = vpop.f32.mrb[0].mxu0 }
 0x11e   : > { %v951_v50 = vpop.f32.mrb[0].mxu1  ;;  %v924_v51 = vpop.f32.mrb[1].mxu0 }
 0x11f   : > { %v925_v52 = vadd.f32 %v924_v51, %v923_v49  ;;  %v952_v53 = vpop.f32.mrb[1].mxu1  ;;  %v926_v54 = vpop.f32.mrb[2].mxu0 }
 0x120   : > { %v953_v55 = vadd.f32 %v952_v53, %v951_v50  ;;  %v954_v56 = vpop.f32.mrb[2].mxu1  ;;  %v927_v57 = vpop.f32.mrb[3].mxu0 }
 0x121   : > { %v928_v59 = vadd.f32 %v927_v57, %v926_v54  ;;  %v955_v60 = vpop.f32.mrb[3].mxu1 }
 0x122   : > { %v688_v61 = vadd.f32 %v953_v55, %v925_v52  ;;  %v956_v62 = vadd.f32 %v955_v60, %v954_v56 }
 0x124   : > { %v702_v0 = vadd.f32 %v688_v61, %v296_v58  ;;  %v691_v1 = vadd.f32 %v956_v62, %v928_v59 }
 0x125   : > { %v929_v2 = vpop.f32.mrb[4].mxu0 }
 0x126   : > { %706 = vst [vmem:[#allocation2] sm:$0xff] %v702_v0  ;;  %v703_v3 = vadd.f32 %v691_v1, %v297_v63  ;;  %v957_v4 = vpop.f32.mrb[4].mxu1  ;;  %v930_v5 = vpop.f32.mrb[5].mxu0 }
 0x127   : > { %v931_v6 = vadd.f32 %v930_v5, %v929_v2  ;;  %v958_v7 = vpop.f32.mrb[5].mxu1  ;;  %v932_v8 = vpop.f32.mrb[6].mxu0 }
 0x128   : > { %707 = vst [vmem:[#allocation2 + $0x8] sm:$0xff] %v703_v3  ;;  %v959_v9 = vadd.f32 %v958_v7, %v957_v4  ;;  %v960_v10 = vpop.f32.mrb[6].mxu1  ;;  %v933_v11 = vpop.f32.mrb[7].mxu0 }
 0x129   : > { %v934_v13 = vadd.f32 %v933_v11, %v932_v8  ;;  %v961_v14 = vpop.f32.mrb[7].mxu1 }
 0x12a   : > { %v696_v15 = vadd.f32 %v959_v9, %v931_v6  ;;  %v962_v16 = vadd.f32 %v961_v14, %v960_v10  ;;  %713 = sbr.rel (%p900_p11) target bundleno = 317 (0x13d), region = 63 }
 0x12c   : > { %v704_v18 = vadd.f32 %v696_v15, %v298_v12  ;;  %v699_v19 = vadd.f32 %v962_v16, %v934_v13 }
 0x12d   : > { %v714_v21 = vld [vmem:[#allocation2] sm:$0xff] (!%p900_p11) }
 0x12e   : > { %708 = vst [vmem:[#allocation2 + $0x10] sm:$0xff] %v704_v18  ;;  %v705_v20 = vadd.f32 %v699_v19, %v299_v17  ;;  %v725_v24 = vadd.f32 (!%p900_p11), %v901_v22, %v714_v21 }
 0x12f   : > { %v715_v23 = vld [vmem:[#allocation2 + $0x8] sm:$0xff] (!%p900_p11) }
 0x130   : > { %709 = vst [vmem:[#allocation2 + $0x18] sm:$0xff] %v705_v20  ;;  %v726_v25 = vadd.f32 (!%p900_p11), %v901_v22, %v715_v23  ;;  %v729_v30 = vmax.f32 (!%p900_p11), %v725_v24, 0.0 }
 0x132   : > { %v730_v31 = vmax.f32 %v726_v25, 0.0  ;;  %733 = vst [vmem:[%s1238_s3] sm:$0xff] %v729_v30 }
 0x134   : > { %734 = vst [vmem:[%s1238_s3 + $0x8] sm:$0xff] %v730_v31 }
 0x135   : > { %v716_v26 = vld [vmem:[#allocation2 + $0x10] sm:$0xff] }
 0x136   : > { %v727_v28 = vadd.f32 %v901_v22, %v716_v26 }
 0x137   : > { %v717_v27 = vld [vmem:[#allocation2 + $0x18] sm:$0xff] }
 0x138   : > { %v728_v29 = vadd.f32 %v901_v22, %v717_v27  ;;  %v731_v32 = vmax.f32 %v727_v28, 0.0 }
 0x13a   : > { %v732_v33 = vmax.f32 %v728_v29, 0.0  ;;  %735 = vst [vmem:[%s1238_s3 + $0x10] sm:$0xff] %v731_v32 }
 0x13c   : > { %736 = vst [vmem:[%s1238_s3 + $0x18] sm:$0xff] %v732_v33 }
 0x13d PF: > { %s13_s16 = sadd.s32 1, %s1086_s16   ;;  %s1239_s12 = smov %s1074_s13 }
 0x13e   : > { %p10_p12 = scmp.ge.s32.totalorder %s13_s16, 5   ;;  %s1240_s13 = smov %s1144_s20 }
 0x13f   : > { %s1241_s14 = smov %s1082_s15  ;;  %s1242_s15 = smov %s1244_s17 }
 0x140   :  { %12 = sbr.rel (!%p10_p12) target bundleno = 3 (0x3), region = 104 }

// kernel: resnet50_fpn_forward.56
= control target key start
LH: loop header
LB: loop body
LE: loop exit
PB: predicated region body
PF: predicated region fallthrough
CT: control target
= control target key end

     0   :  { %s1147_s12 = smov 0   ;;  %s1149_s13 = smov 0   ;;  %s1359_s0 = inlined_call_operand.vmem [shape: bf16[32,256], index: 0, kind: input, shape index: {}]   ;;  %s1360_s1 = inlined_call_operand.vmem [shape: bf16[256,512], index: 1, kind: input, shape index: {}]   ;;  %s1361_s2 = inlined_call_operand.vmem [shape: f32[1,512], index: 2, kind: input, shape index: {}]   ;;  %s1362_s3 = inlined_call_operand.vmem [shape: f32[32,512], index: 3, kind: output, shape index: {}]  }
   0x1   :  { %s1151_s14 = smov 0   ;;  %s1153_s15 = smov 0  }
   0x2   :  { %s1155_s16 = smov 0  }
   0x3 LB: > { %s28_s17 = sadd.s32 1, %s1121_s15  ;;  %s906_s18 = sadd.s32 4294967295, %s1125_s16   ;;  %s1125_s16 = sphi %s1155_s16, %s13_s16   ;;  %s1121_s15 = sphi %s1153_s15, %s1367_s15   ;;  %s1117_s14 = sphi %s1151_s14, %s1366_s14   ;;  %s1113_s13 = sphi %s1149_s13, %s1365_s13   ;;  %s1109_s12 = sphi %s1147_s12, %s1364_s12  }
   0x4   : > { %p30_p0 = scmp.ge.s32.totalorder %s28_s17, 2  ;;  %p76_p1 = scmp.ne.s32.totalorder %s1113_s13, %s1109_s12 }
   0x5   : > { %p77_p2 = scmp.eq.s32.totalorder %s1125_s16, 0  ;;  %p134_p4 = scmp.eq.s32.totalorder %s906_s18, 1 }
   0x6   : > { %s1369_s17 = smov (%p30_p0, %s28_s17), 0  ;;  %s69_s20 = sadd.s32 1, %s1113_s13 }
   0x7   : > { %p78_p3 = por %p77_p2, %p76_p1  ;;  %s65_s19 = ssub.s32 %s1121_s15, %s1369_s17 }
   0x8   : > { %p67_p5 = scmp.eq.s32.totalorder %s65_s19, 0  ;;  %p1182_p6 = por %p134_p4, %p76_p1 }
   0x9   : > { %p910_p7 = scmp.ge.s32.totalorder %s1125_s16, 2 }
   0xa   : > { %s1187_s22 = scalar_select %p67_p5, %s1113_s13, %s69_s20  }
   0xb   : > { %171 = sbr.rel (%p910_p7) target bundleno = 38 (0x26), region = 20 }
  0x12   : > { %174 = sbr.rel (!%p78_p3) target bundleno = 38 (0x26), region = 24  ;;  %s176_s23 = sand.u32 (%p78_p3), 1, %s1113_s13  }
  0x13   : > { %s959_s24 = sshll.u32 (%p78_p3), %s1121_s15, 3  ;;  %s911_s25 = sshll.u32 (%p78_p3), %s176_s23, 8 }
  0x14   : > { %s1195_s28 = scalar_lea.vmem (%p78_p3), %s1360_s1, %s959_s24  ;;  %s1200_s29 = scalar_lea.vmem (%p78_p3), [#allocation3], %s911_s25 }
  0x15   : > { %v274_v0 = vld [vmem:[%s1195_s28] sm:$0xff] (%p78_p3)  ;;  %v276_v1 = vld [vmem:[%s1195_s28 + $0x10] sm:$0xff] (%p78_p3) }
  0x16   : > { %v278_v2 = vld [vmem:[%s1195_s28 + $0x20] sm:$0xff] (%p78_p3)  ;;  %275 = vst [vmem:[%s1200_s29] sm:$0xff] (%p78_p3), %v274_v0  ;;  %277 = vst [vmem:[%s1200_s29 + $0x8] sm:$0xff] (%p78_p3), %v276_v1  ;;  %v280_v3 = vld [vmem:[%s1195_s28 + $0x30] sm:$0xff] (%p78_p3) }
  0x17   : > { %279 = vst [vmem:[%s1200_s29 + $0x10] sm:$0xff] (%p78_p3), %v278_v2  ;;  %v282_v4 = vld [vmem:[%s1195_s28 + $0x40] sm:$0xff] (%p78_p3)  ;;  %v284_v5 = vld [vmem:[%s1195_s28 + $0x50] sm:$0xff] (%p78_p3)  ;;  %281 = vst [vmem:[%s1200_s29 + $0x18] sm:$0xff] (%p78_p3), %v280_v3 }
  0x18   : > { %283 = vst [vmem:[%s1200_s29 + $0x20] sm:$0xff] (%p78_p3), %v282_v4  ;;  %285 = vst [vmem:[%s1200_s29 + $0x28] sm:$0xff] (%p78_p3), %v284_v5  ;;  %v286_v6 = vld [vmem:[%s1195_s28 + $0x60] sm:$0xff] (%p78_p3)  ;;  %v288_v7 = vld [vmem:[%s1195_s28 + $0x70] sm:$0xff] (%p78_p3) }
  0x19   : > { %v290_v8 = vld [vmem:[%s1195_s28 + $0x80] sm:$0xff]  ;;  %287 = vst [vmem:[%s1200_s29 + $0x30] sm:$0xff] %v286_v6  ;;  %289 = vst [vmem:[%s1200_s29 + $0x38] sm:$0xff] %v288_v7  ;;  %v292_v9 = vld [vmem:[%s1195_s28 + $0x90] sm:$0xff] }
  0x1a   : > { %291 = vst [vmem:[%s1200_s29 + $0x40] sm:$0xff] %v290_v8  ;;  %v294_v10 = vld [vmem:[%s1195_s28 + $0xa0] sm:$0xff]  ;;  %v296_v11 = vld [vmem:[%s1195_s28 + $0xb0] sm:$0xff]  ;;  %293 = vst [vmem:[%s1200_s29 + $0x48] sm:$0xff] %v292_v9 }
  0x1b   : > { %295 = vst [vmem:[%s1200_s29 + $0x50] sm:$0xff] %v294_v10  ;;  %297 = vst [vmem:[%s1200_s29 + $0x58] sm:$0xff] %v296_v11  ;;  %v298_v12 = vld [vmem:[%s1195_s28 + $0xc0] sm:$0xff]  ;;  %v300_v13 = vld [vmem:[%s1195_s28 + $0xd0] sm:$0xff] }
  0x1c   : > { %v302_v14 = vld [vmem:[%s1195_s28 + $0xe0] sm:$0xff]  ;;  %299 = vst [vmem:[%s1200_s29 + $0x60] sm:$0xff] %v298_v12  ;;  %301 = vst [vmem:[%s1200_s29 + $0x68] sm:$0xff] %v300_v13  ;;  %v304_v15 = vld [vmem:[%s1195_s28 + $0xf0] sm:$0xff] }
  0x1d   : > { %303 = vst [vmem:[%s1200_s29 + $0x70] sm:$0xff] %v302_v14  ;;  %v306_v16 = vld [vmem:[%s1195_s28 + $0x100] sm:$0xff]  ;;  %v308_v17 = vld [vmem:[%s1195_s28 + $0x110] sm:$0xff]  ;;  %305 = vst [vmem:[%s1200_s29 + $0x78] sm:$0xff] %v304_v15 }
  0x1e   : > { %307 = vst [vmem:[%s1200_s29 + $0x80] sm:$0xff] %v306_v16  ;;  %309 = vst [vmem:[%s1200_s29 + $0x88] sm:$0xff] %v308_v17  ;;  %v310_v18 = vld [vmem:[%s1195_s28 + $0x120] sm:$0xff]  ;;  %v312_v19 = vld [vmem:[%s1195_s28 + $0x130] sm:$0xff] }
  0x1f   : > { %v314_v20 = vld [vmem:[%s1195_s28 + $0x140] sm:$0xff]  ;;  %311 = vst [vmem:[%s1200_s29 + $0x90] sm:$0xff] %v310_v18  ;;  %313 = vst [vmem:[%s1200_s29 + $0x98] sm:$0xff] %v312_v19  ;;  %v316_v21 = vld [vmem:[%s1195_s28 + $0x150] sm:$0xff] }
  0x20   : > { %315 = vst [vmem:[%s1200_s29 + $0xa0] sm:$0xff] %v314_v20  ;;  %v318_v22 = vld [vmem:[%s1195_s28 + $0x160] sm:$0xff]  ;;  %v320_v23 = vld [vmem:[%s1195_s28 + $0x170] sm:$0xff]  ;;  %317 = vst [vmem:[%s1200_s29 + $0xa8] sm:$0xff] %v316_v21 }
  0x21   : > { %319 = vst [vmem:[%s1200_s29 + $0xb0] sm:$0xff] %v318_v22  ;;  %321 = vst [vmem:[%s1200_s29 + $0xb8] sm:$0xff] %v320_v23  ;;  %v322_v24 = vld [vmem:[%s1195_s28 + $0x180] sm:$0xff]  ;;  %v324_v25 = vld [vmem:[%s1195_s28 + $0x190] sm:$0xff] }
  0x22   : > { %v326_v26 = vld [vmem:[%s1195_s28 + $0x1a0] sm:$0xff]  ;;  %323 = vst [vmem:[%s1200_s29 + $0xc0] sm:$0xff] %v322_v24  ;;  %325 = vst [vmem:[%s1200_s29 + $0xc8] sm:$0xff] %v324_v25  ;;  %v328_v27 = vld [vmem:[%s1195_s28 + $0x1b0] sm:$0xff] }
  0x23   : > { %327 = vst [vmem:[%s1200_s29 + $0xd0] sm:$0xff] %v326_v26  ;;  %v330_v28 = vld [vmem:[%s1195_s28 + $0x1c0] sm:$0xff]  ;;  %v332_v29 = vld [vmem:[%s1195_s28 + $0x1d0] sm:$0xff]  ;;  %329 = vst [vmem:[%s1200_s29 + $0xd8] sm:$0xff] %v328_v27 }
  0x24   : > { %331 = vst [vmem:[%s1200_s29 + $0xe0] sm:$0xff] %v330_v28  ;;  %333 = vst [vmem:[%s1200_s29 + $0xe8] sm:$0xff] %v332_v29  ;;  %v334_v30 = vld [vmem:[%s1195_s28 + $0x1e0] sm:$0xff]  ;;  %v336_v31 = vld [vmem:[%s1195_s28 + $0x1f0] sm:$0xff] }
  0x25   : > { %335 = vst [vmem:[%s1200_s29 + $0xf0] sm:$0xff] %v334_v30  ;;  %337 = vst [vmem:[%s1200_s29 + $0xf8] sm:$0xff] %v336_v31 }
  0x26 PF: > { %p914_p8 = scmp.ge.s32.totalorder %s1125_s16, 1  ;;  %p350_p9 = scmp.lt.s32.totalorder %s1125_s16, 3 }
  0x28   : > { %p351_p10 = pnand %p914_p8, %p350_p9 }
  0x29   : > { %s357_s30 = sand.u32 (!%p351_p10), 1, %s1109_s12   ;;  %v1083_v32 = vld [vmem:[%s1359_s0 + $0x4] ss:$8 sps:$4 sm:$0xff] (!%p351_p10)   ;;  %v1086_v33 = vld [vmem:[%s1359_s0 + $0x14] ss:$8 sps:$4 sm:$0xff] (!%p351_p10)   ;;  %s917_s20 = sshll.u32 (!%p351_p10), %s1117_s14, 1  ;;  %v732_v4 = vlaneseq (!%p351_p10) }
  0x2a   : > { %354 = sbr.rel (%p351_p10) target bundleno = 336 (0x150), region = 66  ;;  %s915_s4 = sshll.u32 (!%p351_p10), %s357_s30, 8  ;;  %682 = vmatprep.mubr.bf16.mxu0 (!%p351_p10), %v1083_v32  ;;  %692 = vmatprep.mubr.bf16.mxu1 (!%p351_p10), %v1086_v33  ;;  %v1081_v2 = vld [vmem:[%s1359_s0] ss:$8 sps:$4 sm:$0xff] (!%p351_p10)   ;;  %v1084_v3 = vld [vmem:[%s1359_s0 + $0x10] ss:$8 sps:$4 sm:$0xff] (!%p351_p10)  }
  0x2b   : > { %s1274_s9 = scalar_lea.vmem (!%p351_p10), [#allocation3], %s915_s4  ;;  %p408_p11 = scmp.lt.s32.totalorder (!%p351_p10), %s917_s20, 3  ;;  %v733_v5 = vshrl.u32 (!%p351_p10), %v732_v4, 7 }
  0x2c   : > { %v1033_v34 = vld [vmem:[%s1274_s9 + $0x4] ss:$8 sps:$4 sm:$0xff] (!%p351_p10)   ;;  %v1035_v35 = vld [vmem:[%s1274_s9] ss:$8 sps:$4 sm:$0xff] (!%p351_p10)   ;;  %v1036_v36 = vld [vmem:[%s1274_s9 + $0x14] ss:$8 sps:$4 sm:$0xff] (!%p351_p10)  }
  0x2d   : > { %650 = vmatprep.subr.bf16.mxu0 (!%p351_p10), %v1033_v34  ;;  %961 = vmatprep.subr.bf16.mxu1 (!%p351_p10), %v1033_v34  ;;  %v1038_v37 = vld [vmem:[%s1274_s9 + $0x10] ss:$8 sps:$4 sm:$0xff] (!%p351_p10)   ;;  %v1039_v38 = vld [vmem:[%s1274_s9 + $0x24] ss:$8 sps:$4 sm:$0xff] (!%p351_p10)   ;;  %v1041_v39 = vld [vmem:[%s1274_s9 + $0x20] ss:$8 sps:$4 sm:$0xff] (!%p351_p10)  }
  0x2e   : > { %651 = vmatpush1.bf16.msra.mxu0 (!%p351_p10), %v1035_v35  ;;  %977 = vmatpush1.bf16.msra.mxu1 (!%p351_p10), %v1035_v35  ;;  %v1042_v40 = vld [vmem:[%s1274_s9 + $0x34] ss:$8 sps:$4 sm:$0xff] (!%p351_p10)   ;;  %v1044_v41 = vld [vmem:[%s1274_s9 + $0x30] ss:$8 sps:$4 sm:$0xff] (!%p351_p10)   ;;  %v1045_v42 = vld [vmem:[%s1274_s9 + $0x44] ss:$8 sps:$4 sm:$0xff] (!%p351_p10)  }
  0x2f   : > { %652 = vmatprep.subr.bf16.mxu0 (!%p351_p10), %v1036_v36  ;;  %962 = vmatprep.subr.bf16.mxu1 (!%p351_p10), %v1036_v36  ;;  %v1047_v43 = vld [vmem:[%s1274_s9 + $0x40] ss:$8 sps:$4 sm:$0xff] (!%p351_p10)   ;;  %v1048_v44 = vld [vmem:[%s1274_s9 + $0x54] ss:$8 sps:$4 sm:$0xff] (!%p351_p10)   ;;  %v1050_v45 = vld [vmem:[%s1274_s9 + $0x50] ss:$8 sps:$4 sm:$0xff] (!%p351_p10)  }
  0x30   : > { %v1051_v46 = vld [vmem:[%s1274_s9 + $0x64] ss:$8 sps:$4 sm:$0xff] (!%p351_p10)   ;;  %v1053_v47 = vld [vmem:[%s1274_s9 + $0x60] ss:$8 sps:$4 sm:$0xff] (!%p351_p10)   ;;  %v1054_v48 = vld [vmem:[%s1274_s9 + $0x74] ss:$8 sps:$4 sm:$0xff] (!%p351_p10)  }
  0x31   : > { %v1056_v49 = vld [vmem:[%s1274_s9 + $0x70] ss:$8 sps:$4 sm:$0xff]   ;;  %v1057_v50 = vld [vmem:[%s1274_s9 + $0x84] ss:$8 sps:$4 sm:$0xff]   ;;  %v1059_v51 = vld [vmem:[%s1274_s9 + $0x80] ss:$8 sps:$4 sm:$0xff]  }
  0x32   : > { %653 = vmatpush1.bf16.msra.mxu0 %v1038_v37  ;;  %978 = vmatpush1.bf16.msra.mxu1 %v1038_v37  ;;  %v1060_v52 = vld [vmem:[%s1274_s9 + $0x94] ss:$8 sps:$4 sm:$0xff]   ;;  %v1062_v53 = vld [vmem:[%s1274_s9 + $0x90] ss:$8 sps:$4 sm:$0xff]   ;;  %v1063_v54 = vld [vmem:[%s1274_s9 + $0xa4] ss:$8 sps:$4 sm:$0xff]  }
  0x33   : > { %654 = vmatprep.subr.bf16.mxu0 %v1039_v38  ;;  %963 = vmatprep.subr.bf16.mxu1 %v1039_v38  ;;  %v1065_v55 = vld [vmem:[%s1274_s9 + $0xa0] ss:$8 sps:$4 sm:$0xff]   ;;  %v1066_v56 = vld [vmem:[%s1274_s9 + $0xb4] ss:$8 sps:$4 sm:$0xff]   ;;  %v1068_v57 = vld [vmem:[%s1274_s9 + $0xb0] ss:$8 sps:$4 sm:$0xff]  }
  0x34   : > { %v1069_v58 = vld [vmem:[%s1274_s9 + $0xc4] ss:$8 sps:$4 sm:$0xff]   ;;  %v1071_v59 = vld [vmem:[%s1274_s9 + $0xc0] ss:$8 sps:$4 sm:$0xff]   ;;  %v1072_v60 = vld [vmem:[%s1274_s9 + $0xd4] ss:$8 sps:$4 sm:$0xff]  }
  0x35   : > { %v1074_v61 = vld [vmem:[%s1274_s9 + $0xd0] ss:$8 sps:$4 sm:$0xff]   ;;  %v1075_v62 = vld [vmem:[%s1274_s9 + $0xe4] ss:$8 sps:$4 sm:$0xff]   ;;  %v1077_v63 = vld [vmem:[%s1274_s9 + $0xe0] ss:$8 sps:$4 sm:$0xff]  }
  0x36   : > { %655 = vmatpush1.bf16.msra.mxu0 %v1041_v39  ;;  %979 = vmatpush1.bf16.msra.mxu1 %v1041_v39  ;;  %v1078_v0 = vld [vmem:[%s1274_s9 + $0xf4] ss:$8 sps:$4 sm:$0xff]   ;;  %v1080_v1 = vld [vmem:[%s1274_s9 + $0xf0] ss:$8 sps:$4 sm:$0xff]   ;;  %s1371_s20 = smov (!%p408_p11, %s917_s20), 3  ;;  %v734_v6 = vsub.s32 0, %v733_v5 }
  0x37   : > { %656 = vmatprep.subr.bf16.mxu0 %v1042_v40  ;;  %964 = vmatprep.subr.bf16.mxu1 %v1042_v40  ;;  %s410_s25 = scalar_lea.vmem %s1361_s2, %s1371_s20  ;;  %v738_v8 = vsub.s32 1, %v733_v5  ;;  %s916_s26 = sshll.u32 %s357_s30, 6 }
  0x38   : > { %v730_v7 = vld [vmem:[%s410_s25] sm:$0x3]  ;;  %s1320_s27 = scalar_lea.vmem [#allocation4], %s916_s26  ;;  %s960_s12 = sshll.u32 (%p1182_p6), %s1117_s14, 4 }
  0x39   : > { %v735_v9 = vrot.slane %v730_v7, %v734_v6  ;;  %v739_v10 = vrot.slane %v730_v7, %v738_v8  ;;  %s770_s30 = scalar_lea.vmem (%p1182_p6), %s1362_s3, %s960_s12 }
  0x3a   : > { %657 = vmatpush1.bf16.msra.mxu0 %v1044_v41  ;;  %980 = vmatpush1.bf16.msra.mxu1 %v1044_v41 }
  0x3b   : > { %658 = vmatprep.subr.bf16.mxu0 %v1045_v42  ;;  %965 = vmatprep.subr.bf16.mxu1 %v1045_v42 }
  0x3e   : > { %659 = vmatpush1.bf16.msra.mxu0 %v1047_v43  ;;  %981 = vmatpush1.bf16.msra.mxu1 %v1047_v43 }
  0x3f   : > { %660 = vmatprep.subr.bf16.mxu0 %v1048_v44  ;;  %966 = vmatprep.subr.bf16.mxu1 %v1048_v44 }
  0x42   : > { %661 = vmatpush1.bf16.msra.mxu0 %v1050_v45  ;;  %982 = vmatpush1.bf16.msra.mxu1 %v1050_v45 }
  0x43   : > { %662 = vmatprep.subr.bf16.mxu0 %v1051_v46  ;;  %967 = vmatprep.subr.bf16.mxu1 %v1051_v46 }
  0x46   : > { %663 = vmatpush1.bf16.msra.mxu0 %v1053_v47  ;;  %983 = vmatpush1.bf16.msra.mxu1 %v1053_v47 }
  0x47   : > { %664 = vmatprep.subr.bf16.mxu0 %v1054_v48  ;;  %968 = vmatprep.subr.bf16.mxu1 %v1054_v48 }
  0x4a   : > { %665 = vmatpush1.bf16.msra.mxu0 %v1056_v49  ;;  %984 = vmatpush1.bf16.msra.mxu1 %v1056_v49 }
  0x4b   : > { %666 = vmatprep.subr.bf16.mxu0 %v1057_v50  ;;  %969 = vmatprep.subr.bf16.mxu1 %v1057_v50 }
  0x4e   : > { %667 = vmatpush1.bf16.msra.mxu0 %v1059_v51  ;;  %985 = vmatpush1.bf16.msra.mxu1 %v1059_v51 }
  0x4f   : > { %668 = vmatprep.subr.bf16.mxu0 %v1060_v52  ;;  %970 = vmatprep.subr.bf16.mxu1 %v1060_v52 }
  0x52   : > { %669 = vmatpush1.bf16.msra.mxu0 %v1062_v53  ;;  %986 = vmatpush1.bf16.msra.mxu1 %v1062_v53 }
  0x53   : > { %670 = vmatprep.subr.bf16.mxu0 %v1063_v54  ;;  %971 = vmatprep.subr.bf16.mxu1 %v1063_v54 }
  0x56   : > { %671 = vmatpush1.bf16.msra.mxu0 %v1065_v55  ;;  %987 = vmatpush1.bf16.msra.mxu1 %v1065_v55 }
  0x57   : > { %672 = vmatprep.subr.bf16.mxu0 %v1066_v56  ;;  %972 = vmatprep.subr.bf16.mxu1 %v1066_v56 }
  0x5a   : > { %673 = vmatpush1.bf16.msra.mxu0 %v1068_v57  ;;  %988 = vmatpush1.bf16.msra.mxu1 %v1068_v57 }
  0x5b   : > { %674 = vmatprep.subr.bf16.mxu0 %v1069_v58  ;;  %973 = vmatprep.subr.bf16.mxu1 %v1069_v58 }
  0x5e   : > { %675 = vmatpush1.bf16.msra.mxu0 %v1071_v59  ;;  %989 = vmatpush1.bf16.msra.mxu1 %v1071_v59 }
  0x5f   : > { %676 = vmatprep.subr.bf16.mxu0 %v1072_v60  ;;  %974 = vmatprep.subr.bf16.mxu1 %v1072_v60 }
  0x62   : > { %677 = vmatpush1.bf16.msra.mxu0 %v1074_v61  ;;  %990 = vmatpush1.bf16.msra.mxu1 %v1074_v61 }
  0x63   : > { %678 = vmatprep.subr.bf16.mxu0 %v1075_v62  ;;  %975 = vmatprep.subr.bf16.mxu1 %v1075_v62 }
  0x66   : > { %679 = vmatpush1.bf16.msra.mxu0 %v1077_v63  ;;  %991 = vmatpush1.bf16.msra.mxu1 %v1077_v63 }
  0x67   : > { %680 = vmatprep.subr.bf16.mxu0 %v1078_v0  ;;  %976 = vmatprep.subr.bf16.mxu1 %v1078_v0 }
  0x6a   : > { %681 = vmatpush1.bf16.msra.mxu0 %v1080_v1  ;;  %992 = vmatpush1.bf16.msra.mxu1 %v1080_v1 }
  0x6d   : > { %683 = vmatmul.mubr.bf16.vlgmr.msra.gmra.mrb[0].mxu0 %v1081_v2  ;;  %693 = vmatmul.mubr.bf16.vlgmr.msra.gmra.mrb[0].mxu1 %v1084_v3 }
 0x140   : > { %v684_v11 = vpop.f32.mrb[0].mxu0  ;;  %v694_v12 = vpop.f32.mrb[0].mxu1  ;;  %764 = sbr.rel (!%p1182_p6) target bundleno = 336 (0x150), region = 82 }
 0x141   : > { %v742_v13 = vadd.f32 %v735_v9, %v684_v11  ;;  %v746_v14 = vadd.f32 %v735_v9, %v694_v12  ;;  %v686_v15 = vpop.f32.mrb[1].mxu0  ;;  %v696_v16 = vpop.f32.mrb[1].mxu1 }
 0x142   : > { %v743_v17 = vadd.f32 %v739_v10, %v686_v15  ;;  %v747_v18 = vadd.f32 %v739_v10, %v696_v16  ;;  %v688_v19 = vpop.f32.mrb[2].mxu0  ;;  %v698_v20 = vpop.f32.mrb[2].mxu1 }
 0x143   : > { %750 = vst [vmem:[%s1320_s27] sm:$0xff] %v742_v13  ;;  %754 = vst [vmem:[%s1320_s27 + $0x20] sm:$0xff] %v746_v14  ;;  %v744_v21 = vadd.f32 %v735_v9, %v688_v19  ;;  %v748_v22 = vadd.f32 %v735_v9, %v698_v20  ;;  %v690_v23 = vpop.f32.mrb[3].mxu0  ;;  %v700_v24 = vpop.f32.mrb[3].mxu1 }
 0x144   : > { %751 = vst [vmem:[%s1320_s27 + $0x8] sm:$0xff] %v743_v17  ;;  %755 = vst [vmem:[%s1320_s27 + $0x28] sm:$0xff] %v747_v18  ;;  %v745_v25 = vadd.f32 %v739_v10, %v690_v23  ;;  %v749_v26 = vadd.f32 %v739_v10, %v700_v24 }
 0x145   : > { %752 = vst [vmem:[%s1320_s27 + $0x10] sm:$0xff] %v744_v21  ;;  %756 = vst [vmem:[%s1320_s27 + $0x30] sm:$0xff] %v748_v22 }
 0x146   : > { %753 = vst [vmem:[%s1320_s27 + $0x18] sm:$0xff] %v745_v25  ;;  %757 = vst [vmem:[%s1320_s27 + $0x38] sm:$0xff] %v749_v26 }
 0x14a   : > { %v783_v27 = vld [vmem:[%s1320_s27] sm:$0xff] }
 0x14b   : > { %v785_v28 = vld [vmem:[%s1320_s27 + $0x8] sm:$0xff]  ;;  %v791_v31 = vld [vmem:[%s1320_s27 + $0x20] sm:$0xff]  ;;  %784 = vst [vmem:[%s770_s30] sm:$0xff] %v783_v27 }
 0x14c   : > { %v787_v29 = vld [vmem:[%s1320_s27 + $0x10] sm:$0xff]  ;;  %v793_v32 = vld [vmem:[%s1320_s27 + $0x28] sm:$0xff]  ;;  %786 = vst [vmem:[%s770_s30 + $0x8] sm:$0xff] %v785_v28  ;;  %792 = vst [vmem:[%s770_s30 + $0x40] sm:$0xff] %v791_v31 }
 0x14d   : > { %v789_v30 = vld [vmem:[%s1320_s27 + $0x18] sm:$0xff]  ;;  %788 = vst [vmem:[%s770_s30 + $0x20] sm:$0xff] %v787_v29  ;;  %794 = vst [vmem:[%s770_s30 + $0x48] sm:$0xff] %v793_v32  ;;  %v795_v33 = vld [vmem:[%s1320_s27 + $0x30] sm:$0xff] }
 0x14e   : > { %790 = vst [vmem:[%s770_s30 + $0x28] sm:$0xff] %v789_v30  ;;  %v797_v34 = vld [vmem:[%s1320_s27 + $0x38] sm:$0xff]  ;;  %796 = vst [vmem:[%s770_s30 + $0x60] sm:$0xff] %v795_v33 }
 0x14f   : > { %798 = vst [vmem:[%s770_s30 + $0x68] sm:$0xff] %v797_v34 }
 0x150 PF: > { %s13_s16 = sadd.s32 1, %s1125_s16   ;;  %s1364_s12 = smov %s1113_s13 }
 0x151   : > { %p10_p12 = scmp.ge.s32.totalorder %s13_s16, 4   ;;  %s1365_s13 = smov %s1187_s22 }
 0x152   : > { %s1366_s14 = smov %s1121_s15  ;;  %s1367_s15 = smov %s1369_s17 }
 0x153   :  { %12 = sbr.rel (!%p10_p12) target bundleno = 3 (0x3), region = 142 }

// kernel: resnet50_fpn_forward.59
= control target key start
LH: loop header
LB: loop body
LE: loop exit
PB: predicated region body
PF: predicated region fallthrough
CT: control target
= control target key end

     0   :  { %s1052_s15 = smov 0   ;;  %s1054_s16 = smov 0   ;;  %s1191_s0 = inlined_call_operand.vmem [shape: bf16[32,128], index: 0, kind: input, shape index: {}]   ;;  %s1192_s1 = inlined_call_operand.vmem [shape: bf16[128,512], index: 1, kind: input, shape index: {}]   ;;  %s1193_s2 = inlined_call_operand.vmem [shape: f32[1,512], index: 2, kind: input, shape index: {}]   ;;  %s1194_s3 = inlined_call_operand.vmem [shape: f32[32,512], index: 3, kind: input, shape index: {}]   ;;  %s1195_s4 = inlined_call_operand.vmem [shape: f32[32,512], index: 4, kind: output, shape index: {}]  }
   0x1   :  { %s1056_s17 = smov 0   ;;  %s1058_s18 = smov 0  }
   0x2   :  { %s1060_s19 = smov 0  }
   0x3 LB: > { %s29_s20 = sadd.s32 1, %s1020_s18  ;;  %s861_s21 = sadd.s32 4294967295, %s1024_s19   ;;  %s1024_s19 = sphi %s1060_s19, %s14_s19   ;;  %s1020_s18 = sphi %s1058_s18, %s1201_s18   ;;  %s1016_s17 = sphi %s1056_s17, %s1200_s17   ;;  %s1012_s16 = sphi %s1054_s16, %s1199_s16   ;;  %s1008_s15 = sphi %s1052_s15, %s1198_s15  }
   0x4   : > { %p31_p0 = scmp.ge.s32.totalorder %s29_s20, 2  ;;  %p77_p1 = scmp.ne.s32.totalorder %s1012_s16, %s1008_s15 }
   0x5   : > { %p78_p2 = scmp.eq.s32.totalorder %s1024_s19, 0  ;;  %p163_p4 = scmp.eq.s32.totalorder %s861_s21, 1 }
   0x6   : > { %s1203_s20 = smov (%p31_p0, %s29_s20), 0  ;;  %s70_s24 = sadd.s32 1, %s1012_s16 }
   0x7   : > { %p1084_p3 = por %p78_p2, %p77_p1  ;;  %s66_s23 = ssub.s32 %s1020_s18, %s1203_s20 }
   0x8   : > { %p68_p5 = scmp.eq.s32.totalorder %s66_s23, 0  ;;  %p1091_p6 = por %p163_p4, %p77_p1 }
   0x9   : > { %p865_p7 = scmp.ge.s32.totalorder %s1024_s19, 2 }
   0xa   : > { %s1096_s26 = scalar_select %p68_p5, %s1012_s16, %s70_s24  }
   0xb   : > { %197 = sbr.rel (%p865_p7) target bundleno = 38 (0x26), region = 20 }
  0x12   : > { %200 = sbr.rel (!%p1084_p3) target bundleno = 30 (0x1e), region = 24  ;;  %s202_s27 = sand.u32 (%p1084_p3), 1, %s1012_s16  }
  0x13   : > { %s900_s28 = sshll.u32 (%p1084_p3), %s1020_s18, 3  ;;  %s866_s29 = sshll.u32 (%p1084_p3), %s202_s27, 7 }
  0x14   : > { %s1106_s6 = scalar_lea.vmem (%p1084_p3), %s1192_s1, %s900_s28  ;;  %s204_s7 = scalar_lea.vmem (%p1084_p3), [#allocation3], %s866_s29 }
  0x15   : > { %v268_v0 = vld [vmem:[%s1106_s6] sm:$0xff] (%p1084_p3)  ;;  %v270_v1 = vld [vmem:[%s1106_s6 + $0x10] sm:$0xff] (%p1084_p3) }
  0x16   : > { %v272_v2 = vld [vmem:[%s1106_s6 + $0x20] sm:$0xff] (%p1084_p3)  ;;  %269 = vst [vmem:[%s204_s7] sm:$0xff] (%p1084_p3), %v268_v0  ;;  %271 = vst [vmem:[%s204_s7 + $0x8] sm:$0xff] (%p1084_p3), %v270_v1  ;;  %v274_v3 = vld [vmem:[%s1106_s6 + $0x30] sm:$0xff] (%p1084_p3) }
  0x17   : > { %273 = vst [vmem:[%s204_s7 + $0x10] sm:$0xff] (%p1084_p3), %v272_v2  ;;  %v276_v4 = vld [vmem:[%s1106_s6 + $0x40] sm:$0xff] (%p1084_p3)  ;;  %v278_v5 = vld [vmem:[%s1106_s6 + $0x50] sm:$0xff] (%p1084_p3)  ;;  %275 = vst [vmem:[%s204_s7 + $0x18] sm:$0xff] (%p1084_p3), %v274_v3 }
  0x18   : > { %277 = vst [vmem:[%s204_s7 + $0x20] sm:$0xff] (%p1084_p3), %v276_v4  ;;  %279 = vst [vmem:[%s204_s7 + $0x28] sm:$0xff] (%p1084_p3), %v278_v5  ;;  %v280_v6 = vld [vmem:[%s1106_s6 + $0x60] sm:$0xff] (%p1084_p3)  ;;  %v282_v7 = vld [vmem:[%s1106_s6 + $0x70] sm:$0xff] (%p1084_p3) }
  0x19   : > { %v284_v8 = vld [vmem:[%s1106_s6 + $0x80] sm:$0xff]  ;;  %281 = vst [vmem:[%s204_s7 + $0x30] sm:$0xff] %v280_v6  ;;  %283 = vst [vmem:[%s204_s7 + $0x38] sm:$0xff] %v282_v7  ;;  %v286_v9 = vld [vmem:[%s1106_s6 + $0x90] sm:$0xff] }
  0x1a   : > { %285 = vst [vmem:[%s204_s7 + $0x40] sm:$0xff] %v284_v8  ;;  %v288_v10 = vld [vmem:[%s1106_s6 + $0xa0] sm:$0xff]  ;;  %v290_v11 = vld [vmem:[%s1106_s6 + $0xb0] sm:$0xff]  ;;  %287 = vst [vmem:[%s204_s7 + $0x48] sm:$0xff] %v286_v9 }
  0x1b   : > { %289 = vst [vmem:[%s204_s7 + $0x50] sm:$0xff] %v288_v10  ;;  %291 = vst [vmem:[%s204_s7 + $0x58] sm:$0xff] %v290_v11  ;;  %v292_v12 = vld [vmem:[%s1106_s6 + $0xc0] sm:$0xff]  ;;  %v294_v13 = vld [vmem:[%s1106_s6 + $0xd0] sm:$0xff] }
  0x1c   : > { %v296_v14 = vld [vmem:[%s1106_s6 + $0xe0] sm:$0xff]  ;;  %293 = vst [vmem:[%s204_s7 + $0x60] sm:$0xff] %v292_v12  ;;  %295 = vst [vmem:[%s204_s7 + $0x68] sm:$0xff] %v294_v13  ;;  %v298_v15 = vld [vmem:[%s1106_s6 + $0xf0] sm:$0xff] }
  0x1d   : > { %297 = vst [vmem:[%s204_s7 + $0x70] sm:$0xff] %v296_v14  ;;  %299 = vst [vmem:[%s204_s7 + $0x78] sm:$0xff] %v298_v15 }
  0x1e PF: > { %313 = sbr.rel (!%p1084_p3) target bundleno = 38 (0x26), region = 66  ;;  %s315_s8 = sand.u32 (%p1084_p3), 1, %s1012_s16  }
  0x1f   : > { %s901_s9 = sshll.u32 (%p1084_p3), %s1020_s18, 4  ;;  %s869_s10 = sshll.u32 (%p1084_p3), %s315_s8, 6 }
  0x20   : > { %s323_s13 = scalar_lea.vmem (%p1084_p3), %s1194_s3, %s901_s9  ;;  %s317_s14 = scalar_lea.vmem (%p1084_p3), [#allocation4], %s869_s10 }
  0x21   : > { %v336_v16 = vld [vmem:[%s323_s13] sm:$0xff] (%p1084_p3)  ;;  %v338_v17 = vld [vmem:[%s323_s13 + $0x8] sm:$0xff] (%p1084_p3) }
  0x22   : > { %v340_v18 = vld [vmem:[%s323_s13 + $0x20] sm:$0xff] (%p1084_p3)  ;;  %337 = vst [vmem:[%s317_s14] sm:$0xff] (%p1084_p3), %v336_v16  ;;  %339 = vst [vmem:[%s317_s14 + $0x8] sm:$0xff] (%p1084_p3), %v338_v17  ;;  %v342_v19 = vld [vmem:[%s323_s13 + $0x28] sm:$0xff] (%p1084_p3) }
  0x23   : > { %341 = vst [vmem:[%s317_s14 + $0x10] sm:$0xff] (%p1084_p3), %v340_v18  ;;  %v344_v20 = vld [vmem:[%s323_s13 + $0x40] sm:$0xff] (%p1084_p3)  ;;  %v346_v21 = vld [vmem:[%s323_s13 + $0x48] sm:$0xff] (%p1084_p3)  ;;  %343 = vst [vmem:[%s317_s14 + $0x18] sm:$0xff] (%p1084_p3), %v342_v19 }
  0x24   : > { %345 = vst [vmem:[%s317_s14 + $0x20] sm:$0xff] (%p1084_p3), %v344_v20  ;;  %347 = vst [vmem:[%s317_s14 + $0x28] sm:$0xff] (%p1084_p3), %v346_v21  ;;  %v348_v22 = vld [vmem:[%s323_s13 + $0x60] sm:$0xff] (%p1084_p3)  ;;  %v350_v23 = vld [vmem:[%s323_s13 + $0x68] sm:$0xff] (%p1084_p3) }
  0x25   : > { %349 = vst [vmem:[%s317_s14 + $0x30] sm:$0xff] %v348_v22  ;;  %351 = vst [vmem:[%s317_s14 + $0x38] sm:$0xff] %v350_v23 }
  0x26 PF: > { %p872_p8 = scmp.ge.s32.totalorder %s1024_s19, 1  ;;  %p356_p9 = scmp.lt.s32.totalorder %s1024_s19, 3 }
  0x28   : > { %p357_p10 = pnand %p872_p8, %p356_p9 }
  0x29   : > { %s363_s21 = sand.u32 (!%p357_p10), 1, %s1008_s15   ;;  %v1026_v24 = vmov (!%p357_p10), 0   ;;  %v984_v41 = vld [vmem:[%s1191_s0] sm:$0xff] (!%p357_p10)   ;;  %v985_v42 = vld [vmem:[%s1191_s0 + $0x8] sm:$0xff] (!%p357_p10)   ;;  %s876_s30 = sshll.u32 (!%p357_p10), %s1016_s17, 1  ;;  %v645_v43 = vlaneseq (!%p357_p10) }
  0x2a   : > { %360 = sbr.rel (%p357_p10) target bundleno = 308 (0x134), region = 89  ;;  %s873_s22 = sshll.u32 (!%p357_p10), %s363_s21, 7  ;;  %595 = vmatprep.mubr.bf16.mxu0 (!%p357_p10), %v1026_v24  ;;  %605 = vmatprep.mubr.bf16.mxu1 (!%p357_p10), %v1026_v24 }
  0x2b   : > { %s1136_s23 = scalar_lea.vmem (!%p357_p10), [#allocation3], %s873_s22  ;;  %p422_p11 = scmp.lt.s32.totalorder (!%p357_p10), %s876_s30, 3  ;;  %v646_v44 = vshrl.u32 (!%p357_p10), %v645_v43, 7 }
  0x2c   : > { %v960_v25 = vld [vmem:[%s1136_s23 + $0x4] ss:$8 sps:$4 sm:$0xff] (!%p357_p10)   ;;  %v962_v26 = vld [vmem:[%s1136_s23] ss:$8 sps:$4 sm:$0xff] (!%p357_p10)   ;;  %v963_v27 = vld [vmem:[%s1136_s23 + $0x14] ss:$8 sps:$4 sm:$0xff] (!%p357_p10)  }
  0x2d   : > { %563 = vmatprep.subr.bf16.mxu0 (!%p357_p10), %v960_v25  ;;  %903 = vmatprep.subr.bf16.mxu1 (!%p357_p10), %v960_v25  ;;  %v965_v28 = vld [vmem:[%s1136_s23 + $0x10] ss:$8 sps:$4 sm:$0xff] (!%p357_p10)   ;;  %v966_v29 = vld [vmem:[%s1136_s23 + $0x24] ss:$8 sps:$4 sm:$0xff] (!%p357_p10)   ;;  %v968_v30 = vld [vmem:[%s1136_s23 + $0x20] ss:$8 sps:$4 sm:$0xff] (!%p357_p10)  }
  0x2e   : > { %564 = vmatpush1.bf16.msra.mxu0 (!%p357_p10), %v962_v26  ;;  %911 = vmatpush1.bf16.msra.mxu1 (!%p357_p10), %v962_v26  ;;  %v969_v31 = vld [vmem:[%s1136_s23 + $0x34] ss:$8 sps:$4 sm:$0xff] (!%p357_p10)   ;;  %v971_v32 = vld [vmem:[%s1136_s23 + $0x30] ss:$8 sps:$4 sm:$0xff] (!%p357_p10)   ;;  %v972_v33 = vld [vmem:[%s1136_s23 + $0x44] ss:$8 sps:$4 sm:$0xff] (!%p357_p10)  }
  0x2f   : > { %565 = vmatprep.subr.bf16.mxu0 (!%p357_p10), %v963_v27  ;;  %904 = vmatprep.subr.bf16.mxu1 (!%p357_p10), %v963_v27  ;;  %v974_v34 = vld [vmem:[%s1136_s23 + $0x40] ss:$8 sps:$4 sm:$0xff] (!%p357_p10)   ;;  %v975_v35 = vld [vmem:[%s1136_s23 + $0x54] ss:$8 sps:$4 sm:$0xff] (!%p357_p10)   ;;  %v977_v36 = vld [vmem:[%s1136_s23 + $0x50] ss:$8 sps:$4 sm:$0xff] (!%p357_p10)  }
  0x30   : > { %v978_v37 = vld [vmem:[%s1136_s23 + $0x64] ss:$8 sps:$4 sm:$0xff] (!%p357_p10)   ;;  %v980_v38 = vld [vmem:[%s1136_s23 + $0x60] ss:$8 sps:$4 sm:$0xff] (!%p357_p10)   ;;  %v981_v39 = vld [vmem:[%s1136_s23 + $0x74] ss:$8 sps:$4 sm:$0xff] (!%p357_p10)  }
  0x31   : > { %v983_v40 = vld [vmem:[%s1136_s23 + $0x70] ss:$8 sps:$4 sm:$0xff]   ;;  %s1205_s30 = smov (!%p422_p11, %s876_s30), 3  ;;  %v647_v45 = vsub.s32 0, %v646_v44  ;;  %s1166_s8 = sshll.u32 %s363_s21, 6  ;;  %v651_v47 = vsub.s32 1, %v646_v44 }
  0x32   : > { %566 = vmatpush1.bf16.msra.mxu0 %v965_v28  ;;  %912 = vmatpush1.bf16.msra.mxu1 %v965_v28  ;;  %s424_s7 = scalar_lea.vmem %s1193_s2, %s1205_s30  ;;  %s372_s9 = scalar_lea.vmem [#allocation4], %s1166_s8 }
  0x33   : > { %567 = vmatprep.subr.bf16.mxu0 %v966_v29  ;;  %905 = vmatprep.subr.bf16.mxu1 %v966_v29  ;;  %v643_v46 = vld [vmem:[%s424_s7] sm:$0x3]  ;;  %v664_v57 = vld [vmem:[%s372_s9 + $0x8] sm:$0xff]  ;;  %v665_v63 = vld [vmem:[%s372_s9 + $0x10] sm:$0xff]  ;;  %s409_s15 = scalar_lea.vmem [#allocation5], %s1166_s8  ;;  %s902_s10 = sshll.u32 (%p1091_p6), %s1016_s17, 4 }
  0x34   : > { %v648_v48 = vrot.slane %v643_v46, %v647_v45  ;;  %v652_v49 = vrot.slane %v643_v46, %v651_v47  ;;  %v663_v51 = vld [vmem:[%s372_s9] sm:$0xff]  ;;  %v668_v59 = vld [vmem:[%s372_s9 + $0x28] sm:$0xff]  ;;  %v669_v1 = vld [vmem:[%s372_s9 + $0x30] sm:$0xff]  ;;  %s707_s13 = scalar_lea.vmem (%p1091_p6), %s1195_s4, %s902_s10 }
  0x35   : > { %v667_v53 = vld [vmem:[%s372_s9 + $0x20] sm:$0xff]  ;;  %v666_v7 = vld [vmem:[%s372_s9 + $0x18] sm:$0xff] }
  0x36   : > { %568 = vmatpush1.bf16.msra.mxu0 %v968_v30  ;;  %913 = vmatpush1.bf16.msra.mxu1 %v968_v30  ;;  %v670_v9 = vld [vmem:[%s372_s9 + $0x38] sm:$0xff] }
  0x37   : > { %569 = vmatprep.subr.bf16.mxu0 %v969_v31  ;;  %906 = vmatprep.subr.bf16.mxu1 %v969_v31 }
  0x3a   : > { %570 = vmatpush1.bf16.msra.mxu0 %v971_v32  ;;  %914 = vmatpush1.bf16.msra.mxu1 %v971_v32 }
  0x3b   : > { %571 = vmatprep.subr.bf16.mxu0 %v972_v33  ;;  %907 = vmatprep.subr.bf16.mxu1 %v972_v33 }
  0x3e   : > { %572 = vmatpush1.bf16.msra.mxu0 %v974_v34  ;;  %915 = vmatpush1.bf16.msra.mxu1 %v974_v34 }
  0x3f   : > { %573 = vmatprep.subr.bf16.mxu0 %v975_v35  ;;  %908 = vmatprep.subr.bf16.mxu1 %v975_v35 }
  0x42   : > { %574 = vmatpush1.bf16.msra.mxu0 %v977_v36  ;;  %916 = vmatpush1.bf16.msra.mxu1 %v977_v36 }
  0x43   : > { %575 = vmatprep.subr.bf16.mxu0 %v978_v37  ;;  %909 = vmatprep.subr.bf16.mxu1 %v978_v37 }
  0x46   : > { %576 = vmatpush1.bf16.msra.mxu0 %v980_v38  ;;  %917 = vmatpush1.bf16.msra.mxu1 %v980_v38 }
  0x47   : > { %577 = vmatprep.subr.bf16.mxu0 %v981_v39  ;;  %910 = vmatprep.subr.bf16.mxu1 %v981_v39 }
  0x4a   : > { %578 = vmatpush1.bf16.msra.mxu0 %v983_v40  ;;  %918 = vmatpush1.bf16.msra.mxu1 %v983_v40 }
  0x4d   : > { %596 = vmatmul.mubr.bf16.vlgmr.msra.gmra.mrb[0].mxu0 %v984_v41  ;;  %606 = vmatmul.mubr.bf16.vlgmr.msra.gmra.mrb[0].mxu1 %v985_v42 }
 0x120   : > { %v597_v50 = vpop.f32.mrb[0].mxu0  ;;  %v607_v52 = vpop.f32.mrb[0].mxu1 }
 0x121   : > { %v655_v54 = vadd.f32 %v648_v48, %v597_v50  ;;  %v659_v55 = vadd.f32 %v648_v48, %v607_v52  ;;  %v599_v56 = vpop.f32.mrb[1].mxu0  ;;  %v609_v58 = vpop.f32.mrb[1].mxu1 }
 0x122   : > { %v656_v60 = vadd.f32 %v652_v49, %v599_v56  ;;  %v660_v61 = vadd.f32 %v652_v49, %v609_v58  ;;  %v601_v62 = vpop.f32.mrb[2].mxu0  ;;  %v611_v0 = vpop.f32.mrb[2].mxu1 }
 0x123   : > { %v671_v2 = vadd.f32 %v663_v51, %v655_v54  ;;  %v675_v3 = vadd.f32 %v667_v53, %v659_v55  ;;  %v657_v4 = vadd.f32 %v648_v48, %v601_v62  ;;  %v661_v5 = vadd.f32 %v648_v48, %v611_v0  ;;  %v603_v6 = vpop.f32.mrb[3].mxu0  ;;  %v613_v8 = vpop.f32.mrb[3].mxu1 }
 0x124   : > { %v672_v10 = vadd.f32 %v664_v57, %v656_v60  ;;  %v676_v11 = vadd.f32 %v668_v59, %v660_v61  ;;  %v658_v12 = vadd.f32 %v652_v49, %v603_v6  ;;  %v662_v13 = vadd.f32 %v652_v49, %v613_v8  ;;  %701 = sbr.rel (!%p1091_p6) target bundleno = 308 (0x134), region = 109 }
 0x125   : > { %v679_v14 = vmax.f32 %v671_v2, 0.0  ;;  %v683_v15 = vmax.f32 %v675_v3, 0.0  ;;  %v673_v16 = vadd.f32 %v665_v63, %v657_v4  ;;  %v677_v17 = vadd.f32 %v669_v1, %v661_v5 }
 0x126   : > { %v680_v18 = vmax.f32 %v672_v10, 0.0  ;;  %v684_v19 = vmax.f32 %v676_v11, 0.0  ;;  %v674_v20 = vadd.f32 %v666_v7, %v658_v12  ;;  %v678_v21 = vadd.f32 %v670_v9, %v662_v13 }
 0x127   : > { %687 = vst [vmem:[%s409_s15] sm:$0xff] %v679_v14  ;;  %691 = vst [vmem:[%s409_s15 + $0x20] sm:$0xff] %v683_v15  ;;  %v681_v22 = vmax.f32 %v673_v16, 0.0  ;;  %v685_v23 = vmax.f32 %v677_v17, 0.0 }
 0x128   : > { %688 = vst [vmem:[%s409_s15 + $0x8] sm:$0xff] %v680_v18  ;;  %692 = vst [vmem:[%s409_s15 + $0x28] sm:$0xff] %v684_v19  ;;  %v682_v24 = vmax.f32 %v674_v20, 0.0  ;;  %v686_v25 = vmax.f32 %v678_v21, 0.0 }
 0x129   : > { %689 = vst [vmem:[%s409_s15 + $0x10] sm:$0xff] %v681_v22  ;;  %693 = vst [vmem:[%s409_s15 + $0x30] sm:$0xff] %v685_v23 }
 0x12a   : > { %690 = vst [vmem:[%s409_s15 + $0x18] sm:$0xff] %v682_v24  ;;  %694 = vst [vmem:[%s409_s15 + $0x38] sm:$0xff] %v686_v25 }
 0x12e   : > { %v720_v26 = vld [vmem:[%s409_s15] sm:$0xff] }
 0x12f   : > { %v722_v27 = vld [vmem:[%s409_s15 + $0x8] sm:$0xff]  ;;  %v728_v30 = vld [vmem:[%s409_s15 + $0x20] sm:$0xff]  ;;  %721 = vst [vmem:[%s707_s13] sm:$0xff] %v720_v26 }
 0x130   : > { %v724_v28 = vld [vmem:[%s409_s15 + $0x10] sm:$0xff]  ;;  %v730_v31 = vld [vmem:[%s409_s15 + $0x28] sm:$0xff]  ;;  %723 = vst [vmem:[%s707_s13 + $0x8] sm:$0xff] %v722_v27  ;;  %729 = vst [vmem:[%s707_s13 + $0x40] sm:$0xff] %v728_v30 }
 0x131   : > { %v726_v29 = vld [vmem:[%s409_s15 + $0x18] sm:$0xff]  ;;  %725 = vst [vmem:[%s707_s13 + $0x20] sm:$0xff] %v724_v28  ;;  %731 = vst [vmem:[%s707_s13 + $0x48] sm:$0xff] %v730_v31  ;;  %v732_v32 = vld [vmem:[%s409_s15 + $0x30] sm:$0xff] }
 0x132   : > { %727 = vst [vmem:[%s707_s13 + $0x28] sm:$0xff] %v726_v29  ;;  %v734_v33 = vld [vmem:[%s409_s15 + $0x38] sm:$0xff]  ;;  %733 = vst [vmem:[%s707_s13 + $0x60] sm:$0xff] %v732_v32 }
 0x133   : > { %735 = vst [vmem:[%s707_s13 + $0x68] sm:$0xff] %v734_v33 }
 0x134 PF: > { %s14_s19 = sadd.s32 1, %s1024_s19   ;;  %s1198_s15 = smov %s1012_s16 }
 0x135   : > { %p11_p12 = scmp.ge.s32.totalorder %s14_s19, 4   ;;  %s1199_s16 = smov %s1096_s26 }
 0x136   : > { %s1200_s17 = smov %s1020_s18  ;;  %s1201_s18 = smov %s1203_s20 }
 0x137   :  { %13 = sbr.rel (!%p11_p12) target bundleno = 3 (0x3), region = 177 }

// kernel: resnet50_fpn_forward.60
= control target key start
LH: loop header
LB: loop body
LE: loop exit
PB: predicated region body
PF: predicated region fallthrough
CT: control target
= control target key end

     0   :  { %s763_s1 = inlined_call_operand.vmem [shape: bf16[512,128], index: 1, kind: input, shape index: {}]   ;;  %s764_s0 = inlined_call_operand.vmem [shape: bf16[32,512], index: 0, kind: input, shape index: {}]   ;;  %s765_s2 = inlined_call_operand.vmem [shape: f32[1,128], index: 2, kind: input, shape index: {}]   ;;  %s766_s3 = inlined_call_operand.vmem [shape: f32[32,128], index: 3, kind: output, shape index: {}]  }
   0x1   :  { %v564_v0 = vld [vmem:[%s763_s1 + $0x40] sm:$0xff]   ;;  %v568_v4 = vld [vmem:[%s763_s1 + $0x48] sm:$0xff]   ;;  %v572_v8 = vld [vmem:[%s763_s1 + $0x50] sm:$0xff]  }
   0x2   :  { %v565_v1 = vld [vmem:[%s763_s1 + $0xc0] sm:$0xff]   ;;  %508 = vmatprep.subr.bf16.mxu0 %v564_v0  ;;  %v569_v5 = vld [vmem:[%s763_s1 + $0xc8] sm:$0xff]   ;;  %v573_v9 = vld [vmem:[%s763_s1 + $0xd0] sm:$0xff]  }
   0x3   :  { %v566_v2 = vld [vmem:[%s763_s1] sm:$0xff]   ;;  %536 = vmatprep.subr.bf16.mxu1 %v565_v1  ;;  %v570_v6 = vld [vmem:[%s763_s1 + $0x8] sm:$0xff]   ;;  %v574_v10 = vld [vmem:[%s763_s1 + $0x10] sm:$0xff]  }
   0x4   :  { %v567_v3 = vld [vmem:[%s763_s1 + $0x80] sm:$0xff]   ;;  %509 = vmatpush3.bf16.msra.mxu0 %v566_v2  ;;  %v571_v7 = vld [vmem:[%s763_s1 + $0x88] sm:$0xff]   ;;  %v575_v11 = vld [vmem:[%s763_s1 + $0x90] sm:$0xff]  }
   0x5   :  { %537 = vmatpush3.bf16.msra.mxu1 %v567_v3  ;;  %510 = vmatprep.subr.bf16.mxu0 %v568_v4  ;;  %v576_v12 = vld [vmem:[%s763_s1 + $0x58] sm:$0xff]   ;;  %v580_v16 = vld [vmem:[%s763_s1 + $0x60] sm:$0xff]   ;;  %v584_v20 = vld [vmem:[%s763_s1 + $0x68] sm:$0xff]  }
   0x6   :  { %538 = vmatprep.subr.bf16.mxu1 %v569_v5  ;;  %v577_v13 = vld [vmem:[%s763_s1 + $0xd8] sm:$0xff]   ;;  %v581_v17 = vld [vmem:[%s763_s1 + $0xe0] sm:$0xff]   ;;  %v585_v21 = vld [vmem:[%s763_s1 + $0xe8] sm:$0xff]  }
   0x7   :  { %v578_v14 = vld [vmem:[%s763_s1 + $0x18] sm:$0xff]   ;;  %v582_v18 = vld [vmem:[%s763_s1 + $0x20] sm:$0xff]   ;;  %v586_v22 = vld [vmem:[%s763_s1 + $0x28] sm:$0xff]  }
   0x8   :  { %511 = vmatpush3.bf16.msra.mxu0 %v570_v6  ;;  %v579_v15 = vld [vmem:[%s763_s1 + $0x98] sm:$0xff]   ;;  %v583_v19 = vld [vmem:[%s763_s1 + $0xa0] sm:$0xff]   ;;  %v587_v23 = vld [vmem:[%s763_s1 + $0xa8] sm:$0xff]  }
   0x9   :  { %539 = vmatpush3.bf16.msra.mxu1 %v571_v7  ;;  %512 = vmatprep.subr.bf16.mxu0 %v572_v8  ;;  %v588_v24 = vld [vmem:[%s763_s1 + $0x70] sm:$0xff]   ;;  %v592_v28 = vld [vmem:[%s763_s1 + $0x78] sm:$0xff]   ;;  %v507_v49 = vld [vmem:[%s765_s2] ss:$0 sm:$0xff] }
   0xa   :  { %540 = vmatprep.subr.bf16.mxu1 %v573_v9  ;;  %v589_v25 = vld [vmem:[%s763_s1 + $0xf0] sm:$0xff]   ;;  %v593_v29 = vld [vmem:[%s763_s1 + $0xf8] sm:$0xff]  }
   0xb   :  { %v590_v26 = vld [vmem:[%s763_s1 + $0x30] sm:$0xff]   ;;  %v594_v30 = vld [vmem:[%s763_s1 + $0x38] sm:$0xff]  }
   0xc   :  { %513 = vmatpush3.bf16.msra.mxu0 %v574_v10  ;;  %v591_v27 = vld [vmem:[%s763_s1 + $0xb0] sm:$0xff]   ;;  %v595_v31 = vld [vmem:[%s763_s1 + $0xb8] sm:$0xff]  }
   0xd   :  { %541 = vmatpush3.bf16.msra.mxu1 %v575_v11  ;;  %514 = vmatprep.subr.bf16.mxu0 %v576_v12  ;;  %v596_v32 = vld [vmem:[%s764_s0] ss:$16 sps:$4 sm:$0xff]   ;;  %v598_v33 = vld [vmem:[%s764_s0 + $0x4] ss:$16 sps:$4 sm:$0xff]   ;;  %v599_v34 = vld [vmem:[%s764_s0 + $0x8] ss:$16 sps:$4 sm:$0xff]  }
   0xe   :  { %542 = vmatprep.subr.bf16.mxu1 %v577_v13  ;;  %v601_v35 = vld [vmem:[%s764_s0 + $0xc] ss:$16 sps:$4 sm:$0xff]   ;;  %363 = vmatprep.mubr.bf16.mxu0 %v598_v33  ;;  %v602_v36 = vld [vmem:[%s764_s0 + $0x24] ss:$16 sps:$4 sm:$0xff]   ;;  %v606_v38 = vld [vmem:[%s764_s0 + $0x20] ss:$16 sps:$4 sm:$0xff]  }
   0xf   :  { %412 = vmatprep.mubr.bf16.mxu1 %v601_v35  ;;  %v604_v37 = vld [vmem:[%s764_s0 + $0x2c] ss:$16 sps:$4 sm:$0xff]   ;;  %v607_v39 = vld [vmem:[%s764_s0 + $0x28] ss:$16 sps:$4 sm:$0xff]  }
  0x10   :  { %515 = vmatpush3.bf16.msra.mxu0 %v578_v14 }
  0x11   :  { %543 = vmatpush3.bf16.msra.mxu1 %v579_v15  ;;  %516 = vmatprep.subr.bf16.mxu0 %v580_v16 }
  0x12   :  { %544 = vmatprep.subr.bf16.mxu1 %v581_v17 }
  0x14   :  { %517 = vmatpush3.bf16.msra.mxu0 %v582_v18 }
  0x15   :  { %545 = vmatpush3.bf16.msra.mxu1 %v583_v19  ;;  %518 = vmatprep.subr.bf16.mxu0 %v584_v20 }
  0x16   :  { %546 = vmatprep.subr.bf16.mxu1 %v585_v21 }
  0x18   :  { %519 = vmatpush3.bf16.msra.mxu0 %v586_v22 }
  0x19   :  { %547 = vmatpush3.bf16.msra.mxu1 %v587_v23  ;;  %520 = vmatprep.subr.bf16.mxu0 %v588_v24 }
  0x1a   :  { %548 = vmatprep.subr.bf16.mxu1 %v589_v25 }
  0x1c   :  { %521 = vmatpush3.bf16.msra.mxu0 %v590_v26 }
  0x1d   :  { %549 = vmatpush3.bf16.msra.mxu1 %v591_v27  ;;  %522 = vmatprep.subr.bf16.mxu0 %v592_v28 }
  0x1e   :  { %550 = vmatprep.subr.bf16.mxu1 %v593_v29 }
  0x20   :  { %523 = vmatpush3.bf16.msra.mxu0 %v594_v30 }
  0x21   :  { %551 = vmatpush3.bf16.msra.mxu1 %v595_v31 }
  0x23   :  { %364 = vmatmul.mubr.bf16.vlgmr.msra.gmra.mrb[0].mxu0 %v596_v32 }
  0x24   :  { %413 = vmatmul.mubr.bf16.vlgmr.msra.gmra.mrb[0].mxu1 %v599_v34  ;;  %371 = vmatprep.mubr.bf16.mxu0 %v602_v36 }
  0x25   :  { %420 = vmatprep.mubr.bf16.mxu1 %v604_v37 }
  0x2b   :  { %372 = vmatmul.mubr.bf16.gmra.mrb[4].mxu0 %v606_v38 }
  0x2c   :  { %421 = vmatmul.mubr.bf16.gmra.mrb[4].mxu1 %v607_v39 }
  0xf6   :  { %v524_v40 = vpop.f32.mrb[0].mxu0 }
  0xf7   :  { %v552_v41 = vpop.f32.mrb[0].mxu1  ;;  %v525_v42 = vpop.f32.mrb[1].mxu0 }
  0xf8   :  { %v526_v43 = vadd.f32 %v525_v42, %v524_v40  ;;  %v553_v44 = vpop.f32.mrb[1].mxu1  ;;  %v527_v45 = vpop.f32.mrb[2].mxu0 }
  0xf9   :  { %v554_v46 = vadd.f32 %v553_v44, %v552_v41  ;;  %v555_v47 = vpop.f32.mrb[2].mxu1  ;;  %v528_v48 = vpop.f32.mrb[3].mxu0 }
  0xfa   :  { %v529_v50 = vadd.f32 %v528_v48, %v527_v45  ;;  %v556_v51 = vpop.f32.mrb[3].mxu1 }
  0xfb   :  { %v415_v52 = vadd.f32 %v554_v46, %v526_v43  ;;  %v557_v53 = vadd.f32 %v556_v51, %v555_v47 }
  0xfd   :  { %v451_v54 = vadd.f32 %v507_v49, %v415_v52  ;;  %v418_v55 = vadd.f32 %v557_v53, %v529_v50 }
  0xfe   :  { %v530_v56 = vpop.f32.mrb[4].mxu0 }
  0xff   :  { %v455_v57 = vmax.f32 %v451_v54, 0.0  ;;  %v452_v58 = vadd.f32 %v507_v49, %v418_v55  ;;  %v558_v59 = vpop.f32.mrb[4].mxu1  ;;  %v531_v60 = vpop.f32.mrb[5].mxu0 }
 0x100   :  { %v532_v61 = vadd.f32 %v531_v60, %v530_v56  ;;  %v559_v62 = vpop.f32.mrb[5].mxu1  ;;  %v533_v63 = vpop.f32.mrb[6].mxu0 }
 0x101   :  { %459 = vst [vmem:[%s766_s3] sm:$0xff] %v455_v57  ;;  %v456_v0 = vmax.f32 %v452_v58, 0.0  ;;  %v560_v1 = vadd.f32 %v559_v62, %v558_v59  ;;  %v561_v2 = vpop.f32.mrb[6].mxu1  ;;  %v534_v3 = vpop.f32.mrb[7].mxu0 }
 0x102   :  { %v535_v4 = vadd.f32 %v534_v3, %v533_v63  ;;  %v562_v5 = vpop.f32.mrb[7].mxu1 }
 0x103   :  { %460 = vst [vmem:[%s766_s3 + $0x8] sm:$0xff] %v456_v0  ;;  %v423_v6 = vadd.f32 %v560_v1, %v532_v61  ;;  %v563_v7 = vadd.f32 %v562_v5, %v561_v2 }
 0x105   :  { %v453_v8 = vadd.f32 %v507_v49, %v423_v6  ;;  %v426_v9 = vadd.f32 %v563_v7, %v535_v4 }
 0x107   :  { %v457_v10 = vmax.f32 %v453_v8, 0.0  ;;  %v454_v11 = vadd.f32 %v507_v49, %v426_v9 }
 0x109   :  { %461 = vst [vmem:[%s766_s3 + $0x10] sm:$0xff] %v457_v10  ;;  %v458_v12 = vmax.f32 %v454_v11, 0.0 }
 0x10b   :  { %462 = vst [vmem:[%s766_s3 + $0x18] sm:$0xff] %v458_v12 }

// kernel: resnet50_fpn_forward.70
= control target key start
LH: loop header
LB: loop body
LE: loop exit
PB: predicated region body
PF: predicated region fallthrough
CT: control target
= control target key end

     0   :  { %s1090_s1 = inlined_call_operand.vmem [shape: bf16[512,256], index: 1, kind: input, shape index: {}]   ;;  %s1091_s0 = inlined_call_operand.vmem [shape: bf16[32,512], index: 0, kind: input, shape index: {}]   ;;  %s1092_s2 = inlined_call_operand.vmem [shape: f32[1,256], index: 2, kind: input, shape index: {}]   ;;  %s1093_s3 = inlined_call_operand.vmem [shape: f32[32,256], index: 3, kind: output, shape index: {}]  }
   0x1   :  { %v719_v0 = vld [vmem:[%s1090_s1 + $0x4] ss:$8 sps:$4 sm:$0xff]   ;;  %v723_v2 = vld [vmem:[%s1090_s1] ss:$8 sps:$4 sm:$0xff]   ;;  %v725_v4 = vld [vmem:[%s1090_s1 + $0x14] ss:$8 sps:$4 sm:$0xff]  }
   0x2   :  { %v721_v1 = vld [vmem:[%s1090_s1 + $0x104] ss:$8 sps:$4 sm:$0xff]   ;;  %466 = vmatprep.subr.bf16.mxu1 %v719_v0  ;;  %v724_v3 = vld [vmem:[%s1090_s1 + $0x100] ss:$8 sps:$4 sm:$0xff]   ;;  %v727_v5 = vld [vmem:[%s1090_s1 + $0x114] ss:$8 sps:$4 sm:$0xff]  }
   0x3   :  { %519 = vmatprep.subr.bf16.mxu0 %v721_v1  ;;  %467 = vmatpush1.bf16.msra.mxu1 %v723_v2  ;;  %v729_v6 = vld [vmem:[%s1090_s1 + $0x10] ss:$8 sps:$4 sm:$0xff]   ;;  %v731_v8 = vld [vmem:[%s1090_s1 + $0x24] ss:$8 sps:$4 sm:$0xff]   ;;  %v735_v10 = vld [vmem:[%s1090_s1 + $0x20] ss:$8 sps:$4 sm:$0xff]  }
   0x4   :  { %520 = vmatpush1.bf16.msra.mxu0 %v724_v3  ;;  %468 = vmatprep.subr.bf16.mxu1 %v725_v4  ;;  %v730_v7 = vld [vmem:[%s1090_s1 + $0x110] ss:$8 sps:$4 sm:$0xff]   ;;  %v733_v9 = vld [vmem:[%s1090_s1 + $0x124] ss:$8 sps:$4 sm:$0xff]   ;;  %v736_v11 = vld [vmem:[%s1090_s1 + $0x120] ss:$8 sps:$4 sm:$0xff]  }
   0x5   :  { %521 = vmatprep.subr.bf16.mxu0 %v727_v5  ;;  %v737_v12 = vld [vmem:[%s1090_s1 + $0x34] ss:$8 sps:$4 sm:$0xff]   ;;  %v741_v14 = vld [vmem:[%s1090_s1 + $0x30] ss:$8 sps:$4 sm:$0xff]   ;;  %v743_v16 = vld [vmem:[%s1090_s1 + $0x44] ss:$8 sps:$4 sm:$0xff]  }
   0x6   :  { %v739_v13 = vld [vmem:[%s1090_s1 + $0x134] ss:$8 sps:$4 sm:$0xff]   ;;  %v742_v15 = vld [vmem:[%s1090_s1 + $0x130] ss:$8 sps:$4 sm:$0xff]   ;;  %v745_v17 = vld [vmem:[%s1090_s1 + $0x144] ss:$8 sps:$4 sm:$0xff]  }
   0x7   :  { %469 = vmatpush1.bf16.msra.mxu1 %v729_v6  ;;  %v747_v18 = vld [vmem:[%s1090_s1 + $0x40] ss:$8 sps:$4 sm:$0xff]   ;;  %v749_v20 = vld [vmem:[%s1090_s1 + $0x54] ss:$8 sps:$4 sm:$0xff]   ;;  %v753_v22 = vld [vmem:[%s1090_s1 + $0x50] ss:$8 sps:$4 sm:$0xff]  }
   0x8   :  { %522 = vmatpush1.bf16.msra.mxu0 %v730_v7  ;;  %470 = vmatprep.subr.bf16.mxu1 %v731_v8  ;;  %v748_v19 = vld [vmem:[%s1090_s1 + $0x140] ss:$8 sps:$4 sm:$0xff]   ;;  %v751_v21 = vld [vmem:[%s1090_s1 + $0x154] ss:$8 sps:$4 sm:$0xff]   ;;  %v754_v23 = vld [vmem:[%s1090_s1 + $0x150] ss:$8 sps:$4 sm:$0xff]   ;;  %v601_v8 = vlaneseq }
   0x9   :  { %523 = vmatprep.subr.bf16.mxu0 %v733_v9  ;;  %v755_v24 = vld [vmem:[%s1090_s1 + $0x64] ss:$8 sps:$4 sm:$0xff]   ;;  %v759_v26 = vld [vmem:[%s1090_s1 + $0x60] ss:$8 sps:$4 sm:$0xff]   ;;  %v761_v28 = vld [vmem:[%s1090_s1 + $0x74] ss:$8 sps:$4 sm:$0xff]  }
   0xa   :  { %v757_v25 = vld [vmem:[%s1090_s1 + $0x164] ss:$8 sps:$4 sm:$0xff]   ;;  %v760_v27 = vld [vmem:[%s1090_s1 + $0x160] ss:$8 sps:$4 sm:$0xff]   ;;  %v763_v29 = vld [vmem:[%s1090_s1 + $0x174] ss:$8 sps:$4 sm:$0xff]  }
   0xb   :  { %471 = vmatpush1.bf16.msra.mxu1 %v735_v10  ;;  %v765_v30 = vld [vmem:[%s1090_s1 + $0x70] ss:$8 sps:$4 sm:$0xff]   ;;  %v767_v32 = vld [vmem:[%s1090_s1 + $0x84] ss:$8 sps:$4 sm:$0xff]   ;;  %v771_v34 = vld [vmem:[%s1090_s1 + $0x80] ss:$8 sps:$4 sm:$0xff]  }
   0xc   :  { %524 = vmatpush1.bf16.msra.mxu0 %v736_v11  ;;  %472 = vmatprep.subr.bf16.mxu1 %v737_v12  ;;  %v766_v31 = vld [vmem:[%s1090_s1 + $0x170] ss:$8 sps:$4 sm:$0xff]   ;;  %v769_v33 = vld [vmem:[%s1090_s1 + $0x184] ss:$8 sps:$4 sm:$0xff]   ;;  %v772_v35 = vld [vmem:[%s1090_s1 + $0x180] ss:$8 sps:$4 sm:$0xff]  }
   0xd   :  { %525 = vmatprep.subr.bf16.mxu0 %v739_v13  ;;  %v773_v36 = vld [vmem:[%s1090_s1 + $0x94] ss:$8 sps:$4 sm:$0xff]   ;;  %v777_v38 = vld [vmem:[%s1090_s1 + $0x90] ss:$8 sps:$4 sm:$0xff]   ;;  %v779_v40 = vld [vmem:[%s1090_s1 + $0xa4] ss:$8 sps:$4 sm:$0xff]  }
   0xe   :  { %v775_v37 = vld [vmem:[%s1090_s1 + $0x194] ss:$8 sps:$4 sm:$0xff]   ;;  %v778_v39 = vld [vmem:[%s1090_s1 + $0x190] ss:$8 sps:$4 sm:$0xff]   ;;  %v781_v41 = vld [vmem:[%s1090_s1 + $0x1a4] ss:$8 sps:$4 sm:$0xff]  }
   0xf   :  { %473 = vmatpush1.bf16.msra.mxu1 %v741_v14  ;;  %v783_v42 = vld [vmem:[%s1090_s1 + $0xa0] ss:$8 sps:$4 sm:$0xff]   ;;  %v785_v44 = vld [vmem:[%s1090_s1 + $0xb4] ss:$8 sps:$4 sm:$0xff]   ;;  %v789_v46 = vld [vmem:[%s1090_s1 + $0xb0] ss:$8 sps:$4 sm:$0xff]  }
  0x10   :  { %526 = vmatpush1.bf16.msra.mxu0 %v742_v15  ;;  %474 = vmatprep.subr.bf16.mxu1 %v743_v16  ;;  %v784_v43 = vld [vmem:[%s1090_s1 + $0x1a0] ss:$8 sps:$4 sm:$0xff]   ;;  %v787_v45 = vld [vmem:[%s1090_s1 + $0x1b4] ss:$8 sps:$4 sm:$0xff]   ;;  %v790_v47 = vld [vmem:[%s1090_s1 + $0x1b0] ss:$8 sps:$4 sm:$0xff]  }
  0x11   :  { %527 = vmatprep.subr.bf16.mxu0 %v745_v17  ;;  %v791_v48 = vld [vmem:[%s1090_s1 + $0xc4] ss:$8 sps:$4 sm:$0xff]   ;;  %v795_v52 = vld [vmem:[%s1090_s1 + $0xc0] ss:$8 sps:$4 sm:$0xff]   ;;  %v797_v54 = vld [vmem:[%s1090_s1 + $0xd4] ss:$8 sps:$4 sm:$0xff]  }
  0x12   :  { %v817_v49 = vld [vmem:[%s1091_s0 + $0x4] ss:$16 sps:$4 sm:$0xff]   ;;  %v820_v51 = vld [vmem:[%s1091_s0 + $0xc] ss:$16 sps:$4 sm:$0xff]   ;;  %v796_v53 = vld [vmem:[%s1090_s1 + $0x1c0] ss:$8 sps:$4 sm:$0xff]  }
  0x13   :  { %475 = vmatpush1.bf16.msra.mxu1 %v747_v18  ;;  %v793_v50 = vld [vmem:[%s1090_s1 + $0x1c4] ss:$8 sps:$4 sm:$0xff]   ;;  %498 = vmatprep.mubr.bf16.mxu1 %v817_v49  ;;  %v799_v55 = vld [vmem:[%s1090_s1 + $0x1d4] ss:$8 sps:$4 sm:$0xff]   ;;  %v801_v56 = vld [vmem:[%s1090_s1 + $0xd0] ss:$8 sps:$4 sm:$0xff]  }
  0x14   :  { %528 = vmatpush1.bf16.msra.mxu0 %v748_v19  ;;  %476 = vmatprep.subr.bf16.mxu1 %v749_v20  ;;  %v802_v57 = vld [vmem:[%s1090_s1 + $0x1d0] ss:$8 sps:$4 sm:$0xff]   ;;  %v803_v58 = vld [vmem:[%s1090_s1 + $0xe4] ss:$8 sps:$4 sm:$0xff]   ;;  %v807_v60 = vld [vmem:[%s1090_s1 + $0xe0] ss:$8 sps:$4 sm:$0xff]  }
  0x15   :  { %529 = vmatprep.subr.bf16.mxu0 %v751_v21  ;;  %551 = vmatprep.mubr.bf16.mxu0 %v820_v51  ;;  %v805_v59 = vld [vmem:[%s1090_s1 + $0x1e4] ss:$8 sps:$4 sm:$0xff]   ;;  %v808_v61 = vld [vmem:[%s1090_s1 + $0x1e0] ss:$8 sps:$4 sm:$0xff]   ;;  %v809_v62 = vld [vmem:[%s1090_s1 + $0xf4] ss:$8 sps:$4 sm:$0xff]  }
  0x16   :  { %v811_v63 = vld [vmem:[%s1090_s1 + $0x1f4] ss:$8 sps:$4 sm:$0xff]   ;;  %v813_v0 = vld [vmem:[%s1090_s1 + $0xf0] ss:$8 sps:$4 sm:$0xff]   ;;  %v602_v9 = vshrl.u32 %v601_v8, 7 }
  0x17   :  { %477 = vmatpush1.bf16.msra.mxu1 %v753_v22  ;;  %v814_v1 = vld [vmem:[%s1090_s1 + $0x1f0] ss:$8 sps:$4 sm:$0xff]   ;;  %v821_v4 = vld [vmem:[%s1091_s0 + $0x24] ss:$16 sps:$4 sm:$0xff]   ;;  %v823_v5 = vld [vmem:[%s1091_s0 + $0x2c] ss:$16 sps:$4 sm:$0xff]  }
  0x18   :  { %530 = vmatpush1.bf16.msra.mxu0 %v754_v23  ;;  %478 = vmatprep.subr.bf16.mxu1 %v755_v24  ;;  %v815_v2 = vld [vmem:[%s1091_s0] ss:$16 sps:$4 sm:$0xff]   ;;  %v818_v3 = vld [vmem:[%s1091_s0 + $0x8] ss:$16 sps:$4 sm:$0xff]   ;;  %v603_v10 = vsub.s32 0, %v602_v9  ;;  %v607_v12 = vsub.s32 1, %v602_v9 }
  0x19   :  { %531 = vmatprep.subr.bf16.mxu0 %v757_v25  ;;  %v825_v6 = vld [vmem:[%s1091_s0 + $0x20] ss:$16 sps:$4 sm:$0xff]   ;;  %v826_v7 = vld [vmem:[%s1091_s0 + $0x28] ss:$16 sps:$4 sm:$0xff]  }
  0x1a   :  { %v599_v11 = vld [vmem:[%s1092_s2] sm:$0x3] }
  0x1b   :  { %479 = vmatpush1.bf16.msra.mxu1 %v759_v26  ;;  %v604_v13 = vrot.slane %v599_v11, %v603_v10  ;;  %v608_v16 = vrot.slane %v599_v11, %v607_v12 }
  0x1c   :  { %532 = vmatpush1.bf16.msra.mxu0 %v760_v27  ;;  %480 = vmatprep.subr.bf16.mxu1 %v761_v28 }
  0x1d   :  { %533 = vmatprep.subr.bf16.mxu0 %v763_v29 }
  0x1f   :  { %481 = vmatpush1.bf16.msra.mxu1 %v765_v30 }
  0x20   :  { %534 = vmatpush1.bf16.msra.mxu0 %v766_v31  ;;  %482 = vmatprep.subr.bf16.mxu1 %v767_v32 }
  0x21   :  { %535 = vmatprep.subr.bf16.mxu0 %v769_v33 }
  0x23   :  { %483 = vmatpush1.bf16.msra.mxu1 %v771_v34 }
  0x24   :  { %536 = vmatpush1.bf16.msra.mxu0 %v772_v35  ;;  %484 = vmatprep.subr.bf16.mxu1 %v773_v36 }
  0x25   :  { %537 = vmatprep.subr.bf16.mxu0 %v775_v37 }
  0x27   :  { %485 = vmatpush1.bf16.msra.mxu1 %v777_v38 }
  0x28   :  { %538 = vmatpush1.bf16.msra.mxu0 %v778_v39  ;;  %486 = vmatprep.subr.bf16.mxu1 %v779_v40 }
  0x29   :  { %539 = vmatprep.subr.bf16.mxu0 %v781_v41 }
  0x2b   :  { %487 = vmatpush1.bf16.msra.mxu1 %v783_v42 }
  0x2c   :  { %540 = vmatpush1.bf16.msra.mxu0 %v784_v43  ;;  %488 = vmatprep.subr.bf16.mxu1 %v785_v44 }
  0x2d   :  { %541 = vmatprep.subr.bf16.mxu0 %v787_v45 }
  0x2f   :  { %489 = vmatpush1.bf16.msra.mxu1 %v789_v46 }
  0x30   :  { %542 = vmatpush1.bf16.msra.mxu0 %v790_v47  ;;  %490 = vmatprep.subr.bf16.mxu1 %v791_v48 }
  0x31   :  { %543 = vmatprep.subr.bf16.mxu0 %v793_v50 }
  0x33   :  { %491 = vmatpush1.bf16.msra.mxu1 %v795_v52 }
  0x34   :  { %544 = vmatpush1.bf16.msra.mxu0 %v796_v53  ;;  %492 = vmatprep.subr.bf16.mxu1 %v797_v54 }
  0x35   :  { %545 = vmatprep.subr.bf16.mxu0 %v799_v55 }
  0x37   :  { %493 = vmatpush1.bf16.msra.mxu1 %v801_v56 }
  0x38   :  { %546 = vmatpush1.bf16.msra.mxu0 %v802_v57  ;;  %494 = vmatprep.subr.bf16.mxu1 %v803_v58 }
  0x39   :  { %547 = vmatprep.subr.bf16.mxu0 %v805_v59 }
  0x3b   :  { %495 = vmatpush1.bf16.msra.mxu1 %v807_v60 }
  0x3c   :  { %548 = vmatpush1.bf16.msra.mxu0 %v808_v61  ;;  %496 = vmatprep.subr.bf16.mxu1 %v809_v62 }
  0x3d   :  { %549 = vmatprep.subr.bf16.mxu0 %v811_v63 }
  0x3f   :  { %497 = vmatpush1.bf16.msra.mxu1 %v813_v0 }
  0x40   :  { %550 = vmatpush1.bf16.msra.mxu0 %v814_v1 }
  0x42   :  { %499 = vmatmul.mubr.bf16.vlgmr.msra.gmra.mrb[0].mxu1 %v815_v2 }
  0x43   :  { %552 = vmatmul.mubr.bf16.vlgmr.msra.gmra.mrb[0].mxu0 %v818_v3  ;;  %508 = vmatprep.mubr.bf16.mxu1 %v821_v4 }
  0x44   :  { %561 = vmatprep.mubr.bf16.mxu0 %v823_v5 }
  0x4a   :  { %509 = vmatmul.mubr.bf16.gmra.mrb[4].mxu1 %v825_v6 }
  0x4b   :  { %562 = vmatmul.mubr.bf16.gmra.mrb[4].mxu0 %v826_v7 }
 0x115   :  { %v500_v14 = vpop.f32.mrb[0].mxu1 }
 0x116   :  { %v553_v15 = vpop.f32.mrb[0].mxu0  ;;  %v502_v18 = vpop.f32.mrb[1].mxu1 }
 0x117   :  { %v554_v17 = vadd.f32 %v553_v15, %v500_v14  ;;  %v555_v19 = vpop.f32.mrb[1].mxu0  ;;  %v504_v21 = vpop.f32.mrb[2].mxu1 }
 0x118   :  { %v556_v20 = vadd.f32 %v555_v19, %v502_v18  ;;  %v557_v22 = vpop.f32.mrb[2].mxu0  ;;  %v506_v25 = vpop.f32.mrb[3].mxu1 }
 0x119   :  { %v611_v23 = vadd.f32 %v604_v13, %v554_v17  ;;  %v558_v24 = vadd.f32 %v557_v22, %v504_v21  ;;  %v559_v26 = vpop.f32.mrb[3].mxu0 }
 0x11a   :  { %v612_v27 = vadd.f32 %v608_v16, %v556_v20  ;;  %v560_v28 = vadd.f32 %v559_v26, %v506_v25 }
 0x11b   :  { %v619_v29 = vmax.f32 %v611_v23, 0.0  ;;  %v613_v30 = vadd.f32 %v604_v13, %v558_v24 }
 0x11c   :  { %v620_v31 = vmax.f32 %v612_v27, 0.0  ;;  %v614_v32 = vadd.f32 %v608_v16, %v560_v28 }
 0x11d   :  { %627 = vst [vmem:[%s1093_s3] sm:$0xff] %v619_v29  ;;  %v621_v33 = vmax.f32 %v613_v30, 0.0  ;;  %v510_v35 = vpop.f32.mrb[4].mxu1 }
 0x11e   :  { %628 = vst [vmem:[%s1093_s3 + $0x8] sm:$0xff] %v620_v31  ;;  %v622_v34 = vmax.f32 %v614_v32, 0.0  ;;  %v563_v36 = vpop.f32.mrb[4].mxu0  ;;  %v512_v38 = vpop.f32.mrb[5].mxu1 }
 0x11f   :  { %629 = vst [vmem:[%s1093_s3 + $0x10] sm:$0xff] %v621_v33  ;;  %v564_v37 = vadd.f32 %v563_v36, %v510_v35  ;;  %v565_v39 = vpop.f32.mrb[5].mxu0  ;;  %v514_v41 = vpop.f32.mrb[6].mxu1 }
 0x120   :  { %630 = vst [vmem:[%s1093_s3 + $0x18] sm:$0xff] %v622_v34  ;;  %v566_v40 = vadd.f32 %v565_v39, %v512_v38  ;;  %v567_v42 = vpop.f32.mrb[6].mxu0  ;;  %v516_v45 = vpop.f32.mrb[7].mxu1 }
 0x121   :  { %v615_v43 = vadd.f32 %v604_v13, %v564_v37  ;;  %v568_v44 = vadd.f32 %v567_v42, %v514_v41  ;;  %v569_v46 = vpop.f32.mrb[7].mxu0 }
 0x122   :  { %v616_v47 = vadd.f32 %v608_v16, %v566_v40  ;;  %v570_v48 = vadd.f32 %v569_v46, %v516_v45 }
 0x123   :  { %v623_v49 = vmax.f32 %v615_v43, 0.0  ;;  %v617_v50 = vadd.f32 %v604_v13, %v568_v44 }
 0x124   :  { %v624_v51 = vmax.f32 %v616_v47, 0.0  ;;  %v618_v52 = vadd.f32 %v608_v16, %v570_v48 }
 0x125   :  { %631 = vst [vmem:[%s1093_s3 + $0x20] sm:$0xff] %v623_v49  ;;  %v625_v53 = vmax.f32 %v617_v50, 0.0 }
 0x126   :  { %632 = vst [vmem:[%s1093_s3 + $0x28] sm:$0xff] %v624_v51  ;;  %v626_v54 = vmax.f32 %v618_v52, 0.0 }
 0x127   :  { %633 = vst [vmem:[%s1093_s3 + $0x30] sm:$0xff] %v625_v53 }
 0x128   :  { %634 = vst [vmem:[%s1093_s3 + $0x38] sm:$0xff] %v626_v54 }

// kernel: resnet50_fpn_forward.71
= control target key start
LH: loop header
LB: loop body
LE: loop exit
PB: predicated region body
PF: predicated region fallthrough
CT: control target
= control target key end

     0   :  { %s1262_s12 = smov 0   ;;  %s1264_s13 = smov 0   ;;  %s1416_s0 = inlined_call_operand.vmem [shape: bf16[16,2560], index: 0, kind: input, shape index: {}]   ;;  %s1417_s1 = inlined_call_operand.vmem [shape: bf16[2560,256], index: 1, kind: input, shape index: {}]   ;;  %s1418_s2 = inlined_call_operand.vmem [shape: f32[1,256], index: 2, kind: input, shape index: {}]   ;;  %s1419_s3 = inlined_call_operand.vmem [shape: f32[16,256], index: 3, kind: output, shape index: {}]  }
   0x1   :  { %s1266_s14 = smov 0   ;;  %s1268_s15 = smov 0  }
   0x2   :  { %s1270_s16 = smov 0  }
   0x3 LB: > { %s25_s17 = sadd.s32 1, %s1235_s15  ;;  %p48_p1 = scmp.ne.s32.totalorder %s1227_s13, %s1223_s12  ;;  %s1239_s16 = sphi %s1270_s16, %s13_s16   ;;  %s1235_s15 = sphi %s1268_s15, %s1423_s15   ;;  %s1231_s14 = sphi %s1266_s14, %s1422_s14   ;;  %s1227_s13 = sphi %s1264_s13, %s1421_s13   ;;  %s1223_s12 = sphi %s1262_s12, %s1420_s12  }
   0x4   : > { %p26_p0 = scmp.ge.s32.totalorder %s25_s17, 5  ;;  %p49_p2 = scmp.eq.s32.totalorder %s1239_s16, 0 }
   0x5   : > { %s41_s19 = sadd.s32 1, %s1227_s13  ;;  %p969_p5 = scmp.ge.s32.totalorder %s1239_s16, 5 }
   0x6   : > { %s1425_s17 = smov (%p26_p0, %s25_s17), 0  ;;  %p50_p3 = por %p49_p2, %p48_p1 }
   0x7   : > { %s37_s18 = ssub.s32 %s1235_s15, %s1425_s17  ;;  %164 = sbr.rel (%p969_p5) target bundleno = 21 (0x15), region = 20 }
   0x8   : > { %p39_p4 = scmp.eq.s32.totalorder %s37_s18, 0 }
   0xa   : > { %s1297_s20 = scalar_select %p39_p4, %s1227_s13, %s41_s19  }
   0xe   : > { %167 = sbr.rel (!%p50_p3) target bundleno = 21 (0x15), region = 24  ;;  %s169_s21 = sand.u32 (%p50_p3), 1, %s1227_s13  }
   0xf   : > { %s1052_s22 = sshll.u32 (%p50_p3), %s1235_s15, 4  ;;  %s970_s23 = sshll.u32 (%p50_p3), %s169_s21, 5 }
  0x10   : > { %s177_s26 = scalar_lea.vmem (%p50_p3), %s1416_s0, %s1052_s22  ;;  %s171_s27 = scalar_lea.vmem (%p50_p3), [#allocation3], %s970_s23 }
  0x11   : > { %v190_v0 = vld [vmem:[%s177_s26] sm:$0xff] (%p50_p3)  ;;  %v192_v1 = vld [vmem:[%s177_s26 + $0x8] sm:$0xff] (%p50_p3)  ;;  %v194_v2 = vld [vmem:[%s177_s26 + $0x50] sm:$0xff] (%p50_p3) }
  0x12   : > { %191 = vst [vmem:[%s171_s27] sm:$0xff] (%p50_p3), %v190_v0  ;;  %193 = vst [vmem:[%s171_s27 + $0x8] sm:$0xff] (%p50_p3), %v192_v1  ;;  %v196_v3 = vld [vmem:[%s177_s26 + $0x58] sm:$0xff] (%p50_p3) }
  0x13   : > { %195 = vst [vmem:[%s171_s27 + $0x10] sm:$0xff] (%p50_p3), %v194_v2  ;;  %197 = vst [vmem:[%s171_s27 + $0x18] sm:$0xff] (%p50_p3), %v196_v3 }
  0x15 PF: > { %p973_p6 = scmp.ge.s32.totalorder %s1239_s16, 1  ;;  %p217_p7 = scmp.lt.s32.totalorder %s1239_s16, 6 }
  0x17   : > { %p218_p8 = pnand %p973_p6, %p217_p7 }
  0x18   : > { %s224_s28 = sand.u32 (!%p218_p8), 1, %s1223_s12   ;;  %s975_s29 = sshll.u32 (!%p218_p8), %s1231_s14, 6 }
  0x19   : > { %221 = sbr.rel (%p218_p8) target bundleno = 337 (0x151), region = 51  ;;  %s974_s30 = sshll.u32 (!%p218_p8), %s224_s28, 5 }
  0x1a   : > { %p270_p9 = scmp.lt.s32.totalorder (!%p218_p8), %s975_s29, 319  ;;  %s1314_s8 = scalar_lea.vmem (!%p218_p8), [#allocation3], %s974_s30 }
  0x1b   : > { %p978_p10 = scmp.ne.s32.totalorder (!%p218_p8), %s1231_s14, 0 }
  0x20   : > { %s1427_s29 = smov (!%p270_p9, %s975_s29), 319  ;;  %300 = sbr.rel (%p978_p10) target bundleno = 39 (0x27), region = 59 }
  0x21   : > { %s1053_s4 = sshll.u32 %s1427_s29, 3  ;;  %v1241_v4 = vmov (!%p978_p10), 0.0  }
  0x22   : > { %s1312_s7 = scalar_lea.vmem %s1417_s1, %s1053_s4  ;;  %301 = vst [vmem:[#allocation2] sm:$0xff] (!%p978_p10), %v1241_v4  ;;  %302 = vst [vmem:[#allocation2 + $0x8] sm:$0xff] (!%p978_p10), %v1241_v4 }
  0x23   : > { %303 = vst [vmem:[#allocation2 + $0x10] sm:$0xff] (!%p978_p10), %v1241_v4  ;;  %304 = vst [vmem:[#allocation2 + $0x18] sm:$0xff] (!%p978_p10), %v1241_v4 }
  0x27 PF: > { %v1099_v5 = vld [vmem:[%s1312_s7 + $0x4] ss:$8 sps:$4 sm:$0xff]   ;;  %v1103_v7 = vld [vmem:[%s1312_s7] ss:$8 sps:$4 sm:$0xff]   ;;  %v1105_v9 = vld [vmem:[%s1312_s7 + $0x14] ss:$8 sps:$4 sm:$0xff]  }
  0x28   : > { %v1101_v6 = vld [vmem:[%s1312_s7 + $0x104] ss:$8 sps:$4 sm:$0xff]   ;;  %717 = vmatprep.subr.bf16.mxu1 %v1099_v5  ;;  %v1104_v8 = vld [vmem:[%s1312_s7 + $0x100] ss:$8 sps:$4 sm:$0xff]   ;;  %v1107_v10 = vld [vmem:[%s1312_s7 + $0x114] ss:$8 sps:$4 sm:$0xff]  }
  0x29   : > { %760 = vmatprep.subr.bf16.mxu0 %v1101_v6  ;;  %718 = vmatpush1.bf16.msra.mxu1 %v1103_v7  ;;  %v1109_v11 = vld [vmem:[%s1312_s7 + $0x10] ss:$8 sps:$4 sm:$0xff]   ;;  %v1111_v13 = vld [vmem:[%s1312_s7 + $0x24] ss:$8 sps:$4 sm:$0xff]   ;;  %v1115_v15 = vld [vmem:[%s1312_s7 + $0x20] ss:$8 sps:$4 sm:$0xff]  }
  0x2a   : > { %761 = vmatpush1.bf16.msra.mxu0 %v1104_v8  ;;  %719 = vmatprep.subr.bf16.mxu1 %v1105_v9  ;;  %v1110_v12 = vld [vmem:[%s1312_s7 + $0x110] ss:$8 sps:$4 sm:$0xff]   ;;  %v1113_v14 = vld [vmem:[%s1312_s7 + $0x124] ss:$8 sps:$4 sm:$0xff]   ;;  %v1116_v16 = vld [vmem:[%s1312_s7 + $0x120] ss:$8 sps:$4 sm:$0xff]  }
  0x2b   : > { %762 = vmatprep.subr.bf16.mxu0 %v1107_v10  ;;  %v1117_v17 = vld [vmem:[%s1312_s7 + $0x34] ss:$8 sps:$4 sm:$0xff]   ;;  %v1121_v19 = vld [vmem:[%s1312_s7 + $0x30] ss:$8 sps:$4 sm:$0xff]   ;;  %v1123_v21 = vld [vmem:[%s1312_s7 + $0x44] ss:$8 sps:$4 sm:$0xff]  }
  0x2c   : > { %v1119_v18 = vld [vmem:[%s1312_s7 + $0x134] ss:$8 sps:$4 sm:$0xff]   ;;  %v1122_v20 = vld [vmem:[%s1312_s7 + $0x130] ss:$8 sps:$4 sm:$0xff]   ;;  %v1125_v22 = vld [vmem:[%s1312_s7 + $0x144] ss:$8 sps:$4 sm:$0xff]  }
  0x2d   : > { %720 = vmatpush1.bf16.msra.mxu1 %v1109_v11  ;;  %v1127_v23 = vld [vmem:[%s1312_s7 + $0x40] ss:$8 sps:$4 sm:$0xff]   ;;  %v1129_v25 = vld [vmem:[%s1312_s7 + $0x54] ss:$8 sps:$4 sm:$0xff]   ;;  %v1133_v27 = vld [vmem:[%s1312_s7 + $0x50] ss:$8 sps:$4 sm:$0xff]  }
  0x2e   : > { %763 = vmatpush1.bf16.msra.mxu0 %v1110_v12  ;;  %721 = vmatprep.subr.bf16.mxu1 %v1111_v13  ;;  %v1128_v24 = vld [vmem:[%s1312_s7 + $0x140] ss:$8 sps:$4 sm:$0xff]   ;;  %v1131_v26 = vld [vmem:[%s1312_s7 + $0x154] ss:$8 sps:$4 sm:$0xff]   ;;  %v1134_v28 = vld [vmem:[%s1312_s7 + $0x150] ss:$8 sps:$4 sm:$0xff]  }
  0x2f   : > { %764 = vmatprep.subr.bf16.mxu0 %v1113_v14  ;;  %v1135_v29 = vld [vmem:[%s1312_s7 + $0x64] ss:$8 sps:$4 sm:$0xff]   ;;  %v1139_v31 = vld [vmem:[%s1312_s7 + $0x60] ss:$8 sps:$4 sm:$0xff]   ;;  %v1141_v33 = vld [vmem:[%s1312_s7 + $0x74] ss:$8 sps:$4 sm:$0xff]  }
  0x30   : > { %v1137_v30 = vld [vmem:[%s1312_s7 + $0x164] ss:$8 sps:$4 sm:$0xff]   ;;  %v1140_v32 = vld [vmem:[%s1312_s7 + $0x160] ss:$8 sps:$4 sm:$0xff]   ;;  %v1143_v34 = vld [vmem:[%s1312_s7 + $0x174] ss:$8 sps:$4 sm:$0xff]  }
  0x31   : > { %722 = vmatpush1.bf16.msra.mxu1 %v1115_v15  ;;  %v1145_v35 = vld [vmem:[%s1312_s7 + $0x70] ss:$8 sps:$4 sm:$0xff]   ;;  %v1147_v37 = vld [vmem:[%s1312_s7 + $0x84] ss:$8 sps:$4 sm:$0xff]   ;;  %v1151_v39 = vld [vmem:[%s1312_s7 + $0x80] ss:$8 sps:$4 sm:$0xff]  }
  0x32   : > { %765 = vmatpush1.bf16.msra.mxu0 %v1116_v16  ;;  %723 = vmatprep.subr.bf16.mxu1 %v1117_v17  ;;  %v1146_v36 = vld [vmem:[%s1312_s7 + $0x170] ss:$8 sps:$4 sm:$0xff]   ;;  %v1149_v38 = vld [vmem:[%s1312_s7 + $0x184] ss:$8 sps:$4 sm:$0xff]   ;;  %v1152_v40 = vld [vmem:[%s1312_s7 + $0x180] ss:$8 sps:$4 sm:$0xff]  }
  0x33   : > { %766 = vmatprep.subr.bf16.mxu0 %v1119_v18  ;;  %v1153_v41 = vld [vmem:[%s1312_s7 + $0x94] ss:$8 sps:$4 sm:$0xff]   ;;  %v1157_v43 = vld [vmem:[%s1312_s7 + $0x90] ss:$8 sps:$4 sm:$0xff]   ;;  %v1159_v45 = vld [vmem:[%s1312_s7 + $0xa4] ss:$8 sps:$4 sm:$0xff]  }
  0x34   : > { %v1155_v42 = vld [vmem:[%s1312_s7 + $0x194] ss:$8 sps:$4 sm:$0xff]   ;;  %v1158_v44 = vld [vmem:[%s1312_s7 + $0x190] ss:$8 sps:$4 sm:$0xff]   ;;  %v1161_v46 = vld [vmem:[%s1312_s7 + $0x1a4] ss:$8 sps:$4 sm:$0xff]  }
  0x35   : > { %724 = vmatpush1.bf16.msra.mxu1 %v1121_v19  ;;  %v1163_v47 = vld [vmem:[%s1312_s7 + $0xa0] ss:$8 sps:$4 sm:$0xff]   ;;  %v1165_v49 = vld [vmem:[%s1312_s7 + $0xb4] ss:$8 sps:$4 sm:$0xff]   ;;  %v1169_v51 = vld [vmem:[%s1312_s7 + $0xb0] ss:$8 sps:$4 sm:$0xff]  }
  0x36   : > { %767 = vmatpush1.bf16.msra.mxu0 %v1122_v20  ;;  %725 = vmatprep.subr.bf16.mxu1 %v1123_v21  ;;  %v1164_v48 = vld [vmem:[%s1312_s7 + $0x1a0] ss:$8 sps:$4 sm:$0xff]   ;;  %v1167_v50 = vld [vmem:[%s1312_s7 + $0x1b4] ss:$8 sps:$4 sm:$0xff]   ;;  %v1170_v53 = vld [vmem:[%s1312_s7 + $0x1b0] ss:$8 sps:$4 sm:$0xff]  }
  0x37   : > { %768 = vmatprep.subr.bf16.mxu0 %v1125_v22  ;;  %v1197_v52 = vld [vmem:[%s1314_s8 + $0x4] ss:$16 sps:$4 sm:$0xff]   ;;  %v1200_v56 = vld [vmem:[%s1314_s8 + $0xc] ss:$16 sps:$4 sm:$0xff]   ;;  %v1175_v57 = vld [vmem:[%s1312_s7 + $0xc0] ss:$8 sps:$4 sm:$0xff]  }
  0x38   : > { %v1171_v54 = vld [vmem:[%s1312_s7 + $0xc4] ss:$8 sps:$4 sm:$0xff]   ;;  %749 = vmatprep.mubr.bf16.mxu1 %v1197_v52  ;;  %792 = vmatprep.mubr.bf16.mxu0 %v1200_v56  ;;  %v1176_v58 = vld [vmem:[%s1312_s7 + $0x1c0] ss:$8 sps:$4 sm:$0xff]   ;;  %v1177_v59 = vld [vmem:[%s1312_s7 + $0xd4] ss:$8 sps:$4 sm:$0xff]  }
  0x39   : > { %726 = vmatpush1.bf16.msra.mxu1 %v1127_v23  ;;  %v1173_v55 = vld [vmem:[%s1312_s7 + $0x1c4] ss:$8 sps:$4 sm:$0xff]   ;;  %v1179_v60 = vld [vmem:[%s1312_s7 + $0x1d4] ss:$8 sps:$4 sm:$0xff]   ;;  %v1181_v61 = vld [vmem:[%s1312_s7 + $0xd0] ss:$8 sps:$4 sm:$0xff]  }
  0x3a   : > { %769 = vmatpush1.bf16.msra.mxu0 %v1128_v24  ;;  %727 = vmatprep.subr.bf16.mxu1 %v1129_v25  ;;  %v1182_v62 = vld [vmem:[%s1312_s7 + $0x1d0] ss:$8 sps:$4 sm:$0xff]   ;;  %v1183_v63 = vld [vmem:[%s1312_s7 + $0xe4] ss:$8 sps:$4 sm:$0xff]   ;;  %v1187_v1 = vld [vmem:[%s1312_s7 + $0xe0] ss:$8 sps:$4 sm:$0xff]  }
  0x3b   : > { %770 = vmatprep.subr.bf16.mxu0 %v1131_v26  ;;  %v1185_v0 = vld [vmem:[%s1312_s7 + $0x1e4] ss:$8 sps:$4 sm:$0xff]   ;;  %v1188_v2 = vld [vmem:[%s1312_s7 + $0x1e0] ss:$8 sps:$4 sm:$0xff]   ;;  %v1189_v3 = vld [vmem:[%s1312_s7 + $0xf4] ss:$8 sps:$4 sm:$0xff]  }
  0x3c   : > { %v1191_v4 = vld [vmem:[%s1312_s7 + $0x1f4] ss:$8 sps:$4 sm:$0xff]   ;;  %v1193_v5 = vld [vmem:[%s1312_s7 + $0xf0] ss:$8 sps:$4 sm:$0xff]   ;;  %v305_v10 = vld [vmem:[#allocation2] sm:$0xff]  ;;  %p1047_p11 = scmp.ne.s32.totalorder %s1231_s14, 4 }
  0x3d   : > { %728 = vmatpush1.bf16.msra.mxu1 %v1133_v27  ;;  %v1194_v6 = vld [vmem:[%s1312_s7 + $0x1f0] ss:$8 sps:$4 sm:$0xff]   ;;  %v306_v14 = vld [vmem:[#allocation2 + $0x8] sm:$0xff] }
  0x3e   : > { %771 = vmatpush1.bf16.msra.mxu0 %v1134_v28  ;;  %729 = vmatprep.subr.bf16.mxu1 %v1135_v29  ;;  %v1195_v7 = vld [vmem:[%s1314_s8] ss:$16 sps:$4 sm:$0xff]   ;;  %v1198_v8 = vld [vmem:[%s1314_s8 + $0x8] ss:$16 sps:$4 sm:$0xff]   ;;  %v821_v29 = vlaneseq (!%p1047_p11) }
  0x3f   : > { %772 = vmatprep.subr.bf16.mxu0 %v1137_v30  ;;  %v307_v18 = vld [vmem:[#allocation2 + $0x10] sm:$0xff]  ;;  %v308_v23 = vld [vmem:[#allocation2 + $0x18] sm:$0xff] }
  0x40   : > { %v822_v30 = vshrl.u32 (!%p1047_p11), %v821_v29, 7 }
  0x41   : > { %730 = vmatpush1.bf16.msra.mxu1 %v1139_v31  ;;  %v819_v31 = vld [vmem:[%s1418_s2] sm:$0x3] (!%p1047_p11) }
  0x42   : > { %773 = vmatpush1.bf16.msra.mxu0 %v1140_v32  ;;  %731 = vmatprep.subr.bf16.mxu1 %v1141_v33  ;;  %v823_v33 = vsub.s32 (!%p1047_p11), 0, %v822_v30 }
  0x43   : > { %774 = vmatprep.subr.bf16.mxu0 %v1143_v34  ;;  %v827_v34 = vsub.s32 (!%p1047_p11), 1, %v822_v30 }
  0x45   : > { %732 = vmatpush1.bf16.msra.mxu1 %v1145_v35 }
  0x46   : > { %775 = vmatpush1.bf16.msra.mxu0 %v1146_v36  ;;  %733 = vmatprep.subr.bf16.mxu1 %v1147_v37 }
  0x47   : > { %776 = vmatprep.subr.bf16.mxu0 %v1149_v38  ;;  %v824_v38 = vrot.slane (!%p1047_p11), %v819_v31, %v823_v33 }
  0x49   : > { %734 = vmatpush1.bf16.msra.mxu1 %v1151_v39  ;;  %v828_v39 = vrot.slane (!%p1047_p11), %v819_v31, %v827_v34 }
  0x4a   : > { %777 = vmatpush1.bf16.msra.mxu0 %v1152_v40  ;;  %735 = vmatprep.subr.bf16.mxu1 %v1153_v41 }
  0x4b   : > { %778 = vmatprep.subr.bf16.mxu0 %v1155_v42 }
  0x4d   : > { %736 = vmatpush1.bf16.msra.mxu1 %v1157_v43 }
  0x4e   : > { %779 = vmatpush1.bf16.msra.mxu0 %v1158_v44  ;;  %737 = vmatprep.subr.bf16.mxu1 %v1159_v45 }
  0x4f   : > { %780 = vmatprep.subr.bf16.mxu0 %v1161_v46 }
  0x51   : > { %738 = vmatpush1.bf16.msra.mxu1 %v1163_v47 }
  0x52   : > { %781 = vmatpush1.bf16.msra.mxu0 %v1164_v48  ;;  %739 = vmatprep.subr.bf16.mxu1 %v1165_v49 }
  0x53   : > { %782 = vmatprep.subr.bf16.mxu0 %v1167_v50 }
  0x55   : > { %740 = vmatpush1.bf16.msra.mxu1 %v1169_v51 }
  0x56   : > { %783 = vmatpush1.bf16.msra.mxu0 %v1170_v53  ;;  %741 = vmatprep.subr.bf16.mxu1 %v1171_v54 }
  0x57   : > { %784 = vmatprep.subr.bf16.mxu0 %v1173_v55 }
  0x59   : > { %742 = vmatpush1.bf16.msra.mxu1 %v1175_v57 }
  0x5a   : > { %785 = vmatpush1.bf16.msra.mxu0 %v1176_v58  ;;  %743 = vmatprep.subr.bf16.mxu1 %v1177_v59 }
  0x5b   : > { %786 = vmatprep.subr.bf16.mxu0 %v1179_v60 }
  0x5d   : > { %744 = vmatpush1.bf16.msra.mxu1 %v1181_v61 }
  0x5e   : > { %787 = vmatpush1.bf16.msra.mxu0 %v1182_v62  ;;  %745 = vmatprep.subr.bf16.mxu1 %v1183_v63 }
  0x5f   : > { %788 = vmatprep.subr.bf16.mxu0 %v1185_v0 }
  0x61   : > { %746 = vmatpush1.bf16.msra.mxu1 %v1187_v1 }
  0x62   : > { %789 = vmatpush1.bf16.msra.mxu0 %v1188_v2  ;;  %747 = vmatprep.subr.bf16.mxu1 %v1189_v3 }
  0x63   : > { %790 = vmatprep.subr.bf16.mxu0 %v1191_v4 }
  0x65   : > { %748 = vmatpush1.bf16.msra.mxu1 %v1193_v5 }
  0x66   : > { %791 = vmatpush1.bf16.msra.mxu0 %v1194_v6 }
  0x68   : > { %750 = vmatmul.mubr.bf16.vlgmr.msra.gmra.mrb[0].mxu1 %v1195_v7 }
  0x69   : > { %793 = vmatmul.mubr.bf16.vlgmr.msra.gmra.mrb[0].mxu0 %v1198_v8 }
 0x13b   : > { %v751_v9 = vpop.f32.mrb[0].mxu1 }
 0x13c   : > { %v794_v11 = vpop.f32.mrb[0].mxu0  ;;  %v753_v13 = vpop.f32.mrb[1].mxu1 }
 0x13d   : > { %v795_v12 = vadd.f32 %v794_v11, %v751_v9  ;;  %v796_v15 = vpop.f32.mrb[1].mxu0  ;;  %v755_v17 = vpop.f32.mrb[2].mxu1 }
 0x13e   : > { %v797_v16 = vadd.f32 %v796_v15, %v753_v13  ;;  %v798_v19 = vpop.f32.mrb[2].mxu0  ;;  %v757_v22 = vpop.f32.mrb[3].mxu1  ;;  %814 = sbr.rel (%p1047_p11) target bundleno = 337 (0x151), region = 63 }
 0x13f   : > { %v803_v20 = vadd.f32 %v795_v12, %v305_v10  ;;  %v799_v21 = vadd.f32 %v798_v19, %v755_v17  ;;  %v800_v24 = vpop.f32.mrb[3].mxu0 }
 0x140   : > { %v804_v25 = vadd.f32 %v797_v16, %v306_v14  ;;  %v801_v26 = vadd.f32 %v800_v24, %v757_v22 }
 0x141   : > { %807 = vst [vmem:[#allocation2] sm:$0xff] %v803_v20  ;;  %v805_v27 = vadd.f32 %v799_v21, %v307_v18 }
 0x142   : > { %808 = vst [vmem:[#allocation2 + $0x8] sm:$0xff] %v804_v25  ;;  %v806_v28 = vadd.f32 %v801_v26, %v308_v23 }
 0x143   : > { %809 = vst [vmem:[#allocation2 + $0x10] sm:$0xff] %v805_v27 }
 0x144   : > { %810 = vst [vmem:[#allocation2 + $0x18] sm:$0xff] %v806_v28 }
 0x148   : > { %v815_v32 = vld [vmem:[#allocation2] sm:$0xff] }
 0x149   : > { %v816_v35 = vld [vmem:[#allocation2 + $0x8] sm:$0xff]  ;;  %v831_v40 = vadd.f32 %v824_v38, %v815_v32 }
 0x14a   : > { %v817_v36 = vld [vmem:[#allocation2 + $0x10] sm:$0xff]  ;;  %v832_v41 = vadd.f32 %v828_v39, %v816_v35 }
 0x14b   : > { %v818_v37 = vld [vmem:[#allocation2 + $0x18] sm:$0xff]  ;;  %v833_v42 = vadd.f32 %v824_v38, %v817_v36  ;;  %v835_v44 = vmax.f32 %v831_v40, 0.0 }
 0x14c   : > { %v834_v43 = vadd.f32 %v828_v39, %v818_v37  ;;  %v836_v45 = vmax.f32 %v832_v41, 0.0 }
 0x14d   : > { %v837_v46 = vmax.f32 %v833_v42, 0.0  ;;  %839 = vst [vmem:[%s1419_s3] sm:$0xff] %v835_v44 }
 0x14e   : > { %v838_v47 = vmax.f32 %v834_v43, 0.0  ;;  %840 = vst [vmem:[%s1419_s3 + $0x8] sm:$0xff] %v836_v45 }
 0x14f   : > { %841 = vst [vmem:[%s1419_s3 + $0x10] sm:$0xff] %v837_v46 }
 0x150   : > { %842 = vst [vmem:[%s1419_s3 + $0x18] sm:$0xff] %v838_v47 }
 0x151 PF: > { %s13_s16 = sadd.s32 1, %s1239_s16   ;;  %s1420_s12 = smov %s1227_s13 }
 0x152   : > { %p10_p12 = scmp.ge.s32.totalorder %s13_s16, 7   ;;  %s1421_s13 = smov %s1297_s20 }
 0x153   : > { %s1422_s14 = smov %s1235_s15  ;;  %s1423_s15 = smov %s1425_s17 }
 0x154   :  { %12 = sbr.rel (!%p10_p12) target bundleno = 3 (0x3), region = 104 }

// kernel: resnet50_fpn_forward.69
= control target key start
LH: loop header
LB: loop body
LE: loop exit
PB: predicated region body
PF: predicated region fallthrough
CT: control target
= control target key end

     0   :  { %s1516_s12 = smov 0   ;;  %s1518_s13 = smov 0   ;;  %s1806_s0 = inlined_call_operand.vmem [shape: bf16[16,512], index: 0, kind: input, shape index: {}]   ;;  %s1807_s1 = inlined_call_operand.vmem [shape: bf16[512,1024], index: 1, kind: input, shape index: {}]   ;;  %s1808_s2 = inlined_call_operand.vmem [shape: f32[1,1024], index: 2, kind: input, shape index: {}]   ;;  %s1809_s3 = inlined_call_operand.vmem [shape: f32[16,1024], index: 3, kind: output, shape index: {}]  }
   0x1   :  { %s1520_s14 = smov 0   ;;  %s1522_s15 = smov 0  }
   0x2   :  { %s1524_s16 = smov 0  }
   0x3 LB: > { %s28_s17 = sadd.s32 1, %s1490_s15  ;;  %s1223_s18 = sadd.s32 4294967295, %s1494_s16   ;;  %s1494_s16 = sphi %s1524_s16, %s13_s16   ;;  %s1490_s15 = sphi %s1522_s15, %s1814_s15   ;;  %s1486_s14 = sphi %s1520_s14, %s1813_s14   ;;  %s1482_s13 = sphi %s1518_s13, %s1812_s13   ;;  %s1478_s12 = sphi %s1516_s12, %s1811_s12  }
   0x4   : > { %p30_p0 = scmp.ge.s32.totalorder %s28_s17, 4  ;;  %p76_p1 = scmp.ne.s32.totalorder %s1482_s13, %s1478_s12 }
   0x5   : > { %p77_p2 = scmp.eq.s32.totalorder %s1494_s16, 0  ;;  %p134_p4 = scmp.eq.s32.totalorder %s1223_s18, 3 }
   0x6   : > { %s1816_s17 = smov (%p30_p0, %s28_s17), 0  ;;  %s69_s20 = sadd.s32 1, %s1482_s13 }
   0x7   : > { %p78_p3 = por %p77_p2, %p76_p1  ;;  %s65_s19 = ssub.s32 %s1490_s15, %s1816_s17 }
   0x8   : > { %p67_p5 = scmp.eq.s32.totalorder %s65_s19, 0  ;;  %p1551_p6 = por %p134_p4, %p76_p1 }
   0x9   : > { %p1227_p7 = scmp.ge.s32.totalorder %s1494_s16, 4 }
   0xa   : > { %s1556_s22 = scalar_select %p67_p5, %s1482_s13, %s69_s20  }
   0xb   : > { %171 = sbr.rel (%p1227_p7) target bundleno = 86 (0x56), region = 20 }
  0x12   : > { %174 = sbr.rel (!%p78_p3) target bundleno = 86 (0x56), region = 24  ;;  %s176_s23 = sand.u32 (%p78_p3), 1, %s1482_s13  }
  0x13   : > { %s1308_s24 = sshll.u32 (%p78_p3), %s1490_s15, 3  ;;  %s1228_s25 = sshll.u32 (%p78_p3), %s176_s23, 9 }
  0x14   : > { %s1564_s28 = scalar_lea.vmem (%p78_p3), %s1807_s1, %s1308_s24  ;;  %s1569_s29 = scalar_lea.vmem (%p78_p3), [#allocation3], %s1228_s25 }
  0x15   : > { %v338_v0 = vld [vmem:[%s1564_s28] sm:$0xff] (%p78_p3) }
  0x16   : > { %v340_v1 = vld [vmem:[%s1564_s28 + $0x20] sm:$0xff] (%p78_p3)  ;;  %339 = vst [vmem:[%s1569_s29] sm:$0xff] (%p78_p3), %v338_v0 }
  0x17   : > { %v342_v2 = vld [vmem:[%s1564_s28 + $0x40] sm:$0xff] (%p78_p3)  ;;  %341 = vst [vmem:[%s1569_s29 + $0x8] sm:$0xff] (%p78_p3), %v340_v1 }
  0x18   : > { %343 = vst [vmem:[%s1569_s29 + $0x10] sm:$0xff] (%p78_p3), %v342_v2  ;;  %v344_v3 = vld [vmem:[%s1564_s28 + $0x60] sm:$0xff] (%p78_p3) }
  0x19   : > { %v346_v4 = vld [vmem:[%s1564_s28 + $0x80] sm:$0xff]  ;;  %345 = vst [vmem:[%s1569_s29 + $0x18] sm:$0xff] %v344_v3 }
  0x1a   : > { %v348_v5 = vld [vmem:[%s1564_s28 + $0xa0] sm:$0xff]  ;;  %347 = vst [vmem:[%s1569_s29 + $0x20] sm:$0xff] %v346_v4 }
  0x1b   : > { %349 = vst [vmem:[%s1569_s29 + $0x28] sm:$0xff] %v348_v5  ;;  %v350_v6 = vld [vmem:[%s1564_s28 + $0xc0] sm:$0xff] }
  0x1c   : > { %v352_v7 = vld [vmem:[%s1564_s28 + $0xe0] sm:$0xff]  ;;  %351 = vst [vmem:[%s1569_s29 + $0x30] sm:$0xff] %v350_v6 }
  0x1d   : > { %v354_v8 = vld [vmem:[%s1564_s28 + $0x100] sm:$0xff]  ;;  %353 = vst [vmem:[%s1569_s29 + $0x38] sm:$0xff] %v352_v7 }
  0x1e   : > { %355 = vst [vmem:[%s1569_s29 + $0x40] sm:$0xff] %v354_v8  ;;  %v356_v9 = vld [vmem:[%s1564_s28 + $0x120] sm:$0xff] }
  0x1f   : > { %v358_v10 = vld [vmem:[%s1564_s28 + $0x140] sm:$0xff]  ;;  %357 = vst [vmem:[%s1569_s29 + $0x48] sm:$0xff] %v356_v9 }
  0x20   : > { %v360_v11 = vld [vmem:[%s1564_s28 + $0x160] sm:$0xff]  ;;  %359 = vst [vmem:[%s1569_s29 + $0x50] sm:$0xff] %v358_v10 }
  0x21   : > { %361 = vst [vmem:[%s1569_s29 + $0x58] sm:$0xff] %v360_v11  ;;  %v362_v12 = vld [vmem:[%s1564_s28 + $0x180] sm:$0xff] }
  0x22   : > { %v364_v13 = vld [vmem:[%s1564_s28 + $0x1a0] sm:$0xff]  ;;  %363 = vst [vmem:[%s1569_s29 + $0x60] sm:$0xff] %v362_v12 }
  0x23   : > { %v366_v14 = vld [vmem:[%s1564_s28 + $0x1c0] sm:$0xff]  ;;  %365 = vst [vmem:[%s1569_s29 + $0x68] sm:$0xff] %v364_v13 }
  0x24   : > { %367 = vst [vmem:[%s1569_s29 + $0x70] sm:$0xff] %v366_v14  ;;  %v368_v15 = vld [vmem:[%s1564_s28 + $0x1e0] sm:$0xff] }
  0x25   : > { %v370_v16 = vld [vmem:[%s1564_s28 + $0x200] sm:$0xff]  ;;  %369 = vst [vmem:[%s1569_s29 + $0x78] sm:$0xff] %v368_v15 }
  0x26   : > { %v372_v17 = vld [vmem:[%s1564_s28 + $0x220] sm:$0xff]  ;;  %371 = vst [vmem:[%s1569_s29 + $0x80] sm:$0xff] %v370_v16 }
  0x27   : > { %373 = vst [vmem:[%s1569_s29 + $0x88] sm:$0xff] %v372_v17  ;;  %v374_v18 = vld [vmem:[%s1564_s28 + $0x240] sm:$0xff] }
  0x28   : > { %v376_v19 = vld [vmem:[%s1564_s28 + $0x260] sm:$0xff]  ;;  %375 = vst [vmem:[%s1569_s29 + $0x90] sm:$0xff] %v374_v18 }
  0x29   : > { %v378_v20 = vld [vmem:[%s1564_s28 + $0x280] sm:$0xff]  ;;  %377 = vst [vmem:[%s1569_s29 + $0x98] sm:$0xff] %v376_v19 }
  0x2a   : > { %379 = vst [vmem:[%s1569_s29 + $0xa0] sm:$0xff] %v378_v20  ;;  %v380_v21 = vld [vmem:[%s1564_s28 + $0x2a0] sm:$0xff] }
  0x2b   : > { %v382_v22 = vld [vmem:[%s1564_s28 + $0x2c0] sm:$0xff]  ;;  %381 = vst [vmem:[%s1569_s29 + $0xa8] sm:$0xff] %v380_v21 }
  0x2c   : > { %v384_v23 = vld [vmem:[%s1564_s28 + $0x2e0] sm:$0xff]  ;;  %383 = vst [vmem:[%s1569_s29 + $0xb0] sm:$0xff] %v382_v22 }
  0x2d   : > { %385 = vst [vmem:[%s1569_s29 + $0xb8] sm:$0xff] %v384_v23  ;;  %v386_v24 = vld [vmem:[%s1564_s28 + $0x300] sm:$0xff] }
  0x2e   : > { %v388_v25 = vld [vmem:[%s1564_s28 + $0x320] sm:$0xff]  ;;  %387 = vst [vmem:[%s1569_s29 + $0xc0] sm:$0xff] %v386_v24 }
  0x2f   : > { %v390_v26 = vld [vmem:[%s1564_s28 + $0x340] sm:$0xff]  ;;  %389 = vst [vmem:[%s1569_s29 + $0xc8] sm:$0xff] %v388_v25 }
  0x30   : > { %391 = vst [vmem:[%s1569_s29 + $0xd0] sm:$0xff] %v390_v26  ;;  %v392_v27 = vld [vmem:[%s1564_s28 + $0x360] sm:$0xff] }
  0x31   : > { %v394_v28 = vld [vmem:[%s1564_s28 + $0x380] sm:$0xff]  ;;  %393 = vst [vmem:[%s1569_s29 + $0xd8] sm:$0xff] %v392_v27 }
  0x32   : > { %v396_v29 = vld [vmem:[%s1564_s28 + $0x3a0] sm:$0xff]  ;;  %395 = vst [vmem:[%s1569_s29 + $0xe0] sm:$0xff] %v394_v28 }
  0x33   : > { %397 = vst [vmem:[%s1569_s29 + $0xe8] sm:$0xff] %v396_v29  ;;  %v398_v30 = vld [vmem:[%s1564_s28 + $0x3c0] sm:$0xff] }
  0x34   : > { %v400_v31 = vld [vmem:[%s1564_s28 + $0x3e0] sm:$0xff]  ;;  %399 = vst [vmem:[%s1569_s29 + $0xf0] sm:$0xff] %v398_v30 }
  0x35   : > { %v402_v32 = vld [vmem:[%s1564_s28 + $0x400] sm:$0xff]  ;;  %401 = vst [vmem:[%s1569_s29 + $0xf8] sm:$0xff] %v400_v31 }
  0x36   : > { %403 = vst [vmem:[%s1569_s29 + $0x100] sm:$0xff] %v402_v32  ;;  %v404_v33 = vld [vmem:[%s1564_s28 + $0x420] sm:$0xff] }
  0x37   : > { %v406_v34 = vld [vmem:[%s1564_s28 + $0x440] sm:$0xff]  ;;  %405 = vst [vmem:[%s1569_s29 + $0x108] sm:$0xff] %v404_v33 }
  0x38   : > { %v408_v35 = vld [vmem:[%s1564_s28 + $0x460] sm:$0xff]  ;;  %407 = vst [vmem:[%s1569_s29 + $0x110] sm:$0xff] %v406_v34 }
  0x39   : > { %409 = vst [vmem:[%s1569_s29 + $0x118] sm:$0xff] %v408_v35  ;;  %v410_v36 = vld [vmem:[%s1564_s28 + $0x480] sm:$0xff] }
  0x3a   : > { %v412_v37 = vld [vmem:[%s1564_s28 + $0x4a0] sm:$0xff]  ;;  %411 = vst [vmem:[%s1569_s29 + $0x120] sm:$0xff] %v410_v36 }
  0x3b   : > { %v414_v38 = vld [vmem:[%s1564_s28 + $0x4c0] sm:$0xff]  ;;  %413 = vst [vmem:[%s1569_s29 + $0x128] sm:$0xff] %v412_v37 }
  0x3c   : > { %415 = vst [vmem:[%s1569_s29 + $0x130] sm:$0xff] %v414_v38  ;;  %v416_v39 = vld [vmem:[%s1564_s28 + $0x4e0] sm:$0xff] }
  0x3d   : > { %v418_v40 = vld [vmem:[%s1564_s28 + $0x500] sm:$0xff]  ;;  %417 = vst [vmem:[%s1569_s29 + $0x138] sm:$0xff] %v416_v39 }
  0x3e   : > { %v420_v41 = vld [vmem:[%s1564_s28 + $0x520] sm:$0xff]  ;;  %419 = vst [vmem:[%s1569_s29 + $0x140] sm:$0xff] %v418_v40 }
  0x3f   : > { %421 = vst [vmem:[%s1569_s29 + $0x148] sm:$0xff] %v420_v41  ;;  %v422_v42 = vld [vmem:[%s1564_s28 + $0x540] sm:$0xff] }
  0x40   : > { %v424_v43 = vld [vmem:[%s1564_s28 + $0x560] sm:$0xff]  ;;  %423 = vst [vmem:[%s1569_s29 + $0x150] sm:$0xff] %v422_v42 }
  0x41   : > { %v426_v44 = vld [vmem:[%s1564_s28 + $0x580] sm:$0xff]  ;;  %425 = vst [vmem:[%s1569_s29 + $0x158] sm:$0xff] %v424_v43 }
  0x42   : > { %427 = vst [vmem:[%s1569_s29 + $0x160] sm:$0xff] %v426_v44  ;;  %v428_v45 = vld [vmem:[%s1564_s28 + $0x5a0] sm:$0xff] }
  0x43   : > { %v430_v46 = vld [vmem:[%s1564_s28 + $0x5c0] sm:$0xff]  ;;  %429 = vst [vmem:[%s1569_s29 + $0x168] sm:$0xff] %v428_v45 }
  0x44   : > { %v432_v47 = vld [vmem:[%s1564_s28 + $0x5e0] sm:$0xff]  ;;  %431 = vst [vmem:[%s1569_s29 + $0x170] sm:$0xff] %v430_v46 }
  0x45   : > { %433 = vst [vmem:[%s1569_s29 + $0x178] sm:$0xff] %v432_v47  ;;  %v434_v48 = vld [vmem:[%s1564_s28 + $0x600] sm:$0xff] }
  0x46   : > { %v436_v49 = vld [vmem:[%s1564_s28 + $0x620] sm:$0xff]  ;;  %435 = vst [vmem:[%s1569_s29 + $0x180] sm:$0xff] %v434_v48 }
  0x47   : > { %v438_v50 = vld [vmem:[%s1564_s28 + $0x640] sm:$0xff]  ;;  %437 = vst [vmem:[%s1569_s29 + $0x188] sm:$0xff] %v436_v49 }
  0x48   : > { %439 = vst [vmem:[%s1569_s29 + $0x190] sm:$0xff] %v438_v50  ;;  %v440_v51 = vld [vmem:[%s1564_s28 + $0x660] sm:$0xff] }
  0x49   : > { %v442_v52 = vld [vmem:[%s1564_s28 + $0x680] sm:$0xff]  ;;  %441 = vst [vmem:[%s1569_s29 + $0x198] sm:$0xff] %v440_v51 }
  0x4a   : > { %v444_v53 = vld [vmem:[%s1564_s28 + $0x6a0] sm:$0xff]  ;;  %443 = vst [vmem:[%s1569_s29 + $0x1a0] sm:$0xff] %v442_v52 }
  0x4b   : > { %445 = vst [vmem:[%s1569_s29 + $0x1a8] sm:$0xff] %v444_v53  ;;  %v446_v54 = vld [vmem:[%s1564_s28 + $0x6c0] sm:$0xff] }
  0x4c   : > { %v448_v55 = vld [vmem:[%s1564_s28 + $0x6e0] sm:$0xff]  ;;  %447 = vst [vmem:[%s1569_s29 + $0x1b0] sm:$0xff] %v446_v54 }
  0x4d   : > { %v450_v56 = vld [vmem:[%s1564_s28 + $0x700] sm:$0xff]  ;;  %449 = vst [vmem:[%s1569_s29 + $0x1b8] sm:$0xff] %v448_v55 }
  0x4e   : > { %451 = vst [vmem:[%s1569_s29 + $0x1c0] sm:$0xff] %v450_v56  ;;  %v452_v57 = vld [vmem:[%s1564_s28 + $0x720] sm:$0xff] }
  0x4f   : > { %v454_v58 = vld [vmem:[%s1564_s28 + $0x740] sm:$0xff]  ;;  %453 = vst [vmem:[%s1569_s29 + $0x1c8] sm:$0xff] %v452_v57 }
  0x50   : > { %v456_v59 = vld [vmem:[%s1564_s28 + $0x760] sm:$0xff]  ;;  %455 = vst [vmem:[%s1569_s29 + $0x1d0] sm:$0xff] %v454_v58 }
  0x51   : > { %457 = vst [vmem:[%s1569_s29 + $0x1d8] sm:$0xff] %v456_v59  ;;  %v458_v60 = vld [vmem:[%s1564_s28 + $0x780] sm:$0xff] }
  0x52   : > { %v460_v61 = vld [vmem:[%s1564_s28 + $0x7a0] sm:$0xff]  ;;  %459 = vst [vmem:[%s1569_s29 + $0x1e0] sm:$0xff] %v458_v60 }
  0x53   : > { %v462_v62 = vld [vmem:[%s1564_s28 + $0x7c0] sm:$0xff]  ;;  %461 = vst [vmem:[%s1569_s29 + $0x1e8] sm:$0xff] %v460_v61 }
  0x54   : > { %463 = vst [vmem:[%s1569_s29 + $0x1f0] sm:$0xff] %v462_v62  ;;  %v464_v63 = vld [vmem:[%s1564_s28 + $0x7e0] sm:$0xff] }
  0x55   : > { %465 = vst [vmem:[%s1569_s29 + $0x1f8] sm:$0xff] %v464_v63 }
  0x56 PF: > { %p1231_p8 = scmp.ge.s32.totalorder %s1494_s16, 1  ;;  %p478_p9 = scmp.lt.s32.totalorder %s1494_s16, 5 }
  0x58   : > { %p479_p10 = pnand %p1231_p8, %p478_p9 }
  0x59   : > { %s485_s30 = sand.u32 (!%p479_p10), 1, %s1478_s12   ;;  %v1452_v0 = vld [vmem:[%s1806_s0 + $0x4] ss:$16 sps:$4 sm:$0xff] (!%p479_p10)   ;;  %v1455_v1 = vld [vmem:[%s1806_s0 + $0xc] ss:$16 sps:$4 sm:$0xff] (!%p479_p10)   ;;  %s1234_s20 = sshll.u32 (!%p479_p10), %s1486_s14, 1 }
  0x5a   : > { %482 = sbr.rel (%p479_p10) target bundleno = 386 (0x182), region = 66  ;;  %s1232_s4 = sshll.u32 (!%p479_p10), %s485_s30, 9  ;;  %994 = vmatprep.mubr.bf16.mxu1 (!%p479_p10), %v1452_v0  ;;  %1037 = vmatprep.mubr.bf16.mxu0 (!%p479_p10), %v1455_v1 }
  0x5b   : > { %s1707_s9 = scalar_lea.vmem (!%p479_p10), [#allocation3], %s1232_s4  ;;  %p536_p11 = scmp.lt.s32.totalorder (!%p479_p10), %s1234_s20, 7 }
  0x5c   : > { %v1354_v2 = vld [vmem:[%s1707_s9 + $0x4] ss:$8 sps:$4 sm:$0xff] (!%p479_p10)   ;;  %v1358_v4 = vld [vmem:[%s1707_s9] ss:$8 sps:$4 sm:$0xff] (!%p479_p10)   ;;  %v1360_v6 = vld [vmem:[%s1707_s9 + $0x14] ss:$8 sps:$4 sm:$0xff] (!%p479_p10)  }
  0x5d   : > { %v1356_v3 = vld [vmem:[%s1707_s9 + $0x104] ss:$8 sps:$4 sm:$0xff] (!%p479_p10)   ;;  %962 = vmatprep.subr.bf16.mxu1 (!%p479_p10), %v1354_v2  ;;  %v1359_v5 = vld [vmem:[%s1707_s9 + $0x100] ss:$8 sps:$4 sm:$0xff] (!%p479_p10)   ;;  %v1362_v7 = vld [vmem:[%s1707_s9 + $0x114] ss:$8 sps:$4 sm:$0xff] (!%p479_p10)  }
  0x5e   : > { %1005 = vmatprep.subr.bf16.mxu0 (!%p479_p10), %v1356_v3  ;;  %963 = vmatpush1.bf16.msra.mxu1 (!%p479_p10), %v1358_v4  ;;  %v1364_v8 = vld [vmem:[%s1707_s9 + $0x10] ss:$8 sps:$4 sm:$0xff] (!%p479_p10)   ;;  %v1366_v10 = vld [vmem:[%s1707_s9 + $0x24] ss:$8 sps:$4 sm:$0xff] (!%p479_p10)   ;;  %v1370_v12 = vld [vmem:[%s1707_s9 + $0x20] ss:$8 sps:$4 sm:$0xff] (!%p479_p10)   ;;  %v1065_v4 = vlaneseq (!%p479_p10) }
  0x5f   : > { %1006 = vmatpush1.bf16.msra.mxu0 (!%p479_p10), %v1359_v5  ;;  %964 = vmatprep.subr.bf16.mxu1 (!%p479_p10), %v1360_v6  ;;  %v1365_v9 = vld [vmem:[%s1707_s9 + $0x110] ss:$8 sps:$4 sm:$0xff] (!%p479_p10)   ;;  %v1368_v11 = vld [vmem:[%s1707_s9 + $0x124] ss:$8 sps:$4 sm:$0xff] (!%p479_p10)   ;;  %v1371_v13 = vld [vmem:[%s1707_s9 + $0x120] ss:$8 sps:$4 sm:$0xff] (!%p479_p10)  }
  0x60   : > { %1007 = vmatprep.subr.bf16.mxu0 (!%p479_p10), %v1362_v7  ;;  %v1372_v14 = vld [vmem:[%s1707_s9 + $0x34] ss:$8 sps:$4 sm:$0xff] (!%p479_p10)   ;;  %v1376_v16 = vld [vmem:[%s1707_s9 + $0x30] ss:$8 sps:$4 sm:$0xff] (!%p479_p10)   ;;  %v1378_v18 = vld [vmem:[%s1707_s9 + $0x44] ss:$8 sps:$4 sm:$0xff] (!%p479_p10)  }
  0x61   : > { %v1374_v15 = vld [vmem:[%s1707_s9 + $0x134] ss:$8 sps:$4 sm:$0xff]   ;;  %v1377_v17 = vld [vmem:[%s1707_s9 + $0x130] ss:$8 sps:$4 sm:$0xff]   ;;  %v1380_v19 = vld [vmem:[%s1707_s9 + $0x144] ss:$8 sps:$4 sm:$0xff]  }
  0x62   : > { %965 = vmatpush1.bf16.msra.mxu1 %v1364_v8  ;;  %v1382_v20 = vld [vmem:[%s1707_s9 + $0x40] ss:$8 sps:$4 sm:$0xff]   ;;  %v1384_v22 = vld [vmem:[%s1707_s9 + $0x54] ss:$8 sps:$4 sm:$0xff]   ;;  %v1388_v24 = vld [vmem:[%s1707_s9 + $0x50] ss:$8 sps:$4 sm:$0xff]  }
  0x63   : > { %1008 = vmatpush1.bf16.msra.mxu0 %v1365_v9  ;;  %966 = vmatprep.subr.bf16.mxu1 %v1366_v10  ;;  %v1383_v21 = vld [vmem:[%s1707_s9 + $0x140] ss:$8 sps:$4 sm:$0xff]   ;;  %v1386_v23 = vld [vmem:[%s1707_s9 + $0x154] ss:$8 sps:$4 sm:$0xff]   ;;  %v1389_v25 = vld [vmem:[%s1707_s9 + $0x150] ss:$8 sps:$4 sm:$0xff]  }
  0x64   : > { %1009 = vmatprep.subr.bf16.mxu0 %v1368_v11  ;;  %v1390_v26 = vld [vmem:[%s1707_s9 + $0x64] ss:$8 sps:$4 sm:$0xff]   ;;  %v1394_v28 = vld [vmem:[%s1707_s9 + $0x60] ss:$8 sps:$4 sm:$0xff]   ;;  %v1396_v30 = vld [vmem:[%s1707_s9 + $0x74] ss:$8 sps:$4 sm:$0xff]  }
  0x65   : > { %v1392_v27 = vld [vmem:[%s1707_s9 + $0x164] ss:$8 sps:$4 sm:$0xff]   ;;  %v1395_v29 = vld [vmem:[%s1707_s9 + $0x160] ss:$8 sps:$4 sm:$0xff]   ;;  %v1398_v31 = vld [vmem:[%s1707_s9 + $0x174] ss:$8 sps:$4 sm:$0xff]  }
  0x66   : > { %967 = vmatpush1.bf16.msra.mxu1 %v1370_v12  ;;  %v1400_v32 = vld [vmem:[%s1707_s9 + $0x70] ss:$8 sps:$4 sm:$0xff]   ;;  %v1402_v34 = vld [vmem:[%s1707_s9 + $0x84] ss:$8 sps:$4 sm:$0xff]   ;;  %v1406_v36 = vld [vmem:[%s1707_s9 + $0x80] ss:$8 sps:$4 sm:$0xff]  }
  0x67   : > { %1010 = vmatpush1.bf16.msra.mxu0 %v1371_v13  ;;  %968 = vmatprep.subr.bf16.mxu1 %v1372_v14  ;;  %v1401_v33 = vld [vmem:[%s1707_s9 + $0x170] ss:$8 sps:$4 sm:$0xff]   ;;  %v1404_v35 = vld [vmem:[%s1707_s9 + $0x184] ss:$8 sps:$4 sm:$0xff]   ;;  %v1407_v37 = vld [vmem:[%s1707_s9 + $0x180] ss:$8 sps:$4 sm:$0xff]  }
  0x68   : > { %1011 = vmatprep.subr.bf16.mxu0 %v1374_v15  ;;  %v1408_v38 = vld [vmem:[%s1707_s9 + $0x94] ss:$8 sps:$4 sm:$0xff]   ;;  %v1412_v40 = vld [vmem:[%s1707_s9 + $0x90] ss:$8 sps:$4 sm:$0xff]   ;;  %v1414_v42 = vld [vmem:[%s1707_s9 + $0xa4] ss:$8 sps:$4 sm:$0xff]  }
  0x69   : > { %v1410_v39 = vld [vmem:[%s1707_s9 + $0x194] ss:$8 sps:$4 sm:$0xff]   ;;  %v1413_v41 = vld [vmem:[%s1707_s9 + $0x190] ss:$8 sps:$4 sm:$0xff]   ;;  %v1416_v43 = vld [vmem:[%s1707_s9 + $0x1a4] ss:$8 sps:$4 sm:$0xff]  }
  0x6a   : > { %969 = vmatpush1.bf16.msra.mxu1 %v1376_v16  ;;  %v1418_v44 = vld [vmem:[%s1707_s9 + $0xa0] ss:$8 sps:$4 sm:$0xff]   ;;  %v1420_v46 = vld [vmem:[%s1707_s9 + $0xb4] ss:$8 sps:$4 sm:$0xff]   ;;  %v1424_v48 = vld [vmem:[%s1707_s9 + $0xb0] ss:$8 sps:$4 sm:$0xff]  }
  0x6b   : > { %1012 = vmatpush1.bf16.msra.mxu0 %v1377_v17  ;;  %970 = vmatprep.subr.bf16.mxu1 %v1378_v18  ;;  %v1419_v45 = vld [vmem:[%s1707_s9 + $0x1a0] ss:$8 sps:$4 sm:$0xff]   ;;  %v1422_v47 = vld [vmem:[%s1707_s9 + $0x1b4] ss:$8 sps:$4 sm:$0xff]   ;;  %v1425_v49 = vld [vmem:[%s1707_s9 + $0x1b0] ss:$8 sps:$4 sm:$0xff]  }
  0x6c   : > { %1013 = vmatprep.subr.bf16.mxu0 %v1380_v19  ;;  %v1426_v50 = vld [vmem:[%s1707_s9 + $0xc4] ss:$8 sps:$4 sm:$0xff]   ;;  %v1430_v52 = vld [vmem:[%s1707_s9 + $0xc0] ss:$8 sps:$4 sm:$0xff]   ;;  %v1432_v54 = vld [vmem:[%s1707_s9 + $0xd4] ss:$8 sps:$4 sm:$0xff]  }
  0x6d   : > { %v1428_v51 = vld [vmem:[%s1707_s9 + $0x1c4] ss:$8 sps:$4 sm:$0xff]   ;;  %v1431_v53 = vld [vmem:[%s1707_s9 + $0x1c0] ss:$8 sps:$4 sm:$0xff]   ;;  %v1434_v55 = vld [vmem:[%s1707_s9 + $0x1d4] ss:$8 sps:$4 sm:$0xff]  }
  0x6e   : > { %971 = vmatpush1.bf16.msra.mxu1 %v1382_v20  ;;  %v1436_v56 = vld [vmem:[%s1707_s9 + $0xd0] ss:$8 sps:$4 sm:$0xff]   ;;  %v1438_v58 = vld [vmem:[%s1707_s9 + $0xe4] ss:$8 sps:$4 sm:$0xff]   ;;  %v1442_v60 = vld [vmem:[%s1707_s9 + $0xe0] ss:$8 sps:$4 sm:$0xff]  }
  0x6f   : > { %1014 = vmatpush1.bf16.msra.mxu0 %v1383_v21  ;;  %972 = vmatprep.subr.bf16.mxu1 %v1384_v22  ;;  %v1437_v57 = vld [vmem:[%s1707_s9 + $0x1d0] ss:$8 sps:$4 sm:$0xff]   ;;  %v1440_v59 = vld [vmem:[%s1707_s9 + $0x1e4] ss:$8 sps:$4 sm:$0xff]   ;;  %v1443_v61 = vld [vmem:[%s1707_s9 + $0x1e0] ss:$8 sps:$4 sm:$0xff]  }
  0x70   : > { %1015 = vmatprep.subr.bf16.mxu0 %v1386_v23  ;;  %v1444_v62 = vld [vmem:[%s1707_s9 + $0xf4] ss:$8 sps:$4 sm:$0xff]   ;;  %v1448_v0 = vld [vmem:[%s1707_s9 + $0xf0] ss:$8 sps:$4 sm:$0xff]   ;;  %s1818_s20 = smov (!%p536_p11, %s1234_s20), 7  ;;  %v1066_v5 = vshrl.u32 %v1065_v4, 7 }
  0x71   : > { %v1446_v63 = vld [vmem:[%s1707_s9 + $0x1f4] ss:$8 sps:$4 sm:$0xff]   ;;  %v1449_v1 = vld [vmem:[%s1707_s9 + $0x1f0] ss:$8 sps:$4 sm:$0xff]   ;;  %s538_s25 = scalar_lea.vmem %s1808_s2, %s1818_s20  ;;  %s1233_s26 = sshll.u32 %s485_s30, 5 }
  0x72   : > { %973 = vmatpush1.bf16.msra.mxu1 %v1388_v24  ;;  %v1450_v2 = vld [vmem:[%s1806_s0] ss:$16 sps:$4 sm:$0xff]   ;;  %v1453_v3 = vld [vmem:[%s1806_s0 + $0x8] ss:$16 sps:$4 sm:$0xff]   ;;  %v1067_v6 = vsub.s32 0, %v1066_v5  ;;  %v1071_v8 = vsub.s32 1, %v1066_v5 }
  0x73   : > { %1016 = vmatpush1.bf16.msra.mxu0 %v1389_v25  ;;  %974 = vmatprep.subr.bf16.mxu1 %v1390_v26  ;;  %v1063_v7 = vld [vmem:[%s538_s25] sm:$0x3]  ;;  %s520_s27 = scalar_lea.vmem [#allocation4], %s1233_s26  ;;  %s1309_s12 = sshll.u32 (%p1551_p6), %s1486_s14, 4 }
  0x74   : > { %1017 = vmatprep.subr.bf16.mxu0 %v1392_v27  ;;  %v1068_v9 = vrot.slane %v1063_v7, %v1067_v6  ;;  %v1072_v12 = vrot.slane %v1063_v7, %v1071_v8  ;;  %s1095_s30 = scalar_lea.vmem (%p1551_p6), %s1809_s3, %s1309_s12 }
  0x76   : > { %975 = vmatpush1.bf16.msra.mxu1 %v1394_v28 }
  0x77   : > { %1018 = vmatpush1.bf16.msra.mxu0 %v1395_v29  ;;  %976 = vmatprep.subr.bf16.mxu1 %v1396_v30 }
  0x78   : > { %1019 = vmatprep.subr.bf16.mxu0 %v1398_v31 }
  0x7a   : > { %977 = vmatpush1.bf16.msra.mxu1 %v1400_v32 }
  0x7b   : > { %1020 = vmatpush1.bf16.msra.mxu0 %v1401_v33  ;;  %978 = vmatprep.subr.bf16.mxu1 %v1402_v34 }
  0x7c   : > { %1021 = vmatprep.subr.bf16.mxu0 %v1404_v35 }
  0x7e   : > { %979 = vmatpush1.bf16.msra.mxu1 %v1406_v36 }
  0x7f   : > { %1022 = vmatpush1.bf16.msra.mxu0 %v1407_v37  ;;  %980 = vmatprep.subr.bf16.mxu1 %v1408_v38 }
  0x80   : > { %1023 = vmatprep.subr.bf16.mxu0 %v1410_v39 }
  0x82   : > { %981 = vmatpush1.bf16.msra.mxu1 %v1412_v40 }
  0x83   : > { %1024 = vmatpush1.bf16.msra.mxu0 %v1413_v41  ;;  %982 = vmatprep.subr.bf16.mxu1 %v1414_v42 }
  0x84   : > { %1025 = vmatprep.subr.bf16.mxu0 %v1416_v43 }
  0x86   : > { %983 = vmatpush1.bf16.msra.mxu1 %v1418_v44 }
  0x87   : > { %1026 = vmatpush1.bf16.msra.mxu0 %v1419_v45  ;;  %984 = vmatprep.subr.bf16.mxu1 %v1420_v46 }
  0x88   : > { %1027 = vmatprep.subr.bf16.mxu0 %v1422_v47 }
  0x8a   : > { %985 = vmatpush1.bf16.msra.mxu1 %v1424_v48 }
  0x8b   : > { %1028 = vmatpush1.bf16.msra.mxu0 %v1425_v49  ;;  %986 = vmatprep.subr.bf16.mxu1 %v1426_v50 }
  0x8c   : > { %1029 = vmatprep.subr.bf16.mxu0 %v1428_v51 }
  0x8e   : > { %987 = vmatpush1.bf16.msra.mxu1 %v1430_v52 }
  0x8f   : > { %1030 = vmatpush1.bf16.msra.mxu0 %v1431_v53  ;;  %988 = vmatprep.subr.bf16.mxu1 %v1432_v54 }
  0x90   : > { %1031 = vmatprep.subr.bf16.mxu0 %v1434_v55 }
  0x92   : > { %989 = vmatpush1.bf16.msra.mxu1 %v1436_v56 }
  0x93   : > { %1032 = vmatpush1.bf16.msra.mxu0 %v1437_v57  ;;  %990 = vmatprep.subr.bf16.mxu1 %v1438_v58 }
  0x94   : > { %1033 = vmatprep.subr.bf16.mxu0 %v1440_v59 }
  0x96   : > { %991 = vmatpush1.bf16.msra.mxu1 %v1442_v60 }
  0x97   : > { %1034 = vmatpush1.bf16.msra.mxu0 %v1443_v61  ;;  %992 = vmatprep.subr.bf16.mxu1 %v1444_v62 }
  0x98   : > { %1035 = vmatprep.subr.bf16.mxu0 %v1446_v63 }
  0x9a   : > { %993 = vmatpush1.bf16.msra.mxu1 %v1448_v0 }
  0x9b   : > { %1036 = vmatpush1.bf16.msra.mxu0 %v1449_v1 }
  0x9d   : > { %995 = vmatmul.mubr.bf16.vlgmr.msra.gmra.mrb[0].mxu1 %v1450_v2 }
  0x9e   : > { %1038 = vmatmul.mubr.bf16.vlgmr.msra.gmra.mrb[0].mxu0 %v1453_v3 }
 0x170   : > { %v996_v10 = vpop.f32.mrb[0].mxu1 }
 0x171   : > { %v1039_v11 = vpop.f32.mrb[0].mxu0  ;;  %v998_v14 = vpop.f32.mrb[1].mxu1 }
 0x172   : > { %v1040_v13 = vadd.f32 %v1039_v11, %v996_v10  ;;  %v1041_v15 = vpop.f32.mrb[1].mxu0  ;;  %v1000_v17 = vpop.f32.mrb[2].mxu1 }
 0x173   : > { %v1042_v16 = vadd.f32 %v1041_v15, %v998_v14  ;;  %v1043_v18 = vpop.f32.mrb[2].mxu0  ;;  %v1002_v21 = vpop.f32.mrb[3].mxu1  ;;  %1089 = sbr.rel (!%p1551_p6) target bundleno = 386 (0x182), region = 82 }
 0x174   : > { %v1075_v19 = vadd.f32 %v1068_v9, %v1040_v13  ;;  %v1044_v20 = vadd.f32 %v1043_v18, %v1000_v17  ;;  %v1045_v22 = vpop.f32.mrb[3].mxu0 }
 0x175   : > { %v1076_v23 = vadd.f32 %v1072_v12, %v1042_v16  ;;  %v1046_v24 = vadd.f32 %v1045_v22, %v1002_v21 }
 0x176   : > { %1079 = vst [vmem:[%s520_s27] sm:$0xff] %v1075_v19  ;;  %v1077_v25 = vadd.f32 %v1068_v9, %v1044_v20 }
 0x177   : > { %1080 = vst [vmem:[%s520_s27 + $0x8] sm:$0xff] %v1076_v23  ;;  %v1078_v26 = vadd.f32 %v1072_v12, %v1046_v24 }
 0x178   : > { %1081 = vst [vmem:[%s520_s27 + $0x10] sm:$0xff] %v1077_v25 }
 0x179   : > { %1082 = vst [vmem:[%s520_s27 + $0x18] sm:$0xff] %v1078_v26 }
 0x17d   : > { %v1108_v27 = vld [vmem:[%s520_s27] sm:$0xff] }
 0x17e   : > { %v1110_v28 = vld [vmem:[%s520_s27 + $0x8] sm:$0xff]  ;;  %1109 = vst [vmem:[%s1095_s30] sm:$0xff] %v1108_v27 }
 0x17f   : > { %v1112_v29 = vld [vmem:[%s520_s27 + $0x10] sm:$0xff]  ;;  %1111 = vst [vmem:[%s1095_s30 + $0x8] sm:$0xff] %v1110_v28 }
 0x180   : > { %v1114_v30 = vld [vmem:[%s520_s27 + $0x18] sm:$0xff]  ;;  %1113 = vst [vmem:[%s1095_s30 + $0x40] sm:$0xff] %v1112_v29 }
 0x181   : > { %1115 = vst [vmem:[%s1095_s30 + $0x48] sm:$0xff] %v1114_v30 }
 0x182 PF: > { %s13_s16 = sadd.s32 1, %s1494_s16   ;;  %s1811_s12 = smov %s1482_s13 }
 0x183   : > { %p10_p12 = scmp.ge.s32.totalorder %s13_s16, 6   ;;  %s1812_s13 = smov %s1556_s22 }
 0x184   : > { %s1813_s14 = smov %s1490_s15  ;;  %s1814_s15 = smov %s1816_s17 }
 0x185   :  { %12 = sbr.rel (!%p10_p12) target bundleno = 3 (0x3), region = 142 }

// kernel: resnet50_fpn_forward.72
= control target key start
LH: loop header
LB: loop body
LE: loop exit
PB: predicated region body
PF: predicated region fallthrough
CT: control target
= control target key end

     0   :  { %s1175_s15 = smov 0   ;;  %s1177_s16 = smov 0   ;;  %s1376_s0 = inlined_call_operand.vmem [shape: bf16[16,256], index: 0, kind: input, shape index: {}]   ;;  %s1377_s1 = inlined_call_operand.vmem [shape: bf16[256,1024], index: 1, kind: input, shape index: {}]   ;;  %s1378_s2 = inlined_call_operand.vmem [shape: f32[1,1024], index: 2, kind: input, shape index: {}]   ;;  %s1379_s3 = inlined_call_operand.vmem [shape: f32[16,1024], index: 3, kind: input, shape index: {}]   ;;  %s1380_s4 = inlined_call_operand.vmem [shape: f32[16,1024], index: 4, kind: output, shape index: {}]  }
   0x1   :  { %s1179_s17 = smov 0   ;;  %s1181_s18 = smov 0  }
   0x2   :  { %s1183_s19 = smov 0  }
   0x3 LB: > { %s29_s20 = sadd.s32 1, %s1144_s18  ;;  %s961_s21 = sadd.s32 4294967295, %s1148_s19   ;;  %s1148_s19 = sphi %s1183_s19, %s14_s19   ;;  %s1144_s18 = sphi %s1181_s18, %s1386_s18   ;;  %s1140_s17 = sphi %s1179_s17, %s1385_s17   ;;  %s1136_s16 = sphi %s1177_s16, %s1384_s16   ;;  %s1132_s15 = sphi %s1175_s15, %s1383_s15  }
   0x4   : > { %p31_p0 = scmp.ge.s32.totalorder %s29_s20, 4  ;;  %p77_p1 = scmp.ne.s32.totalorder %s1136_s16, %s1132_s15 }
   0x5   : > { %p78_p2 = scmp.eq.s32.totalorder %s1148_s19, 0  ;;  %p163_p4 = scmp.eq.s32.totalorder %s961_s21, 3 }
   0x6   : > { %s1388_s20 = smov (%p31_p0, %s29_s20), 0  ;;  %s70_s24 = sadd.s32 1, %s1136_s16 }
   0x7   : > { %p1207_p3 = por %p78_p2, %p77_p1  ;;  %s66_s23 = ssub.s32 %s1144_s18, %s1388_s20 }
   0x8   : > { %p68_p5 = scmp.eq.s32.totalorder %s66_s23, 0  ;;  %p1214_p6 = por %p163_p4, %p77_p1 }
   0x9   : > { %p965_p7 = scmp.ge.s32.totalorder %s1148_s19, 4 }
   0xa   : > { %s1219_s26 = scalar_select %p68_p5, %s1136_s16, %s70_s24  }
   0xb   : > { %200 = sbr.rel (%p965_p7) target bundleno = 61 (0x3d), region = 20 }
  0x12   : > { %203 = sbr.rel (!%p1207_p3) target bundleno = 54 (0x36), region = 24  ;;  %s205_s27 = sand.u32 (%p1207_p3), 1, %s1136_s16  }
  0x13   : > { %s1016_s28 = sshll.u32 (%p1207_p3), %s1144_s18, 3  ;;  %s966_s29 = sshll.u32 (%p1207_p3), %s205_s27, 8 }
  0x14   : > { %s1229_s6 = scalar_lea.vmem (%p1207_p3), %s1377_s1, %s1016_s28  ;;  %s1234_s7 = scalar_lea.vmem (%p1207_p3), [#allocation3], %s966_s29 }
  0x15   : > { %v303_v0 = vld [vmem:[%s1229_s6] sm:$0xff] (%p1207_p3) }
  0x16   : > { %v305_v1 = vld [vmem:[%s1229_s6 + $0x20] sm:$0xff] (%p1207_p3)  ;;  %304 = vst [vmem:[%s1234_s7] sm:$0xff] (%p1207_p3), %v303_v0 }
  0x17   : > { %v307_v2 = vld [vmem:[%s1229_s6 + $0x40] sm:$0xff] (%p1207_p3)  ;;  %306 = vst [vmem:[%s1234_s7 + $0x8] sm:$0xff] (%p1207_p3), %v305_v1 }
  0x18   : > { %308 = vst [vmem:[%s1234_s7 + $0x10] sm:$0xff] (%p1207_p3), %v307_v2  ;;  %v309_v3 = vld [vmem:[%s1229_s6 + $0x60] sm:$0xff] (%p1207_p3) }
  0x19   : > { %v311_v4 = vld [vmem:[%s1229_s6 + $0x80] sm:$0xff]  ;;  %310 = vst [vmem:[%s1234_s7 + $0x18] sm:$0xff] %v309_v3 }
  0x1a   : > { %v313_v5 = vld [vmem:[%s1229_s6 + $0xa0] sm:$0xff]  ;;  %312 = vst [vmem:[%s1234_s7 + $0x20] sm:$0xff] %v311_v4 }
  0x1b   : > { %314 = vst [vmem:[%s1234_s7 + $0x28] sm:$0xff] %v313_v5  ;;  %v315_v6 = vld [vmem:[%s1229_s6 + $0xc0] sm:$0xff] }
  0x1c   : > { %v317_v7 = vld [vmem:[%s1229_s6 + $0xe0] sm:$0xff]  ;;  %316 = vst [vmem:[%s1234_s7 + $0x30] sm:$0xff] %v315_v6 }
  0x1d   : > { %v319_v8 = vld [vmem:[%s1229_s6 + $0x100] sm:$0xff]  ;;  %318 = vst [vmem:[%s1234_s7 + $0x38] sm:$0xff] %v317_v7 }
  0x1e   : > { %320 = vst [vmem:[%s1234_s7 + $0x40] sm:$0xff] %v319_v8  ;;  %v321_v9 = vld [vmem:[%s1229_s6 + $0x120] sm:$0xff] }
  0x1f   : > { %v323_v10 = vld [vmem:[%s1229_s6 + $0x140] sm:$0xff]  ;;  %322 = vst [vmem:[%s1234_s7 + $0x48] sm:$0xff] %v321_v9 }
  0x20   : > { %v325_v11 = vld [vmem:[%s1229_s6 + $0x160] sm:$0xff]  ;;  %324 = vst [vmem:[%s1234_s7 + $0x50] sm:$0xff] %v323_v10 }
  0x21   : > { %326 = vst [vmem:[%s1234_s7 + $0x58] sm:$0xff] %v325_v11  ;;  %v327_v12 = vld [vmem:[%s1229_s6 + $0x180] sm:$0xff] }
  0x22   : > { %v329_v13 = vld [vmem:[%s1229_s6 + $0x1a0] sm:$0xff]  ;;  %328 = vst [vmem:[%s1234_s7 + $0x60] sm:$0xff] %v327_v12 }
  0x23   : > { %v331_v14 = vld [vmem:[%s1229_s6 + $0x1c0] sm:$0xff]  ;;  %330 = vst [vmem:[%s1234_s7 + $0x68] sm:$0xff] %v329_v13 }
  0x24   : > { %332 = vst [vmem:[%s1234_s7 + $0x70] sm:$0xff] %v331_v14  ;;  %v333_v15 = vld [vmem:[%s1229_s6 + $0x1e0] sm:$0xff] }
  0x25   : > { %v335_v16 = vld [vmem:[%s1229_s6 + $0x200] sm:$0xff]  ;;  %334 = vst [vmem:[%s1234_s7 + $0x78] sm:$0xff] %v333_v15 }
  0x26   : > { %v337_v17 = vld [vmem:[%s1229_s6 + $0x220] sm:$0xff]  ;;  %336 = vst [vmem:[%s1234_s7 + $0x80] sm:$0xff] %v335_v16 }
  0x27   : > { %338 = vst [vmem:[%s1234_s7 + $0x88] sm:$0xff] %v337_v17  ;;  %v339_v18 = vld [vmem:[%s1229_s6 + $0x240] sm:$0xff] }
  0x28   : > { %v341_v19 = vld [vmem:[%s1229_s6 + $0x260] sm:$0xff]  ;;  %340 = vst [vmem:[%s1234_s7 + $0x90] sm:$0xff] %v339_v18 }
  0x29   : > { %v343_v20 = vld [vmem:[%s1229_s6 + $0x280] sm:$0xff]  ;;  %342 = vst [vmem:[%s1234_s7 + $0x98] sm:$0xff] %v341_v19 }
  0x2a   : > { %344 = vst [vmem:[%s1234_s7 + $0xa0] sm:$0xff] %v343_v20  ;;  %v345_v21 = vld [vmem:[%s1229_s6 + $0x2a0] sm:$0xff] }
  0x2b   : > { %v347_v22 = vld [vmem:[%s1229_s6 + $0x2c0] sm:$0xff]  ;;  %346 = vst [vmem:[%s1234_s7 + $0xa8] sm:$0xff] %v345_v21 }
  0x2c   : > { %v349_v23 = vld [vmem:[%s1229_s6 + $0x2e0] sm:$0xff]  ;;  %348 = vst [vmem:[%s1234_s7 + $0xb0] sm:$0xff] %v347_v22 }
  0x2d   : > { %350 = vst [vmem:[%s1234_s7 + $0xb8] sm:$0xff] %v349_v23  ;;  %v351_v24 = vld [vmem:[%s1229_s6 + $0x300] sm:$0xff] }
  0x2e   : > { %v353_v25 = vld [vmem:[%s1229_s6 + $0x320] sm:$0xff]  ;;  %352 = vst [vmem:[%s1234_s7 + $0xc0] sm:$0xff] %v351_v24 }
  0x2f   : > { %v355_v26 = vld [vmem:[%s1229_s6 + $0x340] sm:$0xff]  ;;  %354 = vst [vmem:[%s1234_s7 + $0xc8] sm:$0xff] %v353_v25 }
  0x30   : > { %356 = vst [vmem:[%s1234_s7 + $0xd0] sm:$0xff] %v355_v26  ;;  %v357_v27 = vld [vmem:[%s1229_s6 + $0x360] sm:$0xff] }
  0x31   : > { %v359_v28 = vld [vmem:[%s1229_s6 + $0x380] sm:$0xff]  ;;  %358 = vst [vmem:[%s1234_s7 + $0xd8] sm:$0xff] %v357_v27 }
  0x32   : > { %v361_v29 = vld [vmem:[%s1229_s6 + $0x3a0] sm:$0xff]  ;;  %360 = vst [vmem:[%s1234_s7 + $0xe0] sm:$0xff] %v359_v28 }
  0x33   : > { %362 = vst [vmem:[%s1234_s7 + $0xe8] sm:$0xff] %v361_v29  ;;  %v363_v30 = vld [vmem:[%s1229_s6 + $0x3c0] sm:$0xff] }
  0x34   : > { %v365_v31 = vld [vmem:[%s1229_s6 + $0x3e0] sm:$0xff]  ;;  %364 = vst [vmem:[%s1234_s7 + $0xf0] sm:$0xff] %v363_v30 }
  0x35   : > { %366 = vst [vmem:[%s1234_s7 + $0xf8] sm:$0xff] %v365_v31 }
  0x36 PF: > { %380 = sbr.rel (!%p1207_p3) target bundleno = 61 (0x3d), region = 66  ;;  %s382_s8 = sand.u32 (%p1207_p3), 1, %s1136_s16  }
  0x37   : > { %s1017_s9 = sshll.u32 (%p1207_p3), %s1144_s18, 4  ;;  %s969_s10 = sshll.u32 (%p1207_p3), %s382_s8, 5 }
  0x38   : > { %s390_s13 = scalar_lea.vmem (%p1207_p3), %s1379_s3, %s1017_s9  ;;  %s384_s14 = scalar_lea.vmem (%p1207_p3), [#allocation4], %s969_s10 }
  0x39   : > { %v403_v32 = vld [vmem:[%s390_s13] sm:$0xff] (%p1207_p3)  ;;  %v405_v33 = vld [vmem:[%s390_s13 + $0x8] sm:$0xff] (%p1207_p3) }
  0x3a   : > { %v407_v34 = vld [vmem:[%s390_s13 + $0x40] sm:$0xff] (%p1207_p3)  ;;  %404 = vst [vmem:[%s384_s14] sm:$0xff] (%p1207_p3), %v403_v32  ;;  %406 = vst [vmem:[%s384_s14 + $0x8] sm:$0xff] (%p1207_p3), %v405_v33  ;;  %v409_v35 = vld [vmem:[%s390_s13 + $0x48] sm:$0xff] (%p1207_p3) }
  0x3b   : > { %408 = vst [vmem:[%s384_s14 + $0x10] sm:$0xff] (%p1207_p3), %v407_v34  ;;  %410 = vst [vmem:[%s384_s14 + $0x18] sm:$0xff] (%p1207_p3), %v409_v35 }
  0x3d PF: > { %p972_p8 = scmp.ge.s32.totalorder %s1148_s19, 1  ;;  %p415_p9 = scmp.lt.s32.totalorder %s1148_s19, 5 }
  0x3f   : > { %p416_p10 = pnand %p972_p8, %p415_p9 }
  0x40   : > { %s422_s21 = sand.u32 (!%p416_p10), 1, %s1132_s15   ;;  %v1109_v36 = vld [vmem:[%s1376_s0 + $0x4] ss:$8 sps:$4 sm:$0xff] (!%p416_p10)   ;;  %v1107_v5 = vld [vmem:[%s1376_s0] ss:$8 sps:$4 sm:$0xff] (!%p416_p10)   ;;  %s976_s30 = sshll.u32 (!%p416_p10), %s1140_s17, 1  ;;  %v770_v6 = vlaneseq (!%p416_p10) }
  0x41   : > { %419 = sbr.rel (%p416_p10) target bundleno = 362 (0x16a), region = 89  ;;  %s973_s22 = sshll.u32 (!%p416_p10), %s422_s21, 8  ;;  %742 = vmatprep.mubr.bf16.mxu0 (!%p416_p10), %v1109_v36 }
  0x42   : > { %s1312_s27 = scalar_lea.vmem (!%p416_p10), [#allocation3], %s973_s22  ;;  %p486_p11 = scmp.lt.s32.totalorder (!%p416_p10), %s976_s30, 7  ;;  %v771_v7 = vshrl.u32 (!%p416_p10), %v770_v6, 7 }
  0x43   : > { %v1059_v37 = vld [vmem:[%s1312_s27 + $0x4] ss:$8 sps:$4 sm:$0xff] (!%p416_p10)   ;;  %v1061_v38 = vld [vmem:[%s1312_s27] ss:$8 sps:$4 sm:$0xff] (!%p416_p10)   ;;  %v1062_v39 = vld [vmem:[%s1312_s27 + $0x14] ss:$8 sps:$4 sm:$0xff] (!%p416_p10)  }
  0x44   : > { %710 = vmatprep.subr.bf16.mxu0 (!%p416_p10), %v1059_v37  ;;  %v1064_v40 = vld [vmem:[%s1312_s27 + $0x10] ss:$8 sps:$4 sm:$0xff] (!%p416_p10)   ;;  %v1065_v41 = vld [vmem:[%s1312_s27 + $0x24] ss:$8 sps:$4 sm:$0xff] (!%p416_p10)   ;;  %v1067_v42 = vld [vmem:[%s1312_s27 + $0x20] ss:$8 sps:$4 sm:$0xff] (!%p416_p10)  }
  0x45   : > { %711 = vmatpush1.bf16.msra.mxu0 (!%p416_p10), %v1061_v38  ;;  %v1068_v43 = vld [vmem:[%s1312_s27 + $0x34] ss:$8 sps:$4 sm:$0xff] (!%p416_p10)   ;;  %v1070_v44 = vld [vmem:[%s1312_s27 + $0x30] ss:$8 sps:$4 sm:$0xff] (!%p416_p10)   ;;  %v1071_v45 = vld [vmem:[%s1312_s27 + $0x44] ss:$8 sps:$4 sm:$0xff] (!%p416_p10)  }
  0x46   : > { %712 = vmatprep.subr.bf16.mxu0 (!%p416_p10), %v1062_v39  ;;  %v1073_v46 = vld [vmem:[%s1312_s27 + $0x40] ss:$8 sps:$4 sm:$0xff] (!%p416_p10)   ;;  %v1074_v47 = vld [vmem:[%s1312_s27 + $0x54] ss:$8 sps:$4 sm:$0xff] (!%p416_p10)   ;;  %v1076_v48 = vld [vmem:[%s1312_s27 + $0x50] ss:$8 sps:$4 sm:$0xff] (!%p416_p10)  }
  0x47   : > { %v1077_v49 = vld [vmem:[%s1312_s27 + $0x64] ss:$8 sps:$4 sm:$0xff] (!%p416_p10)   ;;  %v1079_v50 = vld [vmem:[%s1312_s27 + $0x60] ss:$8 sps:$4 sm:$0xff] (!%p416_p10)   ;;  %v1080_v51 = vld [vmem:[%s1312_s27 + $0x74] ss:$8 sps:$4 sm:$0xff] (!%p416_p10)  }
  0x48   : > { %v1082_v52 = vld [vmem:[%s1312_s27 + $0x70] ss:$8 sps:$4 sm:$0xff]   ;;  %v1083_v53 = vld [vmem:[%s1312_s27 + $0x84] ss:$8 sps:$4 sm:$0xff]   ;;  %v1085_v54 = vld [vmem:[%s1312_s27 + $0x80] ss:$8 sps:$4 sm:$0xff]  }
  0x49   : > { %713 = vmatpush1.bf16.msra.mxu0 %v1064_v40  ;;  %v1086_v55 = vld [vmem:[%s1312_s27 + $0x94] ss:$8 sps:$4 sm:$0xff]   ;;  %v1088_v56 = vld [vmem:[%s1312_s27 + $0x90] ss:$8 sps:$4 sm:$0xff]   ;;  %v1089_v57 = vld [vmem:[%s1312_s27 + $0xa4] ss:$8 sps:$4 sm:$0xff]  }
  0x4a   : > { %714 = vmatprep.subr.bf16.mxu0 %v1065_v41  ;;  %v1091_v58 = vld [vmem:[%s1312_s27 + $0xa0] ss:$8 sps:$4 sm:$0xff]   ;;  %v1092_v59 = vld [vmem:[%s1312_s27 + $0xb4] ss:$8 sps:$4 sm:$0xff]   ;;  %v1094_v60 = vld [vmem:[%s1312_s27 + $0xb0] ss:$8 sps:$4 sm:$0xff]  }
  0x4b   : > { %v1095_v61 = vld [vmem:[%s1312_s27 + $0xc4] ss:$8 sps:$4 sm:$0xff]   ;;  %v1097_v62 = vld [vmem:[%s1312_s27 + $0xc0] ss:$8 sps:$4 sm:$0xff]   ;;  %v1098_v63 = vld [vmem:[%s1312_s27 + $0xd4] ss:$8 sps:$4 sm:$0xff]  }
  0x4c   : > { %v1100_v0 = vld [vmem:[%s1312_s27 + $0xd0] ss:$8 sps:$4 sm:$0xff]   ;;  %v1101_v1 = vld [vmem:[%s1312_s27 + $0xe4] ss:$8 sps:$4 sm:$0xff]   ;;  %v1103_v2 = vld [vmem:[%s1312_s27 + $0xe0] ss:$8 sps:$4 sm:$0xff]  }
  0x4d   : > { %715 = vmatpush1.bf16.msra.mxu0 %v1067_v42  ;;  %v1104_v3 = vld [vmem:[%s1312_s27 + $0xf4] ss:$8 sps:$4 sm:$0xff]   ;;  %v1106_v4 = vld [vmem:[%s1312_s27 + $0xf0] ss:$8 sps:$4 sm:$0xff]   ;;  %s1390_s30 = smov (!%p486_p11, %s976_s30), 7  ;;  %v772_v8 = vsub.s32 0, %v771_v7 }
  0x4e   : > { %716 = vmatprep.subr.bf16.mxu0 %v1068_v43  ;;  %s488_s7 = scalar_lea.vmem %s1378_s2, %s1390_s30  ;;  %s974_s8 = sshll.u32 %s422_s21, 5  ;;  %v776_v10 = vsub.s32 1, %v771_v7 }
  0x4f   : > { %v768_v9 = vld [vmem:[%s488_s7] sm:$0x3]  ;;  %s431_s9 = scalar_lea.vmem [#allocation4], %s974_s8  ;;  %s470_s15 = scalar_lea.vmem [#allocation5], %s974_s8 }
  0x50   : > { %v773_v11 = vrot.slane %v768_v9, %v772_v8  ;;  %v777_v12 = vrot.slane %v768_v9, %v776_v10  ;;  %v784_v14 = vld [vmem:[%s431_s9] sm:$0xff]  ;;  %v785_v17 = vld [vmem:[%s431_s9 + $0x8] sm:$0xff]  ;;  %v786_v20 = vld [vmem:[%s431_s9 + $0x10] sm:$0xff]  ;;  %s1018_s10 = sshll.u32 (%p1214_p6), %s1140_s17, 4 }
  0x51   : > { %717 = vmatpush1.bf16.msra.mxu0 %v1070_v44  ;;  %v787_v24 = vld [vmem:[%s431_s9 + $0x18] sm:$0xff]  ;;  %s812_s13 = scalar_lea.vmem (%p1214_p6), %s1380_s4, %s1018_s10 }
  0x52   : > { %718 = vmatprep.subr.bf16.mxu0 %v1071_v45 }
  0x55   : > { %719 = vmatpush1.bf16.msra.mxu0 %v1073_v46 }
  0x56   : > { %720 = vmatprep.subr.bf16.mxu0 %v1074_v47 }
  0x59   : > { %721 = vmatpush1.bf16.msra.mxu0 %v1076_v48 }
  0x5a   : > { %722 = vmatprep.subr.bf16.mxu0 %v1077_v49 }
  0x5d   : > { %723 = vmatpush1.bf16.msra.mxu0 %v1079_v50 }
  0x5e   : > { %724 = vmatprep.subr.bf16.mxu0 %v1080_v51 }
  0x61   : > { %725 = vmatpush1.bf16.msra.mxu0 %v1082_v52 }
  0x62   : > { %726 = vmatprep.subr.bf16.mxu0 %v1083_v53 }
  0x65   : > { %727 = vmatpush1.bf16.msra.mxu0 %v1085_v54 }
  0x66   : > { %728 = vmatprep.subr.bf16.mxu0 %v1086_v55 }
  0x69   : > { %729 = vmatpush1.bf16.msra.mxu0 %v1088_v56 }
  0x6a   : > { %730 = vmatprep.subr.bf16.mxu0 %v1089_v57 }
  0x6d   : > { %731 = vmatpush1.bf16.msra.mxu0 %v1091_v58 }
  0x6e   : > { %732 = vmatprep.subr.bf16.mxu0 %v1092_v59 }
  0x71   : > { %733 = vmatpush1.bf16.msra.mxu0 %v1094_v60 }
  0x72   : > { %734 = vmatprep.subr.bf16.mxu0 %v1095_v61 }
  0x75   : > { %735 = vmatpush1.bf16.msra.mxu0 %v1097_v62 }
  0x76   : > { %736 = vmatprep.subr.bf16.mxu0 %v1098_v63 }
  0x79   : > { %737 = vmatpush1.bf16.msra.mxu0 %v1100_v0 }
  0x7a   : > { %738 = vmatprep.subr.bf16.mxu0 %v1101_v1 }
  0x7d   : > { %739 = vmatpush1.bf16.msra.mxu0 %v1103_v2 }
  0x7e   : > { %740 = vmatprep.subr.bf16.mxu0 %v1104_v3 }
  0x81   : > { %741 = vmatpush1.bf16.msra.mxu0 %v1106_v4 }
  0x84   : > { %743 = vmatmul.mubr.bf16.vlgmr.msra.gmra.mrb[0].mxu0 %v1107_v5 }
 0x157   : > { %v744_v13 = vpop.f32.mrb[0].mxu0 }
 0x158   : > { %v780_v15 = vadd.f32 %v773_v11, %v744_v13  ;;  %v746_v16 = vpop.f32.mrb[1].mxu0 }
 0x159   : > { %v781_v18 = vadd.f32 %v777_v12, %v746_v16  ;;  %v748_v19 = vpop.f32.mrb[2].mxu0 }
 0x15a   : > { %v788_v21 = vadd.f32 %v784_v14, %v780_v15  ;;  %v782_v22 = vadd.f32 %v773_v11, %v748_v19  ;;  %v750_v23 = vpop.f32.mrb[3].mxu0 }
 0x15b   : > { %v789_v25 = vadd.f32 %v785_v17, %v781_v18  ;;  %v783_v26 = vadd.f32 %v777_v12, %v750_v23  ;;  %806 = sbr.rel (!%p1214_p6) target bundleno = 362 (0x16a), region = 109 }
 0x15c   : > { %v792_v27 = vmax.f32 %v788_v21, 0.0  ;;  %v790_v28 = vadd.f32 %v786_v20, %v782_v22 }
 0x15d   : > { %v793_v29 = vmax.f32 %v789_v25, 0.0  ;;  %v791_v30 = vadd.f32 %v787_v24, %v783_v26 }
 0x15e   : > { %796 = vst [vmem:[%s470_s15] sm:$0xff] %v792_v27  ;;  %v794_v31 = vmax.f32 %v790_v28, 0.0 }
 0x15f   : > { %797 = vst [vmem:[%s470_s15 + $0x8] sm:$0xff] %v793_v29  ;;  %v795_v32 = vmax.f32 %v791_v30, 0.0 }
 0x160   : > { %798 = vst [vmem:[%s470_s15 + $0x10] sm:$0xff] %v794_v31 }
 0x161   : > { %799 = vst [vmem:[%s470_s15 + $0x18] sm:$0xff] %v795_v32 }
 0x165   : > { %v825_v33 = vld [vmem:[%s470_s15] sm:$0xff] }
 0x166   : > { %v827_v34 = vld [vmem:[%s470_s15 + $0x8] sm:$0xff]  ;;  %826 = vst [vmem:[%s812_s13] sm:$0xff] %v825_v33 }
 0x167   : > { %v829_v35 = vld [vmem:[%s470_s15 + $0x10] sm:$0xff]  ;;  %828 = vst [vmem:[%s812_s13 + $0x8] sm:$0xff] %v827_v34 }
 0x168   : > { %v831_v36 = vld [vmem:[%s470_s15 + $0x18] sm:$0xff]  ;;  %830 = vst [vmem:[%s812_s13 + $0x40] sm:$0xff] %v829_v35 }
 0x169   : > { %832 = vst [vmem:[%s812_s13 + $0x48] sm:$0xff] %v831_v36 }
 0x16a PF: > { %s14_s19 = sadd.s32 1, %s1148_s19   ;;  %s1383_s15 = smov %s1136_s16 }
 0x16b   : > { %p11_p12 = scmp.ge.s32.totalorder %s14_s19, 6   ;;  %s1384_s16 = smov %s1219_s26 }
 0x16c   : > { %s1385_s17 = smov %s1144_s18  ;;  %s1386_s18 = smov %s1388_s20 }
 0x16d   :  { %13 = sbr.rel (!%p11_p12) target bundleno = 3 (0x3), region = 177 }

// kernel: resnet50_fpn_forward.73
= control target key start
LH: loop header
LB: loop body
LE: loop exit
PB: predicated region body
PF: predicated region fallthrough
CT: control target
= control target key end

     0   :  { %s1262_s12 = smov 0   ;;  %s1264_s13 = smov 0   ;;  %s1416_s0 = inlined_call_operand.vmem [shape: bf16[16,1024], index: 0, kind: input, shape index: {}]   ;;  %s1417_s1 = inlined_call_operand.vmem [shape: bf16[1024,256], index: 1, kind: input, shape index: {}]   ;;  %s1418_s2 = inlined_call_operand.vmem [shape: f32[1,256], index: 2, kind: input, shape index: {}]   ;;  %s1419_s3 = inlined_call_operand.vmem [shape: f32[16,256], index: 3, kind: output, shape index: {}]  }
   0x1   :  { %s1266_s14 = smov 0   ;;  %s1268_s15 = smov 0  }
   0x2   :  { %s1270_s16 = smov 0  }
   0x3 LB: > { %s25_s17 = sadd.s32 1, %s1235_s15  ;;  %p48_p1 = scmp.ne.s32.totalorder %s1227_s13, %s1223_s12  ;;  %s1239_s16 = sphi %s1270_s16, %s13_s16   ;;  %s1235_s15 = sphi %s1268_s15, %s1423_s15   ;;  %s1231_s14 = sphi %s1266_s14, %s1422_s14   ;;  %s1227_s13 = sphi %s1264_s13, %s1421_s13   ;;  %s1223_s12 = sphi %s1262_s12, %s1420_s12  }
   0x4   : > { %p26_p0 = scmp.ge.s32.totalorder %s25_s17, 2  ;;  %p49_p2 = scmp.eq.s32.totalorder %s1239_s16, 0 }
   0x5   : > { %s41_s19 = sadd.s32 1, %s1227_s13  ;;  %p969_p5 = scmp.ge.s32.totalorder %s1239_s16, 2 }
   0x6   : > { %s1425_s17 = smov (%p26_p0, %s25_s17), 0  ;;  %p50_p3 = por %p49_p2, %p48_p1 }
   0x7   : > { %s37_s18 = ssub.s32 %s1235_s15, %s1425_s17  ;;  %164 = sbr.rel (%p969_p5) target bundleno = 21 (0x15), region = 20 }
   0x8   : > { %p39_p4 = scmp.eq.s32.totalorder %s37_s18, 0 }
   0xa   : > { %s1297_s20 = scalar_select %p39_p4, %s1227_s13, %s41_s19  }
   0xe   : > { %167 = sbr.rel (!%p50_p3) target bundleno = 21 (0x15), region = 24  ;;  %s169_s21 = sand.u32 (%p50_p3), 1, %s1227_s13  }
   0xf   : > { %s1052_s22 = sshll.u32 (%p50_p3), %s1235_s15, 4  ;;  %s970_s23 = sshll.u32 (%p50_p3), %s169_s21, 5 }
  0x10   : > { %s177_s26 = scalar_lea.vmem (%p50_p3), %s1416_s0, %s1052_s22  ;;  %s171_s27 = scalar_lea.vmem (%p50_p3), [#allocation3], %s970_s23 }
  0x11   : > { %v190_v0 = vld [vmem:[%s177_s26] sm:$0xff] (%p50_p3)  ;;  %v192_v1 = vld [vmem:[%s177_s26 + $0x8] sm:$0xff] (%p50_p3) }
  0x12   : > { %v194_v2 = vld [vmem:[%s177_s26 + $0x20] sm:$0xff] (%p50_p3)  ;;  %191 = vst [vmem:[%s171_s27] sm:$0xff] (%p50_p3), %v190_v0  ;;  %193 = vst [vmem:[%s171_s27 + $0x8] sm:$0xff] (%p50_p3), %v192_v1  ;;  %v196_v3 = vld [vmem:[%s177_s26 + $0x28] sm:$0xff] (%p50_p3) }
  0x13   : > { %195 = vst [vmem:[%s171_s27 + $0x10] sm:$0xff] (%p50_p3), %v194_v2  ;;  %197 = vst [vmem:[%s171_s27 + $0x18] sm:$0xff] (%p50_p3), %v196_v3 }
  0x15 PF: > { %p973_p6 = scmp.ge.s32.totalorder %s1239_s16, 1  ;;  %p217_p7 = scmp.lt.s32.totalorder %s1239_s16, 3 }
  0x17   : > { %p218_p8 = pnand %p973_p6, %p217_p7 }
  0x18   : > { %s224_s28 = sand.u32 (!%p218_p8), 1, %s1223_s12   ;;  %s975_s29 = sshll.u32 (!%p218_p8), %s1231_s14, 6 }
  0x19   : > { %221 = sbr.rel (%p218_p8) target bundleno = 337 (0x151), region = 51  ;;  %s974_s30 = sshll.u32 (!%p218_p8), %s224_s28, 5 }
  0x1a   : > { %p270_p9 = scmp.lt.s32.totalorder (!%p218_p8), %s975_s29, 127  ;;  %s1314_s8 = scalar_lea.vmem (!%p218_p8), [#allocation3], %s974_s30 }
  0x1b   : > { %p978_p10 = scmp.ne.s32.totalorder (!%p218_p8), %s1231_s14, 0 }
  0x20   : > { %s1427_s29 = smov (!%p270_p9, %s975_s29), 127  ;;  %300 = sbr.rel (%p978_p10) target bundleno = 39 (0x27), region = 59 }
  0x21   : > { %s1053_s4 = sshll.u32 %s1427_s29, 3  ;;  %v1241_v4 = vmov (!%p978_p10), 0.0  }
  0x22   : > { %s1312_s7 = scalar_lea.vmem %s1417_s1, %s1053_s4  ;;  %301 = vst [vmem:[#allocation2] sm:$0xff] (!%p978_p10), %v1241_v4  ;;  %302 = vst [vmem:[#allocation2 + $0x8] sm:$0xff] (!%p978_p10), %v1241_v4 }
  0x23   : > { %303 = vst [vmem:[#allocation2 + $0x10] sm:$0xff] (!%p978_p10), %v1241_v4  ;;  %304 = vst [vmem:[#allocation2 + $0x18] sm:$0xff] (!%p978_p10), %v1241_v4 }
  0x27 PF: > { %v1099_v5 = vld [vmem:[%s1312_s7 + $0x4] ss:$8 sps:$4 sm:$0xff]   ;;  %v1103_v7 = vld [vmem:[%s1312_s7] ss:$8 sps:$4 sm:$0xff]   ;;  %v1105_v9 = vld [vmem:[%s1312_s7 + $0x14] ss:$8 sps:$4 sm:$0xff]  }
  0x28   : > { %v1101_v6 = vld [vmem:[%s1312_s7 + $0x104] ss:$8 sps:$4 sm:$0xff]   ;;  %717 = vmatprep.subr.bf16.mxu1 %v1099_v5  ;;  %v1104_v8 = vld [vmem:[%s1312_s7 + $0x100] ss:$8 sps:$4 sm:$0xff]   ;;  %v1107_v10 = vld [vmem:[%s1312_s7 + $0x114] ss:$8 sps:$4 sm:$0xff]  }
  0x29   : > { %760 = vmatprep.subr.bf16.mxu0 %v1101_v6  ;;  %718 = vmatpush1.bf16.msra.mxu1 %v1103_v7  ;;  %v1109_v11 = vld [vmem:[%s1312_s7 + $0x10] ss:$8 sps:$4 sm:$0xff]   ;;  %v1111_v13 = vld [vmem:[%s1312_s7 + $0x24] ss:$8 sps:$4 sm:$0xff]   ;;  %v1115_v15 = vld [vmem:[%s1312_s7 + $0x20] ss:$8 sps:$4 sm:$0xff]  }
  0x2a   : > { %761 = vmatpush1.bf16.msra.mxu0 %v1104_v8  ;;  %719 = vmatprep.subr.bf16.mxu1 %v1105_v9  ;;  %v1110_v12 = vld [vmem:[%s1312_s7 + $0x110] ss:$8 sps:$4 sm:$0xff]   ;;  %v1113_v14 = vld [vmem:[%s1312_s7 + $0x124] ss:$8 sps:$4 sm:$0xff]   ;;  %v1116_v16 = vld [vmem:[%s1312_s7 + $0x120] ss:$8 sps:$4 sm:$0xff]  }
  0x2b   : > { %762 = vmatprep.subr.bf16.mxu0 %v1107_v10  ;;  %v1117_v17 = vld [vmem:[%s1312_s7 + $0x34] ss:$8 sps:$4 sm:$0xff]   ;;  %v1121_v19 = vld [vmem:[%s1312_s7 + $0x30] ss:$8 sps:$4 sm:$0xff]   ;;  %v1123_v21 = vld [vmem:[%s1312_s7 + $0x44] ss:$8 sps:$4 sm:$0xff]  }
  0x2c   : > { %v1119_v18 = vld [vmem:[%s1312_s7 + $0x134] ss:$8 sps:$4 sm:$0xff]   ;;  %v1122_v20 = vld [vmem:[%s1312_s7 + $0x130] ss:$8 sps:$4 sm:$0xff]   ;;  %v1125_v22 = vld [vmem:[%s1312_s7 + $0x144] ss:$8 sps:$4 sm:$0xff]  }
  0x2d   : > { %720 = vmatpush1.bf16.msra.mxu1 %v1109_v11  ;;  %v1127_v23 = vld [vmem:[%s1312_s7 + $0x40] ss:$8 sps:$4 sm:$0xff]   ;;  %v1129_v25 = vld [vmem:[%s1312_s7 + $0x54] ss:$8 sps:$4 sm:$0xff]   ;;  %v1133_v27 = vld [vmem:[%s1312_s7 + $0x50] ss:$8 sps:$4 sm:$0xff]  }
  0x2e   : > { %763 = vmatpush1.bf16.msra.mxu0 %v1110_v12  ;;  %721 = vmatprep.subr.bf16.mxu1 %v1111_v13  ;;  %v1128_v24 = vld [vmem:[%s1312_s7 + $0x140] ss:$8 sps:$4 sm:$0xff]   ;;  %v1131_v26 = vld [vmem:[%s1312_s7 + $0x154] ss:$8 sps:$4 sm:$0xff]   ;;  %v1134_v28 = vld [vmem:[%s1312_s7 + $0x150] ss:$8 sps:$4 sm:$0xff]  }
  0x2f   : > { %764 = vmatprep.subr.bf16.mxu0 %v1113_v14  ;;  %v1135_v29 = vld [vmem:[%s1312_s7 + $0x64] ss:$8 sps:$4 sm:$0xff]   ;;  %v1139_v31 = vld [vmem:[%s1312_s7 + $0x60] ss:$8 sps:$4 sm:$0xff]   ;;  %v1141_v33 = vld [vmem:[%s1312_s7 + $0x74] ss:$8 sps:$4 sm:$0xff]  }
  0x30   : > { %v1137_v30 = vld [vmem:[%s1312_s7 + $0x164] ss:$8 sps:$4 sm:$0xff]   ;;  %v1140_v32 = vld [vmem:[%s1312_s7 + $0x160] ss:$8 sps:$4 sm:$0xff]   ;;  %v1143_v34 = vld [vmem:[%s1312_s7 + $0x174] ss:$8 sps:$4 sm:$0xff]  }
  0x31   : > { %722 = vmatpush1.bf16.msra.mxu1 %v1115_v15  ;;  %v1145_v35 = vld [vmem:[%s1312_s7 + $0x70] ss:$8 sps:$4 sm:$0xff]   ;;  %v1147_v37 = vld [vmem:[%s1312_s7 + $0x84] ss:$8 sps:$4 sm:$0xff]   ;;  %v1151_v39 = vld [vmem:[%s1312_s7 + $0x80] ss:$8 sps:$4 sm:$0xff]  }
  0x32   : > { %765 = vmatpush1.bf16.msra.mxu0 %v1116_v16  ;;  %723 = vmatprep.subr.bf16.mxu1 %v1117_v17  ;;  %v1146_v36 = vld [vmem:[%s1312_s7 + $0x170] ss:$8 sps:$4 sm:$0xff]   ;;  %v1149_v38 = vld [vmem:[%s1312_s7 + $0x184] ss:$8 sps:$4 sm:$0xff]   ;;  %v1152_v40 = vld [vmem:[%s1312_s7 + $0x180] ss:$8 sps:$4 sm:$0xff]  }
  0x33   : > { %766 = vmatprep.subr.bf16.mxu0 %v1119_v18  ;;  %v1153_v41 = vld [vmem:[%s1312_s7 + $0x94] ss:$8 sps:$4 sm:$0xff]   ;;  %v1157_v43 = vld [vmem:[%s1312_s7 + $0x90] ss:$8 sps:$4 sm:$0xff]   ;;  %v1159_v45 = vld [vmem:[%s1312_s7 + $0xa4] ss:$8 sps:$4 sm:$0xff]  }
  0x34   : > { %v1155_v42 = vld [vmem:[%s1312_s7 + $0x194] ss:$8 sps:$4 sm:$0xff]   ;;  %v1158_v44 = vld [vmem:[%s1312_s7 + $0x190] ss:$8 sps:$4 sm:$0xff]   ;;  %v1161_v46 = vld [vmem:[%s1312_s7 + $0x1a4] ss:$8 sps:$4 sm:$0xff]  }
  0x35   : > { %724 = vmatpush1.bf16.msra.mxu1 %v1121_v19  ;;  %v1163_v47 = vld [vmem:[%s1312_s7 + $0xa0] ss:$8 sps:$4 sm:$0xff]   ;;  %v1165_v49 = vld [vmem:[%s1312_s7 + $0xb4] ss:$8 sps:$4 sm:$0xff]   ;;  %v1169_v51 = vld [vmem:[%s1312_s7 + $0xb0] ss:$8 sps:$4 sm:$0xff]  }
  0x36   : > { %767 = vmatpush1.bf16.msra.mxu0 %v1122_v20  ;;  %725 = vmatprep.subr.bf16.mxu1 %v1123_v21  ;;  %v1164_v48 = vld [vmem:[%s1312_s7 + $0x1a0] ss:$8 sps:$4 sm:$0xff]   ;;  %v1167_v50 = vld [vmem:[%s1312_s7 + $0x1b4] ss:$8 sps:$4 sm:$0xff]   ;;  %v1170_v53 = vld [vmem:[%s1312_s7 + $0x1b0] ss:$8 sps:$4 sm:$0xff]  }
  0x37   : > { %768 = vmatprep.subr.bf16.mxu0 %v1125_v22  ;;  %v1197_v52 = vld [vmem:[%s1314_s8 + $0x4] ss:$16 sps:$4 sm:$0xff]   ;;  %v1200_v56 = vld [vmem:[%s1314_s8 + $0xc] ss:$16 sps:$4 sm:$0xff]   ;;  %v1175_v57 = vld [vmem:[%s1312_s7 + $0xc0] ss:$8 sps:$4 sm:$0xff]  }
  0x38   : > { %v1171_v54 = vld [vmem:[%s1312_s7 + $0xc4] ss:$8 sps:$4 sm:$0xff]   ;;  %749 = vmatprep.mubr.bf16.mxu1 %v1197_v52  ;;  %792 = vmatprep.mubr.bf16.mxu0 %v1200_v56  ;;  %v1176_v58 = vld [vmem:[%s1312_s7 + $0x1c0] ss:$8 sps:$4 sm:$0xff]   ;;  %v1177_v59 = vld [vmem:[%s1312_s7 + $0xd4] ss:$8 sps:$4 sm:$0xff]  }
  0x39   : > { %726 = vmatpush1.bf16.msra.mxu1 %v1127_v23  ;;  %v1173_v55 = vld [vmem:[%s1312_s7 + $0x1c4] ss:$8 sps:$4 sm:$0xff]   ;;  %v1179_v60 = vld [vmem:[%s1312_s7 + $0x1d4] ss:$8 sps:$4 sm:$0xff]   ;;  %v1181_v61 = vld [vmem:[%s1312_s7 + $0xd0] ss:$8 sps:$4 sm:$0xff]  }
  0x3a   : > { %769 = vmatpush1.bf16.msra.mxu0 %v1128_v24  ;;  %727 = vmatprep.subr.bf16.mxu1 %v1129_v25  ;;  %v1182_v62 = vld [vmem:[%s1312_s7 + $0x1d0] ss:$8 sps:$4 sm:$0xff]   ;;  %v1183_v63 = vld [vmem:[%s1312_s7 + $0xe4] ss:$8 sps:$4 sm:$0xff]   ;;  %v1187_v1 = vld [vmem:[%s1312_s7 + $0xe0] ss:$8 sps:$4 sm:$0xff]  }
  0x3b   : > { %770 = vmatprep.subr.bf16.mxu0 %v1131_v26  ;;  %v1185_v0 = vld [vmem:[%s1312_s7 + $0x1e4] ss:$8 sps:$4 sm:$0xff]   ;;  %v1188_v2 = vld [vmem:[%s1312_s7 + $0x1e0] ss:$8 sps:$4 sm:$0xff]   ;;  %v1189_v3 = vld [vmem:[%s1312_s7 + $0xf4] ss:$8 sps:$4 sm:$0xff]  }
  0x3c   : > { %v1191_v4 = vld [vmem:[%s1312_s7 + $0x1f4] ss:$8 sps:$4 sm:$0xff]   ;;  %v1193_v5 = vld [vmem:[%s1312_s7 + $0xf0] ss:$8 sps:$4 sm:$0xff]   ;;  %v305_v10 = vld [vmem:[#allocation2] sm:$0xff]  ;;  %p1047_p11 = scmp.ne.s32.totalorder %s1231_s14, 1 }
  0x3d   : > { %728 = vmatpush1.bf16.msra.mxu1 %v1133_v27  ;;  %v1194_v6 = vld [vmem:[%s1312_s7 + $0x1f0] ss:$8 sps:$4 sm:$0xff]   ;;  %v306_v14 = vld [vmem:[#allocation2 + $0x8] sm:$0xff] }
  0x3e   : > { %771 = vmatpush1.bf16.msra.mxu0 %v1134_v28  ;;  %729 = vmatprep.subr.bf16.mxu1 %v1135_v29  ;;  %v1195_v7 = vld [vmem:[%s1314_s8] ss:$16 sps:$4 sm:$0xff]   ;;  %v1198_v8 = vld [vmem:[%s1314_s8 + $0x8] ss:$16 sps:$4 sm:$0xff]   ;;  %v821_v29 = vlaneseq (!%p1047_p11) }
  0x3f   : > { %772 = vmatprep.subr.bf16.mxu0 %v1137_v30  ;;  %v307_v18 = vld [vmem:[#allocation2 + $0x10] sm:$0xff]  ;;  %v308_v23 = vld [vmem:[#allocation2 + $0x18] sm:$0xff] }
  0x40   : > { %v822_v30 = vshrl.u32 (!%p1047_p11), %v821_v29, 7 }
  0x41   : > { %730 = vmatpush1.bf16.msra.mxu1 %v1139_v31  ;;  %v819_v31 = vld [vmem:[%s1418_s2] sm:$0x3] (!%p1047_p11) }
  0x42   : > { %773 = vmatpush1.bf16.msra.mxu0 %v1140_v32  ;;  %731 = vmatprep.subr.bf16.mxu1 %v1141_v33  ;;  %v823_v33 = vsub.s32 (!%p1047_p11), 0, %v822_v30 }
  0x43   : > { %774 = vmatprep.subr.bf16.mxu0 %v1143_v34  ;;  %v827_v34 = vsub.s32 (!%p1047_p11), 1, %v822_v30 }
  0x45   : > { %732 = vmatpush1.bf16.msra.mxu1 %v1145_v35 }
  0x46   : > { %775 = vmatpush1.bf16.msra.mxu0 %v1146_v36  ;;  %733 = vmatprep.subr.bf16.mxu1 %v1147_v37 }
  0x47   : > { %776 = vmatprep.subr.bf16.mxu0 %v1149_v38  ;;  %v824_v38 = vrot.slane (!%p1047_p11), %v819_v31, %v823_v33 }
  0x49   : > { %734 = vmatpush1.bf16.msra.mxu1 %v1151_v39  ;;  %v828_v39 = vrot.slane (!%p1047_p11), %v819_v31, %v827_v34 }
  0x4a   : > { %777 = vmatpush1.bf16.msra.mxu0 %v1152_v40  ;;  %735 = vmatprep.subr.bf16.mxu1 %v1153_v41 }
  0x4b   : > { %778 = vmatprep.subr.bf16.mxu0 %v1155_v42 }
  0x4d   : > { %736 = vmatpush1.bf16.msra.mxu1 %v1157_v43 }
  0x4e   : > { %779 = vmatpush1.bf16.msra.mxu0 %v1158_v44  ;;  %737 = vmatprep.subr.bf16.mxu1 %v1159_v45 }
  0x4f   : > { %780 = vmatprep.subr.bf16.mxu0 %v1161_v46 }
  0x51   : > { %738 = vmatpush1.bf16.msra.mxu1 %v1163_v47 }
  0x52   : > { %781 = vmatpush1.bf16.msra.mxu0 %v1164_v48  ;;  %739 = vmatprep.subr.bf16.mxu1 %v1165_v49 }
  0x53   : > { %782 = vmatprep.subr.bf16.mxu0 %v1167_v50 }
  0x55   : > { %740 = vmatpush1.bf16.msra.mxu1 %v1169_v51 }
  0x56   : > { %783 = vmatpush1.bf16.msra.mxu0 %v1170_v53  ;;  %741 = vmatprep.subr.bf16.mxu1 %v1171_v54 }
  0x57   : > { %784 = vmatprep.subr.bf16.mxu0 %v1173_v55 }
  0x59   : > { %742 = vmatpush1.bf16.msra.mxu1 %v1175_v57 }
  0x5a   : > { %785 = vmatpush1.bf16.msra.mxu0 %v1176_v58  ;;  %743 = vmatprep.subr.bf16.mxu1 %v1177_v59 }
  0x5b   : > { %786 = vmatprep.subr.bf16.mxu0 %v1179_v60 }
  0x5d   : > { %744 = vmatpush1.bf16.msra.mxu1 %v1181_v61 }
  0x5e   : > { %787 = vmatpush1.bf16.msra.mxu0 %v1182_v62  ;;  %745 = vmatprep.subr.bf16.mxu1 %v1183_v63 }
  0x5f   : > { %788 = vmatprep.subr.bf16.mxu0 %v1185_v0 }
  0x61   : > { %746 = vmatpush1.bf16.msra.mxu1 %v1187_v1 }
  0x62   : > { %789 = vmatpush1.bf16.msra.mxu0 %v1188_v2  ;;  %747 = vmatprep.subr.bf16.mxu1 %v1189_v3 }
  0x63   : > { %790 = vmatprep.subr.bf16.mxu0 %v1191_v4 }
  0x65   : > { %748 = vmatpush1.bf16.msra.mxu1 %v1193_v5 }
  0x66   : > { %791 = vmatpush1.bf16.msra.mxu0 %v1194_v6 }
  0x68   : > { %750 = vmatmul.mubr.bf16.vlgmr.msra.gmra.mrb[0].mxu1 %v1195_v7 }
  0x69   : > { %793 = vmatmul.mubr.bf16.vlgmr.msra.gmra.mrb[0].mxu0 %v1198_v8 }
 0x13b   : > { %v751_v9 = vpop.f32.mrb[0].mxu1 }
 0x13c   : > { %v794_v11 = vpop.f32.mrb[0].mxu0  ;;  %v753_v13 = vpop.f32.mrb[1].mxu1 }
 0x13d   : > { %v795_v12 = vadd.f32 %v794_v11, %v751_v9  ;;  %v796_v15 = vpop.f32.mrb[1].mxu0  ;;  %v755_v17 = vpop.f32.mrb[2].mxu1 }
 0x13e   : > { %v797_v16 = vadd.f32 %v796_v15, %v753_v13  ;;  %v798_v19 = vpop.f32.mrb[2].mxu0  ;;  %v757_v22 = vpop.f32.mrb[3].mxu1  ;;  %814 = sbr.rel (%p1047_p11) target bundleno = 337 (0x151), region = 63 }
 0x13f   : > { %v803_v20 = vadd.f32 %v795_v12, %v305_v10  ;;  %v799_v21 = vadd.f32 %v798_v19, %v755_v17  ;;  %v800_v24 = vpop.f32.mrb[3].mxu0 }
 0x140   : > { %v804_v25 = vadd.f32 %v797_v16, %v306_v14  ;;  %v801_v26 = vadd.f32 %v800_v24, %v757_v22 }
 0x141   : > { %807 = vst [vmem:[#allocation2] sm:$0xff] %v803_v20  ;;  %v805_v27 = vadd.f32 %v799_v21, %v307_v18 }
 0x142   : > { %808 = vst [vmem:[#allocation2 + $0x8] sm:$0xff] %v804_v25  ;;  %v806_v28 = vadd.f32 %v801_v26, %v308_v23 }
 0x143   : > { %809 = vst [vmem:[#allocation2 + $0x10] sm:$0xff] %v805_v27 }
 0x144   : > { %810 = vst [vmem:[#allocation2 + $0x18] sm:$0xff] %v806_v28 }
 0x148   : > { %v815_v32 = vld [vmem:[#allocation2] sm:$0xff] }
 0x149   : > { %v816_v35 = vld [vmem:[#allocation2 + $0x8] sm:$0xff]  ;;  %v831_v40 = vadd.f32 %v824_v38, %v815_v32 }
 0x14a   : > { %v817_v36 = vld [vmem:[#allocation2 + $0x10] sm:$0xff]  ;;  %v832_v41 = vadd.f32 %v828_v39, %v816_v35 }
 0x14b   : > { %v818_v37 = vld [vmem:[#allocation2 + $0x18] sm:$0xff]  ;;  %v833_v42 = vadd.f32 %v824_v38, %v817_v36  ;;  %v835_v44 = vmax.f32 %v831_v40, 0.0 }
 0x14c   : > { %v834_v43 = vadd.f32 %v828_v39, %v818_v37  ;;  %v836_v45 = vmax.f32 %v832_v41, 0.0 }
 0x14d   : > { %v837_v46 = vmax.f32 %v833_v42, 0.0  ;;  %839 = vst [vmem:[%s1419_s3] sm:$0xff] %v835_v44 }
 0x14e   : > { %v838_v47 = vmax.f32 %v834_v43, 0.0  ;;  %840 = vst [vmem:[%s1419_s3 + $0x8] sm:$0xff] %v836_v45 }
 0x14f   : > { %841 = vst [vmem:[%s1419_s3 + $0x10] sm:$0xff] %v837_v46 }
 0x150   : > { %842 = vst [vmem:[%s1419_s3 + $0x18] sm:$0xff] %v838_v47 }
 0x151 PF: > { %s13_s16 = sadd.s32 1, %s1239_s16   ;;  %s1420_s12 = smov %s1227_s13 }
 0x152   : > { %p10_p12 = scmp.ge.s32.totalorder %s13_s16, 4   ;;  %s1421_s13 = smov %s1297_s20 }
 0x153   : > { %s1422_s14 = smov %s1235_s15  ;;  %s1423_s15 = smov %s1425_s17 }
 0x154   :  { %12 = sbr.rel (!%p10_p12) target bundleno = 3 (0x3), region = 104 }

</bundles_post_ra>
